<compile_context>
chip_gen: v7x
topology: tpu7x:2x2x1
jax: 0.10.0
libtpu: 0.0.40
codegen_flags: <defaults>
</compile_context>

<pallas_src>
import numpy as np
import jax
import jax.numpy as jnp
from jax.experimental import pallas as pl
from jax.experimental.pallas import tpu as pltpu


def _round_up(x, m):
    return (x + m - 1) // m * m


def _pick_tm(M, Kp):
    """M tile: as large as is useful, but keep >=2 M blocks whenever M is big
    enough so v7x megacore gets work on both TensorCores."""
    mp8 = _round_up(max(M, 8), 8)
    cap = 2048 if Kp <= 256 else (1024 if Kp <= 512 else 512)
    if mp8 < 128:
        return mp8                              # single tiny block
    return min(cap, _round_up(mp8 // 2, 8))    # >= 2 blocks


# ----------------------------------------------------------------------------
# Pallas kernel: single-K-block matmul + bias (+ ReLU), f32 accumulate
# ----------------------------------------------------------------------------
def _make_mm_kernel(apply_relu):
    def kernel(a_ref, w_ref, b_ref, o_ref):
        acc = jnp.dot(a_ref[...], w_ref[...],
                      preferred_element_type=jnp.float32)
        out = acc + b_ref[...]
        if apply_relu:
            out = jnp.maximum(out, 0.0)
        o_ref[...] = out.astype(o_ref.dtype)
    return kernel


def pallas_matmul_bias(a, w_p, b_p, n_out, apply_relu=False,
                       out_dtype=jnp.bfloat16):
    """out = [relu](a @ w_p + b_p)[:, :n_out].

    a: (M, K) (cast to bf16 here).  w_p: (Kp, Np) bf16, pre-padded at init.
    b_p: (1, Np) f32.  K is a single block (K <= 640 here) -> 1-D grid over M.
    """
    M, K = a.shape
    Kp, Np = w_p.shape
    TM = _pick_tm(M, Kp)
    Mp = _round_up(M, TM)

    a_p = jnp.pad(a.astype(jnp.bfloat16), ((0, Mp - M), (0, Kp - K)))

    out_bytes = jnp.dtype(out_dtype).itemsize
    cost = pl.CostEstimate(
        flops=2 * Mp * Kp * Np,
        transcendentals=0,
        bytes_accessed=Mp * Kp * 2 + Kp * Np * 2 + Np * 4 + Mp * Np * out_bytes)

    out = pl.pallas_call(
        _make_mm_kernel(apply_relu),
        out_shape=jax.ShapeDtypeStruct((Mp, Np), out_dtype),
        grid_spec=pltpu.PrefetchScalarGridSpec(
            num_scalar_prefetch=0,
            grid=(Mp // TM,),
            in_specs=[
                pl.BlockSpec((TM, Kp), lambda i: (i, 0)),   # A (bf16)
                pl.BlockSpec((Kp, Np), lambda i: (0, 0)),   # W (bf16)
                pl.BlockSpec((1, Np), lambda i: (0, 0)),    # bias (f32)
            ],
            out_specs=pl.BlockSpec((TM, Np), lambda i: (i, 0)),
        ),
        compiler_params=pltpu.CompilerParams(
            dimension_semantics=("parallel",),
            # Let XLA fuse the im2col pad/concat into the A input DMA.
            allow_input_fusion=[True, False, False]),
        cost_estimate=cost,
    )(a_p, w_p, b_p)
    return out[:M, :n_out]


# ----------------------------------------------------------------------------
# Grouped matmul: G small matmuls with shared Kp/Np but per-group weights,
# one pallas_call, scalar-prefetch table maps M-block -> group weight slice.
# Used for (a) the three 1x1 laterals and (b) the five final 3x3 output convs.
# ----------------------------------------------------------------------------
def _grouped_mm_kernel(gid_ref, a_ref, w_ref, b_ref, o_ref):
    del gid_ref  # used only by the index_maps
    acc = jnp.dot(a_ref[...], w_ref[...], preferred_element_type=jnp.float32)
    o_ref[...] = (acc + b_ref[...]).astype(o_ref.dtype)


def pallas_grouped_matmul_bias(a_list, w_stack, b_stack, n_out,
                               out_dtype=jnp.float32):
    """a_list[g]: (M_g, K_g<=Kp).  w_stack: (G, Kp, Np) bf16.  b_stack: (G,1,Np) f32."""
    TM = 128
    G, Kp, Np = w_stack.shape

    padded, block_group, row_starts = [], [], []
    row = 0
    for g, a in enumerate(a_list):
        M, K = a.shape
        mp_g = _round_up(max(M, 8), TM)
        padded.append(jnp.pad(a.astype(jnp.bfloat16),
                              ((0, mp_g - M), (0, Kp - K))))
        block_group += [g] * (mp_g // TM)
        row_starts.append(row)
        row += mp_g
    a_cat = jnp.concatenate(padded, axis=0)
    gid = jnp.asarray(block_group, dtype=jnp.int32)
    num_blocks = len(block_group)

    out_bytes = jnp.dtype(out_dtype).itemsize
    cost = pl.CostEstimate(
        flops=2 * row * Kp * Np,
        transcendentals=0,
        bytes_accessed=(row * Kp * 2 + G * Kp * Np * 2 + G * Np * 4
                        + row * Np * out_bytes))

    out = pl.pallas_call(
        _grouped_mm_kernel,
        out_shape=jax.ShapeDtypeStruct((row, Np), out_dtype),
        grid_spec=pltpu.PrefetchScalarGridSpec(
            num_scalar_prefetch=1,
            grid=(num_blocks,),
            in_specs=[
                pl.BlockSpec((TM, Kp), lambda i, gid_ref: (i, 0)),
                pl.BlockSpec((None, Kp, Np),
                             lambda i, gid_ref: (gid_ref[i], 0, 0)),
                pl.BlockSpec((None, 1, Np),
                             lambda i, gid_ref: (gid_ref[i], 0, 0)),
            ],
            out_specs=pl.BlockSpec((TM, Np), lambda i, gid_ref: (i, 0)),
        ),
        compiler_params=pltpu.CompilerParams(
            dimension_semantics=("parallel",)),
        cost_estimate=cost,
    )(gid, a_cat, w_stack, b_stack)

    return [out[row_starts[g]:row_starts[g] + a_list[g].shape[0], :n_out]
            for g in range(G)]


# ----------------------------------------------------------------------------
# Convolution = im2col (bf16, layout glue under jit) + Pallas matmul
# ----------------------------------------------------------------------------
def _im2col(x_nhwc, kh, kw, stride, padding):
    # TODO(synk): a fully fused variant would accumulate the kh*kw taps inside
    # the kernel (third grid axis + VMEM accumulator) so the inflated patch
    # matrix never hits HBM; allow_input_fusion on A covers part of this.
    B, H, W, Cin = x_nhwc.shape
    Ho = (H + 2 * padding - kh) // stride + 1
    Wo = (W + 2 * padding - kw) // stride + 1
    xp = jnp.pad(x_nhwc.astype(jnp.bfloat16),
                 ((0, 0), (padding, padding), (padding, padding), (0, 0)))
    taps = []
    for i in range(kh):
        for j in range(kw):
            taps.append(
                xp[:, i:i + stride * Ho:stride, j:j + stride * Wo:stride, :])
    a = jnp.concatenate(taps, axis=-1).reshape(B * Ho * Wo, kh * kw * Cin)
    return a, (B, Ho, Wo)


def conv2d(x_nhwc, layer, meta, stride=1, padding=0, apply_relu=False,
           out_dtype=jnp.bfloat16):
    kh, kw, cout = meta["kh"], meta["kw"], meta["cout"]
    a, (B, Ho, Wo) = _im2col(x_nhwc, kh, kw, stride, padding)
    out = pallas_matmul_bias(a, layer["w"], layer["b"], cout,
                             apply_relu=apply_relu, out_dtype=out_dtype)
    return out.reshape(B, Ho, Wo, cout)


def upsample2x_nearest(x_nhwc):
    # Tiny tensors here; stays as XLA-fused layout glue (bf16).
    return jnp.repeat(jnp.repeat(x_nhwc, 2, axis=1), 2, axis=2)


# ----------------------------------------------------------------------------
# Parameter init (deterministic, nn.Conv2d-style uniform bounds) + prep
# ----------------------------------------------------------------------------
def _conv_init(key, kh, kw, cin, cout):
    wkey, bkey = jax.random.split(key)
    bound = 1.0 / np.sqrt(kh * kw * cin)
    w = jax.random.uniform(wkey, (kh, kw, cin, cout), jnp.float32, -bound, bound)
    b = jax.random.uniform(bkey, (cout,), jnp.float32, -bound, bound)
    return w, b


def _prep_layer(w, b):
    """Hoisted once at init: flatten + pad weights (bf16) and bias (f32)."""
    kh, kw, cin, cout = w.shape
    K = kh * kw * cin
    Kp = _round_up(K, 128)
    Np = _round_up(cout, 128)
    w_p = jnp.pad(w.reshape(K, cout).astype(jnp.bfloat16),
                  ((0, Kp - K), (0, Np - cout)))
    b_p = jnp.pad(b.astype(jnp.float32), (0, Np - cout)).reshape(1, Np)
    return {"w": w_p, "b": b_p}, {"kh": kh, "kw": kw, "cin": cin, "cout": cout}


def init_detector_backbone_fpn(key, out_channels=64,
                               backbone_channels=(8, 16, 32, 64, 128)):
    # TODO(synk): pretrained regnet_x_400mf weights cannot be loaded here; a
    # deterministic scaled-down strided-conv backbone with the same stride
    # schedule (c3=/8, c4=/16, c5=/32) stands in for the torchvision extractor.
    c_stem, c1, c3c, c4c, c5c = backbone_channels
    keys = jax.random.split(key, 15)
    raw = {
        "stem":   _conv_init(keys[0], 3, 3, 3, c_stem),        # /2
        "block1": _conv_init(keys[1], 3, 3, c_stem, c1),       # /4
        "block2": _conv_init(keys[2], 3, 3, c1, c3c),          # /8  -> c3
        "block3": _conv_init(keys[3], 3, 3, c3c, c4c),         # /16 -> c4
        "block4": _conv_init(keys[4], 3, 3, c4c, c5c),         # /32 -> c5
        "p5_p6":  _conv_init(keys[13], 3, 3, out_channels, out_channels),
        "p6_p7":  _conv_init(keys[14], 3, 3, out_channels, out_channels),
    }
    params, meta = {}, {}
    for name, (w, b) in raw.items():
        params[name], meta[name] = _prep_layer(w, b)

    # 1x1 lateral convs (c3_p3/c4_p4/c5_p5) stacked -> one grouped pallas_call.
    lat_specs = (("c3_p3", 5, c3c), ("c4_p4", 6, c4c), ("c5_p5", 7, c5c))
    ws, bs = [], []
    for _, kidx, cin in lat_specs:
        w, b = _conv_init(keys[kidx], 1, 1, cin, out_channels)
        p, _ = _prep_layer(w, b)
        ws.append(p["w"]); bs.append(p["b"])
    params["lateral"] = {"w": jnp.stack(ws, axis=0), "b": jnp.stack(bs, axis=0)}
    meta["lateral"] = {"cout": out_channels}

    # Final 3x3 output convs (shared K/N) stacked -> one grouped pallas_call.
    fpn_out_names = ("p3_p3", "p4_p4", "p5_p5", "p6_p6", "p7_p7")
    keymap = {"p3_p3": 8, "p4_p4": 9, "p5_p5": 10, "p6_p6": 11, "p7_p7": 12}
    ws, bs = [], []
    for name in fpn_out_names:
        w, b = _conv_init(keys[keymap[name]], 3, 3, out_channels, out_channels)
        p, _ = _prep_layer(w, b)
        ws.append(p["w"]); bs.append(p["b"])
    params["fpn_out"] = {"w": jnp.stack(ws, axis=0), "b": jnp.stack(bs, axis=0)}
    meta["fpn_out"] = {"kh": 3, "kw": 3, "cin": out_channels,
                       "cout": out_channels, "names": fpn_out_names}
    return params, meta


# ----------------------------------------------------------------------------
# Forward pass (mirrors DetectorBackboneWithFPN.forward), jitted
# ----------------------------------------------------------------------------
def make_forward(meta):
    out_ch = meta["fpn_out"]["cout"]

    def forward(params, images_nchw):
        x = jnp.transpose(images_nchw, (0, 2, 3, 1))  # NCHW -> NHWC

        # ---- backbone stand-in: c3 (/8), c4 (/16), c5 (/32) (bf16 stores) ----
        h = conv2d(x, params["stem"], meta["stem"], stride=2, padding=1,
                   apply_relu=True)
        h = conv2d(h, params["block1"], meta["block1"], stride=2, padding=1,
                   apply_relu=True)
        c3 = conv2d(h, params["block2"], meta["block2"], stride=2, padding=1,
                    apply_relu=True)
        c4 = conv2d(c3, params["block3"], meta["block3"], stride=2, padding=1,
                    apply_relu=True)
        c5 = conv2d(c4, params["block4"], meta["block4"], stride=2, padding=1,
                    apply_relu=True)

        # ---- FPN 1x1 laterals: one grouped pallas_call for c3/c4/c5 ----
        lat_inputs, lat_shapes = [], []
        for feat in (c3, c4, c5):
            B, Hh, Ww, C = feat.shape
            lat_inputs.append(feat.reshape(B * Hh * Ww, C))
            lat_shapes.append((B, Hh, Ww))
        lats = pallas_grouped_matmul_bias(lat_inputs, params["lateral"]["w"],
                                          params["lateral"]["b"], out_ch,
                                          out_dtype=jnp.bfloat16)
        lat3 = lats[0].reshape(lat_shapes[0] + (out_ch,))
        lat4 = lats[1].reshape(lat_shapes[1] + (out_ch,))
        lat5 = lats[2].reshape(lat_shapes[2] + (out_ch,))

        # ---- top-down pathway (tiny bf16 adds, XLA) ----
        p5 = lat5
        p4 = lat4 + upsample2x_nearest(p5)
        p3 = lat3 + upsample2x_nearest(p4)

        # ---- extra pyramid levels (sequential dependency) ----
        p6 = conv2d(p5, params["p5_p6"], meta["p5_p6"], stride=2, padding=1)
        p7 = conv2d(p6, params["p6_p7"], meta["p6_p7"], stride=2, padding=1)

        # ---- final 3x3 output convs, batched into one grouped matmul (f32) ----
        feats = {"p3": p3, "p4": p4, "p5": p5, "p6": p6, "p7": p7}
        names = ("p3", "p4", "p5", "p6", "p7")
        a_list, shapes = [], []
        for name in names:
            a, shp = _im2col(feats[name], 3, 3, 1, 1)
            a_list.append(a)
            shapes.append(shp)
        outs = pallas_grouped_matmul_bias(a_list, params["fpn_out"]["w"],
                                          params["fpn_out"]["b"], out_ch,
                                          out_dtype=jnp.float32)
        result = {}
        for name, o, (B, Ho, Wo) in zip(names, outs, shapes):
            result[name] = jnp.transpose(o.reshape(B, Ho, Wo, out_ch),
                                         (0, 3, 1, 2))  # back to NCHW
        return result

    return jax.jit(forward)


if __name__ == "__main__":
    out_channels = 64
    key = jax.random.PRNGKey(0)
    pkey, xkey = jax.random.split(key)
    params, meta = init_detector_backbone_fpn(pkey, out_channels=out_channels)
    forward = make_forward(meta)

    B, H, W = 2, 128, 128   # smallest spatial size that reaches p7 (stride 128)
    images = jax.random.normal(xkey, (B, 3, H, W), jnp.float32)  # NCHW

    feats = jax.block_until_ready(forward(params, images))

    expected = {
        "p3": (B, out_channels, H // 8, W // 8),
        "p4": (B, out_channels, H // 16, W // 16),
        "p5": (B, out_channels, H // 32, W // 32),
        "p6": (B, out_channels, H // 64, W // 64),
        "p7": (B, out_channels, H // 128, W // 128),
    }
    for name, shape in expected.items():
        assert feats[name].shape == shape, (name, feats[name].shape, shape)
        assert bool(jnp.all(jnp.isfinite(feats[name])))
    print("KERNEL_OK")
</pallas_src>

<mosaic_0001>
module attributes {stable_mosaic.version = 11 : i64} {
  func.func @kernel(%arg0: i32, %arg1: memref<2048x128xbf16, #tpu.memory_space<vmem>>, %arg2: memref<128x128xbf16, #tpu.memory_space<vmem>>, %arg3: memref<1x128xf32, #tpu.memory_space<vmem>>, %arg4: memref<2048x128xbf16, #tpu.memory_space<vmem>>) attributes {dimension_semantics = [#tpu.dimension_semantics<parallel>], iteration_bounds = array<i64: 4>, scalar_prefetch = 0 : i64, scratch_operands = 0 : i64, tpu.core_type = #tpu.core_type<tc>, window_params = [{transform_indices = @transform_0, window_bounds = array<i64: 2048, 128>}, {pipeline_mode = #tpu.pipeline_mode<synchronous>, transform_indices = @transform_1, window_bounds = array<i64: 128, 128>}, {pipeline_mode = #tpu.pipeline_mode<synchronous>, transform_indices = @transform_2, window_bounds = array<i64: 1, 128>}, {transform_indices = @transform_3, window_bounds = array<i64: 2048, 128>}]} {
    %c0 = arith.constant 0 : index
    %c0_0 = arith.constant 0 : index
    %0 = vector.load %arg1[%c0, %c0_0] : memref<2048x128xbf16, #tpu.memory_space<vmem>>, vector<2048x128xbf16>
    %c0_1 = arith.constant 0 : index
    %c0_2 = arith.constant 0 : index
    %1 = vector.load %arg2[%c0_1, %c0_2] : memref<128x128xbf16, #tpu.memory_space<vmem>>, vector<128x128xbf16>
    %cst = arith.constant dense<0.000000e+00> : vector<2048x128xf32>
    %2 = tpu.matmul %0, %1, %cst {dimension_numbers = #tpu.dot_dimension_numbers<[1], [0], [0], [1], [0, 0, 1, 1], [], []>} : vector<2048x128xbf16>, vector<128x128xbf16>, vector<2048x128xf32> -> vector<2048x128xf32>
    %c0_3 = arith.constant 0 : index
    %c0_4 = arith.constant 0 : index
    %3 = vector.load %arg3[%c0_3, %c0_4] : memref<1x128xf32, #tpu.memory_space<vmem>>, vector<1x128xf32>
    %4 = vector.broadcast %3 : vector<1x128xf32> to vector<2048x128xf32>
    %5 = arith.addf %2, %4 : vector<2048x128xf32>
    %cst_5 = arith.constant 0.000000e+00 : f32
    %6 = vector.broadcast %cst_5 : f32 to vector<2048x128xf32>
    %7 = arith.maximumf %5, %6 : vector<2048x128xf32>
    %8 = arith.truncf %7 : vector<2048x128xf32> to vector<2048x128xbf16>
    %c0_6 = arith.constant 0 : index
    %c0_7 = arith.constant 0 : index
    %9 = vector.load %arg4[%c0_6, %c0_7] : memref<2048x128xbf16, #tpu.memory_space<vmem>>, vector<2048x128xbf16>
    tpu.vector_store %arg4[%c0_6, %c0_7], %8 {strides = array<i32>} : memref<2048x128xbf16, #tpu.memory_space<vmem>>, vector<2048x128xbf16>,
    return
  }
  func.func @transform_0(%arg0: i32) -> (i32, i32) {
    %c0_i32 = arith.constant 0 : i32
    %c0_i32_0 = arith.constant 0 : i32
    return %arg0, %c0_i32 : i32, i32
  }
  func.func @transform_1(%arg0: i32) -> (i32, i32) {
    %c0_i32 = arith.constant 0 : i32
    %c0_i32_0 = arith.constant 0 : i32
    %c0_i32_1 = arith.constant 0 : i32
    return %c0_i32, %c0_i32_0 : i32, i32
  }
  func.func @transform_2(%arg0: i32) -> (i32, i32) {
    %c0_i32 = arith.constant 0 : i32
    %c0_i32_0 = arith.constant 0 : i32
    %c0_i32_1 = arith.constant 0 : i32
    return %c0_i32, %c0_i32_0 : i32, i32
  }
  func.func @transform_3(%arg0: i32) -> (i32, i32) {
    %c0_i32 = arith.constant 0 : i32
    %c0_i32_0 = arith.constant 0 : i32
    return %arg0, %c0_i32 : i32, i32
  }
}

module attributes {stable_mosaic.version = 11 : i64} {
  func.func @kernel(%arg0: i32, %arg1: memref<1024x128xbf16, #tpu.memory_space<vmem>>, %arg2: memref<128x128xbf16, #tpu.memory_space<vmem>>, %arg3: memref<1x128xf32, #tpu.memory_space<vmem>>, %arg4: memref<1024x128xbf16, #tpu.memory_space<vmem>>) attributes {dimension_semantics = [#tpu.dimension_semantics<parallel>], iteration_bounds = array<i64: 2>, scalar_prefetch = 0 : i64, scratch_operands = 0 : i64, tpu.core_type = #tpu.core_type<tc>, window_params = [{transform_indices = @transform_0, window_bounds = array<i64: 1024, 128>}, {pipeline_mode = #tpu.pipeline_mode<synchronous>, transform_indices = @transform_1, window_bounds = array<i64: 128, 128>}, {pipeline_mode = #tpu.pipeline_mode<synchronous>, transform_indices = @transform_2, window_bounds = array<i64: 1, 128>}, {transform_indices = @transform_3, window_bounds = array<i64: 1024, 128>}]} {
    %c0 = arith.constant 0 : index
    %c0_0 = arith.constant 0 : index
    %0 = vector.load %arg1[%c0, %c0_0] : memref<1024x128xbf16, #tpu.memory_space<vmem>>, vector<1024x128xbf16>
    %c0_1 = arith.constant 0 : index
    %c0_2 = arith.constant 0 : index
    %1 = vector.load %arg2[%c0_1, %c0_2] : memref<128x128xbf16, #tpu.memory_space<vmem>>, vector<128x128xbf16>
    %cst = arith.constant dense<0.000000e+00> : vector<1024x128xf32>
    %2 = tpu.matmul %0, %1, %cst {dimension_numbers = #tpu.dot_dimension_numbers<[1], [0], [0], [1], [0, 0, 1, 1], [], []>} : vector<1024x128xbf16>, vector<128x128xbf16>, vector<1024x128xf32> -> vector<1024x128xf32>
    %c0_3 = arith.constant 0 : index
    %c0_4 = arith.constant 0 : index
    %3 = vector.load %arg3[%c0_3, %c0_4] : memref<1x128xf32, #tpu.memory_space<vmem>>, vector<1x128xf32>
    %4 = vector.broadcast %3 : vector<1x128xf32> to vector<1024x128xf32>
    %5 = arith.addf %2, %4 : vector<1024x128xf32>
    %cst_5 = arith.constant 0.000000e+00 : f32
    %6 = vector.broadcast %cst_5 : f32 to vector<1024x128xf32>
    %7 = arith.maximumf %5, %6 : vector<1024x128xf32>
    %8 = arith.truncf %7 : vector<1024x128xf32> to vector<1024x128xbf16>
    %c0_6 = arith.constant 0 : index
    %c0_7 = arith.constant 0 : index
    %9 = vector.load %arg4[%c0_6, %c0_7] : memref<1024x128xbf16, #tpu.memory_space<vmem>>, vector<1024x128xbf16>
    tpu.vector_store %arg4[%c0_6, %c0_7], %8 {strides = array<i32>} : memref<1024x128xbf16, #tpu.memory_space<vmem>>, vector<1024x128xbf16>,
    return
  }
  func.func @transform_0(%arg0: i32) -> (i32, i32) {
    %c0_i32 = arith.constant 0 : i32
    %c0_i32_0 = arith.constant 0 : i32
    return %arg0, %c0_i32 : i32, i32
  }
  func.func @transform_1(%arg0: i32) -> (i32, i32) {
    %c0_i32 = arith.constant 0 : i32
    %c0_i32_0 = arith.constant 0 : i32
    %c0_i32_1 = arith.constant 0 : i32
    return %c0_i32, %c0_i32_0 : i32, i32
  }
  func.func @transform_2(%arg0: i32) -> (i32, i32) {
    %c0_i32 = arith.constant 0 : i32
    %c0_i32_0 = arith.constant 0 : i32
    %c0_i32_1 = arith.constant 0 : i32
    return %c0_i32, %c0_i32_0 : i32, i32
  }
  func.func @transform_3(%arg0: i32) -> (i32, i32) {
    %c0_i32 = arith.constant 0 : i32
    %c0_i32_0 = arith.constant 0 : i32
    return %arg0, %c0_i32 : i32, i32
  }
}

module attributes {stable_mosaic.version = 11 : i64} {
  func.func @kernel(%arg0: i32, %arg1: memref<256x256xbf16, #tpu.memory_space<vmem>>, %arg2: memref<256x128xbf16, #tpu.memory_space<vmem>>, %arg3: memref<1x128xf32, #tpu.memory_space<vmem>>, %arg4: memref<256x128xbf16, #tpu.memory_space<vmem>>) attributes {dimension_semantics = [#tpu.dimension_semantics<parallel>], iteration_bounds = array<i64: 2>, scalar_prefetch = 0 : i64, scratch_operands = 0 : i64, tpu.core_type = #tpu.core_type<tc>, window_params = [{transform_indices = @transform_0, window_bounds = array<i64: 256, 256>}, {pipeline_mode = #tpu.pipeline_mode<synchronous>, transform_indices = @transform_1, window_bounds = array<i64: 256, 128>}, {pipeline_mode = #tpu.pipeline_mode<synchronous>, transform_indices = @transform_2, window_bounds = array<i64: 1, 128>}, {transform_indices = @transform_3, window_bounds = array<i64: 256, 128>}]} {
    %c0 = arith.constant 0 : index
    %c0_0 = arith.constant 0 : index
    %0 = vector.load %arg1[%c0, %c0_0] : memref<256x256xbf16, #tpu.memory_space<vmem>>, vector<256x256xbf16>
    %c0_1 = arith.constant 0 : index
    %c0_2 = arith.constant 0 : index
    %1 = vector.load %arg2[%c0_1, %c0_2] : memref<256x128xbf16, #tpu.memory_space<vmem>>, vector<256x128xbf16>
    %cst = arith.constant dense<0.000000e+00> : vector<256x128xf32>
    %2 = tpu.matmul %0, %1, %cst {dimension_numbers = #tpu.dot_dimension_numbers<[1], [0], [0], [1], [0, 0, 1, 1], [], []>} : vector<256x256xbf16>, vector<256x128xbf16>, vector<256x128xf32> -> vector<256x128xf32>
    %c0_3 = arith.constant 0 : index
    %c0_4 = arith.constant 0 : index
    %3 = vector.load %arg3[%c0_3, %c0_4] : memref<1x128xf32, #tpu.memory_space<vmem>>, vector<1x128xf32>
    %4 = vector.broadcast %3 : vector<1x128xf32> to vector<256x128xf32>
    %5 = arith.addf %2, %4 : vector<256x128xf32>
    %cst_5 = arith.constant 0.000000e+00 : f32
    %6 = vector.broadcast %cst_5 : f32 to vector<256x128xf32>
    %7 = arith.maximumf %5, %6 : vector<256x128xf32>
    %8 = arith.truncf %7 : vector<256x128xf32> to vector<256x128xbf16>
    %c0_6 = arith.constant 0 : index
    %c0_7 = arith.constant 0 : index
    %9 = vector.load %arg4[%c0_6, %c0_7] : memref<256x128xbf16, #tpu.memory_space<vmem>>, vector<256x128xbf16>
    tpu.vector_store %arg4[%c0_6, %c0_7], %8 {strides = array<i32>} : memref<256x128xbf16, #tpu.memory_space<vmem>>, vector<256x128xbf16>,
    return
  }
  func.func @transform_0(%arg0: i32) -> (i32, i32) {
    %c0_i32 = arith.constant 0 : i32
    %c0_i32_0 = arith.constant 0 : i32
    return %arg0, %c0_i32 : i32, i32
  }
  func.func @transform_1(%arg0: i32) -> (i32, i32) {
    %c0_i32 = arith.constant 0 : i32
    %c0_i32_0 = arith.constant 0 : i32
    %c0_i32_1 = arith.constant 0 : i32
    return %c0_i32, %c0_i32_0 : i32, i32
  }
  func.func @transform_2(%arg0: i32) -> (i32, i32) {
    %c0_i32 = arith.constant 0 : i32
    %c0_i32_0 = arith.constant 0 : i32
    %c0_i32_1 = arith.constant 0 : i32
    return %c0_i32, %c0_i32_0 : i32, i32
  }
  func.func @transform_3(%arg0: i32) -> (i32, i32) {
    %c0_i32 = arith.constant 0 : i32
    %c0_i32_0 = arith.constant 0 : i32
    return %arg0, %c0_i32 : i32, i32
  }
}

module attributes {stable_mosaic.version = 11 : i64} {
  func.func @kernel(%arg0: i32, %arg1: memref<64x384xbf16, #tpu.memory_space<vmem>>, %arg2: memref<384x128xbf16, #tpu.memory_space<vmem>>, %arg3: memref<1x128xf32, #tpu.memory_space<vmem>>, %arg4: memref<64x128xbf16, #tpu.memory_space<vmem>>) attributes {dimension_semantics = [#tpu.dimension_semantics<parallel>], iteration_bounds = array<i64: 2>, scalar_prefetch = 0 : i64, scratch_operands = 0 : i64, tpu.core_type = #tpu.core_type<tc>, window_params = [{transform_indices = @transform_0, window_bounds = array<i64: 64, 384>}, {pipeline_mode = #tpu.pipeline_mode<synchronous>, transform_indices = @transform_1, window_bounds = array<i64: 384, 128>}, {pipeline_mode = #tpu.pipeline_mode<synchronous>, transform_indices = @transform_2, window_bounds = array<i64: 1, 128>}, {transform_indices = @transform_3, window_bounds = array<i64: 64, 128>}]} {
    %c0 = arith.constant 0 : index
    %c0_0 = arith.constant 0 : index
    %0 = vector.load %arg1[%c0, %c0_0] : memref<64x384xbf16, #tpu.memory_space<vmem>>, vector<64x384xbf16>
    %c0_1 = arith.constant 0 : index
    %c0_2 = arith.constant 0 : index
    %1 = vector.load %arg2[%c0_1, %c0_2] : memref<384x128xbf16, #tpu.memory_space<vmem>>, vector<384x128xbf16>
    %cst = arith.constant dense<0.000000e+00> : vector<64x128xf32>
    %2 = tpu.matmul %0, %1, %cst {dimension_numbers = #tpu.dot_dimension_numbers<[1], [0], [0], [1], [0, 0, 1, 1], [], []>} : vector<64x384xbf16>, vector<384x128xbf16>, vector<64x128xf32> -> vector<64x128xf32>
    %c0_3 = arith.constant 0 : index
    %c0_4 = arith.constant 0 : index
    %3 = vector.load %arg3[%c0_3, %c0_4] : memref<1x128xf32, #tpu.memory_space<vmem>>, vector<1x128xf32>
    %4 = vector.broadcast %3 : vector<1x128xf32> to vector<64x128xf32>
    %5 = arith.addf %2, %4 : vector<64x128xf32>
    %cst_5 = arith.constant 0.000000e+00 : f32
    %6 = vector.broadcast %cst_5 : f32 to vector<64x128xf32>
    %7 = arith.maximumf %5, %6 : vector<64x128xf32>
    %8 = arith.truncf %7 : vector<64x128xf32> to vector<64x128xbf16>
    %c0_6 = arith.constant 0 : index
    %c0_7 = arith.constant 0 : index
    %9 = vector.load %arg4[%c0_6, %c0_7] : memref<64x128xbf16, #tpu.memory_space<vmem>>, vector<64x128xbf16>
    tpu.vector_store %arg4[%c0_6, %c0_7], %8 {strides = array<i32>} : memref<64x128xbf16, #tpu.memory_space<vmem>>, vector<64x128xbf16>,
    return
  }
  func.func @transform_0(%arg0: i32) -> (i32, i32) {
    %c0_i32 = arith.constant 0 : i32
    %c0_i32_0 = arith.constant 0 : i32
    return %arg0, %c0_i32 : i32, i32
  }
  func.func @transform_1(%arg0: i32) -> (i32, i32) {
    %c0_i32 = arith.constant 0 : i32
    %c0_i32_0 = arith.constant 0 : i32
    %c0_i32_1 = arith.constant 0 : i32
    return %c0_i32, %c0_i32_0 : i32, i32
  }
  func.func @transform_2(%arg0: i32) -> (i32, i32) {
    %c0_i32 = arith.constant 0 : i32
    %c0_i32_0 = arith.constant 0 : i32
    %c0_i32_1 = arith.constant 0 : i32
    return %c0_i32, %c0_i32_0 : i32, i32
  }
  func.func @transform_3(%arg0: i32) -> (i32, i32) {
    %c0_i32 = arith.constant 0 : i32
    %c0_i32_0 = arith.constant 0 : i32
    return %arg0, %c0_i32 : i32, i32
  }
}

module attributes {stable_mosaic.version = 11 : i64} {
  func.func @kernel(%arg0: i32, %arg1: memref<32x640xbf16, #tpu.memory_space<vmem>>, %arg2: memref<640x128xbf16, #tpu.memory_space<vmem>>, %arg3: memref<1x128xf32, #tpu.memory_space<vmem>>, %arg4: memref<32x128xbf16, #tpu.memory_space<vmem>>) attributes {dimension_semantics = [#tpu.dimension_semantics<parallel>], iteration_bounds = array<i64: 1>, scalar_prefetch = 0 : i64, scratch_operands = 0 : i64, tpu.core_type = #tpu.core_type<tc>, window_params = [{transform_indices = @transform_0, window_bounds = array<i64: 32, 640>}, {pipeline_mode = #tpu.pipeline_mode<synchronous>, transform_indices = @transform_1, window_bounds = array<i64: 640, 128>}, {pipeline_mode = #tpu.pipeline_mode<synchronous>, transform_indices = @transform_2, window_bounds = array<i64: 1, 128>}, {transform_indices = @transform_3, window_bounds = array<i64: 32, 128>}]} {
    %c0 = arith.constant 0 : index
    %c0_0 = arith.constant 0 : index
    %0 = vector.load %arg1[%c0, %c0_0] : memref<32x640xbf16, #tpu.memory_space<vmem>>, vector<32x640xbf16>
    %c0_1 = arith.constant 0 : index
    %c0_2 = arith.constant 0 : index
    %1 = vector.load %arg2[%c0_1, %c0_2] : memref<640x128xbf16, #tpu.memory_space<vmem>>, vector<640x128xbf16>
    %cst = arith.constant dense<0.000000e+00> : vector<32x128xf32>
    %2 = tpu.matmul %0, %1, %cst {dimension_numbers = #tpu.dot_dimension_numbers<[1], [0], [0], [1], [0, 0, 1, 1], [], []>} : vector<32x640xbf16>, vector<640x128xbf16>, vector<32x128xf32> -> vector<32x128xf32>
    %c0_3 = arith.constant 0 : index
    %c0_4 = arith.constant 0 : index
    %3 = vector.load %arg3[%c0_3, %c0_4] : memref<1x128xf32, #tpu.memory_space<vmem>>, vector<1x128xf32>
    %4 = vector.broadcast %3 : vector<1x128xf32> to vector<32x128xf32>
    %5 = arith.addf %2, %4 : vector<32x128xf32>
    %cst_5 = arith.constant 0.000000e+00 : f32
    %6 = vector.broadcast %cst_5 : f32 to vector<32x128xf32>
    %7 = arith.maximumf %5, %6 : vector<32x128xf32>
    %8 = arith.truncf %7 : vector<32x128xf32> to vector<32x128xbf16>
    %c0_6 = arith.constant 0 : index
    %c0_7 = arith.constant 0 : index
    %9 = vector.load %arg4[%c0_6, %c0_7] : memref<32x128xbf16, #tpu.memory_space<vmem>>, vector<32x128xbf16>
    tpu.vector_store %arg4[%c0_6, %c0_7], %8 {strides = array<i32>} : memref<32x128xbf16, #tpu.memory_space<vmem>>, vector<32x128xbf16>,
    return
  }
  func.func @transform_0(%arg0: i32) -> (i32, i32) {
    %c0_i32 = arith.constant 0 : i32
    %c0_i32_0 = arith.constant 0 : i32
    return %arg0, %c0_i32 : i32, i32
  }
  func.func @transform_1(%arg0: i32) -> (i32, i32) {
    %c0_i32 = arith.constant 0 : i32
    %c0_i32_0 = arith.constant 0 : i32
    %c0_i32_1 = arith.constant 0 : i32
    return %c0_i32, %c0_i32_0 : i32, i32
  }
  func.func @transform_2(%arg0: i32) -> (i32, i32) {
    %c0_i32 = arith.constant 0 : i32
    %c0_i32_0 = arith.constant 0 : i32
    %c0_i32_1 = arith.constant 0 : i32
    return %c0_i32, %c0_i32_0 : i32, i32
  }
  func.func @transform_3(%arg0: i32) -> (i32, i32) {
    %c0_i32 = arith.constant 0 : i32
    %c0_i32_0 = arith.constant 0 : i32
    return %arg0, %c0_i32 : i32, i32
  }
}

module attributes {stable_mosaic.version = 11 : i64} {
  func.func @_grouped_mm_kernel(%arg0: i32, %arg1: memref<6xi32, #tpu.memory_space<smem>>, %arg2: memref<128x128xbf16, #tpu.memory_space<vmem>>, %arg3: memref<1x128x128xbf16, #tpu.memory_space<vmem>>, %arg4: memref<1x1x128xf32, #tpu.memory_space<vmem>>, %arg5: memref<128x128xbf16, #tpu.memory_space<vmem>>) attributes {dimension_semantics = [#tpu.dimension_semantics<parallel>], iteration_bounds = array<i64: 6>, scalar_prefetch = 1 : i64, scratch_operands = 0 : i64, tpu.core_type = #tpu.core_type<tc>, window_params = [{transform_indices = @transform_0, window_bounds = array<i64: 128, 128>}, {transform_indices = @transform_1, window_bounds = array<i64: 1, 128, 128>}, {transform_indices = @transform_2, window_bounds = array<i64: 1, 1, 128>}, {transform_indices = @transform_3, window_bounds = array<i64: 128, 128>}]} {
    %c0 = arith.constant 0 : index
    %c0_0 = arith.constant 0 : index
    %0 = vector.load %arg2[%c0, %c0_0] : memref<128x128xbf16, #tpu.memory_space<vmem>>, vector<128x128xbf16>
    %c0_1 = arith.constant 0 : index
    %c0_2 = arith.constant 0 : index
    %c0_3 = arith.constant 0 : index
    %1 = vector.load %arg3[%c0_1, %c0_2, %c0_3] : memref<1x128x128xbf16, #tpu.memory_space<vmem>>, vector<1x128x128xbf16>
    %2 = vector.shape_cast %1 : vector<1x128x128xbf16> to vector<128x128xbf16>
    %cst = arith.constant dense<0.000000e+00> : vector<128x128xf32>
    %3 = tpu.matmul %0, %2, %cst {dimension_numbers = #tpu.dot_dimension_numbers<[1], [0], [0], [1], [0, 0, 1, 1], [], []>} : vector<128x128xbf16>, vector<128x128xbf16>, vector<128x128xf32> -> vector<128x128xf32>
    %c0_4 = arith.constant 0 : index
    %c0_5 = arith.constant 0 : index
    %c0_6 = arith.constant 0 : index
    %4 = vector.load %arg4[%c0_4, %c0_5, %c0_6] : memref<1x1x128xf32, #tpu.memory_space<vmem>>, vector<1x1x128xf32>
    %5 = vector.shape_cast %4 : vector<1x1x128xf32> to vector<1x128xf32>
    %6 = vector.broadcast %5 : vector<1x128xf32> to vector<128x128xf32>
    %7 = arith.addf %3, %6 : vector<128x128xf32>
    %8 = arith.truncf %7 : vector<128x128xf32> to vector<128x128xbf16>
    %c0_7 = arith.constant 0 : index
    %c0_8 = arith.constant 0 : index
    %9 = vector.load %arg5[%c0_7, %c0_8] : memref<128x128xbf16, #tpu.memory_space<vmem>>, vector<128x128xbf16>
    tpu.vector_store %arg5[%c0_7, %c0_8], %8 {strides = array<i32>} : memref<128x128xbf16, #tpu.memory_space<vmem>>, vector<128x128xbf16>,
    return
  }
  func.func @transform_0(%arg0: i32, %arg1: memref<6xi32, #tpu.memory_space<smem>>) -> (i32, i32) {
    %c0_i32 = arith.constant 0 : i32
    %c0_i32_0 = arith.constant 0 : i32
    return %arg0, %c0_i32 : i32, i32
  }
  func.func @transform_1(%arg0: i32, %arg1: memref<6xi32, #tpu.memory_space<smem>>) -> (i32, i32, i32) {
    %0 = arith.index_cast %arg0 : i32 to index
    %1 = memref.load %arg1[%0] : memref<6xi32, #tpu.memory_space<smem>>
    %c0_i32 = arith.constant 0 : i32
    %c0_i32_0 = arith.constant 0 : i32
    %c0_i32_1 = arith.constant 0 : i32
    return %1, %c0_i32, %c0_i32_0 : i32, i32, i32
  }
  func.func @transform_2(%arg0: i32, %arg1: memref<6xi32, #tpu.memory_space<smem>>) -> (i32, i32, i32) {
    %0 = arith.index_cast %arg0 : i32 to index
    %1 = memref.load %arg1[%0] : memref<6xi32, #tpu.memory_space<smem>>
    %c0_i32 = arith.constant 0 : i32
    %c0_i32_0 = arith.constant 0 : i32
    %c0_i32_1 = arith.constant 0 : i32
    return %1, %c0_i32, %c0_i32_0 : i32, i32, i32
  }
  func.func @transform_3(%arg0: i32, %arg1: memref<6xi32, #tpu.memory_space<smem>>) -> (i32, i32) {
    %c0_i32 = arith.constant 0 : i32
    %c0_i32_0 = arith.constant 0 : i32
    return %arg0, %c0_i32 : i32, i32
  }
}

module attributes {stable_mosaic.version = 11 : i64} {
  func.func @kernel(%arg0: i32, %arg1: memref<8x640xbf16, #tpu.memory_space<vmem>>, %arg2: memref<640x128xbf16, #tpu.memory_space<vmem>>, %arg3: memref<1x128xf32, #tpu.memory_space<vmem>>, %arg4: memref<8x128xbf16, #tpu.memory_space<vmem>>) attributes {dimension_semantics = [#tpu.dimension_semantics<parallel>], iteration_bounds = array<i64: 1>, scalar_prefetch = 0 : i64, scratch_operands = 0 : i64, tpu.core_type = #tpu.core_type<tc>, window_params = [{transform_indices = @transform_0, window_bounds = array<i64: 8, 640>}, {pipeline_mode = #tpu.pipeline_mode<synchronous>, transform_indices = @transform_1, window_bounds = array<i64: 640, 128>}, {pipeline_mode = #tpu.pipeline_mode<synchronous>, transform_indices = @transform_2, window_bounds = array<i64: 1, 128>}, {transform_indices = @transform_3, window_bounds = array<i64: 8, 128>}]} {
    %c0 = arith.constant 0 : index
    %c0_0 = arith.constant 0 : index
    %0 = vector.load %arg1[%c0, %c0_0] : memref<8x640xbf16, #tpu.memory_space<vmem>>, vector<8x640xbf16>
    %c0_1 = arith.constant 0 : index
    %c0_2 = arith.constant 0 : index
    %1 = vector.load %arg2[%c0_1, %c0_2] : memref<640x128xbf16, #tpu.memory_space<vmem>>, vector<640x128xbf16>
    %cst = arith.constant dense<0.000000e+00> : vector<8x128xf32>
    %2 = tpu.matmul %0, %1, %cst {dimension_numbers = #tpu.dot_dimension_numbers<[1], [0], [0], [1], [0, 0, 1, 1], [], []>} : vector<8x640xbf16>, vector<640x128xbf16>, vector<8x128xf32> -> vector<8x128xf32>
    %c0_3 = arith.constant 0 : index
    %c0_4 = arith.constant 0 : index
    %3 = vector.load %arg3[%c0_3, %c0_4] : memref<1x128xf32, #tpu.memory_space<vmem>>, vector<1x128xf32>
    %4 = vector.broadcast %3 : vector<1x128xf32> to vector<8x128xf32>
    %5 = arith.addf %2, %4 : vector<8x128xf32>
    %6 = arith.truncf %5 : vector<8x128xf32> to vector<8x128xbf16>
    %c0_5 = arith.constant 0 : index
    %c0_6 = arith.constant 0 : index
    %7 = vector.load %arg4[%c0_5, %c0_6] : memref<8x128xbf16, #tpu.memory_space<vmem>>, vector<8x128xbf16>
    tpu.vector_store %arg4[%c0_5, %c0_6], %6 {strides = array<i32>} : memref<8x128xbf16, #tpu.memory_space<vmem>>, vector<8x128xbf16>,
    return
  }
  func.func @transform_0(%arg0: i32) -> (i32, i32) {
    %c0_i32 = arith.constant 0 : i32
    %c0_i32_0 = arith.constant 0 : i32
    return %arg0, %c0_i32 : i32, i32
  }
  func.func @transform_1(%arg0: i32) -> (i32, i32) {
    %c0_i32 = arith.constant 0 : i32
    %c0_i32_0 = arith.constant 0 : i32
    %c0_i32_1 = arith.constant 0 : i32
    return %c0_i32, %c0_i32_0 : i32, i32
  }
  func.func @transform_2(%arg0: i32) -> (i32, i32) {
    %c0_i32 = arith.constant 0 : i32
    %c0_i32_0 = arith.constant 0 : i32
    %c0_i32_1 = arith.constant 0 : i32
    return %c0_i32, %c0_i32_0 : i32, i32
  }
  func.func @transform_3(%arg0: i32) -> (i32, i32) {
    %c0_i32 = arith.constant 0 : i32
    %c0_i32_0 = arith.constant 0 : i32
    return %arg0, %c0_i32 : i32, i32
  }
}

module attributes {stable_mosaic.version = 11 : i64} {
  func.func @kernel(%arg0: i32, %arg1: memref<8x640xbf16, #tpu.memory_space<vmem>>, %arg2: memref<640x128xbf16, #tpu.memory_space<vmem>>, %arg3: memref<1x128xf32, #tpu.memory_space<vmem>>, %arg4: memref<8x128xbf16, #tpu.memory_space<vmem>>) attributes {dimension_semantics = [#tpu.dimension_semantics<parallel>], iteration_bounds = array<i64: 1>, scalar_prefetch = 0 : i64, scratch_operands = 0 : i64, tpu.core_type = #tpu.core_type<tc>, window_params = [{transform_indices = @transform_0, window_bounds = array<i64: 8, 640>}, {pipeline_mode = #tpu.pipeline_mode<synchronous>, transform_indices = @transform_1, window_bounds = array<i64: 640, 128>}, {pipeline_mode = #tpu.pipeline_mode<synchronous>, transform_indices = @transform_2, window_bounds = array<i64: 1, 128>}, {transform_indices = @transform_3, window_bounds = array<i64: 8, 128>}]} {
    %c0 = arith.constant 0 : index
    %c0_0 = arith.constant 0 : index
    %0 = vector.load %arg1[%c0, %c0_0] : memref<8x640xbf16, #tpu.memory_space<vmem>>, vector<8x640xbf16>
    %c0_1 = arith.constant 0 : index
    %c0_2 = arith.constant 0 : index
    %1 = vector.load %arg2[%c0_1, %c0_2] : memref<640x128xbf16, #tpu.memory_space<vmem>>, vector<640x128xbf16>
    %cst = arith.constant dense<0.000000e+00> : vector<8x128xf32>
    %2 = tpu.matmul %0, %1, %cst {dimension_numbers = #tpu.dot_dimension_numbers<[1], [0], [0], [1], [0, 0, 1, 1], [], []>} : vector<8x640xbf16>, vector<640x128xbf16>, vector<8x128xf32> -> vector<8x128xf32>
    %c0_3 = arith.constant 0 : index
    %c0_4 = arith.constant 0 : index
    %3 = vector.load %arg3[%c0_3, %c0_4] : memref<1x128xf32, #tpu.memory_space<vmem>>, vector<1x128xf32>
    %4 = vector.broadcast %3 : vector<1x128xf32> to vector<8x128xf32>
    %5 = arith.addf %2, %4 : vector<8x128xf32>
    %6 = arith.truncf %5 : vector<8x128xf32> to vector<8x128xbf16>
    %c0_5 = arith.constant 0 : index
    %c0_6 = arith.constant 0 : index
    %7 = vector.load %arg4[%c0_5, %c0_6] : memref<8x128xbf16, #tpu.memory_space<vmem>>, vector<8x128xbf16>
    tpu.vector_store %arg4[%c0_5, %c0_6], %6 {strides = array<i32>} : memref<8x128xbf16, #tpu.memory_space<vmem>>, vector<8x128xbf16>,
    return
  }
  func.func @transform_0(%arg0: i32) -> (i32, i32) {
    %c0_i32 = arith.constant 0 : i32
    %c0_i32_0 = arith.constant 0 : i32
    return %arg0, %c0_i32 : i32, i32
  }
  func.func @transform_1(%arg0: i32) -> (i32, i32) {
    %c0_i32 = arith.constant 0 : i32
    %c0_i32_0 = arith.constant 0 : i32
    %c0_i32_1 = arith.constant 0 : i32
    return %c0_i32, %c0_i32_0 : i32, i32
  }
  func.func @transform_2(%arg0: i32) -> (i32, i32) {
    %c0_i32 = arith.constant 0 : i32
    %c0_i32_0 = arith.constant 0 : i32
    %c0_i32_1 = arith.constant 0 : i32
    return %c0_i32, %c0_i32_0 : i32, i32
  }
  func.func @transform_3(%arg0: i32) -> (i32, i32) {
    %c0_i32 = arith.constant 0 : i32
    %c0_i32_0 = arith.constant 0 : i32
    return %arg0, %c0_i32 : i32, i32
  }
}

module attributes {stable_mosaic.version = 11 : i64} {
  func.func @_grouped_mm_kernel(%arg0: i32, %arg1: memref<8xi32, #tpu.memory_space<smem>>, %arg2: memref<128x640xbf16, #tpu.memory_space<vmem>>, %arg3: memref<1x640x128xbf16, #tpu.memory_space<vmem>>, %arg4: memref<1x1x128xf32, #tpu.memory_space<vmem>>, %arg5: memref<128x128xf32, #tpu.memory_space<vmem>>) attributes {dimension_semantics = [#tpu.dimension_semantics<parallel>], iteration_bounds = array<i64: 8>, scalar_prefetch = 1 : i64, scratch_operands = 0 : i64, tpu.core_type = #tpu.core_type<tc>, window_params = [{transform_indices = @transform_0, window_bounds = array<i64: 128, 640>}, {transform_indices = @transform_1, window_bounds = array<i64: 1, 640, 128>}, {transform_indices = @transform_2, window_bounds = array<i64: 1, 1, 128>}, {transform_indices = @transform_3, window_bounds = array<i64: 128, 128>}]} {
    %c0 = arith.constant 0 : index
    %c0_0 = arith.constant 0 : index
    %0 = vector.load %arg2[%c0, %c0_0] : memref<128x640xbf16, #tpu.memory_space<vmem>>, vector<128x640xbf16>
    %c0_1 = arith.constant 0 : index
    %c0_2 = arith.constant 0 : index
    %c0_3 = arith.constant 0 : index
    %1 = vector.load %arg3[%c0_1, %c0_2, %c0_3] : memref<1x640x128xbf16, #tpu.memory_space<vmem>>, vector<1x640x128xbf16>
    %2 = vector.shape_cast %1 : vector<1x640x128xbf16> to vector<640x128xbf16>
    %cst = arith.constant dense<0.000000e+00> : vector<128x128xf32>
    %3 = tpu.matmul %0, %2, %cst {dimension_numbers = #tpu.dot_dimension_numbers<[1], [0], [0], [1], [0, 0, 1, 1], [], []>} : vector<128x640xbf16>, vector<640x128xbf16>, vector<128x128xf32> -> vector<128x128xf32>
    %c0_4 = arith.constant 0 : index
    %c0_5 = arith.constant 0 : index
    %c0_6 = arith.constant 0 : index
    %4 = vector.load %arg4[%c0_4, %c0_5, %c0_6] : memref<1x1x128xf32, #tpu.memory_space<vmem>>, vector<1x1x128xf32>
    %5 = vector.shape_cast %4 : vector<1x1x128xf32> to vector<1x128xf32>
    %6 = vector.broadcast %5 : vector<1x128xf32> to vector<128x128xf32>
    %7 = arith.addf %3, %6 : vector<128x128xf32>
    %c0_7 = arith.constant 0 : index
    %c0_8 = arith.constant 0 : index
    %8 = vector.load %arg5[%c0_7, %c0_8] : memref<128x128xf32, #tpu.memory_space<vmem>>, vector<128x128xf32>
    tpu.vector_store %arg5[%c0_7, %c0_8], %7 {strides = array<i32>} : memref<128x128xf32, #tpu.memory_space<vmem>>, vector<128x128xf32>,
    return
  }
  func.func @transform_0(%arg0: i32, %arg1: memref<8xi32, #tpu.memory_space<smem>>) -> (i32, i32) {
    %c0_i32 = arith.constant 0 : i32
    %c0_i32_0 = arith.constant 0 : i32
    return %arg0, %c0_i32 : i32, i32
  }
  func.func @transform_1(%arg0: i32, %arg1: memref<8xi32, #tpu.memory_space<smem>>) -> (i32, i32, i32) {
    %0 = arith.index_cast %arg0 : i32 to index
    %1 = memref.load %arg1[%0] : memref<8xi32, #tpu.memory_space<smem>>
    %c0_i32 = arith.constant 0 : i32
    %c0_i32_0 = arith.constant 0 : i32
    %c0_i32_1 = arith.constant 0 : i32
    return %1, %c0_i32, %c0_i32_0 : i32, i32, i32
  }
  func.func @transform_2(%arg0: i32, %arg1: memref<8xi32, #tpu.memory_space<smem>>) -> (i32, i32, i32) {
    %0 = arith.index_cast %arg0 : i32 to index
    %1 = memref.load %arg1[%0] : memref<8xi32, #tpu.memory_space<smem>>
    %c0_i32 = arith.constant 0 : i32
    %c0_i32_0 = arith.constant 0 : i32
    %c0_i32_1 = arith.constant 0 : i32
    return %1, %c0_i32, %c0_i32_0 : i32, i32, i32
  }
  func.func @transform_3(%arg0: i32, %arg1: memref<8xi32, #tpu.memory_space<smem>>) -> (i32, i32) {
    %c0_i32 = arith.constant 0 : i32
    %c0_i32_0 = arith.constant 0 : i32
    return %arg0, %c0_i32 : i32, i32
  }
}

</mosaic_0001>

<bundles_post_ra>
// kernel: forward.18
= control target key start
LH: loop header
LB: loop body
LE: loop exit
PB: predicated region body
PF: predicated region fallthrough
CT: control target
= control target key end

     0   :  { %s11847_s17 = smov 0   ;;  %s13443_s0 = inlined_call_operand.vmem [shape: bf16[128,128], index: 0, kind: input, shape index: {}]   ;;  %s13444_s1 = inlined_call_operand.vmem [shape: f32[1,128], index: 1, kind: input, shape index: {}]   ;;  %s13445_s2 = inlined_call_operand.vmem [shape: bf16[8192,27], index: 2, kind: input, shape index: {}]   ;;  %s13446_s3 = inlined_call_operand.<no memory space> [shape: bf16[], index: 3, kind: input, shape index: {}]   ;;  %s13447_s4 = inlined_call_operand.vmem [shape: bf16[8192,128], index: 4, kind: output, shape index: {}]  }
   0x1   :  { %v9_v0 = vstv %s13446_s3 }
   0x2   :  { %v11845_v1 = vunpack.i.l.bf16 %v9_v0 }
   0x3 LB: > { %s9555_s18 = sadd.s32 4294967295, %s11814_s17   ;;  %p9559_p0 = scmp.ge.s32.totalorder %s11814_s17, 1  ;;  %s11814_s17 = sphi %s11847_s17, %s19_s17  }
   0x4   : > { %p144_p1 = scmp.lt.s32.totalorder %s11814_s17, 5 }
   0x6   : > { %p145_p2 = pnand %p9559_p0, %p144_p1 }
   0x8   : > { %148 = sbr.rel (%p145_p2) target bundleno = 520 (0x208), region = 32 }
   0xf   : > { %v11670_v2 = vld [vmem:[%s13443_s0] sm:$0xff]   ;;  %s9560_s3 = sshll.u32 %s9555_s18, 8  ;;  %v192_v3 = vlaneseq  ;;  %v11671_v4 = vld [vmem:[%s13443_s0 + $0x8] sm:$0xff]   ;;  %v11672_v5 = vld [vmem:[%s13443_s0 + $0x10] sm:$0xff]   ;;  %v11816_v26 = vmov 0.0  }
  0x10   : > { %p169_p3 = scmp.lt.s32.totalorder %s9560_s3, 1023  ;;  %11373 = vmatprep.subr.bf16.mxu0 %v11670_v2  ;;  %11645 = vmatprep.subr.bf16.mxu1 %v11670_v2  ;;  %v11673_v7 = vld [vmem:[%s13443_s0 + $0x18] sm:$0xff]   ;;  %v11674_v25 = vld [vmem:[%s13443_s0 + $0x20] sm:$0xff]   ;;  %v11675_v47 = vld [vmem:[%s13443_s0 + $0x28] sm:$0xff]  }
  0x11   : > { %11374 = vmatpush3.bf16.msra.mxu0 %v11670_v2  ;;  %11653 = vmatpush3.bf16.msra.mxu1 %v11670_v2  ;;  %v11866_v6 = vand.u32 127, %v192_v3  ;;  %v11676_v61 = vld [vmem:[%s13443_s0 + $0x30] sm:$0xff]  }
  0x12   : > { %s13449_s3 = smov (!%p169_p3, %s9560_s3), 1023  ;;  %11375 = vmatprep.subr.bf16.mxu0 %v11671_v4  ;;  %11646 = vmatprep.subr.bf16.mxu1 %v11671_v4 }
  0x13   : > { %s9561_s25 = sshll.u32 %s13449_s3, 2  ;;  %vm195_vm0 = vcmp.lt.s32.totalorder %v11866_v6, 27 }
  0x14   : > { %s11874_s28 = scalar_lea.vmem %s13445_s2, %s9561_s25  ;;  %s13062_s18 = scalar_lea.vmem %s13447_s4, %s9561_s25 }
  0x15   : > { %11376 = vmatpush3.bf16.msra.mxu0 %v11671_v4  ;;  %11654 = vmatpush3.bf16.msra.mxu1 %v11671_v4  ;;  %v189_v8 = vld [vmem:[%s11874_s28] sm:$0xff]   ;;  %v9565_v10 = vld [vmem:[%s11874_s28 + $0x8] sm:$0xff]   ;;  %v9567_v16 = vld [vmem:[%s11874_s28 + $0x10] sm:$0xff]  }
  0x16   : > { %11377 = vmatprep.subr.bf16.mxu0 %v11672_v5  ;;  %11647 = vmatprep.subr.bf16.mxu1 %v11672_v5  ;;  %v9691_v9 = vld [vmem:[%s11874_s28 + $0x200] sm:$0xff]   ;;  %v190_v11 = vunpack.c.l.bf16 %v189_v8  ;;  %v211_v12 = vunpack.c.h.bf16 %v189_v8  ;;  %v9693_v15 = vld [vmem:[%s11874_s28 + $0x208] sm:$0xff]   ;;  %v233_v17 = vunpack.c.l.bf16 %v9565_v10  ;;  %v255_v18 = vunpack.c.h.bf16 %v9565_v10  ;;  %v9695_v31 = vld [vmem:[%s11874_s28 + $0x210] sm:$0xff]  }
  0x17   : > { %v3005_v13 = vunpack.c.l.bf16 %v9691_v9  ;;  %v3027_v14 = vunpack.c.h.bf16 %v9691_v9  ;;  %v3049_v19 = vunpack.c.l.bf16 %v9693_v15  ;;  %v3071_v20 = vunpack.c.h.bf16 %v9693_v15  ;;  %v9569_v40 = vld [vmem:[%s11874_s28 + $0x18] sm:$0xff]   ;;  %v9571_v46 = vld [vmem:[%s11874_s28 + $0x20] sm:$0xff]   ;;  %v9573_v8 = vld [vmem:[%s11874_s28 + $0x28] sm:$0xff]  }
  0x18   : > { %v196_v21 = vsel %vm195_vm0, %v190_v11, %v11845_v1  ;;  %v217_v22 = vsel %vm195_vm0, %v211_v12, %v11845_v1  ;;  %v277_v24 = vunpack.c.l.bf16 %v9567_v16  ;;  %v299_v30 = vunpack.c.h.bf16 %v9567_v16  ;;  %v9697_v41 = vld [vmem:[%s11874_s28 + $0x218] sm:$0xff]   ;;  %v9699_v56 = vld [vmem:[%s11874_s28 + $0x220] sm:$0xff]   ;;  %v9701_v9 = vld [vmem:[%s11874_s28 + $0x228] sm:$0xff]  }
  0x19   : > { %11378 = vmatpush3.bf16.msra.mxu0 %v11672_v5  ;;  %11655 = vmatpush3.bf16.msra.mxu1 %v11672_v5  ;;  %v3011_v23 = vsel %vm195_vm0, %v3005_v13, %v11845_v1  ;;  %v197_v27 = vpack.c.bf16 %v11816_v26, %v196_v21  ;;  %v219_v28 = vpack.c.bf16 %v11816_v26, %v217_v22  ;;  %v3093_v45 = vunpack.c.l.bf16 %v9695_v31  ;;  %v9575_v10 = vld [vmem:[%s11874_s28 + $0x30] sm:$0xff]  }
  0x1a   : > { %11379 = vmatprep.subr.bf16.mxu0 %v11673_v7  ;;  %11648 = vmatprep.subr.bf16.mxu1 %v11673_v7  ;;  %v3013_v29 = vpack.c.bf16 %v11816_v26, %v3011_v23  ;;  %v3033_v32 = vsel %vm195_vm0, %v3027_v14, %v11845_v1  ;;  %v239_v33 = vsel %vm195_vm0, %v233_v17, %v11845_v1  ;;  %v3115_v51 = vunpack.c.h.bf16 %v9695_v31 }
  0x1b   : > { %v261_v34 = vsel %vm195_vm0, %v255_v18, %v11845_v1  ;;  %v3055_v35 = vsel %vm195_vm0, %v3049_v19, %v11845_v1  ;;  %199 = vst [vmem:[#allocation7] sm:$0xf] %v197_v27  ;;  %221 = vst [vmem:[#allocation7 + $0x4] sm:$0xf] %v219_v28  ;;  %v3035_v36 = vpack.c.bf16 %v11816_v26, %v3033_v32  ;;  %v321_v53 = vunpack.c.l.bf16 %v9569_v40  ;;  %v11677_v27 = vld [vmem:[%s13443_s0 + $0x38] sm:$0xff]  }
  0x1c   : > { %3015 = vst [vmem:[#allocation7 + $0x200] sm:$0xf] %v3013_v29  ;;  %v241_v37 = vpack.c.bf16 %v11816_v26, %v239_v33  ;;  %v263_v38 = vpack.c.bf16 %v11816_v26, %v261_v34  ;;  %v3057_v39 = vpack.c.bf16 %v11816_v26, %v3055_v35  ;;  %v3077_v42 = vsel %vm195_vm0, %v3071_v20, %v11845_v1  ;;  %v9703_v20 = vld [vmem:[%s11874_s28 + $0x230] sm:$0xff]  }
  0x1d   : > { %11380 = vmatpush3.bf16.msra.mxu0 %v11673_v7  ;;  %11656 = vmatpush3.bf16.msra.mxu1 %v11673_v7  ;;  %v283_v43 = vsel %vm195_vm0, %v277_v24, %v11845_v1  ;;  %v305_v44 = vsel %vm195_vm0, %v299_v30, %v11845_v1  ;;  %3037 = vst [vmem:[#allocation7 + $0x204] sm:$0xf] %v3035_v36  ;;  %v343_v54 = vunpack.c.h.bf16 %v9569_v40  ;;  %v3137_v55 = vunpack.c.l.bf16 %v9697_v41  ;;  %v9577_v36 = vld [vmem:[%s11874_s28 + $0x38] sm:$0xff]  }
  0x1e   : > { %11381 = vmatprep.subr.bf16.mxu0 %v11674_v25  ;;  %11649 = vmatprep.subr.bf16.mxu1 %v11674_v25  ;;  %243 = vst [vmem:[#allocation7 + $0x8] sm:$0xf] %v241_v37  ;;  %265 = vst [vmem:[#allocation7 + $0xc] sm:$0xf] %v263_v38  ;;  %v3079_v48 = vpack.c.bf16 %v11816_v26, %v3077_v42  ;;  %v285_v49 = vpack.c.bf16 %v11816_v26, %v283_v43  ;;  %v3159_v59 = vunpack.c.h.bf16 %v9697_v41 }
  0x1f   : > { %3059 = vst [vmem:[#allocation7 + $0x208] sm:$0xf] %v3057_v39  ;;  %v307_v50 = vpack.c.bf16 %v11816_v26, %v305_v44  ;;  %v3099_v52 = vsel %vm195_vm0, %v3093_v45, %v11845_v1  ;;  %v3121_v58 = vsel %vm195_vm0, %v3115_v51, %v11845_v1  ;;  %v365_v60 = vunpack.c.l.bf16 %v9571_v46  ;;  %v9705_v45 = vld [vmem:[%s11874_s28 + $0x238] sm:$0xff]   ;;  %v9707_v51 = vld [vmem:[%s11874_s28 + $0x240] sm:$0xff]  }
  0x20   : > { %3081 = vst [vmem:[#allocation7 + $0x20c] sm:$0xf] %v3079_v48  ;;  %287 = vst [vmem:[#allocation7 + $0x10] sm:$0xf] %v285_v49  ;;  %v3101_v57 = vpack.c.bf16 %v11816_v26, %v3099_v52  ;;  %v3123_v62 = vpack.c.bf16 %v11816_v26, %v3121_v58  ;;  %v327_v63 = vsel %vm195_vm0, %v321_v53, %v11845_v1  ;;  %v387_v2 = vunpack.c.h.bf16 %v9571_v46 }
  0x21   : > { %309 = vst [vmem:[#allocation7 + $0x14] sm:$0xf] %v307_v50  ;;  %11382 = vmatpush3.bf16.msra.mxu0 %v11674_v25  ;;  %11657 = vmatpush3.bf16.msra.mxu1 %v11674_v25  ;;  %v349_v0 = vsel %vm195_vm0, %v343_v54, %v11845_v1  ;;  %v329_v3 = vpack.c.bf16 %v11816_v26, %v327_v63  ;;  %v3181_v7 = vunpack.c.l.bf16 %v9699_v56  ;;  %v3203_v23 = vunpack.c.h.bf16 %v9699_v56  ;;  %v9579_v50 = vld [vmem:[%s11874_s28 + $0x40] sm:$0xff]  }
  0x22   : > { %11383 = vmatprep.subr.bf16.mxu0 %v11675_v47  ;;  %11650 = vmatprep.subr.bf16.mxu1 %v11675_v47  ;;  %3103 = vst [vmem:[#allocation7 + $0x210] sm:$0xf] %v3101_v57  ;;  %v351_v4 = vpack.c.bf16 %v11816_v26, %v349_v0  ;;  %v3143_v5 = vsel %vm195_vm0, %v3137_v55, %v11845_v1  ;;  %v11678_v11 = vld [vmem:[#allocation7] sm:$0xff]   ;;  %3125 = vst [vmem:[#allocation7 + $0x214] sm:$0xf] %v3123_v62  ;;  %v409_v24 = vunpack.c.l.bf16 %v9573_v8  ;;  %v9581_v57 = vld [vmem:[%s11874_s28 + $0x48] sm:$0xff]  }
  0x23   : > { %v3145_v12 = vpack.c.bf16 %v11816_v26, %v3143_v5  ;;  %v3165_v13 = vsel %vm195_vm0, %v3159_v59, %v11845_v1  ;;  %v371_v14 = vsel %vm195_vm0, %v365_v60, %v11845_v1  ;;  %v393_v15 = vsel %vm195_vm0, %v387_v2, %v11845_v1  ;;  %331 = vst [vmem:[#allocation7 + $0x18] sm:$0xf] %v329_v3 }
  0x24   : > { %353 = vst [vmem:[#allocation7 + $0x1c] sm:$0xf] %v351_v4  ;;  %v3167_v16 = vpack.c.bf16 %v11816_v26, %v3165_v13  ;;  %v373_v17 = vpack.c.bf16 %v11816_v26, %v371_v14  ;;  %v395_v18 = vpack.c.bf16 %v11816_v26, %v393_v15  ;;  %v3187_v19 = vsel %vm195_vm0, %v3181_v7, %v11845_v1  ;;  %v11679_v21 = vld [vmem:[#allocation7 + $0x200] sm:$0xff]   ;;  %v9709_v15 = vld [vmem:[%s11874_s28 + $0x248] sm:$0xff]  }
  0x25   : > { %11384 = vmatpush3.bf16.msra.mxu0 %v11675_v47  ;;  %11658 = vmatpush3.bf16.msra.mxu1 %v11675_v47  ;;  %3147 = vst [vmem:[#allocation7 + $0x218] sm:$0xf] %v3145_v12  ;;  %v3189_v22 = vpack.c.bf16 %v11816_v26, %v3187_v19  ;;  %v431_v25 = vunpack.c.h.bf16 %v9573_v8  ;;  %v3225_v28 = vunpack.c.l.bf16 %v9701_v9  ;;  %v3247_v29 = vunpack.c.h.bf16 %v9701_v9  ;;  %v11680_v52 = vld [vmem:[#allocation7 + $0x8] sm:$0xff]  }
  0x26   : > { %11385 = vmatprep.subr.bf16.mxu0 %v11676_v61  ;;  %11651 = vmatprep.subr.bf16.mxu1 %v11676_v61  ;;  %3169 = vst [vmem:[#allocation7 + $0x21c] sm:$0xf] %v3167_v16  ;;  %375 = vst [vmem:[#allocation7 + $0x20] sm:$0xf] %v373_v17  ;;  %v453_v30 = vunpack.c.l.bf16 %v9575_v10  ;;  %v475_v31 = vunpack.c.h.bf16 %v9575_v10  ;;  %v3209_v32 = vsel %vm195_vm0, %v3203_v23, %v11845_v1  ;;  %v3269_v35 = vunpack.c.l.bf16 %v9703_v20 }
  0x27   : > { %397 = vst [vmem:[#allocation7 + $0x24] sm:$0xf] %v395_v18  ;;  %11389 = vmatprep.mubr.bf16.mxu0 %v11678_v11  ;;  %11517 = vmatprep.mubr.bf16.mxu1 %v11679_v21  ;;  %3191 = vst [vmem:[#allocation7 + $0x220] sm:$0xf] %v3189_v22  ;;  %v415_v33 = vsel %vm195_vm0, %v409_v24, %v11845_v1  ;;  %v437_v34 = vsel %vm195_vm0, %v431_v25, %v11845_v1  ;;  %v3291_v44 = vunpack.c.h.bf16 %v9703_v20  ;;  %v11681_v58 = vld [vmem:[#allocation7 + $0x208] sm:$0xff]   ;;  %v9583_v20 = vld [vmem:[%s11874_s28 + $0x50] sm:$0xff]  }
  0x28   : > { %v3211_v37 = vpack.c.bf16 %v11816_v26, %v3209_v32  ;;  %v417_v38 = vpack.c.bf16 %v11816_v26, %v415_v33  ;;  %v439_v39 = vpack.c.bf16 %v11816_v26, %v437_v34  ;;  %v3231_v40 = vsel %vm195_vm0, %v3225_v28, %v11845_v1  ;;  %v11682_v59 = vld [vmem:[#allocation7 + $0x10] sm:$0xff]  }
  0x29   : > { %11386 = vmatpush3.bf16.msra.mxu0 %v11676_v61  ;;  %11659 = vmatpush3.bf16.msra.mxu1 %v11676_v61  ;;  %v3233_v41 = vpack.c.bf16 %v11816_v26, %v3231_v40  ;;  %v3253_v42 = vsel %vm195_vm0, %v3247_v29, %v11845_v1  ;;  %v459_v43 = vsel %vm195_vm0, %v453_v30, %v11845_v1  ;;  %v497_v49 = vunpack.c.l.bf16 %v9577_v36  ;;  %v11683_v0 = vld [vmem:[#allocation7 + $0x210] sm:$0xff]  }
  0x2a   : > { %11387 = vmatprep.subr.bf16.mxu0 %v11677_v27  ;;  %11652 = vmatprep.subr.bf16.mxu1 %v11677_v27  ;;  %3213 = vst [vmem:[#allocation7 + $0x224] sm:$0xf] %v3211_v37  ;;  %419 = vst [vmem:[#allocation7 + $0x28] sm:$0xf] %v417_v38  ;;  %v3255_v46 = vpack.c.bf16 %v11816_v26, %v3253_v42  ;;  %v461_v47 = vpack.c.bf16 %v11816_v26, %v459_v43  ;;  %v519_v56 = vunpack.c.h.bf16 %v9577_v36  ;;  %v9711_v25 = vld [vmem:[%s11874_s28 + $0x250] sm:$0xff]   ;;  %v9713_v37 = vld [vmem:[%s11874_s28 + $0x258] sm:$0xff]  }
  0x2b   : > { %441 = vst [vmem:[#allocation7 + $0x2c] sm:$0xf] %v439_v39  ;;  %v481_v48 = vsel %vm195_vm0, %v475_v31, %v11845_v1  ;;  %3235 = vst [vmem:[#allocation7 + $0x228] sm:$0xf] %v3233_v41  ;;  %v3275_v54 = vsel %vm195_vm0, %v3269_v35, %v11845_v1  ;;  %v3297_v55 = vsel %vm195_vm0, %v3291_v44, %v11845_v1  ;;  %v3313_v63 = vunpack.c.l.bf16 %v9705_v45  ;;  %v9585_v31 = vld [vmem:[%s11874_s28 + $0x58] sm:$0xff]  }
  0x2c   : > { %v483_v53 = vpack.c.bf16 %v11816_v26, %v481_v48  ;;  %3257 = vst [vmem:[#allocation7 + $0x22c] sm:$0xf] %v3255_v46  ;;  %463 = vst [vmem:[#allocation7 + $0x30] sm:$0xf] %v461_v47  ;;  %v3277_v60 = vpack.c.bf16 %v11816_v26, %v3275_v54  ;;  %v3299_v61 = vpack.c.bf16 %v11816_v26, %v3297_v55  ;;  %v3335_v4 = vunpack.c.h.bf16 %v9705_v45  ;;  %v11684_v32 = vld [vmem:[#allocation7 + $0x18] sm:$0xff]   ;;  %v9715_v54 = vld [vmem:[%s11874_s28 + $0x260] sm:$0xff]  }
  0x2d   : > { %v503_v62 = vsel %vm195_vm0, %v497_v49, %v11845_v1  ;;  %11388 = vmatpush3.bf16.msra.mxu0 %v11677_v27  ;;  %11660 = vmatpush3.bf16.msra.mxu1 %v11677_v27  ;;  %v525_v3 = vsel %vm195_vm0, %v519_v56, %v11845_v1  ;;  %v541_v5 = vunpack.c.l.bf16 %v9579_v50  ;;  %v3319_v8 = vsel %vm195_vm0, %v3313_v63, %v11845_v1  ;;  %v11685_v38 = vld [vmem:[#allocation7 + $0x218] sm:$0xff]  }
  0x2e   : > { %485 = vst [vmem:[#allocation7 + $0x34] sm:$0xf] %v483_v53  ;;  %v505_v2 = vpack.c.bf16 %v11816_v26, %v503_v62  ;;  %3279 = vst [vmem:[#allocation7 + $0x230] sm:$0xf] %v3277_v60  ;;  %v527_v7 = vpack.c.bf16 %v11816_v26, %v525_v3  ;;  %v563_v9 = vunpack.c.h.bf16 %v9579_v50  ;;  %v3357_v10 = vunpack.c.l.bf16 %v9707_v51  ;;  %v11686_v39 = vld [vmem:[#allocation7 + $0x20] sm:$0xff]  }
  0x2f   : > { %3301 = vst [vmem:[#allocation7 + $0x234] sm:$0xf] %v3299_v61  ;;  %v3321_v11 = vpack.c.bf16 %v11816_v26, %v3319_v8  ;;  %v3341_v12 = vsel %vm195_vm0, %v3335_v4, %v11845_v1  ;;  %v547_v13 = vsel %vm195_vm0, %v541_v5, %v11845_v1  ;;  %v3379_v14 = vunpack.c.h.bf16 %v9707_v51  ;;  %v9587_v53 = vld [vmem:[%s11874_s28 + $0x60] sm:$0xff]   ;;  %v9589_v4 = vld [vmem:[%s11874_s28 + $0x68] sm:$0xff]  }
  0x30   : > { %507 = vst [vmem:[#allocation7 + $0x38] sm:$0xf] %v505_v2  ;;  %11390 = vmatmul.mubr.bf16.vlgmr.msra.gmra.mrb[0].mxu0 %v11680_v52  ;;  %11518 = vmatmul.mubr.bf16.vlgmr.msra.gmra.mrb[0].mxu1 %v11681_v58  ;;  %529 = vst [vmem:[#allocation7 + $0x3c] sm:$0xf] %v527_v7  ;;  %v3343_v16 = vpack.c.bf16 %v11816_v26, %v3341_v12  ;;  %v549_v17 = vpack.c.bf16 %v11816_v26, %v547_v13  ;;  %v585_v19 = vunpack.c.l.bf16 %v9581_v57 }
  0x31   : > { %v569_v18 = vsel %vm195_vm0, %v563_v9, %v11845_v1  ;;  %11393 = vmatprep.mubr.bf16.mxu0 %v11682_v59  ;;  %11521 = vmatprep.mubr.bf16.mxu1 %v11683_v0  ;;  %3323 = vst [vmem:[#allocation7 + $0x238] sm:$0xf] %v3321_v11  ;;  %v3363_v22 = vsel %vm195_vm0, %v3357_v10, %v11845_v1  ;;  %v607_v24 = vunpack.c.h.bf16 %v9581_v57  ;;  %v3401_v30 = vunpack.c.l.bf16 %v9709_v15  ;;  %v11687_v44 = vld [vmem:[#allocation7 + $0x220] sm:$0xff]   ;;  %v9717_v10 = vld [vmem:[%s11874_s28 + $0x268] sm:$0xff]   ;;  %v9591_v11 = vld [vmem:[%s11874_s28 + $0x70] sm:$0xff]  }
  0x32   : > { %v571_v21 = vpack.c.bf16 %v11816_v26, %v569_v18  ;;  %v3385_v23 = vsel %vm195_vm0, %v3379_v14, %v11845_v1  ;;  %3345 = vst [vmem:[#allocation7 + $0x23c] sm:$0xf] %v3343_v16  ;;  %551 = vst [vmem:[#allocation7 + $0x40] sm:$0xf] %v549_v17  ;;  %v3365_v27 = vpack.c.bf16 %v11816_v26, %v3363_v22  ;;  %v3423_v35 = vunpack.c.h.bf16 %v9709_v15  ;;  %v9719_v16 = vld [vmem:[%s11874_s28 + $0x270] sm:$0xff]   ;;  %v11688_v17 = vld [vmem:[#allocation7 + $0x28] sm:$0xff]  }
  0x33   : > { %v3387_v28 = vpack.c.bf16 %v11816_v26, %v3385_v23  ;;  %v591_v29 = vsel %vm195_vm0, %v585_v19, %v11845_v1  ;;  %v613_v34 = vsel %vm195_vm0, %v607_v24, %v11845_v1  ;;  %v629_v36 = vunpack.c.l.bf16 %v9583_v20  ;;  %v11689_v18 = vld [vmem:[#allocation7 + $0x228] sm:$0xff]  }
  0x34   : > { %573 = vst [vmem:[#allocation7 + $0x44] sm:$0xf] %v571_v21  ;;  %v593_v33 = vpack.c.bf16 %v11816_v26, %v591_v29  ;;  %3367 = vst [vmem:[#allocation7 + $0x240] sm:$0xf] %v3365_v27  ;;  %v615_v40 = vpack.c.bf16 %v11816_v26, %v613_v34  ;;  %v3407_v41 = vsel %vm195_vm0, %v3401_v30, %v11845_v1  ;;  %v651_v42 = vunpack.c.h.bf16 %v9583_v20 }
  0x35   : > { %3389 = vst [vmem:[#allocation7 + $0x244] sm:$0xf] %v3387_v28  ;;  %v3445_v43 = vunpack.c.l.bf16 %v9711_v25  ;;  %v3409_v45 = vpack.c.bf16 %v11816_v26, %v3407_v41  ;;  %v3429_v46 = vsel %vm195_vm0, %v3423_v35, %v11845_v1  ;;  %v635_v47 = vsel %vm195_vm0, %v629_v36, %v11845_v1  ;;  %v11690_v23 = vld [vmem:[#allocation7 + $0x30] sm:$0xff]  }
  0x36   : > { %595 = vst [vmem:[#allocation7 + $0x48] sm:$0xf] %v593_v33  ;;  %v3467_v48 = vunpack.c.h.bf16 %v9711_v25  ;;  %617 = vst [vmem:[#allocation7 + $0x4c] sm:$0xf] %v615_v40  ;;  %v3431_v49 = vpack.c.bf16 %v11816_v26, %v3429_v46  ;;  %v637_v50 = vpack.c.bf16 %v11816_v26, %v635_v47  ;;  %v657_v51 = vsel %vm195_vm0, %v651_v42, %v11845_v1  ;;  %v11691_v24 = vld [vmem:[#allocation7 + $0x230] sm:$0xff]   ;;  %v9593_v42 = vld [vmem:[%s11874_s28 + $0x78] sm:$0xff]  }
  0x37   : > { %v3451_v52 = vsel %vm195_vm0, %v3445_v43, %v11845_v1  ;;  %3411 = vst [vmem:[#allocation7 + $0x248] sm:$0xf] %v3409_v45  ;;  %v659_v55 = vpack.c.bf16 %v11816_v26, %v657_v51  ;;  %v673_v58 = vunpack.c.l.bf16 %v9585_v31  ;;  %v695_v60 = vunpack.c.h.bf16 %v9585_v31  ;;  %v9721_v47 = vld [vmem:[%s11874_s28 + $0x278] sm:$0xff]  }
  0x38   : > { %v3453_v56 = vpack.c.bf16 %v11816_v26, %v3451_v52  ;;  %v3473_v57 = vsel %vm195_vm0, %v3467_v48, %v11845_v1  ;;  %11394 = vmatmul.mubr.bf16.gmra.mrb[4].mxu0 %v11684_v32  ;;  %11522 = vmatmul.mubr.bf16.gmra.mrb[4].mxu1 %v11685_v38  ;;  %3433 = vst [vmem:[#allocation7 + $0x24c] sm:$0xf] %v3431_v49  ;;  %639 = vst [vmem:[#allocation7 + $0x50] sm:$0xf] %v637_v50  ;;  %v3489_v61 = vunpack.c.l.bf16 %v9713_v37  ;;  %v9595_v52 = vld [vmem:[%s11874_s28 + $0x80] sm:$0xff]  }
  0x39   : > { %v3475_v59 = vpack.c.bf16 %v11816_v26, %v3473_v57  ;;  %v3511_v62 = vunpack.c.h.bf16 %v9713_v37  ;;  %11397 = vmatprep.mubr.bf16.mxu0 %v11686_v39  ;;  %11525 = vmatprep.mubr.bf16.mxu1 %v11687_v44  ;;  %661 = vst [vmem:[#allocation7 + $0x54] sm:$0xf] %v659_v55  ;;  %v679_v63 = vsel %vm195_vm0, %v673_v58, %v11845_v1  ;;  %v717_v0 = vunpack.c.l.bf16 %v9587_v53  ;;  %v11693_v55 = vld [vmem:[#allocation7 + $0x238] sm:$0xff]  }
  0x3a   : > { %3455 = vst [vmem:[#allocation7 + $0x250] sm:$0xf] %v3453_v56  ;;  %v739_v2 = vunpack.c.h.bf16 %v9587_v53  ;;  %v3533_v3 = vunpack.c.l.bf16 %v9715_v54  ;;  %v681_v5 = vpack.c.bf16 %v11816_v26, %v679_v63  ;;  %v701_v7 = vsel %vm195_vm0, %v695_v60, %v11845_v1  ;;  %v9723_v53 = vld [vmem:[%s11874_s28 + $0x280] sm:$0xff]  }
  0x3b   : > { %3477 = vst [vmem:[#allocation7 + $0x254] sm:$0xf] %v3475_v59  ;;  %v3495_v8 = vsel %vm195_vm0, %v3489_v61, %v11845_v1  ;;  %v3517_v9 = vsel %vm195_vm0, %v3511_v62, %v11845_v1  ;;  %v703_v12 = vpack.c.bf16 %v11816_v26, %v701_v7  ;;  %v723_v15 = vsel %vm195_vm0, %v717_v0, %v11845_v1  ;;  %v11694_v60 = vld [vmem:[#allocation7 + $0x40] sm:$0xff]  }
  0x3c   : > { %v3497_v13 = vpack.c.bf16 %v11816_v26, %v3495_v8  ;;  %v3519_v14 = vpack.c.bf16 %v11816_v26, %v3517_v9  ;;  %683 = vst [vmem:[#allocation7 + $0x58] sm:$0xf] %v681_v5  ;;  %v725_v19 = vpack.c.bf16 %v11816_v26, %v723_v15  ;;  %v745_v20 = vsel %vm195_vm0, %v739_v2, %v11845_v1  ;;  %v11695_v2 = vld [vmem:[#allocation7 + $0x240] sm:$0xff]  }
  0x3d   : > { %v3539_v21 = vsel %vm195_vm0, %v3533_v3, %v11845_v1  ;;  %v3555_v22 = vunpack.c.h.bf16 %v9715_v54  ;;  %705 = vst [vmem:[#allocation7 + $0x5c] sm:$0xf] %v703_v12  ;;  %v747_v25 = vpack.c.bf16 %v11816_v26, %v745_v20  ;;  %v761_v28 = vunpack.c.l.bf16 %v9589_v4  ;;  %v11692_v54 = vld [vmem:[#allocation7 + $0x38] sm:$0xff]   ;;  %v9597_v12 = vld [vmem:[%s11874_s28 + $0x88] sm:$0xff]  }
  0x3e   : > { %3499 = vst [vmem:[#allocation7 + $0x258] sm:$0xf] %v3497_v13  ;;  %3521 = vst [vmem:[#allocation7 + $0x25c] sm:$0xf] %v3519_v14  ;;  %v3541_v27 = vpack.c.bf16 %v11816_v26, %v3539_v21  ;;  %v783_v29 = vunpack.c.h.bf16 %v9589_v4  ;;  %v3577_v31 = vunpack.c.l.bf16 %v9717_v10  ;;  %v3599_v32 = vunpack.c.h.bf16 %v9717_v10 }
  0x3f   : > { %727 = vst [vmem:[#allocation7 + $0x60] sm:$0xf] %v725_v19  ;;  %v3561_v30 = vsel %vm195_vm0, %v3555_v22, %v11845_v1  ;;  %v805_v33 = vunpack.c.l.bf16 %v9591_v11  ;;  %749 = vst [vmem:[#allocation7 + $0x64] sm:$0xf] %v747_v25  ;;  %v767_v35 = vsel %vm195_vm0, %v761_v28, %v11845_v1  ;;  %v827_v37 = vunpack.c.h.bf16 %v9591_v11  ;;  %v9727_v28 = vld [vmem:[%s11874_s28 + $0x290] sm:$0xff]  }
  0x40   : > { %3543 = vst [vmem:[#allocation7 + $0x260] sm:$0xf] %v3541_v27  ;;  %v3563_v34 = vpack.c.bf16 %v11816_v26, %v3561_v30  ;;  %v789_v36 = vsel %vm195_vm0, %v783_v29, %v11845_v1  ;;  %11398 = vmatmul.mubr.bf16.gmra.mrb[8].mxu0 %v11688_v17  ;;  %11526 = vmatmul.mubr.bf16.gmra.mrb[8].mxu1 %v11689_v18  ;;  %v3621_v41 = vunpack.c.l.bf16 %v9719_v16  ;;  %v3643_v46 = vunpack.c.h.bf16 %v9719_v16  ;;  %v9725_v17 = vld [vmem:[%s11874_s28 + $0x288] sm:$0xff]   ;;  %v9599_v18 = vld [vmem:[%s11874_s28 + $0x90] sm:$0xff]  }
  0x41   : > { %v769_v38 = vpack.c.bf16 %v11816_v26, %v767_v35  ;;  %v791_v39 = vpack.c.bf16 %v11816_v26, %v789_v36  ;;  %v3583_v40 = vsel %vm195_vm0, %v3577_v31, %v11845_v1  ;;  %11401 = vmatprep.mubr.bf16.mxu0 %v11690_v23  ;;  %11529 = vmatprep.mubr.bf16.mxu1 %v11691_v24  ;;  %v849_v59 = vunpack.c.l.bf16 %v9593_v42  ;;  %v11696_v35 = vld [vmem:[#allocation7 + $0x48] sm:$0xff]  }
  0x42   : > { %3565 = vst [vmem:[#allocation7 + $0x264] sm:$0xf] %v3563_v34  ;;  %v3585_v43 = vpack.c.bf16 %v11816_v26, %v3583_v40  ;;  %v3605_v44 = vsel %vm195_vm0, %v3599_v32, %v11845_v1  ;;  %v811_v45 = vsel %vm195_vm0, %v805_v33, %v11845_v1  ;;  %v833_v50 = vsel %vm195_vm0, %v827_v37, %v11845_v1  ;;  %v9601_v33 = vld [vmem:[%s11874_s28 + $0x98] sm:$0xff]   ;;  %v9603_v40 = vld [vmem:[%s11874_s28 + $0xa0] sm:$0xff]  }
  0x43   : > { %771 = vst [vmem:[#allocation7 + $0x68] sm:$0xf] %v769_v38  ;;  %793 = vst [vmem:[#allocation7 + $0x6c] sm:$0xf] %v791_v39  ;;  %v3607_v48 = vpack.c.bf16 %v11816_v26, %v3605_v44  ;;  %v813_v49 = vpack.c.bf16 %v11816_v26, %v811_v45  ;;  %v3627_v51 = vsel %vm195_vm0, %v3621_v41, %v11845_v1  ;;  %v871_v62 = vunpack.c.h.bf16 %v9593_v42  ;;  %v9729_v34 = vld [vmem:[%s11874_s28 + $0x298] sm:$0xff]   ;;  %v11697_v41 = vld [vmem:[#allocation7 + $0x248] sm:$0xff]  }
  0x44   : > { %3587 = vst [vmem:[#allocation7 + $0x268] sm:$0xf] %v3585_v43  ;;  %v835_v56 = vpack.c.bf16 %v11816_v26, %v833_v50  ;;  %v3629_v57 = vpack.c.bf16 %v11816_v26, %v3627_v51  ;;  %v3649_v58 = vsel %vm195_vm0, %v3643_v46, %v11845_v1  ;;  %v3665_v63 = vunpack.c.l.bf16 %v9721_v47  ;;  %v11698_v46 = vld [vmem:[#allocation7 + $0x50] sm:$0xff]  }
  0x45   : > { %3609 = vst [vmem:[#allocation7 + $0x26c] sm:$0xf] %v3607_v48  ;;  %815 = vst [vmem:[#allocation7 + $0x70] sm:$0xf] %v813_v49  ;;  %v3651_v61 = vpack.c.bf16 %v11816_v26, %v3649_v58  ;;  %v3687_v0 = vunpack.c.h.bf16 %v9721_v47  ;;  %v855_v3 = vsel %vm195_vm0, %v849_v59, %v11845_v1  ;;  %v893_v4 = vunpack.c.l.bf16 %v9595_v52  ;;  %v11699_v47 = vld [vmem:[#allocation7 + $0x250] sm:$0xff]  }
  0x46   : > { %837 = vst [vmem:[#allocation7 + $0x74] sm:$0xf] %v835_v56  ;;  %3631 = vst [vmem:[#allocation7 + $0x270] sm:$0xf] %v3629_v57  ;;  %v915_v5 = vunpack.c.h.bf16 %v9595_v52  ;;  %v3709_v7 = vunpack.c.l.bf16 %v9723_v53  ;;  %v857_v8 = vpack.c.bf16 %v11816_v26, %v855_v3  ;;  %v877_v9 = vsel %vm195_vm0, %v871_v62, %v11845_v1  ;;  %v9731_v56 = vld [vmem:[%s11874_s28 + $0x2a0] sm:$0xff]  }
  0x47   : > { %3653 = vst [vmem:[#allocation7 + $0x274] sm:$0xf] %v3651_v61  ;;  %v3671_v10 = vsel %vm195_vm0, %v3665_v63, %v11845_v1  ;;  %v3693_v11 = vsel %vm195_vm0, %v3687_v0, %v11845_v1  ;;  %v879_v13 = vpack.c.bf16 %v11816_v26, %v877_v9  ;;  %v899_v16 = vsel %vm195_vm0, %v893_v4, %v11845_v1 }
  0x48   : > { %v3673_v14 = vpack.c.bf16 %v11816_v26, %v3671_v10  ;;  %v3695_v15 = vpack.c.bf16 %v11816_v26, %v3693_v11  ;;  %11402 = vmatmul.mubr.bf16.gmra.mrb[12].mxu0 %v11692_v54  ;;  %11530 = vmatmul.mubr.bf16.gmra.mrb[12].mxu1 %v11693_v55  ;;  %859 = vst [vmem:[#allocation7 + $0x78] sm:$0xf] %v857_v8  ;;  %v3731_v22 = vunpack.c.h.bf16 %v9723_v53  ;;  %v937_v25 = vunpack.c.l.bf16 %v9597_v12 }
  0x49   : > { %v901_v19 = vpack.c.bf16 %v11816_v26, %v899_v16  ;;  %v921_v20 = vsel %vm195_vm0, %v915_v5, %v11845_v1  ;;  %v3715_v21 = vsel %vm195_vm0, %v3709_v7, %v11845_v1  ;;  %11405 = vmatprep.mubr.bf16.mxu0 %v11694_v60  ;;  %11533 = vmatprep.mubr.bf16.mxu1 %v11695_v2  ;;  %v959_v27 = vunpack.c.h.bf16 %v9597_v12  ;;  %v9605_v7 = vld [vmem:[%s11874_s28 + $0xa8] sm:$0xff]  }
  0x4a   : > { %881 = vst [vmem:[#allocation7 + $0x7c] sm:$0xf] %v879_v13  ;;  %3675 = vst [vmem:[#allocation7 + $0x278] sm:$0xf] %v3673_v14  ;;  %v923_v23 = vpack.c.bf16 %v11816_v26, %v921_v20  ;;  %v3717_v24 = vpack.c.bf16 %v11816_v26, %v3715_v21  ;;  %v3737_v29 = vsel %vm195_vm0, %v3731_v22, %v11845_v1  ;;  %v3753_v30 = vunpack.c.l.bf16 %v9725_v17  ;;  %v9733_v12 = vld [vmem:[%s11874_s28 + $0x2a8] sm:$0xff]   ;;  %v11700_v13 = vld [vmem:[#allocation7 + $0x58] sm:$0xff]  }
  0x4b   : > { %3697 = vst [vmem:[#allocation7 + $0x27c] sm:$0xf] %v3695_v15  ;;  %903 = vst [vmem:[#allocation7 + $0x80] sm:$0xf] %v901_v19  ;;  %v3775_v31 = vunpack.c.h.bf16 %v9725_v17  ;;  %v981_v32 = vunpack.c.l.bf16 %v9599_v18  ;;  %v3739_v36 = vpack.c.bf16 %v11816_v26, %v3737_v29  ;;  %v943_v37 = vsel %vm195_vm0, %v937_v25, %v11845_v1  ;;  %v9735_v19 = vld [vmem:[%s11874_s28 + $0x2b0] sm:$0xff]   ;;  %v11701_v20 = vld [vmem:[#allocation7 + $0x258] sm:$0xff]  }
  0x4c   : > { %925 = vst [vmem:[#allocation7 + $0x84] sm:$0xf] %v923_v23  ;;  %3719 = vst [vmem:[#allocation7 + $0x280] sm:$0xf] %v3717_v24  ;;  %v965_v38 = vsel %vm195_vm0, %v959_v27, %v11845_v1  ;;  %v1003_v39 = vunpack.c.h.bf16 %v9599_v18  ;;  %v945_v42 = vpack.c.bf16 %v11816_v26, %v943_v37  ;;  %v3759_v44 = vsel %vm195_vm0, %v3753_v30, %v11845_v1  ;;  %v9607_v18 = vld [vmem:[%s11874_s28 + $0xb0] sm:$0xff]   ;;  %v11702_v21 = vld [vmem:[#allocation7 + $0x60] sm:$0xff]  }
  0x4d   : > { %v967_v43 = vpack.c.bf16 %v11816_v26, %v965_v38  ;;  %v3781_v45 = vsel %vm195_vm0, %v3775_v31, %v11845_v1  ;;  %3741 = vst [vmem:[#allocation7 + $0x284] sm:$0xf] %v3739_v36  ;;  %v3761_v48 = vpack.c.bf16 %v11816_v26, %v3759_v44  ;;  %v987_v50 = vsel %vm195_vm0, %v981_v32, %v11845_v1  ;;  %v11703_v27 = vld [vmem:[#allocation7 + $0x260] sm:$0xff]   ;;  %v9609_v44 = vld [vmem:[%s11874_s28 + $0xb8] sm:$0xff]  }
  0x4e   : > { %v3783_v49 = vpack.c.bf16 %v11816_v26, %v3781_v45  ;;  %v1009_v51 = vsel %vm195_vm0, %v1003_v39, %v11845_v1  ;;  %947 = vst [vmem:[#allocation7 + $0x88] sm:$0xf] %v945_v42  ;;  %v989_v52 = vpack.c.bf16 %v11816_v26, %v987_v50  ;;  %v3797_v54 = vunpack.c.l.bf16 %v9727_v28  ;;  %v9611_v50 = vld [vmem:[%s11874_s28 + $0xc0] sm:$0xff]  }
  0x4f   : > { %969 = vst [vmem:[#allocation7 + $0x8c] sm:$0xf] %v967_v43  ;;  %v1011_v53 = vpack.c.bf16 %v11816_v26, %v1009_v51  ;;  %v3819_v55 = vunpack.c.h.bf16 %v9727_v28  ;;  %3763 = vst [vmem:[#allocation7 + $0x288] sm:$0xf] %v3761_v48  ;;  %v1025_v57 = vunpack.c.l.bf16 %v9601_v33  ;;  %v1047_v58 = vunpack.c.h.bf16 %v9601_v33 }
  0x50   : > { %3785 = vst [vmem:[#allocation7 + $0x28c] sm:$0xf] %v3783_v49  ;;  %v3841_v59 = vunpack.c.l.bf16 %v9729_v34  ;;  %v3863_v60 = vunpack.c.h.bf16 %v9729_v34  ;;  %11406 = vmatmul.mubr.bf16.gmra.mrb[16].mxu0 %v11696_v35  ;;  %11534 = vmatmul.mubr.bf16.gmra.mrb[16].mxu1 %v11697_v41  ;;  %991 = vst [vmem:[#allocation7 + $0x90] sm:$0xf] %v989_v52  ;;  %v3803_v61 = vsel %vm195_vm0, %v3797_v54, %v11845_v1  ;;  %v1069_v63 = vunpack.c.l.bf16 %v9603_v40  ;;  %v9737_v49 = vld [vmem:[%s11874_s28 + $0x2b8] sm:$0xff]  }
  0x51   : > { %1013 = vst [vmem:[#allocation7 + $0x94] sm:$0xf] %v1011_v53  ;;  %v3825_v62 = vsel %vm195_vm0, %v3819_v55, %v11845_v1  ;;  %v1091_v0 = vunpack.c.h.bf16 %v9603_v40  ;;  %11409 = vmatprep.mubr.bf16.mxu0 %v11698_v46  ;;  %11537 = vmatprep.mubr.bf16.mxu1 %v11699_v47  ;;  %v3805_v2 = vpack.c.bf16 %v11816_v26, %v3803_v61  ;;  %v3885_v5 = vunpack.c.l.bf16 %v9731_v56  ;;  %v9739_v55 = vld [vmem:[%s11874_s28 + $0x2c0] sm:$0xff]  }
  0x52   : > { %v3827_v3 = vpack.c.bf16 %v11816_v26, %v3825_v62  ;;  %v1031_v4 = vsel %vm195_vm0, %v1025_v57, %v11845_v1  ;;  %v1053_v9 = vsel %vm195_vm0, %v1047_v58, %v11845_v1  ;;  %v3847_v10 = vsel %vm195_vm0, %v3841_v59, %v11845_v1  ;;  %v11705_v57 = vld [vmem:[#allocation7 + $0x268] sm:$0xff]   ;;  %v11706_v62 = vld [vmem:[#allocation7 + $0x70] sm:$0xff]  }
  0x53   : > { %v1033_v8 = vpack.c.bf16 %v11816_v26, %v1031_v4  ;;  %v3869_v11 = vsel %vm195_vm0, %v3863_v60, %v11845_v1  ;;  %3807 = vst [vmem:[#allocation7 + $0x290] sm:$0xf] %v3805_v2  ;;  %v1055_v14 = vpack.c.bf16 %v11816_v26, %v1053_v9  ;;  %v3849_v15 = vpack.c.bf16 %v11816_v26, %v3847_v10  ;;  %v11707_v4 = vld [vmem:[#allocation7 + $0x270] sm:$0xff]  }
  0x54   : > { %3829 = vst [vmem:[#allocation7 + $0x294] sm:$0xf] %v3827_v3  ;;  %v3871_v16 = vpack.c.bf16 %v11816_v26, %v3869_v11  ;;  %v1075_v17 = vsel %vm195_vm0, %v1069_v63, %v11845_v1  ;;  %v1097_v23 = vsel %vm195_vm0, %v1091_v0, %v11845_v1  ;;  %v3891_v24 = vsel %vm195_vm0, %v3885_v5, %v11845_v1 }
  0x55   : > { %1035 = vst [vmem:[#allocation7 + $0x98] sm:$0xf] %v1033_v8  ;;  %v1077_v22 = vpack.c.bf16 %v11816_v26, %v1075_v17  ;;  %v3907_v25 = vunpack.c.h.bf16 %v9731_v56  ;;  %1057 = vst [vmem:[#allocation7 + $0x9c] sm:$0xf] %v1055_v14  ;;  %v1099_v28 = vpack.c.bf16 %v11816_v26, %v1097_v23  ;;  %v3893_v29 = vpack.c.bf16 %v11816_v26, %v3891_v24  ;;  %v11704_v56 = vld [vmem:[#allocation7 + $0x68] sm:$0xff]  }
  0x56   : > { %3851 = vst [vmem:[#allocation7 + $0x298] sm:$0xf] %v3849_v15  ;;  %3873 = vst [vmem:[#allocation7 + $0x29c] sm:$0xf] %v3871_v16  ;;  %v1113_v30 = vunpack.c.l.bf16 %v9605_v7  ;;  %v1135_v31 = vunpack.c.h.bf16 %v9605_v7  ;;  %v3929_v33 = vunpack.c.l.bf16 %v9733_v12  ;;  %v3951_v34 = vunpack.c.h.bf16 %v9733_v12  ;;  %v9613_v14 = vld [vmem:[%s11874_s28 + $0xc8] sm:$0xff]  }
  0x57   : > { %1079 = vst [vmem:[#allocation7 + $0xa0] sm:$0xf] %v1077_v22  ;;  %v3913_v32 = vsel %vm195_vm0, %v3907_v25, %v11845_v1  ;;  %v1157_v35 = vunpack.c.l.bf16 %v9607_v18  ;;  %1101 = vst [vmem:[#allocation7 + $0xa4] sm:$0xf] %v1099_v28  ;;  %v1179_v39 = vunpack.c.h.bf16 %v9607_v18  ;;  %v3973_v43 = vunpack.c.l.bf16 %v9735_v19 }
  0x58   : > { %3895 = vst [vmem:[#allocation7 + $0x2a0] sm:$0xf] %v3893_v29  ;;  %v3915_v36 = vpack.c.bf16 %v11816_v26, %v3913_v32  ;;  %v1119_v37 = vsel %vm195_vm0, %v1113_v30, %v11845_v1  ;;  %v1141_v38 = vsel %vm195_vm0, %v1135_v31, %v11845_v1  ;;  %11410 = vmatmul.mubr.bf16.gmra.mrb[20].mxu0 %v11700_v13  ;;  %v3995_v48 = vunpack.c.h.bf16 %v9735_v19  ;;  %v9741_v19 = vld [vmem:[%s11874_s28 + $0x2c8] sm:$0xff]   ;;  %v9743_v30 = vld [vmem:[%s11874_s28 + $0x2d0] sm:$0xff]  }
  0x59   : > { %11538 = vmatmul.mubr.bf16.gmra.mrb[20].mxu1 %v11701_v20  ;;  %v1121_v40 = vpack.c.bf16 %v11816_v26, %v1119_v37  ;;  %v1143_v41 = vpack.c.bf16 %v11816_v26, %v1141_v38  ;;  %v3935_v42 = vsel %vm195_vm0, %v3929_v33, %v11845_v1  ;;  %11413 = vmatprep.mubr.bf16.mxu0 %v11702_v21  ;;  %v1201_v61 = vunpack.c.l.bf16 %v9609_v44  ;;  %v9615_v20 = vld [vmem:[%s11874_s28 + $0xd0] sm:$0xff]   ;;  %v11708_v37 = vld [vmem:[#allocation7 + $0x78] sm:$0xff]  }
  0x5a   : > { %11541 = vmatprep.mubr.bf16.mxu1 %v11703_v27  ;;  %3917 = vst [vmem:[#allocation7 + $0x2a4] sm:$0xf] %v3915_v36  ;;  %v3937_v45 = vpack.c.bf16 %v11816_v26, %v3935_v42  ;;  %v3957_v46 = vsel %vm195_vm0, %v3951_v34, %v11845_v1  ;;  %v1163_v47 = vsel %vm195_vm0, %v1157_v35, %v11845_v1  ;;  %v1223_v0 = vunpack.c.h.bf16 %v9609_v44  ;;  %v9617_v35 = vld [vmem:[%s11874_s28 + $0xd8] sm:$0xff]   ;;  %v9619_v42 = vld [vmem:[%s11874_s28 + $0xe0] sm:$0xff]  }
  0x5b   : > { %1123 = vst [vmem:[#allocation7 + $0xa8] sm:$0xf] %v1121_v40  ;;  %1145 = vst [vmem:[#allocation7 + $0xac] sm:$0xf] %v1143_v41  ;;  %v3959_v51 = vpack.c.bf16 %v11816_v26, %v3957_v46  ;;  %v1165_v52 = vpack.c.bf16 %v11816_v26, %v1163_v47  ;;  %v1185_v53 = vsel %vm195_vm0, %v1179_v39, %v11845_v1  ;;  %v4017_v2 = vunpack.c.l.bf16 %v9737_v49  ;;  %v9745_v36 = vld [vmem:[%s11874_s28 + $0x2d8] sm:$0xff]  }
  0x5c   : > { %v3979_v54 = vsel %vm195_vm0, %v3973_v43, %v11845_v1  ;;  %3939 = vst [vmem:[#allocation7 + $0x2a8] sm:$0xf] %v3937_v45  ;;  %v1187_v58 = vpack.c.bf16 %v11816_v26, %v1185_v53  ;;  %v4001_v60 = vsel %vm195_vm0, %v3995_v48, %v11845_v1  ;;  %v4039_v3 = vunpack.c.h.bf16 %v9737_v49  ;;  %v11709_v43 = vld [vmem:[#allocation7 + $0x278] sm:$0xff]   ;;  %v11710_v48 = vld [vmem:[#allocation7 + $0x80] sm:$0xff]  }
  0x5d   : > { %v3981_v59 = vpack.c.bf16 %v11816_v26, %v3979_v54  ;;  %3961 = vst [vmem:[#allocation7 + $0x2ac] sm:$0xf] %v3959_v51  ;;  %1167 = vst [vmem:[#allocation7 + $0xb0] sm:$0xf] %v1165_v52  ;;  %v4003_v63 = vpack.c.bf16 %v11816_v26, %v4001_v60  ;;  %v1207_v5 = vsel %vm195_vm0, %v1201_v61, %v11845_v1  ;;  %v1245_v7 = vunpack.c.l.bf16 %v9611_v50  ;;  %v11711_v49 = vld [vmem:[#allocation7 + $0x280] sm:$0xff]  }
  0x5e   : > { %1189 = vst [vmem:[#allocation7 + $0xb4] sm:$0xf] %v1187_v58  ;;  %v1267_v8 = vunpack.c.h.bf16 %v9611_v50  ;;  %v4061_v9 = vunpack.c.l.bf16 %v9739_v55  ;;  %v1209_v10 = vpack.c.bf16 %v11816_v26, %v1207_v5  ;;  %v1229_v11 = vsel %vm195_vm0, %v1223_v0, %v11845_v1  ;;  %v9747_v58 = vld [vmem:[%s11874_s28 + $0x2e0] sm:$0xff]  }
  0x5f   : > { %3983 = vst [vmem:[#allocation7 + $0x2b0] sm:$0xf] %v3981_v59  ;;  %4005 = vst [vmem:[#allocation7 + $0x2b4] sm:$0xf] %v4003_v63  ;;  %v4023_v12 = vsel %vm195_vm0, %v4017_v2, %v11845_v1  ;;  %v4045_v13 = vsel %vm195_vm0, %v4039_v3, %v11845_v1  ;;  %v1231_v15 = vpack.c.bf16 %v11816_v26, %v1229_v11  ;;  %v4083_v24 = vunpack.c.h.bf16 %v9739_v55 }
  0x60   : > { %v4025_v16 = vpack.c.bf16 %v11816_v26, %v4023_v12  ;;  %v4047_v17 = vpack.c.bf16 %v11816_v26, %v4045_v13  ;;  %v1251_v18 = vsel %vm195_vm0, %v1245_v7, %v11845_v1  ;;  %11414 = vmatmul.mubr.bf16.gmra.mrb[24].mxu0 %v11704_v56  ;;  %1211 = vst [vmem:[#allocation7 + $0xb8] sm:$0xf] %v1209_v10  ;;  %v1289_v28 = vunpack.c.l.bf16 %v9613_v14 }
  0x61   : > { %11542 = vmatmul.mubr.bf16.gmra.mrb[24].mxu1 %v11705_v57  ;;  %v1253_v21 = vpack.c.bf16 %v11816_v26, %v1251_v18  ;;  %v1273_v22 = vsel %vm195_vm0, %v1267_v8, %v11845_v1  ;;  %v4067_v23 = vsel %vm195_vm0, %v4061_v9, %v11845_v1  ;;  %11417 = vmatprep.mubr.bf16.mxu0 %v11706_v62  ;;  %v1311_v29 = vunpack.c.h.bf16 %v9613_v14  ;;  %v9621_v9 = vld [vmem:[%s11874_s28 + $0xe8] sm:$0xff]  }
  0x62   : > { %11545 = vmatprep.mubr.bf16.mxu1 %v11707_v4  ;;  %1233 = vst [vmem:[#allocation7 + $0xbc] sm:$0xf] %v1231_v15  ;;  %4027 = vst [vmem:[#allocation7 + $0x2b8] sm:$0xf] %v4025_v16  ;;  %v1275_v25 = vpack.c.bf16 %v11816_v26, %v1273_v22  ;;  %v4069_v27 = vpack.c.bf16 %v11816_v26, %v4067_v23  ;;  %v4089_v31 = vsel %vm195_vm0, %v4083_v24, %v11845_v1  ;;  %v9749_v14 = vld [vmem:[%s11874_s28 + $0x2e8] sm:$0xff]   ;;  %v11714_v23 = vld [vmem:[#allocation7 + $0x90] sm:$0xff]  }
  0x63   : > { %4049 = vst [vmem:[#allocation7 + $0x2bc] sm:$0xf] %v4047_v17  ;;  %1255 = vst [vmem:[#allocation7 + $0xc0] sm:$0xf] %v1253_v21  ;;  %v4105_v32 = vunpack.c.l.bf16 %v9741_v19  ;;  %v4127_v33 = vunpack.c.h.bf16 %v9741_v19  ;;  %v1333_v34 = vunpack.c.l.bf16 %v9615_v20  ;;  %v4091_v38 = vpack.c.bf16 %v11816_v26, %v4089_v31  ;;  %v11712_v15 = vld [vmem:[#allocation7 + $0x88] sm:$0xff]   ;;  %v9751_v21 = vld [vmem:[%s11874_s28 + $0x2f0] sm:$0xff]  }
  0x64   : > { %1277 = vst [vmem:[#allocation7 + $0xc4] sm:$0xf] %v1275_v25  ;;  %4071 = vst [vmem:[#allocation7 + $0x2c0] sm:$0xf] %v4069_v27  ;;  %v1295_v39 = vsel %vm195_vm0, %v1289_v28, %v11845_v1  ;;  %v1317_v40 = vsel %vm195_vm0, %v1311_v29, %v11845_v1  ;;  %v1355_v41 = vunpack.c.h.bf16 %v9615_v20  ;;  %v4149_v56 = vunpack.c.l.bf16 %v9743_v30  ;;  %v9623_v20 = vld [vmem:[%s11874_s28 + $0xf0] sm:$0xff]   ;;  %v11713_v22 = vld [vmem:[#allocation7 + $0x288] sm:$0xff]  }
  0x65   : > { %v1297_v44 = vpack.c.bf16 %v11816_v26, %v1295_v39  ;;  %v1319_v45 = vpack.c.bf16 %v11816_v26, %v1317_v40  ;;  %v4111_v46 = vsel %vm195_vm0, %v4105_v32, %v11845_v1  ;;  %v4133_v47 = vsel %vm195_vm0, %v4127_v33, %v11845_v1  ;;  %4093 = vst [vmem:[#allocation7 + $0x2c4] sm:$0xf] %v4091_v38  ;;  %v11715_v29 = vld [vmem:[#allocation7 + $0x290] sm:$0xff]  }
  0x66   : > { %v4113_v50 = vpack.c.bf16 %v11816_v26, %v4111_v46  ;;  %v4135_v51 = vpack.c.bf16 %v11816_v26, %v4133_v47  ;;  %v1339_v52 = vsel %vm195_vm0, %v1333_v34, %v11845_v1  ;;  %v1361_v53 = vsel %vm195_vm0, %v1355_v41, %v11845_v1  ;;  %v9625_v46 = vld [vmem:[%s11874_s28 + $0xf8] sm:$0xff]  }
  0x67   : > { %1299 = vst [vmem:[#allocation7 + $0xc8] sm:$0xf] %v1297_v44  ;;  %1321 = vst [vmem:[#allocation7 + $0xcc] sm:$0xf] %v1319_v45  ;;  %v1341_v54 = vpack.c.bf16 %v11816_v26, %v1339_v52  ;;  %v1363_v55 = vpack.c.bf16 %v11816_v26, %v1361_v53  ;;  %v4171_v57 = vunpack.c.h.bf16 %v9743_v30  ;;  %v1377_v59 = vunpack.c.l.bf16 %v9617_v35  ;;  %v9627_v52 = vld [vmem:[%s11874_s28 + $0x100] sm:$0xff]  }
  0x68   : > { %4115 = vst [vmem:[#allocation7 + $0x2c8] sm:$0xf] %v4113_v50  ;;  %4137 = vst [vmem:[#allocation7 + $0x2cc] sm:$0xf] %v4135_v51  ;;  %v1399_v60 = vunpack.c.h.bf16 %v9617_v35  ;;  %v4193_v61 = vunpack.c.l.bf16 %v9745_v36  ;;  %v4215_v62 = vunpack.c.h.bf16 %v9745_v36  ;;  %11418 = vmatmul.mubr.bf16.gmra.mrb[28].mxu0 %v11708_v37  ;;  %v4155_v63 = vsel %vm195_vm0, %v4149_v56, %v11845_v1  ;;  %v9753_v51 = vld [vmem:[%s11874_s28 + $0x2f8] sm:$0xff]  }
  0x69   : > { %11546 = vmatmul.mubr.bf16.gmra.mrb[28].mxu1 %v11709_v43  ;;  %1343 = vst [vmem:[#allocation7 + $0xd0] sm:$0xf] %v1341_v54  ;;  %1365 = vst [vmem:[#allocation7 + $0xd4] sm:$0xf] %v1363_v55  ;;  %v4177_v0 = vsel %vm195_vm0, %v4171_v57, %v11845_v1  ;;  %v1421_v2 = vunpack.c.l.bf16 %v9619_v42  ;;  %v1443_v3 = vunpack.c.h.bf16 %v9619_v42  ;;  %11421 = vmatprep.mubr.bf16.mxu0 %v11710_v48  ;;  %v4237_v8 = vunpack.c.l.bf16 %v9747_v58  ;;  %v9755_v57 = vld [vmem:[%s11874_s28 + $0x300] sm:$0xff]  }
  0x6a   : > { %11549 = vmatprep.mubr.bf16.mxu1 %v11711_v49  ;;  %v4157_v4 = vpack.c.bf16 %v11816_v26, %v4155_v63  ;;  %v4179_v5 = vpack.c.bf16 %v11816_v26, %v4177_v0  ;;  %v1383_v7 = vsel %vm195_vm0, %v1377_v59, %v11845_v1  ;;  %v1405_v11 = vsel %vm195_vm0, %v1399_v60, %v11845_v1  ;;  %v11717_v59 = vld [vmem:[#allocation7 + $0x298] sm:$0xff]   ;;  %v11718_v0 = vld [vmem:[#allocation7 + $0xa0] sm:$0xff]  }
  0x6b   : > { %v1385_v10 = vpack.c.bf16 %v11816_v26, %v1383_v7  ;;  %v4199_v12 = vsel %vm195_vm0, %v4193_v61, %v11845_v1  ;;  %v4221_v13 = vsel %vm195_vm0, %v4215_v62, %v11845_v1  ;;  %v1407_v16 = vpack.c.bf16 %v11816_v26, %v1405_v11  ;;  %v11719_v7 = vld [vmem:[#allocation7 + $0x2a0] sm:$0xff]  }
  0x6c   : > { %4159 = vst [vmem:[#allocation7 + $0x2d0] sm:$0xf] %v4157_v4  ;;  %4181 = vst [vmem:[#allocation7 + $0x2d4] sm:$0xf] %v4179_v5  ;;  %v4201_v17 = vpack.c.bf16 %v11816_v26, %v4199_v12  ;;  %v4223_v18 = vpack.c.bf16 %v11816_v26, %v4221_v13  ;;  %v1427_v19 = vsel %vm195_vm0, %v1421_v2, %v11845_v1  ;;  %v4259_v28 = vunpack.c.h.bf16 %v9747_v58  ;;  %v11716_v58 = vld [vmem:[#allocation7 + $0x98] sm:$0xff]  }
  0x6d   : > { %1387 = vst [vmem:[#allocation7 + $0xd8] sm:$0xf] %v1385_v10  ;;  %v1429_v24 = vpack.c.bf16 %v11816_v26, %v1427_v19  ;;  %v1449_v25 = vsel %vm195_vm0, %v1443_v3, %v11845_v1  ;;  %v4243_v27 = vsel %vm195_vm0, %v4237_v8, %v11845_v1  ;;  %1409 = vst [vmem:[#allocation7 + $0xdc] sm:$0xf] %v1407_v16  ;;  %v1465_v32 = vunpack.c.l.bf16 %v9621_v9  ;;  %v9629_v16 = vld [vmem:[%s11874_s28 + $0x108] sm:$0xff]  }
  0x6e   : > { %4203 = vst [vmem:[#allocation7 + $0x2d8] sm:$0xf] %v4201_v17  ;;  %4225 = vst [vmem:[#allocation7 + $0x2dc] sm:$0xf] %v4223_v18  ;;  %v1451_v30 = vpack.c.bf16 %v11816_v26, %v1449_v25  ;;  %v4245_v31 = vpack.c.bf16 %v11816_v26, %v4243_v27  ;;  %v1487_v33 = vunpack.c.h.bf16 %v9621_v9  ;;  %v4265_v34 = vsel %vm195_vm0, %v4259_v28, %v11845_v1 }
  0x6f   : > { %1431 = vst [vmem:[#allocation7 + $0xe0] sm:$0xf] %v1429_v24  ;;  %v4281_v35 = vunpack.c.l.bf16 %v9749_v14  ;;  %v4303_v36 = vunpack.c.h.bf16 %v9749_v14  ;;  %v1509_v37 = vunpack.c.l.bf16 %v9623_v20  ;;  %v4267_v38 = vpack.c.bf16 %v11816_v26, %v4265_v34 }
  0x70   : > { %1453 = vst [vmem:[#allocation7 + $0xe4] sm:$0xf] %v1451_v30  ;;  %4247 = vst [vmem:[#allocation7 + $0x2e0] sm:$0xf] %v4245_v31  ;;  %v1471_v39 = vsel %vm195_vm0, %v1465_v32, %v11845_v1  ;;  %v1493_v40 = vsel %vm195_vm0, %v1487_v33, %v11845_v1  ;;  %v1531_v41 = vunpack.c.h.bf16 %v9623_v20  ;;  %11422 = vmatmul.mubr.bf16.gmra.mrb[32].mxu0 %v11712_v15  ;;  %v4325_v45 = vunpack.c.l.bf16 %v9751_v21  ;;  %v9759_v32 = vld [vmem:[%s11874_s28 + $0x310] sm:$0xff]  }
  0x71   : > { %11550 = vmatmul.mubr.bf16.gmra.mrb[32].mxu1 %v11713_v22  ;;  %v1473_v42 = vpack.c.bf16 %v11816_v26, %v1471_v39  ;;  %v1495_v43 = vpack.c.bf16 %v11816_v26, %v1493_v40  ;;  %v4287_v44 = vsel %vm195_vm0, %v4281_v35, %v11845_v1  ;;  %11425 = vmatprep.mubr.bf16.mxu0 %v11714_v23  ;;  %v4347_v50 = vunpack.c.h.bf16 %v9751_v21  ;;  %v9757_v21 = vld [vmem:[%s11874_s28 + $0x308] sm:$0xff]   ;;  %v9631_v22 = vld [vmem:[%s11874_s28 + $0x110] sm:$0xff]  }
  0x72   : > { %11553 = vmatprep.mubr.bf16.mxu1 %v11715_v29  ;;  %4269 = vst [vmem:[#allocation7 + $0x2e4] sm:$0xf] %v4267_v38  ;;  %v4289_v47 = vpack.c.bf16 %v11816_v26, %v4287_v44  ;;  %v4309_v48 = vsel %vm195_vm0, %v4303_v36, %v11845_v1  ;;  %v1515_v49 = vsel %vm195_vm0, %v1509_v37, %v11845_v1  ;;  %v1553_v63 = vunpack.c.l.bf16 %v9625_v46  ;;  %v9633_v37 = vld [vmem:[%s11874_s28 + $0x118] sm:$0xff]   ;;  %v11720_v39 = vld [vmem:[#allocation7 + $0xa8] sm:$0xff]   ;;  %v9635_v44 = vld [vmem:[%s11874_s28 + $0x120] sm:$0xff]  }
  0x73   : > { %1475 = vst [vmem:[#allocation7 + $0xe8] sm:$0xf] %v1473_v42  ;;  %1497 = vst [vmem:[#allocation7 + $0xec] sm:$0xf] %v1495_v43  ;;  %v4311_v53 = vpack.c.bf16 %v11816_v26, %v4309_v48  ;;  %v1517_v54 = vpack.c.bf16 %v11816_v26, %v1515_v49  ;;  %v1537_v55 = vsel %vm195_vm0, %v1531_v41, %v11845_v1  ;;  %v1575_v3 = vunpack.c.h.bf16 %v9625_v46  ;;  %v9761_v38 = vld [vmem:[%s11874_s28 + $0x318] sm:$0xff]  }
  0x74   : > { %v4331_v56 = vsel %vm195_vm0, %v4325_v45, %v11845_v1  ;;  %4291 = vst [vmem:[#allocation7 + $0x2e8] sm:$0xf] %v4289_v47  ;;  %v1539_v60 = vpack.c.bf16 %v11816_v26, %v1537_v55  ;;  %v4353_v62 = vsel %vm195_vm0, %v4347_v50, %v11845_v1  ;;  %v4369_v4 = vunpack.c.l.bf16 %v9753_v51  ;;  %v11721_v45 = vld [vmem:[#allocation7 + $0x2a8] sm:$0xff]   ;;  %v11722_v50 = vld [vmem:[#allocation7 + $0xb0] sm:$0xff]  }
  0x75   : > { %v4333_v61 = vpack.c.bf16 %v11816_v26, %v4331_v56  ;;  %4313 = vst [vmem:[#allocation7 + $0x2ec] sm:$0xf] %v4311_v53  ;;  %1519 = vst [vmem:[#allocation7 + $0xf0] sm:$0xf] %v1517_v54  ;;  %v4355_v2 = vpack.c.bf16 %v11816_v26, %v4353_v62  ;;  %v4391_v5 = vunpack.c.h.bf16 %v9753_v51  ;;  %v1559_v8 = vsel %vm195_vm0, %v1553_v63, %v11845_v1  ;;  %v11723_v51 = vld [vmem:[#allocation7 + $0x2b0] sm:$0xff]  }
  0x76   : > { %1541 = vst [vmem:[#allocation7 + $0xf4] sm:$0xf] %v1539_v60  ;;  %v1597_v9 = vunpack.c.l.bf16 %v9627_v52  ;;  %v1619_v10 = vunpack.c.h.bf16 %v9627_v52  ;;  %v4413_v11 = vunpack.c.l.bf16 %v9755_v57  ;;  %v1561_v12 = vpack.c.bf16 %v11816_v26, %v1559_v8  ;;  %v9763_v60 = vld [vmem:[%s11874_s28 + $0x320] sm:$0xff]  }
  0x77   : > { %4335 = vst [vmem:[#allocation7 + $0x2f0] sm:$0xf] %v4333_v61  ;;  %4357 = vst [vmem:[#allocation7 + $0x2f4] sm:$0xf] %v4355_v2  ;;  %v1581_v13 = vsel %vm195_vm0, %v1575_v3, %v11845_v1  ;;  %v4375_v14 = vsel %vm195_vm0, %v4369_v4, %v11845_v1  ;;  %v4397_v15 = vsel %vm195_vm0, %v4391_v5, %v11845_v1  ;;  %v4435_v27 = vunpack.c.h.bf16 %v9755_v57 }
  0x78   : > { %v1583_v17 = vpack.c.bf16 %v11816_v26, %v1581_v13  ;;  %v4377_v18 = vpack.c.bf16 %v11816_v26, %v4375_v14  ;;  %v4399_v19 = vpack.c.bf16 %v11816_v26, %v4397_v15  ;;  %v1603_v20 = vsel %vm195_vm0, %v1597_v9, %v11845_v1  ;;  %11426 = vmatmul.mubr.bf16.gmra.mrb[36].mxu0 %v11716_v58 }
  0x79   : > { %11554 = vmatmul.mubr.bf16.gmra.mrb[36].mxu1 %v11717_v59  ;;  %1563 = vst [vmem:[#allocation7 + $0xf8] sm:$0xf] %v1561_v12  ;;  %v1605_v23 = vpack.c.bf16 %v11816_v26, %v1603_v20  ;;  %v1625_v24 = vsel %vm195_vm0, %v1619_v10, %v11845_v1  ;;  %v4419_v25 = vsel %vm195_vm0, %v4413_v11, %v11845_v1  ;;  %v1641_v30 = vunpack.c.l.bf16 %v9629_v16  ;;  %v9637_v11 = vld [vmem:[%s11874_s28 + $0x128] sm:$0xff]  }
  0x7a   : > { %11429 = vmatprep.mubr.bf16.mxu0 %v11718_v0  ;;  %11557 = vmatprep.mubr.bf16.mxu1 %v11719_v7  ;;  %1585 = vst [vmem:[#allocation7 + $0xfc] sm:$0xf] %v1583_v17  ;;  %4379 = vst [vmem:[#allocation7 + $0x2f8] sm:$0xf] %v4377_v18  ;;  %v1627_v28 = vpack.c.bf16 %v11816_v26, %v1625_v24  ;;  %v4421_v29 = vpack.c.bf16 %v11816_v26, %v4419_v25  ;;  %v1663_v31 = vunpack.c.h.bf16 %v9629_v16  ;;  %v9765_v16 = vld [vmem:[%s11874_s28 + $0x328] sm:$0xff]   ;;  %v11724_v17 = vld [vmem:[#allocation7 + $0xb8] sm:$0xff]  }
  0x7b   : > { %4401 = vst [vmem:[#allocation7 + $0x2fc] sm:$0xf] %v4399_v19  ;;  %1607 = vst [vmem:[#allocation7 + $0x100] sm:$0xf] %v1605_v23  ;;  %v4441_v33 = vsel %vm195_vm0, %v4435_v27, %v11845_v1  ;;  %v4457_v34 = vunpack.c.l.bf16 %v9757_v21  ;;  %v4479_v35 = vunpack.c.h.bf16 %v9757_v21  ;;  %v1685_v36 = vunpack.c.l.bf16 %v9631_v22  ;;  %v9767_v23 = vld [vmem:[%s11874_s28 + $0x330] sm:$0xff]   ;;  %v11725_v24 = vld [vmem:[#allocation7 + $0x2b8] sm:$0xff]  }
  0x7c   : > { %1629 = vst [vmem:[#allocation7 + $0x104] sm:$0xf] %v1627_v28  ;;  %4423 = vst [vmem:[#allocation7 + $0x300] sm:$0xf] %v4421_v29  ;;  %v4443_v40 = vpack.c.bf16 %v11816_v26, %v4441_v33  ;;  %v1647_v41 = vsel %vm195_vm0, %v1641_v30, %v11845_v1  ;;  %v1669_v42 = vsel %vm195_vm0, %v1663_v31, %v11845_v1  ;;  %v1707_v43 = vunpack.c.h.bf16 %v9631_v22  ;;  %v9639_v22 = vld [vmem:[%s11874_s28 + $0x130] sm:$0xff]   ;;  %v11726_v25 = vld [vmem:[#allocation7 + $0xc0] sm:$0xff]  }
  0x7d   : > { %v1649_v46 = vpack.c.bf16 %v11816_v26, %v1647_v41  ;;  %v1671_v47 = vpack.c.bf16 %v11816_v26, %v1669_v42  ;;  %v4463_v48 = vsel %vm195_vm0, %v4457_v34, %v11845_v1  ;;  %v4485_v49 = vsel %vm195_vm0, %v4479_v35, %v11845_v1  ;;  %v11727_v31 = vld [vmem:[#allocation7 + $0x2c0] sm:$0xff]  }
  0x7e   : > { %4445 = vst [vmem:[#allocation7 + $0x304] sm:$0xf] %v4443_v40  ;;  %v4465_v52 = vpack.c.bf16 %v11816_v26, %v4463_v48  ;;  %v4487_v53 = vpack.c.bf16 %v11816_v26, %v4485_v49  ;;  %v1691_v54 = vsel %vm195_vm0, %v1685_v36, %v11845_v1  ;;  %v1713_v55 = vsel %vm195_vm0, %v1707_v43, %v11845_v1  ;;  %v9641_v48 = vld [vmem:[%s11874_s28 + $0x138] sm:$0xff]  }
  0x7f   : > { %1651 = vst [vmem:[#allocation7 + $0x108] sm:$0xf] %v1649_v46  ;;  %1673 = vst [vmem:[#allocation7 + $0x10c] sm:$0xf] %v1671_v47  ;;  %v1693_v56 = vpack.c.bf16 %v11816_v26, %v1691_v54  ;;  %v1715_v57 = vpack.c.bf16 %v11816_v26, %v1713_v55  ;;  %v4501_v58 = vunpack.c.l.bf16 %v9759_v32  ;;  %v4523_v59 = vunpack.c.h.bf16 %v9759_v32  ;;  %v9643_v54 = vld [vmem:[%s11874_s28 + $0x140] sm:$0xff]  }
  0x80   : > { %4467 = vst [vmem:[#allocation7 + $0x308] sm:$0xf] %v4465_v52  ;;  %4489 = vst [vmem:[#allocation7 + $0x30c] sm:$0xf] %v4487_v53  ;;  %v1729_v61 = vunpack.c.l.bf16 %v9633_v37  ;;  %v1751_v62 = vunpack.c.h.bf16 %v9633_v37  ;;  %v4545_v63 = vunpack.c.l.bf16 %v9761_v38  ;;  %v4567_v0 = vunpack.c.h.bf16 %v9761_v38  ;;  %11430 = vmatmul.mubr.bf16.gmra.mrb[40].mxu0 %v11720_v39  ;;  %v9769_v53 = vld [vmem:[%s11874_s28 + $0x338] sm:$0xff]  }
  0x81   : > { %11558 = vmatmul.mubr.bf16.gmra.mrb[40].mxu1 %v11721_v45  ;;  %1695 = vst [vmem:[#allocation7 + $0x110] sm:$0xf] %v1693_v56  ;;  %1717 = vst [vmem:[#allocation7 + $0x114] sm:$0xf] %v1715_v57  ;;  %v4507_v2 = vsel %vm195_vm0, %v4501_v58, %v11845_v1  ;;  %v4529_v3 = vsel %vm195_vm0, %v4523_v59, %v11845_v1  ;;  %v1773_v4 = vunpack.c.l.bf16 %v9635_v44  ;;  %v1795_v5 = vunpack.c.h.bf16 %v9635_v44  ;;  %v9771_v59 = vld [vmem:[%s11874_s28 + $0x340] sm:$0xff]  }
  0x82   : > { %11433 = vmatprep.mubr.bf16.mxu0 %v11722_v50  ;;  %11561 = vmatprep.mubr.bf16.mxu1 %v11723_v51  ;;  %v4509_v7 = vpack.c.bf16 %v11816_v26, %v4507_v2  ;;  %v4531_v8 = vpack.c.bf16 %v11816_v26, %v4529_v3  ;;  %v1735_v9 = vsel %vm195_vm0, %v1729_v61, %v11845_v1  ;;  %v4589_v10 = vunpack.c.l.bf16 %v9763_v60  ;;  %v11729_v61 = vld [vmem:[#allocation7 + $0x2c8] sm:$0xff]   ;;  %v11730_v3 = vld [vmem:[#allocation7 + $0xd0] sm:$0xff]  }
  0x83   : > { %v1737_v12 = vpack.c.bf16 %v11816_v26, %v1735_v9  ;;  %v1757_v13 = vsel %vm195_vm0, %v1751_v62, %v11845_v1  ;;  %v4551_v14 = vsel %vm195_vm0, %v4545_v63, %v11845_v1  ;;  %v4573_v15 = vsel %vm195_vm0, %v4567_v0, %v11845_v1  ;;  %v11731_v9 = vld [vmem:[#allocation7 + $0x2d0] sm:$0xff]  }
  0x84   : > { %4511 = vst [vmem:[#allocation7 + $0x310] sm:$0xf] %v4509_v7  ;;  %4533 = vst [vmem:[#allocation7 + $0x314] sm:$0xf] %v4531_v8  ;;  %v1759_v18 = vpack.c.bf16 %v11816_v26, %v1757_v13  ;;  %v4553_v19 = vpack.c.bf16 %v11816_v26, %v4551_v14  ;;  %v4575_v20 = vpack.c.bf16 %v11816_v26, %v4573_v15  ;;  %v4611_v30 = vunpack.c.h.bf16 %v9763_v60  ;;  %v11728_v60 = vld [vmem:[#allocation7 + $0xc8] sm:$0xff]  }
  0x85   : > { %v1779_v21 = vsel %vm195_vm0, %v1773_v4, %v11845_v1  ;;  %1739 = vst [vmem:[#allocation7 + $0x118] sm:$0xf] %v1737_v12  ;;  %v1801_v28 = vsel %vm195_vm0, %v1795_v5, %v11845_v1  ;;  %v4595_v29 = vsel %vm195_vm0, %v4589_v10, %v11845_v1  ;;  %v1817_v34 = vunpack.c.l.bf16 %v9637_v11 }
  0x86   : > { %v1781_v27 = vpack.c.bf16 %v11816_v26, %v1779_v21  ;;  %1761 = vst [vmem:[#allocation7 + $0x11c] sm:$0xf] %v1759_v18  ;;  %4555 = vst [vmem:[#allocation7 + $0x318] sm:$0xf] %v4553_v19  ;;  %v1803_v32 = vpack.c.bf16 %v11816_v26, %v1801_v28  ;;  %v4597_v33 = vpack.c.bf16 %v11816_v26, %v4595_v29  ;;  %v1839_v35 = vunpack.c.h.bf16 %v9637_v11  ;;  %v9645_v18 = vld [vmem:[%s11874_s28 + $0x148] sm:$0xff]  }
  0x87   : > { %4577 = vst [vmem:[#allocation7 + $0x31c] sm:$0xf] %v4575_v20  ;;  %v4617_v36 = vsel %vm195_vm0, %v4611_v30, %v11845_v1  ;;  %v4633_v37 = vunpack.c.l.bf16 %v9765_v16  ;;  %v4655_v38 = vunpack.c.h.bf16 %v9765_v16  ;;  %v1861_v39 = vunpack.c.l.bf16 %v9639_v22 }
  0x88   : > { %1783 = vst [vmem:[#allocation7 + $0x120] sm:$0xf] %v1781_v27  ;;  %1805 = vst [vmem:[#allocation7 + $0x124] sm:$0xf] %v1803_v32  ;;  %v4619_v40 = vpack.c.bf16 %v11816_v26, %v4617_v36  ;;  %v1823_v41 = vsel %vm195_vm0, %v1817_v34, %v11845_v1  ;;  %v1845_v42 = vsel %vm195_vm0, %v1839_v35, %v11845_v1  ;;  %v1883_v43 = vunpack.c.h.bf16 %v9639_v22  ;;  %v9775_v34 = vld [vmem:[%s11874_s28 + $0x350] sm:$0xff]  }
  0x89   : > { %4599 = vst [vmem:[#allocation7 + $0x320] sm:$0xf] %v4597_v33  ;;  %11434 = vmatmul.mubr.bf16.gmra.mrb[44].mxu0 %v11724_v17  ;;  %11562 = vmatmul.mubr.bf16.gmra.mrb[44].mxu1 %v11725_v24  ;;  %v1825_v44 = vpack.c.bf16 %v11816_v26, %v1823_v41  ;;  %v1847_v45 = vpack.c.bf16 %v11816_v26, %v1845_v42  ;;  %v4677_v47 = vunpack.c.l.bf16 %v9767_v23  ;;  %v4699_v52 = vunpack.c.h.bf16 %v9767_v23  ;;  %v9773_v23 = vld [vmem:[%s11874_s28 + $0x348] sm:$0xff]   ;;  %v9647_v24 = vld [vmem:[%s11874_s28 + $0x150] sm:$0xff]   ;;  %v11732_v41 = vld [vmem:[#allocation7 + $0xd8] sm:$0xff]  }
  0x8a   : > { %v4639_v46 = vsel %vm195_vm0, %v4633_v37, %v11845_v1  ;;  %11437 = vmatprep.mubr.bf16.mxu0 %v11726_v25  ;;  %11565 = vmatprep.mubr.bf16.mxu1 %v11727_v31  ;;  %4621 = vst [vmem:[#allocation7 + $0x324] sm:$0xf] %v4619_v40  ;;  %v4661_v50 = vsel %vm195_vm0, %v4655_v38, %v11845_v1  ;;  %v1905_v2 = vunpack.c.l.bf16 %v9641_v48  ;;  %v1927_v5 = vunpack.c.h.bf16 %v9641_v48  ;;  %v9777_v40 = vld [vmem:[%s11874_s28 + $0x358] sm:$0xff]  }
  0x8b   : > { %v4641_v49 = vpack.c.bf16 %v11816_v26, %v4639_v46  ;;  %v1867_v51 = vsel %vm195_vm0, %v1861_v39, %v11845_v1  ;;  %1827 = vst [vmem:[#allocation7 + $0x128] sm:$0xf] %v1825_v44  ;;  %1849 = vst [vmem:[#allocation7 + $0x12c] sm:$0xf] %v1847_v45  ;;  %v4663_v55 = vpack.c.bf16 %v11816_v26, %v4661_v50  ;;  %v4721_v7 = vunpack.c.l.bf16 %v9769_v53  ;;  %v9649_v39 = vld [vmem:[%s11874_s28 + $0x158] sm:$0xff]   ;;  %v9651_v46 = vld [vmem:[%s11874_s28 + $0x160] sm:$0xff]  }
  0x8c   : > { %v1869_v56 = vpack.c.bf16 %v11816_v26, %v1867_v51  ;;  %v1889_v57 = vsel %vm195_vm0, %v1883_v43, %v11845_v1  ;;  %v4683_v58 = vsel %vm195_vm0, %v4677_v47, %v11845_v1  ;;  %v4705_v0 = vsel %vm195_vm0, %v4699_v52, %v11845_v1  ;;  %v11733_v47 = vld [vmem:[#allocation7 + $0x2d8] sm:$0xff]   ;;  %v11734_v52 = vld [vmem:[#allocation7 + $0xe0] sm:$0xff]  }
  0x8d   : > { %4643 = vst [vmem:[#allocation7 + $0x328] sm:$0xf] %v4641_v49  ;;  %v1891_v62 = vpack.c.bf16 %v11816_v26, %v1889_v57  ;;  %v4685_v63 = vpack.c.bf16 %v11816_v26, %v4683_v58  ;;  %4665 = vst [vmem:[#allocation7 + $0x32c] sm:$0xf] %v4663_v55  ;;  %v4707_v4 = vpack.c.bf16 %v11816_v26, %v4705_v0  ;;  %v4743_v8 = vunpack.c.h.bf16 %v9769_v53  ;;  %v11735_v53 = vld [vmem:[#allocation7 + $0x2e0] sm:$0xff]  }
  0x8e   : > { %1871 = vst [vmem:[#allocation7 + $0x130] sm:$0xf] %v1869_v56  ;;  %v1911_v10 = vsel %vm195_vm0, %v1905_v2, %v11845_v1  ;;  %v1949_v11 = vunpack.c.l.bf16 %v9643_v54  ;;  %v1971_v12 = vunpack.c.h.bf16 %v9643_v54  ;;  %v4765_v13 = vunpack.c.l.bf16 %v9771_v59 }
  0x8f   : > { %1893 = vst [vmem:[#allocation7 + $0x134] sm:$0xf] %v1891_v62  ;;  %4687 = vst [vmem:[#allocation7 + $0x330] sm:$0xf] %v4685_v63  ;;  %v1913_v14 = vpack.c.bf16 %v11816_v26, %v1911_v10  ;;  %v1933_v15 = vsel %vm195_vm0, %v1927_v5, %v11845_v1  ;;  %v4727_v16 = vsel %vm195_vm0, %v4721_v7, %v11845_v1  ;;  %v4787_v29 = vunpack.c.h.bf16 %v9771_v59  ;;  %v9779_v62 = vld [vmem:[%s11874_s28 + $0x360] sm:$0xff]  }
  0x90   : > { %4709 = vst [vmem:[#allocation7 + $0x334] sm:$0xf] %v4707_v4  ;;  %v4749_v17 = vsel %vm195_vm0, %v4743_v8, %v11845_v1  ;;  %v1935_v19 = vpack.c.bf16 %v11816_v26, %v1933_v15  ;;  %v4729_v20 = vpack.c.bf16 %v11816_v26, %v4727_v16  ;;  %v1955_v22 = vsel %vm195_vm0, %v1949_v11, %v11845_v1 }
  0x91   : > { %v4751_v21 = vpack.c.bf16 %v11816_v26, %v4749_v17  ;;  %11438 = vmatmul.mubr.bf16.gmra.mrb[48].mxu0 %v11728_v60  ;;  %11566 = vmatmul.mubr.bf16.gmra.mrb[48].mxu1 %v11729_v61  ;;  %1915 = vst [vmem:[#allocation7 + $0x138] sm:$0xf] %v1913_v14  ;;  %v1957_v25 = vpack.c.bf16 %v11816_v26, %v1955_v22  ;;  %v1993_v32 = vunpack.c.l.bf16 %v9645_v18  ;;  %v2015_v33 = vunpack.c.h.bf16 %v9645_v18  ;;  %v9781_v18 = vld [vmem:[%s11874_s28 + $0x368] sm:$0xff]  }
  0x92   : > { %v1977_v27 = vsel %vm195_vm0, %v1971_v12, %v11845_v1  ;;  %v4771_v28 = vsel %vm195_vm0, %v4765_v13, %v11845_v1  ;;  %11441 = vmatprep.mubr.bf16.mxu0 %v11730_v3  ;;  %11569 = vmatprep.mubr.bf16.mxu1 %v11731_v9  ;;  %1937 = vst [vmem:[#allocation7 + $0x13c] sm:$0xf] %v1935_v19  ;;  %4731 = vst [vmem:[#allocation7 + $0x338] sm:$0xf] %v4729_v20  ;;  %v4809_v36 = vunpack.c.l.bf16 %v9773_v23  ;;  %v9653_v13 = vld [vmem:[%s11874_s28 + $0x168] sm:$0xff]  }
  0x93   : > { %4753 = vst [vmem:[#allocation7 + $0x33c] sm:$0xf] %v4751_v21  ;;  %v1979_v30 = vpack.c.bf16 %v11816_v26, %v1977_v27  ;;  %v4773_v31 = vpack.c.bf16 %v11816_v26, %v4771_v28  ;;  %1959 = vst [vmem:[#allocation7 + $0x140] sm:$0xf] %v1957_v25  ;;  %v4793_v35 = vsel %vm195_vm0, %v4787_v29, %v11845_v1  ;;  %v4831_v37 = vunpack.c.h.bf16 %v9773_v23  ;;  %v11736_v19 = vld [vmem:[#allocation7 + $0xe8] sm:$0xff]   ;;  %v9783_v25 = vld [vmem:[%s11874_s28 + $0x370] sm:$0xff]  }
  0x94   : > { %v2037_v38 = vunpack.c.l.bf16 %v9647_v24  ;;  %v4795_v42 = vpack.c.bf16 %v11816_v26, %v4793_v35  ;;  %v1999_v43 = vsel %vm195_vm0, %v1993_v32, %v11845_v1  ;;  %v2021_v44 = vsel %vm195_vm0, %v2015_v33, %v11845_v1  ;;  %v11737_v27 = vld [vmem:[#allocation7 + $0x2e8] sm:$0xff]   ;;  %v11738_v28 = vld [vmem:[#allocation7 + $0xf0] sm:$0xff]  }
  0x95   : > { %1981 = vst [vmem:[#allocation7 + $0x144] sm:$0xf] %v1979_v30  ;;  %4775 = vst [vmem:[#allocation7 + $0x340] sm:$0xf] %v4773_v31  ;;  %v2059_v45 = vunpack.c.h.bf16 %v9647_v24  ;;  %v2001_v48 = vpack.c.bf16 %v11816_v26, %v1999_v43  ;;  %v2023_v49 = vpack.c.bf16 %v11816_v26, %v2021_v44  ;;  %v4815_v50 = vsel %vm195_vm0, %v4809_v36, %v11845_v1  ;;  %v9655_v24 = vld [vmem:[%s11874_s28 + $0x170] sm:$0xff]  }
  0x96   : > { %v4837_v51 = vsel %vm195_vm0, %v4831_v37, %v11845_v1  ;;  %4797 = vst [vmem:[#allocation7 + $0x344] sm:$0xf] %v4795_v42  ;;  %v4817_v54 = vpack.c.bf16 %v11816_v26, %v4815_v50  ;;  %v2043_v56 = vsel %vm195_vm0, %v2037_v38, %v11845_v1  ;;  %v4853_v60 = vunpack.c.l.bf16 %v9775_v34  ;;  %v11739_v33 = vld [vmem:[#allocation7 + $0x2f0] sm:$0xff]   ;;  %v9657_v50 = vld [vmem:[%s11874_s28 + $0x178] sm:$0xff]  }
  0x97   : > { %v4839_v55 = vpack.c.bf16 %v11816_v26, %v4837_v51  ;;  %v2065_v57 = vsel %vm195_vm0, %v2059_v45, %v11845_v1  ;;  %2003 = vst [vmem:[#allocation7 + $0x148] sm:$0xf] %v2001_v48  ;;  %2025 = vst [vmem:[#allocation7 + $0x14c] sm:$0xf] %v2023_v49  ;;  %v2045_v58 = vpack.c.bf16 %v11816_v26, %v2043_v56  ;;  %v4875_v61 = vunpack.c.h.bf16 %v9775_v34  ;;  %v9659_v56 = vld [vmem:[%s11874_s28 + $0x180] sm:$0xff]  }
  0x98   : > { %v2067_v59 = vpack.c.bf16 %v11816_v26, %v2065_v57  ;;  %4819 = vst [vmem:[#allocation7 + $0x348] sm:$0xf] %v4817_v54  ;;  %v2081_v63 = vunpack.c.l.bf16 %v9649_v39  ;;  %v2103_v0 = vunpack.c.h.bf16 %v9649_v39  ;;  %v4897_v2 = vunpack.c.l.bf16 %v9777_v40 }
  0x99   : > { %4841 = vst [vmem:[#allocation7 + $0x34c] sm:$0xf] %v4839_v55  ;;  %v4919_v3 = vunpack.c.h.bf16 %v9777_v40  ;;  %11442 = vmatmul.mubr.bf16.gmra.mrb[52].mxu0 %v11732_v41  ;;  %11570 = vmatmul.mubr.bf16.gmra.mrb[52].mxu1 %v11733_v47  ;;  %2047 = vst [vmem:[#allocation7 + $0x150] sm:$0xf] %v2045_v58  ;;  %v4859_v4 = vsel %vm195_vm0, %v4853_v60, %v11845_v1  ;;  %v4881_v5 = vsel %vm195_vm0, %v4875_v61, %v11845_v1  ;;  %v9785_v55 = vld [vmem:[%s11874_s28 + $0x378] sm:$0xff]   ;;  %v9787_v61 = vld [vmem:[%s11874_s28 + $0x380] sm:$0xff]  }
  0x9a   : > { %2069 = vst [vmem:[#allocation7 + $0x154] sm:$0xf] %v2067_v59  ;;  %v2125_v7 = vunpack.c.l.bf16 %v9651_v46  ;;  %v2147_v8 = vunpack.c.h.bf16 %v9651_v46  ;;  %11445 = vmatprep.mubr.bf16.mxu0 %v11734_v52  ;;  %11573 = vmatprep.mubr.bf16.mxu1 %v11735_v53  ;;  %v4861_v9 = vpack.c.bf16 %v11816_v26, %v4859_v4  ;;  %v4883_v10 = vpack.c.bf16 %v11816_v26, %v4881_v5  ;;  %v11742_v5 = vld [vmem:[#allocation7 + $0x100] sm:$0xff]  }
  0x9b   : > { %v2087_v11 = vsel %vm195_vm0, %v2081_v63, %v11845_v1  ;;  %v4941_v12 = vunpack.c.l.bf16 %v9779_v62  ;;  %v2109_v15 = vsel %vm195_vm0, %v2103_v0, %v11845_v1  ;;  %v4903_v16 = vsel %vm195_vm0, %v4897_v2, %v11845_v1  ;;  %v11741_v63 = vld [vmem:[#allocation7 + $0x2f8] sm:$0xff]  }
  0x9c   : > { %v2089_v14 = vpack.c.bf16 %v11816_v26, %v2087_v11  ;;  %v4925_v17 = vsel %vm195_vm0, %v4919_v3, %v11845_v1  ;;  %4863 = vst [vmem:[#allocation7 + $0x350] sm:$0xf] %v4861_v9  ;;  %4885 = vst [vmem:[#allocation7 + $0x354] sm:$0xf] %v4883_v10  ;;  %v2111_v20 = vpack.c.bf16 %v11816_v26, %v2109_v15  ;;  %v4963_v32 = vunpack.c.h.bf16 %v9779_v62  ;;  %v11740_v62 = vld [vmem:[#allocation7 + $0xf8] sm:$0xff]   ;;  %v11743_v11 = vld [vmem:[#allocation7 + $0x300] sm:$0xff]  }
  0x9d   : > { %v4905_v21 = vpack.c.bf16 %v11816_v26, %v4903_v16  ;;  %v4927_v22 = vpack.c.bf16 %v11816_v26, %v4925_v17  ;;  %v2131_v23 = vsel %vm195_vm0, %v2125_v7, %v11845_v1  ;;  %v2153_v30 = vsel %vm195_vm0, %v2147_v8, %v11845_v1 }
  0x9e   : > { %2091 = vst [vmem:[#allocation7 + $0x158] sm:$0xf] %v2089_v14  ;;  %v2133_v29 = vpack.c.bf16 %v11816_v26, %v2131_v23  ;;  %v4947_v31 = vsel %vm195_vm0, %v4941_v12, %v11845_v1  ;;  %2113 = vst [vmem:[#allocation7 + $0x15c] sm:$0xf] %v2111_v20  ;;  %v2155_v34 = vpack.c.bf16 %v11816_v26, %v2153_v30  ;;  %v2169_v36 = vunpack.c.l.bf16 %v9653_v13  ;;  %v9661_v20 = vld [vmem:[%s11874_s28 + $0x188] sm:$0xff]  }
  0x9f   : > { %4907 = vst [vmem:[#allocation7 + $0x358] sm:$0xf] %v4905_v21  ;;  %4929 = vst [vmem:[#allocation7 + $0x35c] sm:$0xf] %v4927_v22  ;;  %v4949_v35 = vpack.c.bf16 %v11816_v26, %v4947_v31  ;;  %v2191_v37 = vunpack.c.h.bf16 %v9653_v13  ;;  %v4969_v38 = vsel %vm195_vm0, %v4963_v32, %v11845_v1  ;;  %v4985_v39 = vunpack.c.l.bf16 %v9781_v18 }
  0xa0   : > { %2135 = vst [vmem:[#allocation7 + $0x160] sm:$0xf] %v2133_v29  ;;  %v5007_v40 = vunpack.c.h.bf16 %v9781_v18  ;;  %v2213_v41 = vunpack.c.l.bf16 %v9655_v24  ;;  %2157 = vst [vmem:[#allocation7 + $0x164] sm:$0xf] %v2155_v34  ;;  %v4971_v42 = vpack.c.bf16 %v11816_v26, %v4969_v38  ;;  %v2175_v43 = vsel %vm195_vm0, %v2169_v36, %v11845_v1  ;;  %v9791_v36 = vld [vmem:[%s11874_s28 + $0x390] sm:$0xff]  }
  0xa1   : > { %4951 = vst [vmem:[#allocation7 + $0x360] sm:$0xf] %v4949_v35  ;;  %v2197_v44 = vsel %vm195_vm0, %v2191_v37, %v11845_v1  ;;  %v2235_v45 = vunpack.c.h.bf16 %v9655_v24  ;;  %11446 = vmatmul.mubr.bf16.gmra.mrb[56].mxu0 %v11736_v19  ;;  %11574 = vmatmul.mubr.bf16.gmra.mrb[56].mxu1 %v11737_v27  ;;  %v2177_v46 = vpack.c.bf16 %v11816_v26, %v2175_v43  ;;  %v5029_v49 = vunpack.c.l.bf16 %v9783_v25  ;;  %v9663_v27 = vld [vmem:[%s11874_s28 + $0x190] sm:$0xff]   ;;  %v11744_v43 = vld [vmem:[#allocation7 + $0x108] sm:$0xff]  }
  0xa2   : > { %v2199_v47 = vpack.c.bf16 %v11816_v26, %v2197_v44  ;;  %v4991_v48 = vsel %vm195_vm0, %v4985_v39, %v11845_v1  ;;  %11449 = vmatprep.mubr.bf16.mxu0 %v11738_v28  ;;  %11577 = vmatprep.mubr.bf16.mxu1 %v11739_v33  ;;  %4973 = vst [vmem:[#allocation7 + $0x364] sm:$0xf] %v4971_v42  ;;  %v5051_v54 = vunpack.c.h.bf16 %v9783_v25  ;;  %v2257_v4 = vunpack.c.l.bf16 %v9657_v50  ;;  %v9789_v25 = vld [vmem:[%s11874_s28 + $0x388] sm:$0xff]   ;;  %v9793_v42 = vld [vmem:[%s11874_s28 + $0x398] sm:$0xff]  }
  0xa3   : > { %v4993_v51 = vpack.c.bf16 %v11816_v26, %v4991_v48  ;;  %v5013_v52 = vsel %vm195_vm0, %v5007_v40, %v11845_v1  ;;  %v2219_v53 = vsel %vm195_vm0, %v2213_v41, %v11845_v1  ;;  %2179 = vst [vmem:[#allocation7 + $0x168] sm:$0xf] %v2177_v46  ;;  %v2241_v59 = vsel %vm195_vm0, %v2235_v45, %v11845_v1  ;;  %v9665_v41 = vld [vmem:[%s11874_s28 + $0x198] sm:$0xff]   ;;  %v9667_v48 = vld [vmem:[%s11874_s28 + $0x1a0] sm:$0xff]  }
  0xa4   : > { %2201 = vst [vmem:[#allocation7 + $0x16c] sm:$0xf] %v2199_v47  ;;  %v5015_v57 = vpack.c.bf16 %v11816_v26, %v5013_v52  ;;  %v2221_v58 = vpack.c.bf16 %v11816_v26, %v2219_v53  ;;  %v5035_v60 = vsel %vm195_vm0, %v5029_v49, %v11845_v1  ;;  %v2243_v0 = vpack.c.bf16 %v11816_v26, %v2241_v59  ;;  %v11745_v49 = vld [vmem:[#allocation7 + $0x308] sm:$0xff]  }
  0xa5   : > { %4995 = vst [vmem:[#allocation7 + $0x368] sm:$0xf] %v4993_v51  ;;  %v5037_v2 = vpack.c.bf16 %v11816_v26, %v5035_v60  ;;  %v5057_v3 = vsel %vm195_vm0, %v5051_v54, %v11845_v1  ;;  %v2279_v8 = vunpack.c.h.bf16 %v9657_v50  ;;  %v5073_v9 = vunpack.c.l.bf16 %v9785_v55  ;;  %v11746_v54 = vld [vmem:[#allocation7 + $0x110] sm:$0xff]  }
  0xa6   : > { %5017 = vst [vmem:[#allocation7 + $0x36c] sm:$0xf] %v5015_v57  ;;  %2223 = vst [vmem:[#allocation7 + $0x170] sm:$0xf] %v2221_v58  ;;  %v5059_v7 = vpack.c.bf16 %v11816_v26, %v5057_v3  ;;  %v5095_v10 = vunpack.c.h.bf16 %v9785_v55  ;;  %v2263_v12 = vsel %vm195_vm0, %v2257_v4, %v11845_v1  ;;  %v2301_v13 = vunpack.c.l.bf16 %v9659_v56  ;;  %v11747_v55 = vld [vmem:[#allocation7 + $0x310] sm:$0xff]  }
  0xa7   : > { %2245 = vst [vmem:[#allocation7 + $0x174] sm:$0xf] %v2243_v0  ;;  %5039 = vst [vmem:[#allocation7 + $0x370] sm:$0xf] %v5037_v2  ;;  %v2323_v14 = vunpack.c.h.bf16 %v9659_v56  ;;  %v5117_v15 = vunpack.c.l.bf16 %v9787_v61  ;;  %v2265_v16 = vpack.c.bf16 %v11816_v26, %v2263_v12  ;;  %v2285_v17 = vsel %vm195_vm0, %v2279_v8, %v11845_v1  ;;  %v9795_v0 = vld [vmem:[%s11874_s28 + $0x3a0] sm:$0xff]  }
  0xa8   : > { %5061 = vst [vmem:[#allocation7 + $0x374] sm:$0xf] %v5059_v7  ;;  %v5079_v18 = vsel %vm195_vm0, %v5073_v9, %v11845_v1  ;;  %v5101_v19 = vsel %vm195_vm0, %v5095_v10, %v11845_v1  ;;  %v2287_v21 = vpack.c.bf16 %v11816_v26, %v2285_v17  ;;  %v2307_v24 = vsel %vm195_vm0, %v2301_v13, %v11845_v1 }
  0xa9   : > { %v5081_v22 = vpack.c.bf16 %v11816_v26, %v5079_v18  ;;  %v5103_v23 = vpack.c.bf16 %v11816_v26, %v5101_v19  ;;  %11450 = vmatmul.mubr.bf16.gmra.mrb[60].mxu0 %v11740_v62  ;;  %11578 = vmatmul.mubr.bf16.gmra.mrb[60].mxu1 %v11741_v63  ;;  %2267 = vst [vmem:[#allocation7 + $0x178] sm:$0xf] %v2265_v16  ;;  %v5139_v31 = vunpack.c.h.bf16 %v9787_v61  ;;  %v2345_v34 = vunpack.c.l.bf16 %v9661_v20 }
  0xaa   : > { %v2309_v28 = vpack.c.bf16 %v11816_v26, %v2307_v24  ;;  %v2329_v29 = vsel %vm195_vm0, %v2323_v14, %v11845_v1  ;;  %v5123_v30 = vsel %vm195_vm0, %v5117_v15, %v11845_v1  ;;  %11453 = vmatprep.mubr.bf16.mxu0 %v11742_v5  ;;  %11581 = vmatprep.mubr.bf16.mxu1 %v11743_v11  ;;  %v2367_v35 = vunpack.c.h.bf16 %v9661_v20  ;;  %v9669_v15 = vld [vmem:[%s11874_s28 + $0x1a8] sm:$0xff]  }
  0xab   : > { %2289 = vst [vmem:[#allocation7 + $0x17c] sm:$0xf] %v2287_v21  ;;  %5083 = vst [vmem:[#allocation7 + $0x378] sm:$0xf] %v5081_v22  ;;  %v2331_v32 = vpack.c.bf16 %v11816_v26, %v2329_v29  ;;  %v5125_v33 = vpack.c.bf16 %v11816_v26, %v5123_v30  ;;  %v5145_v37 = vsel %vm195_vm0, %v5139_v31, %v11845_v1  ;;  %v5161_v38 = vunpack.c.l.bf16 %v9789_v25  ;;  %v9797_v20 = vld [vmem:[%s11874_s28 + $0x3a8] sm:$0xff]   ;;  %v11748_v21 = vld [vmem:[#allocation7 + $0x118] sm:$0xff]  }
  0xac   : > { %5105 = vst [vmem:[#allocation7 + $0x37c] sm:$0xf] %v5103_v23  ;;  %2311 = vst [vmem:[#allocation7 + $0x180] sm:$0xf] %v2309_v28  ;;  %v5183_v39 = vunpack.c.h.bf16 %v9789_v25  ;;  %v2389_v40 = vunpack.c.l.bf16 %v9663_v27  ;;  %v5147_v44 = vpack.c.bf16 %v11816_v26, %v5145_v37  ;;  %v2351_v45 = vsel %vm195_vm0, %v2345_v34, %v11845_v1  ;;  %v9799_v28 = vld [vmem:[%s11874_s28 + $0x3b0] sm:$0xff]   ;;  %v11749_v29 = vld [vmem:[#allocation7 + $0x318] sm:$0xff]  }
  0xad   : > { %2333 = vst [vmem:[#allocation7 + $0x184] sm:$0xf] %v2331_v32  ;;  %5127 = vst [vmem:[#allocation7 + $0x380] sm:$0xf] %v5125_v33  ;;  %v2373_v46 = vsel %vm195_vm0, %v2367_v35, %v11845_v1  ;;  %v2411_v47 = vunpack.c.h.bf16 %v9663_v27  ;;  %v2353_v50 = vpack.c.bf16 %v11816_v26, %v2351_v45  ;;  %v5167_v52 = vsel %vm195_vm0, %v5161_v38, %v11845_v1  ;;  %v9671_v27 = vld [vmem:[%s11874_s28 + $0x1b0] sm:$0xff]   ;;  %v11750_v30 = vld [vmem:[#allocation7 + $0x120] sm:$0xff]  }
  0xae   : > { %v2375_v51 = vpack.c.bf16 %v11816_v26, %v2373_v46  ;;  %v5189_v53 = vsel %vm195_vm0, %v5183_v39, %v11845_v1  ;;  %5149 = vst [vmem:[#allocation7 + $0x384] sm:$0xf] %v5147_v44  ;;  %v5169_v56 = vpack.c.bf16 %v11816_v26, %v5167_v52  ;;  %v2395_v58 = vsel %vm195_vm0, %v2389_v40, %v11845_v1  ;;  %v11751_v35 = vld [vmem:[#allocation7 + $0x320] sm:$0xff]   ;;  %v9673_v52 = vld [vmem:[%s11874_s28 + $0x1b8] sm:$0xff]  }
  0xaf   : > { %v5191_v57 = vpack.c.bf16 %v11816_v26, %v5189_v53  ;;  %v2417_v59 = vsel %vm195_vm0, %v2411_v47, %v11845_v1  ;;  %2355 = vst [vmem:[#allocation7 + $0x188] sm:$0xf] %v2353_v50  ;;  %v2397_v60 = vpack.c.bf16 %v11816_v26, %v2395_v58  ;;  %v5205_v62 = vunpack.c.l.bf16 %v9791_v36  ;;  %v9675_v58 = vld [vmem:[%s11874_s28 + $0x1c0] sm:$0xff]  }
  0xb0   : > { %2377 = vst [vmem:[#allocation7 + $0x18c] sm:$0xf] %v2375_v51  ;;  %v2419_v61 = vpack.c.bf16 %v11816_v26, %v2417_v59  ;;  %v5227_v63 = vunpack.c.h.bf16 %v9791_v36  ;;  %5171 = vst [vmem:[#allocation7 + $0x388] sm:$0xf] %v5169_v56  ;;  %v2433_v2 = vunpack.c.l.bf16 %v9665_v41  ;;  %v2455_v3 = vunpack.c.h.bf16 %v9665_v41 }
  0xb1   : > { %5193 = vst [vmem:[#allocation7 + $0x38c] sm:$0xf] %v5191_v57  ;;  %v5249_v4 = vunpack.c.l.bf16 %v9793_v42  ;;  %v5271_v5 = vunpack.c.h.bf16 %v9793_v42  ;;  %11454 = vmatmul.mubr.bf16.gmra.mrb[64].mxu0 %v11744_v43  ;;  %11582 = vmatmul.mubr.bf16.gmra.mrb[64].mxu1 %v11745_v49  ;;  %2399 = vst [vmem:[#allocation7 + $0x190] sm:$0xf] %v2397_v60  ;;  %v5211_v7 = vsel %vm195_vm0, %v5205_v62, %v11845_v1  ;;  %v2477_v9 = vunpack.c.l.bf16 %v9667_v48  ;;  %v9801_v57 = vld [vmem:[%s11874_s28 + $0x3b8] sm:$0xff]  }
  0xb2   : > { %2421 = vst [vmem:[#allocation7 + $0x194] sm:$0xf] %v2419_v61  ;;  %v5233_v8 = vsel %vm195_vm0, %v5227_v63, %v11845_v1  ;;  %v2499_v10 = vunpack.c.h.bf16 %v9667_v48  ;;  %11457 = vmatprep.mubr.bf16.mxu0 %v11746_v54  ;;  %11585 = vmatprep.mubr.bf16.mxu1 %v11747_v55  ;;  %v5213_v11 = vpack.c.bf16 %v11816_v26, %v5211_v7  ;;  %v5293_v14 = vunpack.c.l.bf16 %v9795_v0  ;;  %v9803_v63 = vld [vmem:[%s11874_s28 + $0x3c0] sm:$0xff]   ;;  %v11772_v6 = vld [vmem:[#allocation7 + $0x178] sm:$0xff]  }
  0xb3   : > { %v5235_v12 = vpack.c.bf16 %v11816_v26, %v5233_v8  ;;  %v2439_v13 = vsel %vm195_vm0, %v2433_v2, %v11845_v1  ;;  %v2461_v17 = vsel %vm195_vm0, %v2455_v3, %v11845_v1  ;;  %v5255_v18 = vsel %vm195_vm0, %v5249_v4, %v11845_v1  ;;  %v11753_v2 = vld [vmem:[#allocation7 + $0x328] sm:$0xff]   ;;  %v11754_v8 = vld [vmem:[#allocation7 + $0x130] sm:$0xff]  }
  0xb4   : > { %v2441_v16 = vpack.c.bf16 %v11816_v26, %v2439_v13  ;;  %v5277_v19 = vsel %vm195_vm0, %v5271_v5, %v11845_v1  ;;  %5215 = vst [vmem:[#allocation7 + $0x390] sm:$0xf] %v5213_v11  ;;  %v2463_v22 = vpack.c.bf16 %v11816_v26, %v2461_v17  ;;  %v5257_v23 = vpack.c.bf16 %v11816_v26, %v5255_v18  ;;  %v11755_v13 = vld [vmem:[#allocation7 + $0x330] sm:$0xff]  }
  0xb5   : > { %5237 = vst [vmem:[#allocation7 + $0x394] sm:$0xf] %v5235_v12  ;;  %v5279_v24 = vpack.c.bf16 %v11816_v26, %v5277_v19  ;;  %v2483_v25 = vsel %vm195_vm0, %v2477_v9, %v11845_v1  ;;  %v2505_v32 = vsel %vm195_vm0, %v2499_v10, %v11845_v1  ;;  %v5299_v33 = vsel %vm195_vm0, %v5293_v14, %v11845_v1 }
  0xb6   : > { %2443 = vst [vmem:[#allocation7 + $0x198] sm:$0xf] %v2441_v16  ;;  %v2485_v31 = vpack.c.bf16 %v11816_v26, %v2483_v25  ;;  %v5315_v34 = vunpack.c.h.bf16 %v9795_v0  ;;  %2465 = vst [vmem:[#allocation7 + $0x19c] sm:$0xf] %v2463_v22  ;;  %v2507_v36 = vpack.c.bf16 %v11816_v26, %v2505_v32  ;;  %v5301_v37 = vpack.c.bf16 %v11816_v26, %v5299_v33  ;;  %v11752_v0 = vld [vmem:[#allocation7 + $0x128] sm:$0xff]  }
  0xb7   : > { %5259 = vst [vmem:[#allocation7 + $0x398] sm:$0xf] %v5257_v23  ;;  %5281 = vst [vmem:[#allocation7 + $0x39c] sm:$0xf] %v5279_v24  ;;  %v2521_v38 = vunpack.c.l.bf16 %v9669_v15  ;;  %v2543_v39 = vunpack.c.h.bf16 %v9669_v15  ;;  %v5337_v41 = vunpack.c.l.bf16 %v9797_v20  ;;  %v5359_v42 = vunpack.c.h.bf16 %v9797_v20  ;;  %v9677_v22 = vld [vmem:[%s11874_s28 + $0x1c8] sm:$0xff]  }
  0xb8   : > { %2487 = vst [vmem:[#allocation7 + $0x1a0] sm:$0xf] %v2485_v31  ;;  %v5321_v40 = vsel %vm195_vm0, %v5315_v34, %v11845_v1  ;;  %v2565_v43 = vunpack.c.l.bf16 %v9671_v27  ;;  %2509 = vst [vmem:[#allocation7 + $0x1a4] sm:$0xf] %v2507_v36  ;;  %v2587_v47 = vunpack.c.h.bf16 %v9671_v27  ;;  %v5381_v51 = vunpack.c.l.bf16 %v9799_v28 }
  0xb9   : > { %5303 = vst [vmem:[#allocation7 + $0x3a0] sm:$0xf] %v5301_v37  ;;  %v5323_v44 = vpack.c.bf16 %v11816_v26, %v5321_v40  ;;  %v2527_v45 = vsel %vm195_vm0, %v2521_v38, %v11845_v1  ;;  %v2549_v46 = vsel %vm195_vm0, %v2543_v39, %v11845_v1  ;;  %11458 = vmatmul.mubr.bf16.gmra.mrb[68].mxu0 %v11748_v21  ;;  %v5403_v56 = vunpack.c.h.bf16 %v9799_v28  ;;  %v9805_v28 = vld [vmem:[%s11874_s28 + $0x3c8] sm:$0xff]   ;;  %v9807_v38 = vld [vmem:[%s11874_s28 + $0x3d0] sm:$0xff]  }
  0xba   : > { %11586 = vmatmul.mubr.bf16.gmra.mrb[68].mxu1 %v11749_v29  ;;  %v2529_v48 = vpack.c.bf16 %v11816_v26, %v2527_v45  ;;  %v2551_v49 = vpack.c.bf16 %v11816_v26, %v2549_v46  ;;  %v5343_v50 = vsel %vm195_vm0, %v5337_v41, %v11845_v1  ;;  %11461 = vmatprep.mubr.bf16.mxu0 %v11750_v30  ;;  %v2609_v7 = vunpack.c.l.bf16 %v9673_v52  ;;  %v9679_v29 = vld [vmem:[%s11874_s28 + $0x1d0] sm:$0xff]   ;;  %v11756_v45 = vld [vmem:[#allocation7 + $0x138] sm:$0xff]  }
  0xbb   : > { %11589 = vmatprep.mubr.bf16.mxu1 %v11751_v35  ;;  %5325 = vst [vmem:[#allocation7 + $0x3a4] sm:$0xf] %v5323_v44  ;;  %v5345_v53 = vpack.c.bf16 %v11816_v26, %v5343_v50  ;;  %v5365_v54 = vsel %vm195_vm0, %v5359_v42, %v11845_v1  ;;  %v2571_v55 = vsel %vm195_vm0, %v2565_v43, %v11845_v1  ;;  %v2631_v10 = vunpack.c.h.bf16 %v9673_v52  ;;  %v9681_v43 = vld [vmem:[%s11874_s28 + $0x1d8] sm:$0xff]   ;;  %v9683_v50 = vld [vmem:[%s11874_s28 + $0x1e0] sm:$0xff]  }
  0xbc   : > { %2531 = vst [vmem:[#allocation7 + $0x1a8] sm:$0xf] %v2529_v48  ;;  %2553 = vst [vmem:[#allocation7 + $0x1ac] sm:$0xf] %v2551_v49  ;;  %v5367_v59 = vpack.c.bf16 %v11816_v26, %v5365_v54  ;;  %v2573_v60 = vpack.c.bf16 %v11816_v26, %v2571_v55  ;;  %v2593_v61 = vsel %vm195_vm0, %v2587_v47, %v11845_v1  ;;  %v5425_v11 = vunpack.c.l.bf16 %v9801_v57  ;;  %v9809_v44 = vld [vmem:[%s11874_s28 + $0x3d8] sm:$0xff]  }
  0xbd   : > { %v5387_v62 = vsel %vm195_vm0, %v5381_v51, %v11845_v1  ;;  %5347 = vst [vmem:[#allocation7 + $0x3a8] sm:$0xf] %v5345_v53  ;;  %v2595_v3 = vpack.c.bf16 %v11816_v26, %v2593_v61  ;;  %v5409_v5 = vsel %vm195_vm0, %v5403_v56, %v11845_v1  ;;  %v5447_v12 = vunpack.c.h.bf16 %v9801_v57  ;;  %v11757_v51 = vld [vmem:[#allocation7 + $0x338] sm:$0xff]   ;;  %v11758_v56 = vld [vmem:[#allocation7 + $0x140] sm:$0xff]  }
  0xbe   : > { %v5389_v4 = vpack.c.bf16 %v11816_v26, %v5387_v62  ;;  %5369 = vst [vmem:[#allocation7 + $0x3ac] sm:$0xf] %v5367_v59  ;;  %2575 = vst [vmem:[#allocation7 + $0x1b0] sm:$0xf] %v2573_v60  ;;  %v5411_v9 = vpack.c.bf16 %v11816_v26, %v5409_v5  ;;  %v2615_v14 = vsel %vm195_vm0, %v2609_v7, %v11845_v1  ;;  %v2653_v15 = vunpack.c.l.bf16 %v9675_v58  ;;  %v11759_v57 = vld [vmem:[#allocation7 + $0x340] sm:$0xff]  }
  0xbf   : > { %2597 = vst [vmem:[#allocation7 + $0x1b4] sm:$0xf] %v2595_v3  ;;  %v2675_v16 = vunpack.c.h.bf16 %v9675_v58  ;;  %v5469_v17 = vunpack.c.l.bf16 %v9803_v63  ;;  %v2617_v18 = vpack.c.bf16 %v11816_v26, %v2615_v14  ;;  %v2637_v19 = vsel %vm195_vm0, %v2631_v10, %v11845_v1  ;;  %v9811_v3 = vld [vmem:[%s11874_s28 + $0x3e0] sm:$0xff]  }
  0xc0   : > { %5391 = vst [vmem:[#allocation7 + $0x3b0] sm:$0xf] %v5389_v4  ;;  %5413 = vst [vmem:[#allocation7 + $0x3b4] sm:$0xf] %v5411_v9  ;;  %v5431_v20 = vsel %vm195_vm0, %v5425_v11, %v11845_v1  ;;  %v5453_v21 = vsel %vm195_vm0, %v5447_v12, %v11845_v1  ;;  %v2639_v23 = vpack.c.bf16 %v11816_v26, %v2637_v19  ;;  %v5491_v33 = vunpack.c.h.bf16 %v9803_v63 }
  0xc1   : > { %v5433_v24 = vpack.c.bf16 %v11816_v26, %v5431_v20  ;;  %v5455_v25 = vpack.c.bf16 %v11816_v26, %v5453_v21  ;;  %v2659_v27 = vsel %vm195_vm0, %v2653_v15, %v11845_v1  ;;  %11462 = vmatmul.mubr.bf16.gmra.mrb[72].mxu0 %v11752_v0  ;;  %2619 = vst [vmem:[#allocation7 + $0x1b8] sm:$0xf] %v2617_v18  ;;  %v2697_v36 = vunpack.c.l.bf16 %v9677_v22 }
  0xc2   : > { %11590 = vmatmul.mubr.bf16.gmra.mrb[72].mxu1 %v11753_v2  ;;  %v2661_v30 = vpack.c.bf16 %v11816_v26, %v2659_v27  ;;  %v2681_v31 = vsel %vm195_vm0, %v2675_v16, %v11845_v1  ;;  %v5475_v32 = vsel %vm195_vm0, %v5469_v17, %v11845_v1  ;;  %11465 = vmatprep.mubr.bf16.mxu0 %v11754_v8  ;;  %v2719_v37 = vunpack.c.h.bf16 %v9677_v22  ;;  %v9685_v17 = vld [vmem:[%s11874_s28 + $0x1e8] sm:$0xff]  }
  0xc3   : > { %11593 = vmatprep.mubr.bf16.mxu1 %v11755_v13  ;;  %2641 = vst [vmem:[#allocation7 + $0x1bc] sm:$0xf] %v2639_v23  ;;  %5435 = vst [vmem:[#allocation7 + $0x3b8] sm:$0xf] %v5433_v24  ;;  %v2683_v34 = vpack.c.bf16 %v11816_v26, %v2681_v31  ;;  %v5477_v35 = vpack.c.bf16 %v11816_v26, %v5475_v32  ;;  %v5497_v39 = vsel %vm195_vm0, %v5491_v33, %v11845_v1  ;;  %v9813_v22 = vld [vmem:[%s11874_s28 + $0x3e8] sm:$0xff]   ;;  %v11762_v32 = vld [vmem:[#allocation7 + $0x150] sm:$0xff]  }
  0xc4   : > { %5457 = vst [vmem:[#allocation7 + $0x3bc] sm:$0xf] %v5455_v25  ;;  %2663 = vst [vmem:[#allocation7 + $0x1c0] sm:$0xf] %v2661_v30  ;;  %v5513_v40 = vunpack.c.l.bf16 %v9805_v28  ;;  %v5535_v41 = vunpack.c.h.bf16 %v9805_v28  ;;  %v2741_v42 = vunpack.c.l.bf16 %v9679_v29  ;;  %v5499_v46 = vpack.c.bf16 %v11816_v26, %v5497_v39  ;;  %v11760_v23 = vld [vmem:[#allocation7 + $0x148] sm:$0xff]   ;;  %v9815_v30 = vld [vmem:[%s11874_s28 + $0x3f0] sm:$0xff]  }
  0xc5   : > { %2685 = vst [vmem:[#allocation7 + $0x1c4] sm:$0xf] %v2683_v34  ;;  %5479 = vst [vmem:[#allocation7 + $0x3c0] sm:$0xf] %v5477_v35  ;;  %v2703_v47 = vsel %vm195_vm0, %v2697_v36, %v11845_v1  ;;  %v2725_v48 = vsel %vm195_vm0, %v2719_v37, %v11845_v1  ;;  %v2763_v49 = vunpack.c.h.bf16 %v9679_v29  ;;  %v5557_v0 = vunpack.c.l.bf16 %v9807_v38  ;;  %v9687_v29 = vld [vmem:[%s11874_s28 + $0x1f0] sm:$0xff]   ;;  %v11761_v31 = vld [vmem:[#allocation7 + $0x348] sm:$0xff]  }
  0xc6   : > { %v2705_v52 = vpack.c.bf16 %v11816_v26, %v2703_v47  ;;  %v2727_v53 = vpack.c.bf16 %v11816_v26, %v2725_v48  ;;  %v5519_v54 = vsel %vm195_vm0, %v5513_v40, %v11845_v1  ;;  %v5541_v55 = vsel %vm195_vm0, %v5535_v41, %v11845_v1  ;;  %5501 = vst [vmem:[#allocation7 + $0x3c4] sm:$0xf] %v5499_v46  ;;  %v11763_v37 = vld [vmem:[#allocation7 + $0x350] sm:$0xff]  }
  0xc7   : > { %v5521_v58 = vpack.c.bf16 %v11816_v26, %v5519_v54  ;;  %v5543_v59 = vpack.c.bf16 %v11816_v26, %v5541_v55  ;;  %v2747_v60 = vsel %vm195_vm0, %v2741_v42, %v11845_v1  ;;  %v2769_v61 = vsel %vm195_vm0, %v2763_v49, %v11845_v1  ;;  %v9689_v54 = vld [vmem:[%s11874_s28 + $0x1f8] sm:$0xff]  }
  0xc8   : > { %2707 = vst [vmem:[#allocation7 + $0x1c8] sm:$0xf] %v2705_v52  ;;  %2729 = vst [vmem:[#allocation7 + $0x1cc] sm:$0xf] %v2727_v53  ;;  %v2749_v62 = vpack.c.bf16 %v11816_v26, %v2747_v60  ;;  %v2771_v63 = vpack.c.bf16 %v11816_v26, %v2769_v61  ;;  %v5579_v2 = vunpack.c.h.bf16 %v9807_v38  ;;  %v2785_v4 = vunpack.c.l.bf16 %v9681_v43 }
  0xc9   : > { %5523 = vst [vmem:[#allocation7 + $0x3c8] sm:$0xf] %v5521_v58  ;;  %5545 = vst [vmem:[#allocation7 + $0x3cc] sm:$0xf] %v5543_v59  ;;  %v2807_v5 = vunpack.c.h.bf16 %v9681_v43  ;;  %v5601_v7 = vunpack.c.l.bf16 %v9809_v44  ;;  %v5623_v8 = vunpack.c.h.bf16 %v9809_v44  ;;  %11466 = vmatmul.mubr.bf16.gmra.mrb[76].mxu0 %v11756_v45  ;;  %v5563_v9 = vsel %vm195_vm0, %v5557_v0, %v11845_v1  ;;  %v9817_v59 = vld [vmem:[%s11874_s28 + $0x3f8] sm:$0xff]  }
  0xca   : > { %11594 = vmatmul.mubr.bf16.gmra.mrb[76].mxu1 %v11757_v51  ;;  %2751 = vst [vmem:[#allocation7 + $0x1d0] sm:$0xf] %v2749_v62  ;;  %2773 = vst [vmem:[#allocation7 + $0x1d4] sm:$0xf] %v2771_v63  ;;  %v5585_v10 = vsel %vm195_vm0, %v5579_v2, %v11845_v1  ;;  %v2829_v11 = vunpack.c.l.bf16 %v9683_v50  ;;  %v2851_v12 = vunpack.c.h.bf16 %v9683_v50  ;;  %11469 = vmatprep.mubr.bf16.mxu0 %v11758_v56  ;;  %v5645_v16 = vunpack.c.l.bf16 %v9811_v3  ;;  %v11764_v0 = vld [vmem:[#allocation7 + $0x158] sm:$0xff]  }
  0xcb   : > { %11597 = vmatprep.mubr.bf16.mxu1 %v11759_v57  ;;  %v5565_v13 = vpack.c.bf16 %v11816_v26, %v5563_v9  ;;  %v5587_v14 = vpack.c.bf16 %v11816_v26, %v5585_v10  ;;  %v2791_v15 = vsel %vm195_vm0, %v2785_v4, %v11845_v1  ;;  %v2813_v19 = vsel %vm195_vm0, %v2807_v5, %v11845_v1  ;;  %v11765_v2 = vld [vmem:[#allocation7 + $0x358] sm:$0xff]  }
  0xcc   : > { %v2793_v18 = vpack.c.bf16 %v11816_v26, %v2791_v15  ;;  %v5607_v20 = vsel %vm195_vm0, %v5601_v7, %v11845_v1  ;;  %v5629_v21 = vsel %vm195_vm0, %v5623_v8, %v11845_v1  ;;  %v2815_v24 = vpack.c.bf16 %v11816_v26, %v2813_v19  ;;  %v11766_v8 = vld [vmem:[#allocation7 + $0x160] sm:$0xff]  }
  0xcd   : > { %5567 = vst [vmem:[#allocation7 + $0x3d0] sm:$0xf] %v5565_v13  ;;  %5589 = vst [vmem:[#allocation7 + $0x3d4] sm:$0xf] %v5587_v14  ;;  %v5609_v25 = vpack.c.bf16 %v11816_v26, %v5607_v20  ;;  %v5631_v27 = vpack.c.bf16 %v11816_v26, %v5629_v21  ;;  %v2835_v28 = vsel %vm195_vm0, %v2829_v11, %v11845_v1  ;;  %v5667_v36 = vunpack.c.h.bf16 %v9811_v3  ;;  %v11767_v13 = vld [vmem:[#allocation7 + $0x360] sm:$0xff]  }
  0xce   : > { %2795 = vst [vmem:[#allocation7 + $0x1d8] sm:$0xf] %v2793_v18  ;;  %v2837_v33 = vpack.c.bf16 %v11816_v26, %v2835_v28  ;;  %v2857_v34 = vsel %vm195_vm0, %v2851_v12, %v11845_v1  ;;  %v5651_v35 = vsel %vm195_vm0, %v5645_v16, %v11845_v1  ;;  %2817 = vst [vmem:[#allocation7 + $0x1dc] sm:$0xf] %v2815_v24  ;;  %v2873_v40 = vunpack.c.l.bf16 %v9685_v17  ;;  %v11770_v24 = vld [vmem:[#allocation7 + $0x170] sm:$0xff]   ;;  %v11774_v28 = vld [vmem:[#allocation7 + $0x180] sm:$0xff]  }
  0xcf   : > { %5611 = vst [vmem:[#allocation7 + $0x3d8] sm:$0xf] %v5609_v25  ;;  %5633 = vst [vmem:[#allocation7 + $0x3dc] sm:$0xf] %v5631_v27  ;;  %v2859_v38 = vpack.c.bf16 %v11816_v26, %v2857_v34  ;;  %v5653_v39 = vpack.c.bf16 %v11816_v26, %v5651_v35  ;;  %v2895_v41 = vunpack.c.h.bf16 %v9685_v17  ;;  %v5673_v42 = vsel %vm195_vm0, %v5667_v36, %v11845_v1  ;;  %v11771_v25 = vld [vmem:[#allocation7 + $0x370] sm:$0xff]   ;;  %v11773_v27 = vld [vmem:[#allocation7 + $0x378] sm:$0xff]  }
  0xd0   : > { %2839 = vst [vmem:[#allocation7 + $0x1e0] sm:$0xf] %v2837_v33  ;;  %v5689_v43 = vunpack.c.l.bf16 %v9813_v22  ;;  %v5711_v44 = vunpack.c.h.bf16 %v9813_v22  ;;  %v2917_v45 = vunpack.c.l.bf16 %v9687_v29  ;;  %v5675_v46 = vpack.c.bf16 %v11816_v26, %v5673_v42  ;;  %v11768_v22 = vld [vmem:[#allocation7 + $0x168] sm:$0xff]   ;;  %v11780_v33 = vld [vmem:[#allocation7 + $0x198] sm:$0xff]   ;;  %v11782_v35 = vld [vmem:[#allocation7 + $0x1a0] sm:$0xff]  }
  0xd1   : > { %2861 = vst [vmem:[#allocation7 + $0x1e4] sm:$0xf] %v2859_v38  ;;  %5655 = vst [vmem:[#allocation7 + $0x3e0] sm:$0xf] %v5653_v39  ;;  %v2879_v47 = vsel %vm195_vm0, %v2873_v40, %v11845_v1  ;;  %v2901_v48 = vsel %vm195_vm0, %v2895_v41, %v11845_v1  ;;  %v2939_v49 = vunpack.c.h.bf16 %v9687_v29  ;;  %11470 = vmatmul.mubr.bf16.gmra.mrb[80].mxu0 %v11760_v23  ;;  %v5733_v53 = vunpack.c.l.bf16 %v9815_v30  ;;  %v11769_v23 = vld [vmem:[#allocation7 + $0x368] sm:$0xff]   ;;  %v11781_v34 = vld [vmem:[#allocation7 + $0x398] sm:$0xff]  }
  0xd2   : > { %11598 = vmatmul.mubr.bf16.gmra.mrb[80].mxu1 %v11761_v31  ;;  %v2881_v50 = vpack.c.bf16 %v11816_v26, %v2879_v47  ;;  %v2903_v51 = vpack.c.bf16 %v11816_v26, %v2901_v48  ;;  %v5695_v52 = vsel %vm195_vm0, %v5689_v43, %v11845_v1  ;;  %11473 = vmatprep.mubr.bf16.mxu0 %v11762_v32  ;;  %v5755_v58 = vunpack.c.h.bf16 %v9815_v30  ;;  %v11776_v29 = vld [vmem:[#allocation7 + $0x188] sm:$0xff]   ;;  %v11778_v31 = vld [vmem:[#allocation7 + $0x190] sm:$0xff]   ;;  %v11783_v36 = vld [vmem:[#allocation7 + $0x3a0] sm:$0xff]  }
  0xd3   : > { %11601 = vmatprep.mubr.bf16.mxu1 %v11763_v37  ;;  %5677 = vst [vmem:[#allocation7 + $0x3e4] sm:$0xf] %v5675_v46  ;;  %v5697_v55 = vpack.c.bf16 %v11816_v26, %v5695_v52  ;;  %v5717_v56 = vsel %vm195_vm0, %v5711_v44, %v11845_v1  ;;  %v2923_v57 = vsel %vm195_vm0, %v2917_v45, %v11845_v1  ;;  %v2961_v7 = vunpack.c.l.bf16 %v9689_v54  ;;  %v11777_v30 = vld [vmem:[#allocation7 + $0x388] sm:$0xff]   ;;  %v11779_v32 = vld [vmem:[#allocation7 + $0x390] sm:$0xff]   ;;  %v13047_v41 = vld [vmem:[%s13444_s1] ss:$0 sm:$0xff] }
  0xd4   : > { %2883 = vst [vmem:[#allocation7 + $0x1e8] sm:$0xf] %v2881_v50  ;;  %2905 = vst [vmem:[#allocation7 + $0x1ec] sm:$0xf] %v2903_v51  ;;  %v5719_v60 = vpack.c.bf16 %v11816_v26, %v5717_v56  ;;  %v2925_v61 = vpack.c.bf16 %v11816_v26, %v2923_v57  ;;  %v2945_v62 = vsel %vm195_vm0, %v2939_v49, %v11845_v1  ;;  %v2983_v10 = vunpack.c.h.bf16 %v9689_v54  ;;  %v11784_v37 = vld [vmem:[#allocation7 + $0x1a8] sm:$0xff]   ;;  %v11786_v39 = vld [vmem:[#allocation7 + $0x1b0] sm:$0xff]  }
  0xd5   : > { %v5739_v63 = vsel %vm195_vm0, %v5733_v53, %v11845_v1  ;;  %5699 = vst [vmem:[#allocation7 + $0x3e8] sm:$0xf] %v5697_v55  ;;  %v2947_v3 = vpack.c.bf16 %v11816_v26, %v2945_v62  ;;  %v5761_v5 = vsel %vm195_vm0, %v5755_v58, %v11845_v1  ;;  %v5777_v11 = vunpack.c.l.bf16 %v9817_v59  ;;  %v11785_v38 = vld [vmem:[#allocation7 + $0x3a8] sm:$0xff]   ;;  %v11787_v40 = vld [vmem:[#allocation7 + $0x3b0] sm:$0xff]   ;;  %v11788_v48 = vld [vmem:[#allocation7 + $0x1b8] sm:$0xff]  }
  0xd6   : > { %v5741_v4 = vpack.c.bf16 %v11816_v26, %v5739_v63  ;;  %5721 = vst [vmem:[#allocation7 + $0x3ec] sm:$0xf] %v5719_v60  ;;  %2927 = vst [vmem:[#allocation7 + $0x1f0] sm:$0xf] %v2925_v61  ;;  %v5763_v9 = vpack.c.bf16 %v11816_v26, %v5761_v5  ;;  %v5799_v12 = vunpack.c.h.bf16 %v9817_v59  ;;  %v2967_v14 = vsel %vm195_vm0, %v2961_v7, %v11845_v1  ;;  %v11789_v49 = vld [vmem:[#allocation7 + $0x3b8] sm:$0xff]   ;;  %v11790_v54 = vld [vmem:[#allocation7 + $0x1c0] sm:$0xff]  }
  0xd7   : > { %2949 = vst [vmem:[#allocation7 + $0x1f4] sm:$0xf] %v2947_v3  ;;  %v2969_v15 = vpack.c.bf16 %v11816_v26, %v2967_v14  ;;  %v2989_v16 = vsel %vm195_vm0, %v2983_v10, %v11845_v1  ;;  %v5783_v17 = vsel %vm195_vm0, %v5777_v11, %v11845_v1  ;;  %v11791_v55 = vld [vmem:[#allocation7 + $0x3c0] sm:$0xff]  }
  0xd8   : > { %5743 = vst [vmem:[#allocation7 + $0x3f0] sm:$0xf] %v5741_v4  ;;  %5765 = vst [vmem:[#allocation7 + $0x3f4] sm:$0xf] %v5763_v9  ;;  %v5805_v18 = vsel %vm195_vm0, %v5799_v12, %v11845_v1  ;;  %v2991_v19 = vpack.c.bf16 %v11816_v26, %v2989_v16  ;;  %v5785_v20 = vpack.c.bf16 %v11816_v26, %v5783_v17 }
  0xd9   : > { %v5807_v21 = vpack.c.bf16 %v11816_v26, %v5805_v18  ;;  %11474 = vmatmul.mubr.bf16.gmra.mrb[84].mxu0 %v11764_v0  ;;  %2971 = vst [vmem:[#allocation7 + $0x1f8] sm:$0xf] %v2969_v15  ;;  %v11775_v26 = vld [vmem:[#allocation7 + $0x380] sm:$0xff]   ;;  %v11792_v18 = vld [vmem:[#allocation7 + $0x1c8] sm:$0xff]  }
  0xda   : > { %11602 = vmatmul.mubr.bf16.gmra.mrb[84].mxu1 %v11765_v2  ;;  %11477 = vmatprep.mubr.bf16.mxu0 %v11766_v8  ;;  %2993 = vst [vmem:[#allocation7 + $0x1fc] sm:$0xf] %v2991_v19  ;;  %5787 = vst [vmem:[#allocation7 + $0x3f8] sm:$0xf] %v5785_v20  ;;  %v11793_v19 = vld [vmem:[#allocation7 + $0x3c8] sm:$0xff]  }
  0xdb   : > { %11605 = vmatprep.mubr.bf16.mxu1 %v11767_v13  ;;  %5809 = vst [vmem:[#allocation7 + $0x3fc] sm:$0xf] %v5807_v21 }
  0xe1   : > { %11478 = vmatmul.mubr.bf16.gmra.mrb[88].mxu0 %v11768_v22 }
  0xe2   : > { %11606 = vmatmul.mubr.bf16.gmra.mrb[88].mxu1 %v11769_v23  ;;  %11481 = vmatprep.mubr.bf16.mxu0 %v11770_v24  ;;  %v11794_v24 = vld [vmem:[#allocation7 + $0x1d0] sm:$0xff]  }
  0xe3   : > { %11609 = vmatprep.mubr.bf16.mxu1 %v11771_v25  ;;  %v11795_v25 = vld [vmem:[#allocation7 + $0x3d0] sm:$0xff]  }
  0xe9   : > { %11482 = vmatmul.mubr.bf16.gmra.mrb[92].mxu0 %v11772_v6 }
  0xea   : > { %11610 = vmatmul.mubr.bf16.gmra.mrb[92].mxu1 %v11773_v27  ;;  %11485 = vmatprep.mubr.bf16.mxu0 %v11774_v28 }
  0xeb   : > { %11613 = vmatprep.mubr.bf16.mxu1 %v11775_v26 }
  0xf1   : > { %11486 = vmatmul.mubr.bf16.gmra.mrb[96].mxu0 %v11776_v29 }
  0xf2   : > { %11614 = vmatmul.mubr.bf16.gmra.mrb[96].mxu1 %v11777_v30  ;;  %11489 = vmatprep.mubr.bf16.mxu0 %v11778_v31 }
  0xf3   : > { %11617 = vmatprep.mubr.bf16.mxu1 %v11779_v32 }
  0xf9   : > { %11490 = vmatmul.mubr.bf16.gmra.mrb[100].mxu0 %v11780_v33 }
  0xfa   : > { %11618 = vmatmul.mubr.bf16.gmra.mrb[100].mxu1 %v11781_v34  ;;  %11493 = vmatprep.mubr.bf16.mxu0 %v11782_v35 }
  0xfb   : > { %11621 = vmatprep.mubr.bf16.mxu1 %v11783_v36 }
 0x101   : > { %11494 = vmatmul.mubr.bf16.gmra.mrb[104].mxu0 %v11784_v37 }
 0x102   : > { %11622 = vmatmul.mubr.bf16.gmra.mrb[104].mxu1 %v11785_v38  ;;  %11497 = vmatprep.mubr.bf16.mxu0 %v11786_v39 }
 0x103   : > { %11625 = vmatprep.mubr.bf16.mxu1 %v11787_v40  ;;  %v11391_v42 = vpop.f32.mrb[0].mxu0  ;;  %v11519_v43 = vpop.f32.mrb[0].mxu1 }
 0x104   : > { %v6949_v44 = vadd.f32 %v11391_v42, %v13047_v41  ;;  %v7461_v45 = vadd.f32 %v11519_v43, %v13047_v41  ;;  %v6940_v46 = vpop.f32.mrb[1].mxu0  ;;  %v7452_v47 = vpop.f32.mrb[1].mxu1 }
 0x105   : > { %v6941_v50 = vadd.f32 %v13047_v41, %v6940_v46  ;;  %v7453_v51 = vadd.f32 %v13047_v41, %v7452_v47  ;;  %v11392_v52 = vpop.f32.mrb[2].mxu0  ;;  %v11520_v53 = vpop.f32.mrb[2].mxu1 }
 0x106   : > { %v6952_v56 = vadd.f32 %v11392_v52, %v13047_v41  ;;  %v7464_v57 = vadd.f32 %v11520_v53, %v13047_v41  ;;  %v6943_v58 = vpop.f32.mrb[3].mxu0  ;;  %v7455_v59 = vpop.f32.mrb[3].mxu1  ;;  %v7965_v62 = vmax.f32 %v6949_v44, 0.0  ;;  %v8093_v63 = vmax.f32 %v7461_v45, 0.0 }
 0x107   : > { %v6944_v60 = vadd.f32 %v13047_v41, %v6943_v58  ;;  %v7456_v61 = vadd.f32 %v13047_v41, %v7455_v59  ;;  %v7963_v3 = vmax.f32 %v6941_v50, 0.0  ;;  %v8091_v4 = vmax.f32 %v7453_v51, 0.0  ;;  %v11796_v50 = vld [vmem:[#allocation7 + $0x1d8] sm:$0xff]  }
 0x108   : > { %v7966_v0 = vmax.f32 %v6952_v56, 0.0  ;;  %v8094_v2 = vmax.f32 %v7464_v57, 0.0  ;;  %v11797_v51 = vld [vmem:[#allocation7 + $0x3d8] sm:$0xff]   ;;  %v11798_v56 = vld [vmem:[#allocation7 + $0x1e0] sm:$0xff]  }
 0x109   : > { %11498 = vmatmul.mubr.bf16.gmra.mrb[108].mxu0 %v11788_v48  ;;  %v7964_v5 = vmax.f32 %v6944_v60, 0.0  ;;  %v8092_v7 = vmax.f32 %v7456_v61, 0.0  ;;  %v11799_v57 = vld [vmem:[#allocation7 + $0x3e0] sm:$0xff]  }
 0x10a   : > { %11626 = vmatmul.mubr.bf16.gmra.mrb[108].mxu1 %v11789_v49  ;;  %11501 = vmatprep.mubr.bf16.mxu0 %v11790_v54  ;;  %v10478_v8 = vpack.c.bf16 %v7966_v0, %v7965_v62  ;;  %v10798_v9 = vpack.c.bf16 %v8094_v2, %v8093_v63 }
 0x10b   : > { %11629 = vmatprep.mubr.bf16.mxu1 %v11791_v55  ;;  %v10473_v10 = vpack.c.bf16 %v7964_v5, %v7963_v3  ;;  %v10793_v11 = vpack.c.bf16 %v8092_v7, %v8091_v4  ;;  %v11395_v12 = vpop.f32.mrb[4].mxu0  ;;  %v11523_v13 = vpop.f32.mrb[4].mxu1 }
 0x10c   : > { %11110 = vst [vmem:[%s13062_s18 + $0x8] sm:$0xff] %v10478_v8   ;;  %11174 = vst [vmem:[%s13062_s18 + $0x208] sm:$0xff] %v10798_v9   ;;  %v6965_v14 = vadd.f32 %v11395_v12, %v13047_v41  ;;  %v7477_v15 = vadd.f32 %v11523_v13, %v13047_v41  ;;  %v6956_v16 = vpop.f32.mrb[5].mxu0  ;;  %v7468_v17 = vpop.f32.mrb[5].mxu1 }
 0x10d   : > { %10474 = vst [vmem:[%s13062_s18] sm:$0xff] %v10473_v10   ;;  %11173 = vst [vmem:[%s13062_s18 + $0x200] sm:$0xff] %v10793_v11   ;;  %v6957_v20 = vadd.f32 %v13047_v41, %v6956_v16  ;;  %v7469_v21 = vadd.f32 %v13047_v41, %v7468_v17  ;;  %v11396_v22 = vpop.f32.mrb[6].mxu0  ;;  %v11524_v23 = vpop.f32.mrb[6].mxu1 }
 0x10e   : > { %v6968_v6 = vadd.f32 %v11396_v22, %v13047_v41  ;;  %v7480_v27 = vadd.f32 %v11524_v23, %v13047_v41  ;;  %v6959_v28 = vpop.f32.mrb[7].mxu0  ;;  %v7471_v26 = vpop.f32.mrb[7].mxu1  ;;  %v7969_v31 = vmax.f32 %v6965_v14, 0.0  ;;  %v8097_v32 = vmax.f32 %v7477_v15, 0.0 }
 0x10f   : > { %v6960_v29 = vadd.f32 %v13047_v41, %v6959_v28  ;;  %v7472_v30 = vadd.f32 %v13047_v41, %v7471_v26  ;;  %v7967_v35 = vmax.f32 %v6957_v20, 0.0  ;;  %v8095_v36 = vmax.f32 %v7469_v21, 0.0  ;;  %v11800_v20 = vld [vmem:[#allocation7 + $0x1e8] sm:$0xff]  }
 0x110   : > { %v7970_v33 = vmax.f32 %v6968_v6, 0.0  ;;  %v8098_v34 = vmax.f32 %v7480_v27, 0.0  ;;  %v11801_v21 = vld [vmem:[#allocation7 + $0x3e8] sm:$0xff]   ;;  %v11802_v6 = vld [vmem:[#allocation7 + $0x1f0] sm:$0xff]  }
 0x111   : > { %11502 = vmatmul.mubr.bf16.gmra.mrb[112].mxu0 %v11792_v18  ;;  %v7968_v37 = vmax.f32 %v6960_v29, 0.0  ;;  %v8096_v38 = vmax.f32 %v7472_v30, 0.0  ;;  %v11803_v27 = vld [vmem:[#allocation7 + $0x3f0] sm:$0xff]  }
 0x112   : > { %11630 = vmatmul.mubr.bf16.gmra.mrb[112].mxu1 %v11793_v19  ;;  %11505 = vmatprep.mubr.bf16.mxu0 %v11794_v24  ;;  %v10488_v39 = vpack.c.bf16 %v7970_v33, %v7969_v31  ;;  %v10808_v40 = vpack.c.bf16 %v8098_v34, %v8097_v32 }
 0x113   : > { %11633 = vmatprep.mubr.bf16.mxu1 %v11795_v25  ;;  %v10483_v42 = vpack.c.bf16 %v7968_v37, %v7967_v35  ;;  %v10803_v43 = vpack.c.bf16 %v8096_v38, %v8095_v36  ;;  %v11399_v44 = vpop.f32.mrb[8].mxu0  ;;  %v11527_v45 = vpop.f32.mrb[8].mxu1 }
 0x114   : > { %11112 = vst [vmem:[%s13062_s18 + $0x18] sm:$0xff] %v10488_v39   ;;  %11176 = vst [vmem:[%s13062_s18 + $0x218] sm:$0xff] %v10808_v40   ;;  %v6981_v46 = vadd.f32 %v11399_v44, %v13047_v41  ;;  %v7493_v47 = vadd.f32 %v11527_v45, %v13047_v41  ;;  %v6972_v48 = vpop.f32.mrb[9].mxu0  ;;  %v7484_v49 = vpop.f32.mrb[9].mxu1 }
 0x115   : > { %11111 = vst [vmem:[%s13062_s18 + $0x10] sm:$0xff] %v10483_v42   ;;  %11175 = vst [vmem:[%s13062_s18 + $0x210] sm:$0xff] %v10803_v43   ;;  %v6973_v52 = vadd.f32 %v13047_v41, %v6972_v48  ;;  %v7485_v53 = vadd.f32 %v13047_v41, %v7484_v49  ;;  %v11400_v54 = vpop.f32.mrb[10].mxu0  ;;  %v11528_v55 = vpop.f32.mrb[10].mxu1 }
 0x116   : > { %v6984_v58 = vadd.f32 %v11400_v54, %v13047_v41  ;;  %v7496_v59 = vadd.f32 %v11528_v55, %v13047_v41  ;;  %v6975_v60 = vpop.f32.mrb[11].mxu0  ;;  %v7487_v61 = vpop.f32.mrb[11].mxu1  ;;  %v7973_v0 = vmax.f32 %v6981_v46, 0.0  ;;  %v8101_v2 = vmax.f32 %v7493_v47, 0.0 }
 0x117   : > { %v6976_v62 = vadd.f32 %v13047_v41, %v6975_v60  ;;  %v7488_v63 = vadd.f32 %v13047_v41, %v7487_v61  ;;  %v7971_v5 = vmax.f32 %v6973_v52, 0.0  ;;  %v8099_v7 = vmax.f32 %v7485_v53, 0.0  ;;  %v11804_v52 = vld [vmem:[#allocation7 + $0x1f8] sm:$0xff]  }
 0x118   : > { %v7974_v3 = vmax.f32 %v6984_v58, 0.0  ;;  %v8102_v4 = vmax.f32 %v7496_v59, 0.0  ;;  %v11805_v53 = vld [vmem:[#allocation7 + $0x3f8] sm:$0xff]  }
 0x119   : > { %11506 = vmatmul.mubr.bf16.gmra.mrb[116].mxu0 %v11796_v50  ;;  %v7972_v8 = vmax.f32 %v6976_v62, 0.0  ;;  %v8100_v9 = vmax.f32 %v7488_v63, 0.0 }
 0x11a   : > { %11634 = vmatmul.mubr.bf16.gmra.mrb[116].mxu1 %v11797_v51  ;;  %11509 = vmatprep.mubr.bf16.mxu0 %v11798_v56  ;;  %v10498_v10 = vpack.c.bf16 %v7974_v3, %v7973_v0  ;;  %v10818_v11 = vpack.c.bf16 %v8102_v4, %v8101_v2 }
 0x11b   : > { %11637 = vmatprep.mubr.bf16.mxu1 %v11799_v57  ;;  %v10493_v12 = vpack.c.bf16 %v7972_v8, %v7971_v5  ;;  %v10813_v13 = vpack.c.bf16 %v8100_v9, %v8099_v7  ;;  %v11403_v14 = vpop.f32.mrb[12].mxu0  ;;  %v11531_v15 = vpop.f32.mrb[12].mxu1 }
 0x11c   : > { %11114 = vst [vmem:[%s13062_s18 + $0x28] sm:$0xff] %v10498_v10   ;;  %11178 = vst [vmem:[%s13062_s18 + $0x228] sm:$0xff] %v10818_v11   ;;  %v6997_v16 = vadd.f32 %v11403_v14, %v13047_v41  ;;  %v7509_v17 = vadd.f32 %v11531_v15, %v13047_v41  ;;  %v6988_v18 = vpop.f32.mrb[13].mxu0  ;;  %v7500_v19 = vpop.f32.mrb[13].mxu1 }
 0x11d   : > { %11113 = vst [vmem:[%s13062_s18 + $0x20] sm:$0xff] %v10493_v12   ;;  %11177 = vst [vmem:[%s13062_s18 + $0x220] sm:$0xff] %v10813_v13   ;;  %v6989_v22 = vadd.f32 %v13047_v41, %v6988_v18  ;;  %v7501_v23 = vadd.f32 %v13047_v41, %v7500_v19  ;;  %v11404_v24 = vpop.f32.mrb[14].mxu0  ;;  %v11532_v25 = vpop.f32.mrb[14].mxu1 }
 0x11e   : > { %v7000_v28 = vadd.f32 %v11404_v24, %v13047_v41  ;;  %v7512_v26 = vadd.f32 %v11532_v25, %v13047_v41  ;;  %v6991_v29 = vpop.f32.mrb[15].mxu0  ;;  %v7503_v30 = vpop.f32.mrb[15].mxu1  ;;  %v7977_v33 = vmax.f32 %v6997_v16, 0.0  ;;  %v8105_v34 = vmax.f32 %v7509_v17, 0.0 }
 0x11f   : > { %v6992_v31 = vadd.f32 %v13047_v41, %v6991_v29  ;;  %v7504_v32 = vadd.f32 %v13047_v41, %v7503_v30  ;;  %v7975_v37 = vmax.f32 %v6989_v22, 0.0  ;;  %v8103_v38 = vmax.f32 %v7501_v23, 0.0 }
 0x120   : > { %v7978_v35 = vmax.f32 %v7000_v28, 0.0  ;;  %v8106_v36 = vmax.f32 %v7512_v26, 0.0 }
 0x121   : > { %11510 = vmatmul.mubr.bf16.gmra.mrb[120].mxu0 %v11800_v20  ;;  %v7976_v39 = vmax.f32 %v6992_v31, 0.0  ;;  %v8104_v40 = vmax.f32 %v7504_v32, 0.0 }
 0x122   : > { %11638 = vmatmul.mubr.bf16.gmra.mrb[120].mxu1 %v11801_v21  ;;  %11513 = vmatprep.mubr.bf16.mxu0 %v11802_v6  ;;  %v10508_v42 = vpack.c.bf16 %v7978_v35, %v7977_v33  ;;  %v10828_v43 = vpack.c.bf16 %v8106_v36, %v8105_v34 }
 0x123   : > { %11641 = vmatprep.mubr.bf16.mxu1 %v11803_v27  ;;  %v10503_v44 = vpack.c.bf16 %v7976_v39, %v7975_v37  ;;  %v10823_v45 = vpack.c.bf16 %v8104_v40, %v8103_v38  ;;  %v11407_v46 = vpop.f32.mrb[16].mxu0  ;;  %v11535_v47 = vpop.f32.mrb[16].mxu1 }
 0x124   : > { %11116 = vst [vmem:[%s13062_s18 + $0x38] sm:$0xff] %v10508_v42   ;;  %11180 = vst [vmem:[%s13062_s18 + $0x238] sm:$0xff] %v10828_v43   ;;  %v7013_v48 = vadd.f32 %v11407_v46, %v13047_v41  ;;  %v7525_v49 = vadd.f32 %v11535_v47, %v13047_v41  ;;  %v7004_v50 = vpop.f32.mrb[17].mxu0  ;;  %v7516_v51 = vpop.f32.mrb[17].mxu1 }
 0x125   : > { %11115 = vst [vmem:[%s13062_s18 + $0x30] sm:$0xff] %v10503_v44   ;;  %11179 = vst [vmem:[%s13062_s18 + $0x230] sm:$0xff] %v10823_v45   ;;  %v7005_v54 = vadd.f32 %v13047_v41, %v7004_v50  ;;  %v7517_v55 = vadd.f32 %v13047_v41, %v7516_v51  ;;  %v11408_v56 = vpop.f32.mrb[18].mxu0  ;;  %v11536_v57 = vpop.f32.mrb[18].mxu1 }
 0x126   : > { %v7016_v58 = vadd.f32 %v11408_v56, %v13047_v41  ;;  %v7528_v59 = vadd.f32 %v11536_v57, %v13047_v41  ;;  %v7007_v60 = vpop.f32.mrb[19].mxu0  ;;  %v7519_v61 = vpop.f32.mrb[19].mxu1  ;;  %v7981_v0 = vmax.f32 %v7013_v48, 0.0  ;;  %v8109_v2 = vmax.f32 %v7525_v49, 0.0 }
 0x127   : > { %v7008_v62 = vadd.f32 %v13047_v41, %v7007_v60  ;;  %v7520_v63 = vadd.f32 %v13047_v41, %v7519_v61  ;;  %v7979_v5 = vmax.f32 %v7005_v54, 0.0  ;;  %v8107_v7 = vmax.f32 %v7517_v55, 0.0 }
 0x128   : > { %v7982_v3 = vmax.f32 %v7016_v58, 0.0  ;;  %v8110_v4 = vmax.f32 %v7528_v59, 0.0 }
 0x129   : > { %11514 = vmatmul.mubr.bf16.gmra.mrb[124].mxu0 %v11804_v52  ;;  %v7980_v8 = vmax.f32 %v7008_v62, 0.0  ;;  %v8108_v9 = vmax.f32 %v7520_v63, 0.0 }
 0x12a   : > { %11642 = vmatmul.mubr.bf16.gmra.mrb[124].mxu1 %v11805_v53  ;;  %v10518_v10 = vpack.c.bf16 %v7982_v3, %v7981_v0  ;;  %v10838_v11 = vpack.c.bf16 %v8110_v4, %v8109_v2 }
 0x12b   : > { %v10513_v12 = vpack.c.bf16 %v7980_v8, %v7979_v5  ;;  %v10833_v13 = vpack.c.bf16 %v8108_v9, %v8107_v7  ;;  %v11411_v14 = vpop.f32.mrb[20].mxu0 }
 0x12c   : > { %v11539_v15 = vpop.f32.mrb[20].mxu1  ;;  %11118 = vst [vmem:[%s13062_s18 + $0x48] sm:$0xff] %v10518_v10   ;;  %11182 = vst [vmem:[%s13062_s18 + $0x248] sm:$0xff] %v10838_v11   ;;  %v7029_v16 = vadd.f32 %v11411_v14, %v13047_v41  ;;  %v7020_v18 = vpop.f32.mrb[21].mxu0 }
 0x12d   : > { %v7541_v17 = vadd.f32 %v11539_v15, %v13047_v41  ;;  %v7532_v19 = vpop.f32.mrb[21].mxu1  ;;  %11117 = vst [vmem:[%s13062_s18 + $0x40] sm:$0xff] %v10513_v12   ;;  %11181 = vst [vmem:[%s13062_s18 + $0x240] sm:$0xff] %v10833_v13   ;;  %v7021_v20 = vadd.f32 %v13047_v41, %v7020_v18  ;;  %v11412_v22 = vpop.f32.mrb[22].mxu0 }
 0x12e   : > { %v7533_v21 = vadd.f32 %v13047_v41, %v7532_v19  ;;  %v11540_v23 = vpop.f32.mrb[22].mxu1  ;;  %v7032_v24 = vadd.f32 %v11412_v22, %v13047_v41  ;;  %v7023_v6 = vpop.f32.mrb[23].mxu0  ;;  %v7985_v29 = vmax.f32 %v7029_v16, 0.0 }
 0x12f   : > { %v7544_v25 = vadd.f32 %v11540_v23, %v13047_v41  ;;  %v7535_v27 = vpop.f32.mrb[23].mxu1  ;;  %v7024_v28 = vadd.f32 %v13047_v41, %v7023_v6  ;;  %v8113_v30 = vmax.f32 %v7541_v17, 0.0  ;;  %v7983_v33 = vmax.f32 %v7021_v20, 0.0 }
 0x130   : > { %v7536_v26 = vadd.f32 %v13047_v41, %v7535_v27  ;;  %v7986_v31 = vmax.f32 %v7032_v24, 0.0  ;;  %v8111_v34 = vmax.f32 %v7533_v21, 0.0 }
 0x131   : > { %v8114_v32 = vmax.f32 %v7544_v25, 0.0  ;;  %v7984_v35 = vmax.f32 %v7024_v28, 0.0 }
 0x132   : > { %v8112_v36 = vmax.f32 %v7536_v26, 0.0  ;;  %v10528_v37 = vpack.c.bf16 %v7986_v31, %v7985_v29 }
 0x133   : > { %v10848_v38 = vpack.c.bf16 %v8114_v32, %v8113_v30  ;;  %v10523_v39 = vpack.c.bf16 %v7984_v35, %v7983_v33  ;;  %v11415_v42 = vpop.f32.mrb[24].mxu0 }
 0x134   : > { %v10843_v40 = vpack.c.bf16 %v8112_v36, %v8111_v34  ;;  %v11543_v43 = vpop.f32.mrb[24].mxu1  ;;  %11120 = vst [vmem:[%s13062_s18 + $0x58] sm:$0xff] %v10528_v37   ;;  %v7045_v44 = vadd.f32 %v11415_v42, %v13047_v41  ;;  %v7036_v46 = vpop.f32.mrb[25].mxu0 }
 0x135   : > { %11184 = vst [vmem:[%s13062_s18 + $0x258] sm:$0xff] %v10848_v38   ;;  %v7557_v45 = vadd.f32 %v11543_v43, %v13047_v41  ;;  %v7548_v47 = vpop.f32.mrb[25].mxu1  ;;  %11119 = vst [vmem:[%s13062_s18 + $0x50] sm:$0xff] %v10523_v39   ;;  %v7037_v48 = vadd.f32 %v13047_v41, %v7036_v46  ;;  %v11416_v50 = vpop.f32.mrb[26].mxu0 }
 0x136   : > { %11183 = vst [vmem:[%s13062_s18 + $0x250] sm:$0xff] %v10843_v40   ;;  %v7549_v49 = vadd.f32 %v13047_v41, %v7548_v47  ;;  %v11544_v51 = vpop.f32.mrb[26].mxu1  ;;  %v7048_v52 = vadd.f32 %v11416_v50, %v13047_v41  ;;  %v7039_v54 = vpop.f32.mrb[27].mxu0  ;;  %v7989_v58 = vmax.f32 %v7045_v44, 0.0 }
 0x137   : > { %v7560_v53 = vadd.f32 %v11544_v51, %v13047_v41  ;;  %v7551_v55 = vpop.f32.mrb[27].mxu1  ;;  %v7040_v56 = vadd.f32 %v13047_v41, %v7039_v54  ;;  %v8117_v59 = vmax.f32 %v7557_v45, 0.0  ;;  %v7987_v62 = vmax.f32 %v7037_v48, 0.0 }
 0x138   : > { %v7552_v57 = vadd.f32 %v13047_v41, %v7551_v55  ;;  %v7990_v60 = vmax.f32 %v7048_v52, 0.0  ;;  %v8115_v63 = vmax.f32 %v7549_v49, 0.0 }
 0x139   : > { %v8118_v61 = vmax.f32 %v7560_v53, 0.0  ;;  %v7988_v0 = vmax.f32 %v7040_v56, 0.0 }
 0x13a   : > { %v8116_v2 = vmax.f32 %v7552_v57, 0.0  ;;  %v10538_v3 = vpack.c.bf16 %v7990_v60, %v7989_v58 }
 0x13b   : > { %v10858_v4 = vpack.c.bf16 %v8118_v61, %v8117_v59  ;;  %v10533_v5 = vpack.c.bf16 %v7988_v0, %v7987_v62  ;;  %v11419_v8 = vpop.f32.mrb[28].mxu0 }
 0x13c   : > { %v10853_v7 = vpack.c.bf16 %v8116_v2, %v8115_v63  ;;  %v11547_v9 = vpop.f32.mrb[28].mxu1  ;;  %11122 = vst [vmem:[%s13062_s18 + $0x68] sm:$0xff] %v10538_v3   ;;  %v7061_v10 = vadd.f32 %v11419_v8, %v13047_v41  ;;  %v7052_v12 = vpop.f32.mrb[29].mxu0 }
 0x13d   : > { %11186 = vst [vmem:[%s13062_s18 + $0x268] sm:$0xff] %v10858_v4   ;;  %v7573_v11 = vadd.f32 %v11547_v9, %v13047_v41  ;;  %v7564_v13 = vpop.f32.mrb[29].mxu1  ;;  %11121 = vst [vmem:[%s13062_s18 + $0x60] sm:$0xff] %v10533_v5   ;;  %v7053_v14 = vadd.f32 %v13047_v41, %v7052_v12  ;;  %v11420_v16 = vpop.f32.mrb[30].mxu0 }
 0x13e   : > { %11185 = vst [vmem:[%s13062_s18 + $0x260] sm:$0xff] %v10853_v7   ;;  %v7565_v15 = vadd.f32 %v13047_v41, %v7564_v13  ;;  %v11548_v17 = vpop.f32.mrb[30].mxu1  ;;  %v7064_v18 = vadd.f32 %v11420_v16, %v13047_v41  ;;  %v7055_v20 = vpop.f32.mrb[31].mxu0  ;;  %v7993_v24 = vmax.f32 %v7061_v10, 0.0 }
 0x13f   : > { %v7576_v19 = vadd.f32 %v11548_v17, %v13047_v41  ;;  %v7567_v21 = vpop.f32.mrb[31].mxu1  ;;  %v7056_v22 = vadd.f32 %v13047_v41, %v7055_v20  ;;  %v8121_v25 = vmax.f32 %v7573_v11, 0.0  ;;  %v7991_v28 = vmax.f32 %v7053_v14, 0.0 }
 0x140   : > { %v7568_v23 = vadd.f32 %v13047_v41, %v7567_v21  ;;  %v7994_v6 = vmax.f32 %v7064_v18, 0.0  ;;  %v8119_v26 = vmax.f32 %v7565_v15, 0.0 }
 0x141   : > { %v8122_v27 = vmax.f32 %v7576_v19, 0.0  ;;  %v7992_v29 = vmax.f32 %v7056_v22, 0.0 }
 0x142   : > { %v8120_v30 = vmax.f32 %v7568_v23, 0.0  ;;  %v10548_v31 = vpack.c.bf16 %v7994_v6, %v7993_v24 }
 0x143   : > { %v10868_v32 = vpack.c.bf16 %v8122_v27, %v8121_v25  ;;  %v10543_v33 = vpack.c.bf16 %v7992_v29, %v7991_v28  ;;  %v11423_v35 = vpop.f32.mrb[32].mxu0 }
 0x144   : > { %v10863_v34 = vpack.c.bf16 %v8120_v30, %v8119_v26  ;;  %v11551_v36 = vpop.f32.mrb[32].mxu1  ;;  %11124 = vst [vmem:[%s13062_s18 + $0x78] sm:$0xff] %v10548_v31   ;;  %v7077_v37 = vadd.f32 %v11423_v35, %v13047_v41  ;;  %v7068_v39 = vpop.f32.mrb[33].mxu0 }
 0x145   : > { %11188 = vst [vmem:[%s13062_s18 + $0x278] sm:$0xff] %v10868_v32   ;;  %v7589_v38 = vadd.f32 %v11551_v36, %v13047_v41  ;;  %v7580_v40 = vpop.f32.mrb[33].mxu1  ;;  %11123 = vst [vmem:[%s13062_s18 + $0x70] sm:$0xff] %v10543_v33   ;;  %v7069_v42 = vadd.f32 %v13047_v41, %v7068_v39  ;;  %v11424_v44 = vpop.f32.mrb[34].mxu0 }
 0x146   : > { %11187 = vst [vmem:[%s13062_s18 + $0x270] sm:$0xff] %v10863_v34   ;;  %v7581_v43 = vadd.f32 %v13047_v41, %v7580_v40  ;;  %v11552_v45 = vpop.f32.mrb[34].mxu1  ;;  %v7080_v46 = vadd.f32 %v11424_v44, %v13047_v41  ;;  %v7071_v48 = vpop.f32.mrb[35].mxu0  ;;  %v7997_v52 = vmax.f32 %v7077_v37, 0.0 }
 0x147   : > { %v7592_v47 = vadd.f32 %v11552_v45, %v13047_v41  ;;  %v7583_v49 = vpop.f32.mrb[35].mxu1  ;;  %v7072_v50 = vadd.f32 %v13047_v41, %v7071_v48  ;;  %v8125_v53 = vmax.f32 %v7589_v38, 0.0  ;;  %v7995_v56 = vmax.f32 %v7069_v42, 0.0 }
 0x148   : > { %v7584_v51 = vadd.f32 %v13047_v41, %v7583_v49  ;;  %v7998_v54 = vmax.f32 %v7080_v46, 0.0  ;;  %v8123_v57 = vmax.f32 %v7581_v43, 0.0 }
 0x149   : > { %v8126_v55 = vmax.f32 %v7592_v47, 0.0  ;;  %v7996_v58 = vmax.f32 %v7072_v50, 0.0 }
 0x14a   : > { %v8124_v59 = vmax.f32 %v7584_v51, 0.0  ;;  %v10558_v60 = vpack.c.bf16 %v7998_v54, %v7997_v52 }
 0x14b   : > { %v10878_v61 = vpack.c.bf16 %v8126_v55, %v8125_v53  ;;  %v10553_v62 = vpack.c.bf16 %v7996_v58, %v7995_v56  ;;  %v11427_v0 = vpop.f32.mrb[36].mxu0 }
 0x14c   : > { %v10873_v63 = vpack.c.bf16 %v8124_v59, %v8123_v57  ;;  %v11555_v2 = vpop.f32.mrb[36].mxu1  ;;  %11126 = vst [vmem:[%s13062_s18 + $0x88] sm:$0xff] %v10558_v60   ;;  %v7093_v3 = vadd.f32 %v11427_v0, %v13047_v41  ;;  %v7084_v5 = vpop.f32.mrb[37].mxu0 }
 0x14d   : > { %11190 = vst [vmem:[%s13062_s18 + $0x288] sm:$0xff] %v10878_v61   ;;  %v7605_v4 = vadd.f32 %v11555_v2, %v13047_v41  ;;  %v7596_v7 = vpop.f32.mrb[37].mxu1  ;;  %11125 = vst [vmem:[%s13062_s18 + $0x80] sm:$0xff] %v10553_v62   ;;  %v7085_v8 = vadd.f32 %v13047_v41, %v7084_v5  ;;  %v11428_v10 = vpop.f32.mrb[38].mxu0 }
 0x14e   : > { %11189 = vst [vmem:[%s13062_s18 + $0x280] sm:$0xff] %v10873_v63   ;;  %v7597_v9 = vadd.f32 %v13047_v41, %v7596_v7  ;;  %v11556_v11 = vpop.f32.mrb[38].mxu1  ;;  %v7096_v12 = vadd.f32 %v11428_v10, %v13047_v41  ;;  %v7087_v14 = vpop.f32.mrb[39].mxu0  ;;  %v8001_v18 = vmax.f32 %v7093_v3, 0.0 }
 0x14f   : > { %v7608_v13 = vadd.f32 %v11556_v11, %v13047_v41  ;;  %v7599_v15 = vpop.f32.mrb[39].mxu1  ;;  %v7088_v16 = vadd.f32 %v13047_v41, %v7087_v14  ;;  %v8129_v19 = vmax.f32 %v7605_v4, 0.0  ;;  %v7999_v22 = vmax.f32 %v7085_v8, 0.0 }
 0x150   : > { %v7600_v17 = vadd.f32 %v13047_v41, %v7599_v15  ;;  %v8002_v20 = vmax.f32 %v7096_v12, 0.0  ;;  %v8127_v23 = vmax.f32 %v7597_v9, 0.0 }
 0x151   : > { %v8130_v21 = vmax.f32 %v7608_v13, 0.0  ;;  %v8000_v24 = vmax.f32 %v7088_v16, 0.0 }
 0x152   : > { %v8128_v25 = vmax.f32 %v7600_v17, 0.0  ;;  %v10568_v6 = vpack.c.bf16 %v8002_v20, %v8001_v18 }
 0x153   : > { %v10888_v27 = vpack.c.bf16 %v8130_v21, %v8129_v19  ;;  %v10563_v28 = vpack.c.bf16 %v8000_v24, %v7999_v22  ;;  %v11431_v29 = vpop.f32.mrb[40].mxu0 }
 0x154   : > { %v10883_v26 = vpack.c.bf16 %v8128_v25, %v8127_v23  ;;  %v11559_v30 = vpop.f32.mrb[40].mxu1  ;;  %11128 = vst [vmem:[%s13062_s18 + $0x98] sm:$0xff] %v10568_v6   ;;  %v7109_v31 = vadd.f32 %v11431_v29, %v13047_v41  ;;  %v7100_v33 = vpop.f32.mrb[41].mxu0 }
 0x155   : > { %11192 = vst [vmem:[%s13062_s18 + $0x298] sm:$0xff] %v10888_v27   ;;  %v7621_v32 = vadd.f32 %v11559_v30, %v13047_v41  ;;  %v7612_v34 = vpop.f32.mrb[41].mxu1  ;;  %11127 = vst [vmem:[%s13062_s18 + $0x90] sm:$0xff] %v10563_v28   ;;  %v7101_v35 = vadd.f32 %v13047_v41, %v7100_v33  ;;  %v11432_v37 = vpop.f32.mrb[42].mxu0 }
 0x156   : > { %11191 = vst [vmem:[%s13062_s18 + $0x290] sm:$0xff] %v10883_v26   ;;  %v7613_v36 = vadd.f32 %v13047_v41, %v7612_v34  ;;  %v11560_v38 = vpop.f32.mrb[42].mxu1  ;;  %v7112_v39 = vadd.f32 %v11432_v37, %v13047_v41  ;;  %v7103_v42 = vpop.f32.mrb[43].mxu0  ;;  %v8005_v46 = vmax.f32 %v7109_v31, 0.0 }
 0x157   : > { %v7624_v40 = vadd.f32 %v11560_v38, %v13047_v41  ;;  %v7615_v43 = vpop.f32.mrb[43].mxu1  ;;  %v7104_v44 = vadd.f32 %v13047_v41, %v7103_v42  ;;  %v8133_v47 = vmax.f32 %v7621_v32, 0.0  ;;  %v8003_v50 = vmax.f32 %v7101_v35, 0.0 }
 0x158   : > { %v7616_v45 = vadd.f32 %v13047_v41, %v7615_v43  ;;  %v8006_v48 = vmax.f32 %v7112_v39, 0.0  ;;  %v8131_v51 = vmax.f32 %v7613_v36, 0.0 }
 0x159   : > { %v8134_v49 = vmax.f32 %v7624_v40, 0.0  ;;  %v8004_v52 = vmax.f32 %v7104_v44, 0.0 }
 0x15a   : > { %v8132_v53 = vmax.f32 %v7616_v45, 0.0  ;;  %v10578_v54 = vpack.c.bf16 %v8006_v48, %v8005_v46 }
 0x15b   : > { %v10898_v55 = vpack.c.bf16 %v8134_v49, %v8133_v47  ;;  %v10573_v56 = vpack.c.bf16 %v8004_v52, %v8003_v50 }
 0x15c   : > { %v10893_v57 = vpack.c.bf16 %v8132_v53, %v8131_v51  ;;  %v11435_v58 = vpop.f32.mrb[44].mxu0  ;;  %v11563_v59 = vpop.f32.mrb[44].mxu1  ;;  %11130 = vst [vmem:[%s13062_s18 + $0xa8] sm:$0xff] %v10578_v54  }
 0x15d   : > { %11194 = vst [vmem:[%s13062_s18 + $0x2a8] sm:$0xff] %v10898_v55   ;;  %v7125_v60 = vadd.f32 %v11435_v58, %v13047_v41  ;;  %v7637_v61 = vadd.f32 %v11563_v59, %v13047_v41  ;;  %v7116_v62 = vpop.f32.mrb[45].mxu0  ;;  %v7628_v63 = vpop.f32.mrb[45].mxu1  ;;  %11129 = vst [vmem:[%s13062_s18 + $0xa0] sm:$0xff] %v10573_v56  }
 0x15e   : > { %11193 = vst [vmem:[%s13062_s18 + $0x2a0] sm:$0xff] %v10893_v57   ;;  %v7117_v0 = vadd.f32 %v13047_v41, %v7116_v62  ;;  %v7629_v2 = vadd.f32 %v13047_v41, %v7628_v63  ;;  %v11436_v3 = vpop.f32.mrb[46].mxu0  ;;  %v11564_v4 = vpop.f32.mrb[46].mxu1 }
 0x15f   : > { %v7128_v5 = vadd.f32 %v11436_v3, %v13047_v41  ;;  %v7640_v7 = vadd.f32 %v11564_v4, %v13047_v41  ;;  %v7119_v8 = vpop.f32.mrb[47].mxu0  ;;  %v7631_v9 = vpop.f32.mrb[47].mxu1  ;;  %v8009_v12 = vmax.f32 %v7125_v60, 0.0  ;;  %v8137_v13 = vmax.f32 %v7637_v61, 0.0 }
 0x160   : > { %v7120_v10 = vadd.f32 %v13047_v41, %v7119_v8  ;;  %v7632_v11 = vadd.f32 %v13047_v41, %v7631_v9  ;;  %v8007_v16 = vmax.f32 %v7117_v0, 0.0  ;;  %v8135_v17 = vmax.f32 %v7629_v2, 0.0 }
 0x161   : > { %v8010_v14 = vmax.f32 %v7128_v5, 0.0  ;;  %v8138_v15 = vmax.f32 %v7640_v7, 0.0 }
 0x162   : > { %v8008_v18 = vmax.f32 %v7120_v10, 0.0  ;;  %v8136_v19 = vmax.f32 %v7632_v11, 0.0 }
 0x163   : > { %v10588_v20 = vpack.c.bf16 %v8010_v14, %v8009_v12  ;;  %v10908_v21 = vpack.c.bf16 %v8138_v15, %v8137_v13 }
 0x164   : > { %v10583_v22 = vpack.c.bf16 %v8008_v18, %v8007_v16  ;;  %v10903_v23 = vpack.c.bf16 %v8136_v19, %v8135_v17  ;;  %v11439_v24 = vpop.f32.mrb[48].mxu0  ;;  %v11567_v25 = vpop.f32.mrb[48].mxu1 }
 0x165   : > { %11132 = vst [vmem:[%s13062_s18 + $0xb8] sm:$0xff] %v10588_v20   ;;  %11196 = vst [vmem:[%s13062_s18 + $0x2b8] sm:$0xff] %v10908_v21   ;;  %v7141_v6 = vadd.f32 %v11439_v24, %v13047_v41  ;;  %v7653_v27 = vadd.f32 %v11567_v25, %v13047_v41  ;;  %v7132_v28 = vpop.f32.mrb[49].mxu0  ;;  %v7644_v26 = vpop.f32.mrb[49].mxu1 }
 0x166   : > { %11131 = vst [vmem:[%s13062_s18 + $0xb0] sm:$0xff] %v10583_v22   ;;  %11195 = vst [vmem:[%s13062_s18 + $0x2b0] sm:$0xff] %v10903_v23   ;;  %v7133_v29 = vadd.f32 %v13047_v41, %v7132_v28  ;;  %v7645_v30 = vadd.f32 %v13047_v41, %v7644_v26  ;;  %v11440_v31 = vpop.f32.mrb[50].mxu0  ;;  %v11568_v32 = vpop.f32.mrb[50].mxu1 }
 0x167   : > { %v7144_v33 = vadd.f32 %v11440_v31, %v13047_v41  ;;  %v7656_v34 = vadd.f32 %v11568_v32, %v13047_v41  ;;  %v7135_v35 = vpop.f32.mrb[51].mxu0  ;;  %v7647_v36 = vpop.f32.mrb[51].mxu1  ;;  %v8013_v39 = vmax.f32 %v7141_v6, 0.0  ;;  %v8141_v40 = vmax.f32 %v7653_v27, 0.0 }
 0x168   : > { %v7136_v37 = vadd.f32 %v13047_v41, %v7135_v35  ;;  %v7648_v38 = vadd.f32 %v13047_v41, %v7647_v36  ;;  %v8011_v44 = vmax.f32 %v7133_v29, 0.0  ;;  %v8139_v45 = vmax.f32 %v7645_v30, 0.0 }
 0x169   : > { %v8014_v42 = vmax.f32 %v7144_v33, 0.0  ;;  %v8142_v43 = vmax.f32 %v7656_v34, 0.0 }
 0x16a   : > { %v8012_v46 = vmax.f32 %v7136_v37, 0.0  ;;  %v8140_v47 = vmax.f32 %v7648_v38, 0.0 }
 0x16b   : > { %v10598_v48 = vpack.c.bf16 %v8014_v42, %v8013_v39  ;;  %v10918_v49 = vpack.c.bf16 %v8142_v43, %v8141_v40 }
 0x16c   : > { %v10593_v50 = vpack.c.bf16 %v8012_v46, %v8011_v44  ;;  %v10913_v51 = vpack.c.bf16 %v8140_v47, %v8139_v45  ;;  %v11443_v52 = vpop.f32.mrb[52].mxu0  ;;  %v11571_v53 = vpop.f32.mrb[52].mxu1 }
 0x16d   : > { %11134 = vst [vmem:[%s13062_s18 + $0xc8] sm:$0xff] %v10598_v48   ;;  %11198 = vst [vmem:[%s13062_s18 + $0x2c8] sm:$0xff] %v10918_v49   ;;  %v7157_v54 = vadd.f32 %v11443_v52, %v13047_v41  ;;  %v7669_v55 = vadd.f32 %v11571_v53, %v13047_v41  ;;  %v7148_v56 = vpop.f32.mrb[53].mxu0  ;;  %v7660_v57 = vpop.f32.mrb[53].mxu1 }
 0x16e   : > { %11133 = vst [vmem:[%s13062_s18 + $0xc0] sm:$0xff] %v10593_v50   ;;  %11197 = vst [vmem:[%s13062_s18 + $0x2c0] sm:$0xff] %v10913_v51   ;;  %v7149_v58 = vadd.f32 %v13047_v41, %v7148_v56  ;;  %v7661_v59 = vadd.f32 %v13047_v41, %v7660_v57  ;;  %v11444_v60 = vpop.f32.mrb[54].mxu0  ;;  %v11572_v61 = vpop.f32.mrb[54].mxu1 }
 0x16f   : > { %v7160_v62 = vadd.f32 %v11444_v60, %v13047_v41  ;;  %v7672_v63 = vadd.f32 %v11572_v61, %v13047_v41  ;;  %v7151_v0 = vpop.f32.mrb[55].mxu0  ;;  %v7663_v2 = vpop.f32.mrb[55].mxu1  ;;  %v8017_v5 = vmax.f32 %v7157_v54, 0.0  ;;  %v8145_v7 = vmax.f32 %v7669_v55, 0.0 }
 0x170   : > { %v7152_v3 = vadd.f32 %v13047_v41, %v7151_v0  ;;  %v7664_v4 = vadd.f32 %v13047_v41, %v7663_v2  ;;  %v8015_v10 = vmax.f32 %v7149_v58, 0.0  ;;  %v8143_v11 = vmax.f32 %v7661_v59, 0.0 }
 0x171   : > { %v8018_v8 = vmax.f32 %v7160_v62, 0.0  ;;  %v8146_v9 = vmax.f32 %v7672_v63, 0.0 }
 0x172   : > { %v8016_v12 = vmax.f32 %v7152_v3, 0.0  ;;  %v8144_v13 = vmax.f32 %v7664_v4, 0.0 }
 0x173   : > { %v10608_v14 = vpack.c.bf16 %v8018_v8, %v8017_v5  ;;  %v10928_v15 = vpack.c.bf16 %v8146_v9, %v8145_v7 }
 0x174   : > { %v10603_v16 = vpack.c.bf16 %v8016_v12, %v8015_v10  ;;  %v10923_v17 = vpack.c.bf16 %v8144_v13, %v8143_v11  ;;  %v11447_v18 = vpop.f32.mrb[56].mxu0  ;;  %v11575_v19 = vpop.f32.mrb[56].mxu1 }
 0x175   : > { %11136 = vst [vmem:[%s13062_s18 + $0xd8] sm:$0xff] %v10608_v14   ;;  %11200 = vst [vmem:[%s13062_s18 + $0x2d8] sm:$0xff] %v10928_v15   ;;  %v7173_v20 = vadd.f32 %v11447_v18, %v13047_v41  ;;  %v7685_v21 = vadd.f32 %v11575_v19, %v13047_v41  ;;  %v7164_v22 = vpop.f32.mrb[57].mxu0  ;;  %v7676_v23 = vpop.f32.mrb[57].mxu1 }
 0x176   : > { %11135 = vst [vmem:[%s13062_s18 + $0xd0] sm:$0xff] %v10603_v16   ;;  %11199 = vst [vmem:[%s13062_s18 + $0x2d0] sm:$0xff] %v10923_v17   ;;  %v7165_v24 = vadd.f32 %v13047_v41, %v7164_v22  ;;  %v7677_v25 = vadd.f32 %v13047_v41, %v7676_v23  ;;  %v11448_v6 = vpop.f32.mrb[58].mxu0  ;;  %v11576_v27 = vpop.f32.mrb[58].mxu1 }
 0x177   : > { %v7176_v28 = vadd.f32 %v11448_v6, %v13047_v41  ;;  %v7688_v26 = vadd.f32 %v11576_v27, %v13047_v41  ;;  %v7167_v29 = vpop.f32.mrb[59].mxu0  ;;  %v7679_v30 = vpop.f32.mrb[59].mxu1  ;;  %v8021_v33 = vmax.f32 %v7173_v20, 0.0  ;;  %v8149_v34 = vmax.f32 %v7685_v21, 0.0 }
 0x178   : > { %v7168_v31 = vadd.f32 %v13047_v41, %v7167_v29  ;;  %v7680_v32 = vadd.f32 %v13047_v41, %v7679_v30  ;;  %v8019_v37 = vmax.f32 %v7165_v24, 0.0  ;;  %v8147_v38 = vmax.f32 %v7677_v25, 0.0  ;;  %v13237_v41 = vld [vmem:[%s13444_s1] ss:$0 sm:$0xff] }
 0x179   : > { %v8022_v35 = vmax.f32 %v7176_v28, 0.0  ;;  %v8150_v36 = vmax.f32 %v7688_v26, 0.0 }
 0x17a   : > { %v8020_v39 = vmax.f32 %v7168_v31, 0.0  ;;  %v8148_v40 = vmax.f32 %v7680_v32, 0.0 }
 0x17b   : > { %v10618_v42 = vpack.c.bf16 %v8022_v35, %v8021_v33  ;;  %v10938_v43 = vpack.c.bf16 %v8150_v36, %v8149_v34 }
 0x17c   : > { %v10613_v44 = vpack.c.bf16 %v8020_v39, %v8019_v37  ;;  %v10933_v45 = vpack.c.bf16 %v8148_v40, %v8147_v38  ;;  %v11451_v46 = vpop.f32.mrb[60].mxu0  ;;  %v11579_v47 = vpop.f32.mrb[60].mxu1 }
 0x17d   : > { %11138 = vst [vmem:[%s13062_s18 + $0xe8] sm:$0xff] %v10618_v42   ;;  %11202 = vst [vmem:[%s13062_s18 + $0x2e8] sm:$0xff] %v10938_v43   ;;  %v7189_v48 = vadd.f32 %v13237_v41, %v11451_v46  ;;  %v7701_v49 = vadd.f32 %v13237_v41, %v11579_v47  ;;  %v7180_v50 = vpop.f32.mrb[61].mxu0  ;;  %v7692_v51 = vpop.f32.mrb[61].mxu1 }
 0x17e   : > { %11137 = vst [vmem:[%s13062_s18 + $0xe0] sm:$0xff] %v10613_v44   ;;  %11201 = vst [vmem:[%s13062_s18 + $0x2e0] sm:$0xff] %v10933_v45   ;;  %v7181_v52 = vadd.f32 %v13237_v41, %v7180_v50  ;;  %v7693_v53 = vadd.f32 %v13237_v41, %v7692_v51  ;;  %v11452_v54 = vpop.f32.mrb[62].mxu0  ;;  %v11580_v55 = vpop.f32.mrb[62].mxu1 }
 0x17f   : > { %v7192_v56 = vadd.f32 %v13237_v41, %v11452_v54  ;;  %v7704_v57 = vadd.f32 %v13237_v41, %v11580_v55  ;;  %v7183_v58 = vpop.f32.mrb[63].mxu0  ;;  %v7695_v59 = vpop.f32.mrb[63].mxu1  ;;  %v8025_v62 = vmax.f32 %v7189_v48, 0.0  ;;  %v8153_v63 = vmax.f32 %v7701_v49, 0.0 }
 0x180   : > { %v7184_v60 = vadd.f32 %v13237_v41, %v7183_v58  ;;  %v7696_v61 = vadd.f32 %v13237_v41, %v7695_v59  ;;  %v8023_v3 = vmax.f32 %v7181_v52, 0.0  ;;  %v8151_v4 = vmax.f32 %v7693_v53, 0.0 }
 0x181   : > { %v8026_v0 = vmax.f32 %v7192_v56, 0.0  ;;  %v8154_v2 = vmax.f32 %v7704_v57, 0.0 }
 0x182   : > { %v8024_v5 = vmax.f32 %v7184_v60, 0.0  ;;  %v8152_v7 = vmax.f32 %v7696_v61, 0.0 }
 0x183   : > { %v10628_v8 = vpack.c.bf16 %v8026_v0, %v8025_v62  ;;  %v10948_v9 = vpack.c.bf16 %v8154_v2, %v8153_v63 }
 0x184   : > { %v10623_v10 = vpack.c.bf16 %v8024_v5, %v8023_v3  ;;  %v10943_v11 = vpack.c.bf16 %v8152_v7, %v8151_v4  ;;  %v11455_v12 = vpop.f32.mrb[64].mxu0  ;;  %v11583_v13 = vpop.f32.mrb[64].mxu1 }
 0x185   : > { %11140 = vst [vmem:[%s13062_s18 + $0xf8] sm:$0xff] %v10628_v8   ;;  %11204 = vst [vmem:[%s13062_s18 + $0x2f8] sm:$0xff] %v10948_v9   ;;  %v7205_v14 = vadd.f32 %v13237_v41, %v11455_v12  ;;  %v7717_v15 = vadd.f32 %v13237_v41, %v11583_v13  ;;  %v7196_v16 = vpop.f32.mrb[65].mxu0  ;;  %v7708_v17 = vpop.f32.mrb[65].mxu1 }
 0x186   : > { %11139 = vst [vmem:[%s13062_s18 + $0xf0] sm:$0xff] %v10623_v10   ;;  %11203 = vst [vmem:[%s13062_s18 + $0x2f0] sm:$0xff] %v10943_v11   ;;  %v7197_v18 = vadd.f32 %v13237_v41, %v7196_v16  ;;  %v7709_v19 = vadd.f32 %v13237_v41, %v7708_v17  ;;  %v11456_v20 = vpop.f32.mrb[66].mxu0  ;;  %v11584_v21 = vpop.f32.mrb[66].mxu1 }
 0x187   : > { %v7208_v22 = vadd.f32 %v13237_v41, %v11456_v20  ;;  %v7720_v23 = vadd.f32 %v13237_v41, %v11584_v21  ;;  %v7199_v24 = vpop.f32.mrb[67].mxu0  ;;  %v7711_v25 = vpop.f32.mrb[67].mxu1  ;;  %v8029_v28 = vmax.f32 %v7205_v14, 0.0  ;;  %v8157_v26 = vmax.f32 %v7717_v15, 0.0 }
 0x188   : > { %v7200_v6 = vadd.f32 %v13237_v41, %v7199_v24  ;;  %v7712_v27 = vadd.f32 %v13237_v41, %v7711_v25  ;;  %v8027_v31 = vmax.f32 %v7197_v18, 0.0  ;;  %v8155_v32 = vmax.f32 %v7709_v19, 0.0 }
 0x189   : > { %v8030_v29 = vmax.f32 %v7208_v22, 0.0  ;;  %v8158_v30 = vmax.f32 %v7720_v23, 0.0 }
 0x18a   : > { %v8028_v33 = vmax.f32 %v7200_v6, 0.0  ;;  %v8156_v34 = vmax.f32 %v7712_v27, 0.0 }
 0x18b   : > { %v10638_v35 = vpack.c.bf16 %v8030_v29, %v8029_v28  ;;  %v10958_v36 = vpack.c.bf16 %v8158_v30, %v8157_v26 }
 0x18c   : > { %v10633_v37 = vpack.c.bf16 %v8028_v33, %v8027_v31  ;;  %v10953_v38 = vpack.c.bf16 %v8156_v34, %v8155_v32  ;;  %v11459_v39 = vpop.f32.mrb[68].mxu0 }
 0x18d   : > { %v11587_v40 = vpop.f32.mrb[68].mxu1  ;;  %11142 = vst [vmem:[%s13062_s18 + $0x108] sm:$0xff] %v10638_v35   ;;  %11206 = vst [vmem:[%s13062_s18 + $0x308] sm:$0xff] %v10958_v36   ;;  %v7221_v42 = vadd.f32 %v13237_v41, %v11459_v39  ;;  %v7212_v44 = vpop.f32.mrb[69].mxu0 }
 0x18e   : > { %v7733_v43 = vadd.f32 %v13237_v41, %v11587_v40  ;;  %v7724_v45 = vpop.f32.mrb[69].mxu1  ;;  %11141 = vst [vmem:[%s13062_s18 + $0x100] sm:$0xff] %v10633_v37   ;;  %11205 = vst [vmem:[%s13062_s18 + $0x300] sm:$0xff] %v10953_v38   ;;  %v7213_v46 = vadd.f32 %v13237_v41, %v7212_v44  ;;  %v11460_v48 = vpop.f32.mrb[70].mxu0 }
 0x18f   : > { %v7725_v47 = vadd.f32 %v13237_v41, %v7724_v45  ;;  %v11588_v49 = vpop.f32.mrb[70].mxu1  ;;  %v7224_v50 = vadd.f32 %v13237_v41, %v11460_v48  ;;  %v7215_v52 = vpop.f32.mrb[71].mxu0  ;;  %v8033_v56 = vmax.f32 %v7221_v42, 0.0 }
 0x190   : > { %v7736_v51 = vadd.f32 %v13237_v41, %v11588_v49  ;;  %v7727_v53 = vpop.f32.mrb[71].mxu1  ;;  %v7216_v54 = vadd.f32 %v13237_v41, %v7215_v52  ;;  %v8161_v57 = vmax.f32 %v7733_v43, 0.0  ;;  %v8031_v60 = vmax.f32 %v7213_v46, 0.0 }
 0x191   : > { %v7728_v55 = vadd.f32 %v13237_v41, %v7727_v53  ;;  %v8034_v58 = vmax.f32 %v7224_v50, 0.0  ;;  %v8159_v61 = vmax.f32 %v7725_v47, 0.0 }
 0x192   : > { %v8162_v59 = vmax.f32 %v7736_v51, 0.0  ;;  %v8032_v62 = vmax.f32 %v7216_v54, 0.0 }
 0x193   : > { %v8160_v63 = vmax.f32 %v7728_v55, 0.0  ;;  %v10648_v0 = vpack.c.bf16 %v8034_v58, %v8033_v56 }
 0x194   : > { %v10968_v2 = vpack.c.bf16 %v8162_v59, %v8161_v57  ;;  %v10643_v3 = vpack.c.bf16 %v8032_v62, %v8031_v60  ;;  %v11463_v5 = vpop.f32.mrb[72].mxu0 }
 0x195   : > { %v10963_v4 = vpack.c.bf16 %v8160_v63, %v8159_v61  ;;  %v11591_v7 = vpop.f32.mrb[72].mxu1  ;;  %11144 = vst [vmem:[%s13062_s18 + $0x118] sm:$0xff] %v10648_v0   ;;  %v7237_v8 = vadd.f32 %v13237_v41, %v11463_v5  ;;  %v7228_v10 = vpop.f32.mrb[73].mxu0 }
 0x196   : > { %11208 = vst [vmem:[%s13062_s18 + $0x318] sm:$0xff] %v10968_v2   ;;  %v7749_v9 = vadd.f32 %v13237_v41, %v11591_v7  ;;  %v7740_v11 = vpop.f32.mrb[73].mxu1  ;;  %11143 = vst [vmem:[%s13062_s18 + $0x110] sm:$0xff] %v10643_v3   ;;  %v7229_v12 = vadd.f32 %v13237_v41, %v7228_v10  ;;  %v11464_v14 = vpop.f32.mrb[74].mxu0 }
 0x197   : > { %11207 = vst [vmem:[%s13062_s18 + $0x310] sm:$0xff] %v10963_v4   ;;  %v7741_v13 = vadd.f32 %v13237_v41, %v7740_v11  ;;  %v11592_v15 = vpop.f32.mrb[74].mxu1  ;;  %v7240_v16 = vadd.f32 %v13237_v41, %v11464_v14  ;;  %v7231_v18 = vpop.f32.mrb[75].mxu0  ;;  %v8037_v22 = vmax.f32 %v7237_v8, 0.0 }
 0x198   : > { %v7752_v17 = vadd.f32 %v13237_v41, %v11592_v15  ;;  %v7743_v19 = vpop.f32.mrb[75].mxu1  ;;  %v7232_v20 = vadd.f32 %v13237_v41, %v7231_v18  ;;  %v8165_v23 = vmax.f32 %v7749_v9, 0.0  ;;  %v8035_v6 = vmax.f32 %v7229_v12, 0.0 }
 0x199   : > { %v7744_v21 = vadd.f32 %v13237_v41, %v7743_v19  ;;  %v8038_v24 = vmax.f32 %v7240_v16, 0.0  ;;  %v8163_v27 = vmax.f32 %v7741_v13, 0.0 }
 0x19a   : > { %v8166_v25 = vmax.f32 %v7752_v17, 0.0  ;;  %v8036_v28 = vmax.f32 %v7232_v20, 0.0 }
 0x19b   : > { %v8164_v26 = vmax.f32 %v7744_v21, 0.0  ;;  %v10658_v29 = vpack.c.bf16 %v8038_v24, %v8037_v22 }
 0x19c   : > { %v10978_v30 = vpack.c.bf16 %v8166_v25, %v8165_v23  ;;  %v10653_v31 = vpack.c.bf16 %v8036_v28, %v8035_v6  ;;  %v11467_v33 = vpop.f32.mrb[76].mxu0 }
 0x19d   : > { %v10973_v32 = vpack.c.bf16 %v8164_v26, %v8163_v27  ;;  %v11595_v34 = vpop.f32.mrb[76].mxu1  ;;  %11146 = vst [vmem:[%s13062_s18 + $0x128] sm:$0xff] %v10658_v29   ;;  %v7253_v35 = vadd.f32 %v13237_v41, %v11467_v33  ;;  %v7244_v37 = vpop.f32.mrb[77].mxu0 }
 0x19e   : > { %11210 = vst [vmem:[%s13062_s18 + $0x328] sm:$0xff] %v10978_v30   ;;  %v7765_v36 = vadd.f32 %v13237_v41, %v11595_v34  ;;  %v7756_v38 = vpop.f32.mrb[77].mxu1  ;;  %11145 = vst [vmem:[%s13062_s18 + $0x120] sm:$0xff] %v10653_v31   ;;  %v7245_v39 = vadd.f32 %v13237_v41, %v7244_v37  ;;  %v11468_v42 = vpop.f32.mrb[78].mxu0 }
 0x19f   : > { %11209 = vst [vmem:[%s13062_s18 + $0x320] sm:$0xff] %v10973_v32   ;;  %v7757_v40 = vadd.f32 %v13237_v41, %v7756_v38  ;;  %v11596_v43 = vpop.f32.mrb[78].mxu1  ;;  %v7256_v44 = vadd.f32 %v13237_v41, %v11468_v42  ;;  %v7247_v46 = vpop.f32.mrb[79].mxu0  ;;  %v8041_v50 = vmax.f32 %v7253_v35, 0.0 }
 0x1a0   : > { %v7768_v45 = vadd.f32 %v13237_v41, %v11596_v43  ;;  %v7759_v47 = vpop.f32.mrb[79].mxu1  ;;  %v7248_v48 = vadd.f32 %v13237_v41, %v7247_v46  ;;  %v8169_v51 = vmax.f32 %v7765_v36, 0.0  ;;  %v8039_v54 = vmax.f32 %v7245_v39, 0.0 }
 0x1a1   : > { %v7760_v49 = vadd.f32 %v13237_v41, %v7759_v47  ;;  %v8042_v52 = vmax.f32 %v7256_v44, 0.0  ;;  %v8167_v55 = vmax.f32 %v7757_v40, 0.0 }
 0x1a2   : > { %v8170_v53 = vmax.f32 %v7768_v45, 0.0  ;;  %v8040_v56 = vmax.f32 %v7248_v48, 0.0 }
 0x1a3   : > { %v8168_v57 = vmax.f32 %v7760_v49, 0.0  ;;  %v10668_v58 = vpack.c.bf16 %v8042_v52, %v8041_v50 }
 0x1a4   : > { %v10988_v59 = vpack.c.bf16 %v8170_v53, %v8169_v51  ;;  %v10663_v60 = vpack.c.bf16 %v8040_v56, %v8039_v54  ;;  %v11471_v62 = vpop.f32.mrb[80].mxu0 }
 0x1a5   : > { %v10983_v61 = vpack.c.bf16 %v8168_v57, %v8167_v55  ;;  %v11599_v63 = vpop.f32.mrb[80].mxu1  ;;  %11148 = vst [vmem:[%s13062_s18 + $0x138] sm:$0xff] %v10668_v58   ;;  %v7269_v0 = vadd.f32 %v13237_v41, %v11471_v62  ;;  %v7260_v3 = vpop.f32.mrb[81].mxu0 }
 0x1a6   : > { %11212 = vst [vmem:[%s13062_s18 + $0x338] sm:$0xff] %v10988_v59   ;;  %v7781_v2 = vadd.f32 %v13237_v41, %v11599_v63  ;;  %v7772_v4 = vpop.f32.mrb[81].mxu1  ;;  %11147 = vst [vmem:[%s13062_s18 + $0x130] sm:$0xff] %v10663_v60   ;;  %v7261_v5 = vadd.f32 %v13237_v41, %v7260_v3  ;;  %v11472_v8 = vpop.f32.mrb[82].mxu0 }
 0x1a7   : > { %11211 = vst [vmem:[%s13062_s18 + $0x330] sm:$0xff] %v10983_v61   ;;  %v7773_v7 = vadd.f32 %v13237_v41, %v7772_v4  ;;  %v11600_v9 = vpop.f32.mrb[82].mxu1  ;;  %v7272_v10 = vadd.f32 %v13237_v41, %v11472_v8  ;;  %v7263_v12 = vpop.f32.mrb[83].mxu0  ;;  %v8045_v16 = vmax.f32 %v7269_v0, 0.0 }
 0x1a8   : > { %v7784_v11 = vadd.f32 %v13237_v41, %v11600_v9  ;;  %v7775_v13 = vpop.f32.mrb[83].mxu1  ;;  %v7264_v14 = vadd.f32 %v13237_v41, %v7263_v12  ;;  %v8173_v17 = vmax.f32 %v7781_v2, 0.0  ;;  %v8043_v20 = vmax.f32 %v7261_v5, 0.0 }
 0x1a9   : > { %v7776_v15 = vadd.f32 %v13237_v41, %v7775_v13  ;;  %v8046_v18 = vmax.f32 %v7272_v10, 0.0  ;;  %v8171_v21 = vmax.f32 %v7773_v7, 0.0 }
 0x1aa   : > { %v8174_v19 = vmax.f32 %v7784_v11, 0.0  ;;  %v8044_v22 = vmax.f32 %v7264_v14, 0.0 }
 0x1ab   : > { %v8172_v23 = vmax.f32 %v7776_v15, 0.0  ;;  %v10678_v24 = vpack.c.bf16 %v8046_v18, %v8045_v16 }
 0x1ac   : > { %v10998_v25 = vpack.c.bf16 %v8174_v19, %v8173_v17  ;;  %v10673_v6 = vpack.c.bf16 %v8044_v22, %v8043_v20  ;;  %v11475_v28 = vpop.f32.mrb[84].mxu0 }
 0x1ad   : > { %v10993_v27 = vpack.c.bf16 %v8172_v23, %v8171_v21  ;;  %v11603_v26 = vpop.f32.mrb[84].mxu1  ;;  %11150 = vst [vmem:[%s13062_s18 + $0x148] sm:$0xff] %v10678_v24   ;;  %v7285_v29 = vadd.f32 %v13237_v41, %v11475_v28  ;;  %v7276_v31 = vpop.f32.mrb[85].mxu0 }
 0x1ae   : > { %11214 = vst [vmem:[%s13062_s18 + $0x348] sm:$0xff] %v10998_v25   ;;  %v7797_v30 = vadd.f32 %v13237_v41, %v11603_v26  ;;  %v7788_v32 = vpop.f32.mrb[85].mxu1  ;;  %11149 = vst [vmem:[%s13062_s18 + $0x140] sm:$0xff] %v10673_v6   ;;  %v7277_v33 = vadd.f32 %v13237_v41, %v7276_v31  ;;  %v11476_v35 = vpop.f32.mrb[86].mxu0 }
 0x1af   : > { %11213 = vst [vmem:[%s13062_s18 + $0x340] sm:$0xff] %v10993_v27   ;;  %v7789_v34 = vadd.f32 %v13237_v41, %v7788_v32  ;;  %v11604_v36 = vpop.f32.mrb[86].mxu1  ;;  %v7288_v37 = vadd.f32 %v13237_v41, %v11476_v35  ;;  %v7279_v39 = vpop.f32.mrb[87].mxu0  ;;  %v8049_v44 = vmax.f32 %v7285_v29, 0.0 }
 0x1b0   : > { %v7800_v38 = vadd.f32 %v13237_v41, %v11604_v36  ;;  %v7791_v40 = vpop.f32.mrb[87].mxu1  ;;  %v7280_v42 = vadd.f32 %v13237_v41, %v7279_v39  ;;  %v8177_v45 = vmax.f32 %v7797_v30, 0.0  ;;  %v8047_v48 = vmax.f32 %v7277_v33, 0.0 }
 0x1b1   : > { %v7792_v43 = vadd.f32 %v13237_v41, %v7791_v40  ;;  %v8050_v46 = vmax.f32 %v7288_v37, 0.0  ;;  %v8175_v49 = vmax.f32 %v7789_v34, 0.0 }
 0x1b2   : > { %v8178_v47 = vmax.f32 %v7800_v38, 0.0  ;;  %v8048_v50 = vmax.f32 %v7280_v42, 0.0 }
 0x1b3   : > { %v8176_v51 = vmax.f32 %v7792_v43, 0.0  ;;  %v10688_v52 = vpack.c.bf16 %v8050_v46, %v8049_v44 }
 0x1b4   : > { %v11008_v53 = vpack.c.bf16 %v8178_v47, %v8177_v45  ;;  %v10683_v54 = vpack.c.bf16 %v8048_v50, %v8047_v48  ;;  %v11479_v56 = vpop.f32.mrb[88].mxu0 }
 0x1b5   : > { %v11003_v55 = vpack.c.bf16 %v8176_v51, %v8175_v49  ;;  %v11607_v57 = vpop.f32.mrb[88].mxu1  ;;  %11152 = vst [vmem:[%s13062_s18 + $0x158] sm:$0xff] %v10688_v52   ;;  %v7301_v58 = vadd.f32 %v13237_v41, %v11479_v56  ;;  %v7292_v60 = vpop.f32.mrb[89].mxu0 }
 0x1b6   : > { %11216 = vst [vmem:[%s13062_s18 + $0x358] sm:$0xff] %v11008_v53   ;;  %v7813_v59 = vadd.f32 %v13237_v41, %v11607_v57  ;;  %v7804_v61 = vpop.f32.mrb[89].mxu1  ;;  %11151 = vst [vmem:[%s13062_s18 + $0x150] sm:$0xff] %v10683_v54   ;;  %v7293_v62 = vadd.f32 %v13237_v41, %v7292_v60  ;;  %v11480_v0 = vpop.f32.mrb[90].mxu0 }
 0x1b7   : > { %11215 = vst [vmem:[%s13062_s18 + $0x350] sm:$0xff] %v11003_v55   ;;  %v7805_v63 = vadd.f32 %v13237_v41, %v7804_v61  ;;  %v11608_v2 = vpop.f32.mrb[90].mxu1  ;;  %v7304_v3 = vadd.f32 %v13237_v41, %v11480_v0  ;;  %v7295_v5 = vpop.f32.mrb[91].mxu0  ;;  %v8053_v10 = vmax.f32 %v7301_v58, 0.0 }
 0x1b8   : > { %v7816_v4 = vadd.f32 %v13237_v41, %v11608_v2  ;;  %v7807_v7 = vpop.f32.mrb[91].mxu1  ;;  %v7296_v8 = vadd.f32 %v13237_v41, %v7295_v5  ;;  %v8181_v11 = vmax.f32 %v7813_v59, 0.0  ;;  %v8051_v14 = vmax.f32 %v7293_v62, 0.0 }
 0x1b9   : > { %v7808_v9 = vadd.f32 %v13237_v41, %v7807_v7  ;;  %v8054_v12 = vmax.f32 %v7304_v3, 0.0  ;;  %v8179_v15 = vmax.f32 %v7805_v63, 0.0 }
 0x1ba   : > { %v8182_v13 = vmax.f32 %v7816_v4, 0.0  ;;  %v8052_v16 = vmax.f32 %v7296_v8, 0.0 }
 0x1bb   : > { %v8180_v17 = vmax.f32 %v7808_v9, 0.0  ;;  %v10698_v18 = vpack.c.bf16 %v8054_v12, %v8053_v10 }
 0x1bc   : > { %v11018_v19 = vpack.c.bf16 %v8182_v13, %v8181_v11  ;;  %v10693_v20 = vpack.c.bf16 %v8052_v16, %v8051_v14  ;;  %v11483_v22 = vpop.f32.mrb[92].mxu0 }
 0x1bd   : > { %v11013_v21 = vpack.c.bf16 %v8180_v17, %v8179_v15  ;;  %v11611_v23 = vpop.f32.mrb[92].mxu1  ;;  %11154 = vst [vmem:[%s13062_s18 + $0x168] sm:$0xff] %v10698_v18   ;;  %v7317_v24 = vadd.f32 %v13237_v41, %v11483_v22  ;;  %v7308_v6 = vpop.f32.mrb[93].mxu0 }
 0x1be   : > { %11218 = vst [vmem:[%s13062_s18 + $0x368] sm:$0xff] %v11018_v19   ;;  %v7829_v25 = vadd.f32 %v13237_v41, %v11611_v23  ;;  %v7820_v27 = vpop.f32.mrb[93].mxu1  ;;  %11153 = vst [vmem:[%s13062_s18 + $0x160] sm:$0xff] %v10693_v20   ;;  %v7309_v28 = vadd.f32 %v13237_v41, %v7308_v6  ;;  %v11484_v29 = vpop.f32.mrb[94].mxu0 }
 0x1bf   : > { %11217 = vst [vmem:[%s13062_s18 + $0x360] sm:$0xff] %v11013_v21   ;;  %v7821_v26 = vadd.f32 %v13237_v41, %v7820_v27  ;;  %v11612_v30 = vpop.f32.mrb[94].mxu1  ;;  %v7320_v31 = vadd.f32 %v13237_v41, %v11484_v29  ;;  %v7311_v33 = vpop.f32.mrb[95].mxu0  ;;  %v8057_v37 = vmax.f32 %v7317_v24, 0.0 }
 0x1c0   : > { %v7832_v32 = vadd.f32 %v13237_v41, %v11612_v30  ;;  %v7823_v34 = vpop.f32.mrb[95].mxu1  ;;  %v7312_v35 = vadd.f32 %v13237_v41, %v7311_v33  ;;  %v8185_v38 = vmax.f32 %v7829_v25, 0.0  ;;  %v8055_v42 = vmax.f32 %v7309_v28, 0.0 }
 0x1c1   : > { %v7824_v36 = vadd.f32 %v13237_v41, %v7823_v34  ;;  %v8058_v39 = vmax.f32 %v7320_v31, 0.0  ;;  %v8183_v43 = vmax.f32 %v7821_v26, 0.0 }
 0x1c2   : > { %v8186_v40 = vmax.f32 %v7832_v32, 0.0  ;;  %v8056_v44 = vmax.f32 %v7312_v35, 0.0 }
 0x1c3   : > { %v8184_v45 = vmax.f32 %v7824_v36, 0.0  ;;  %v10708_v46 = vpack.c.bf16 %v8058_v39, %v8057_v37 }
 0x1c4   : > { %v11028_v47 = vpack.c.bf16 %v8186_v40, %v8185_v38  ;;  %v10703_v48 = vpack.c.bf16 %v8056_v44, %v8055_v42  ;;  %v11487_v50 = vpop.f32.mrb[96].mxu0 }
 0x1c5   : > { %v11023_v49 = vpack.c.bf16 %v8184_v45, %v8183_v43  ;;  %v11615_v51 = vpop.f32.mrb[96].mxu1  ;;  %11156 = vst [vmem:[%s13062_s18 + $0x178] sm:$0xff] %v10708_v46   ;;  %v7333_v52 = vadd.f32 %v13237_v41, %v11487_v50  ;;  %v7324_v54 = vpop.f32.mrb[97].mxu0 }
 0x1c6   : > { %11220 = vst [vmem:[%s13062_s18 + $0x378] sm:$0xff] %v11028_v47   ;;  %v7845_v53 = vadd.f32 %v13237_v41, %v11615_v51  ;;  %v7836_v55 = vpop.f32.mrb[97].mxu1  ;;  %11155 = vst [vmem:[%s13062_s18 + $0x170] sm:$0xff] %v10703_v48   ;;  %v7325_v56 = vadd.f32 %v13237_v41, %v7324_v54  ;;  %v11488_v58 = vpop.f32.mrb[98].mxu0 }
 0x1c7   : > { %11219 = vst [vmem:[%s13062_s18 + $0x370] sm:$0xff] %v11023_v49   ;;  %v7837_v57 = vadd.f32 %v13237_v41, %v7836_v55  ;;  %v11616_v59 = vpop.f32.mrb[98].mxu1  ;;  %v7336_v60 = vadd.f32 %v13237_v41, %v11488_v58  ;;  %v7327_v62 = vpop.f32.mrb[99].mxu0  ;;  %v8061_v3 = vmax.f32 %v7333_v52, 0.0 }
 0x1c8   : > { %v7848_v61 = vadd.f32 %v13237_v41, %v11616_v59  ;;  %v7839_v63 = vpop.f32.mrb[99].mxu1  ;;  %v7328_v0 = vadd.f32 %v13237_v41, %v7327_v62  ;;  %v8189_v4 = vmax.f32 %v7845_v53, 0.0  ;;  %v8059_v8 = vmax.f32 %v7325_v56, 0.0 }
 0x1c9   : > { %v7840_v2 = vadd.f32 %v13237_v41, %v7839_v63  ;;  %v8062_v5 = vmax.f32 %v7336_v60, 0.0  ;;  %v8187_v9 = vmax.f32 %v7837_v57, 0.0 }
 0x1ca   : > { %v8190_v7 = vmax.f32 %v7848_v61, 0.0  ;;  %v8060_v10 = vmax.f32 %v7328_v0, 0.0 }
 0x1cb   : > { %v8188_v11 = vmax.f32 %v7840_v2, 0.0  ;;  %v10718_v12 = vpack.c.bf16 %v8062_v5, %v8061_v3 }
 0x1cc   : > { %v11038_v13 = vpack.c.bf16 %v8190_v7, %v8189_v4  ;;  %v10713_v14 = vpack.c.bf16 %v8060_v10, %v8059_v8  ;;  %v11491_v16 = vpop.f32.mrb[100].mxu0 }
 0x1cd   : > { %v11033_v15 = vpack.c.bf16 %v8188_v11, %v8187_v9  ;;  %v11619_v17 = vpop.f32.mrb[100].mxu1  ;;  %11158 = vst [vmem:[%s13062_s18 + $0x188] sm:$0xff] %v10718_v12   ;;  %v7349_v18 = vadd.f32 %v13237_v41, %v11491_v16  ;;  %v7340_v20 = vpop.f32.mrb[101].mxu0 }
 0x1ce   : > { %11222 = vst [vmem:[%s13062_s18 + $0x388] sm:$0xff] %v11038_v13   ;;  %v7861_v19 = vadd.f32 %v13237_v41, %v11619_v17  ;;  %v7852_v21 = vpop.f32.mrb[101].mxu1  ;;  %11157 = vst [vmem:[%s13062_s18 + $0x180] sm:$0xff] %v10713_v14   ;;  %v7341_v22 = vadd.f32 %v13237_v41, %v7340_v20  ;;  %v11492_v24 = vpop.f32.mrb[102].mxu0 }
 0x1cf   : > { %11221 = vst [vmem:[%s13062_s18 + $0x380] sm:$0xff] %v11033_v15   ;;  %v7853_v23 = vadd.f32 %v13237_v41, %v7852_v21  ;;  %v11620_v25 = vpop.f32.mrb[102].mxu1  ;;  %v7352_v6 = vadd.f32 %v13237_v41, %v11492_v24  ;;  %v7343_v28 = vpop.f32.mrb[103].mxu0  ;;  %v8065_v31 = vmax.f32 %v7349_v18, 0.0 }
 0x1d0   : > { %v7864_v27 = vadd.f32 %v13237_v41, %v11620_v25  ;;  %v7855_v26 = vpop.f32.mrb[103].mxu1  ;;  %v7344_v29 = vadd.f32 %v13237_v41, %v7343_v28  ;;  %v8193_v32 = vmax.f32 %v7861_v19, 0.0  ;;  %v8063_v35 = vmax.f32 %v7341_v22, 0.0 }
 0x1d1   : > { %v7856_v30 = vadd.f32 %v13237_v41, %v7855_v26  ;;  %v8066_v33 = vmax.f32 %v7352_v6, 0.0  ;;  %v8191_v36 = vmax.f32 %v7853_v23, 0.0 }
 0x1d2   : > { %v8194_v34 = vmax.f32 %v7864_v27, 0.0  ;;  %v8064_v37 = vmax.f32 %v7344_v29, 0.0 }
 0x1d3   : > { %v8192_v38 = vmax.f32 %v7856_v30, 0.0  ;;  %v10728_v39 = vpack.c.bf16 %v8066_v33, %v8065_v31 }
 0x1d4   : > { %v11048_v40 = vpack.c.bf16 %v8194_v34, %v8193_v32  ;;  %v10723_v42 = vpack.c.bf16 %v8064_v37, %v8063_v35  ;;  %v11495_v44 = vpop.f32.mrb[104].mxu0 }
 0x1d5   : > { %v11043_v43 = vpack.c.bf16 %v8192_v38, %v8191_v36  ;;  %v11623_v45 = vpop.f32.mrb[104].mxu1  ;;  %11160 = vst [vmem:[%s13062_s18 + $0x198] sm:$0xff] %v10728_v39   ;;  %v7365_v46 = vadd.f32 %v13237_v41, %v11495_v44  ;;  %v7356_v48 = vpop.f32.mrb[105].mxu0 }
 0x1d6   : > { %11224 = vst [vmem:[%s13062_s18 + $0x398] sm:$0xff] %v11048_v40   ;;  %v7877_v47 = vadd.f32 %v13237_v41, %v11623_v45  ;;  %v7868_v49 = vpop.f32.mrb[105].mxu1  ;;  %11159 = vst [vmem:[%s13062_s18 + $0x190] sm:$0xff] %v10723_v42   ;;  %v7357_v50 = vadd.f32 %v13237_v41, %v7356_v48  ;;  %v11496_v52 = vpop.f32.mrb[106].mxu0 }
 0x1d7   : > { %11223 = vst [vmem:[%s13062_s18 + $0x390] sm:$0xff] %v11043_v43   ;;  %v7869_v51 = vadd.f32 %v13237_v41, %v7868_v49  ;;  %v11624_v53 = vpop.f32.mrb[106].mxu1  ;;  %v7368_v54 = vadd.f32 %v13237_v41, %v11496_v52  ;;  %v7359_v56 = vpop.f32.mrb[107].mxu0  ;;  %v8069_v60 = vmax.f32 %v7365_v46, 0.0 }
 0x1d8   : > { %v7880_v55 = vadd.f32 %v13237_v41, %v11624_v53  ;;  %v7871_v57 = vpop.f32.mrb[107].mxu1  ;;  %v7360_v58 = vadd.f32 %v13237_v41, %v7359_v56  ;;  %v8197_v61 = vmax.f32 %v7877_v47, 0.0  ;;  %v8067_v0 = vmax.f32 %v7357_v50, 0.0 }
 0x1d9   : > { %v7872_v59 = vadd.f32 %v13237_v41, %v7871_v57  ;;  %v8070_v62 = vmax.f32 %v7368_v54, 0.0  ;;  %v8195_v2 = vmax.f32 %v7869_v51, 0.0 }
 0x1da   : > { %v8198_v63 = vmax.f32 %v7880_v55, 0.0  ;;  %v8068_v3 = vmax.f32 %v7360_v58, 0.0 }
 0x1db   : > { %v8196_v4 = vmax.f32 %v7872_v59, 0.0  ;;  %v10738_v5 = vpack.c.bf16 %v8070_v62, %v8069_v60 }
 0x1dc   : > { %v11058_v7 = vpack.c.bf16 %v8198_v63, %v8197_v61  ;;  %v10733_v8 = vpack.c.bf16 %v8068_v3, %v8067_v0  ;;  %v11499_v10 = vpop.f32.mrb[108].mxu0 }
 0x1dd   : > { %v11053_v9 = vpack.c.bf16 %v8196_v4, %v8195_v2  ;;  %v11627_v11 = vpop.f32.mrb[108].mxu1  ;;  %11162 = vst [vmem:[%s13062_s18 + $0x1a8] sm:$0xff] %v10738_v5   ;;  %v7381_v12 = vadd.f32 %v13237_v41, %v11499_v10  ;;  %v7372_v14 = vpop.f32.mrb[109].mxu0 }
 0x1de   : > { %11226 = vst [vmem:[%s13062_s18 + $0x3a8] sm:$0xff] %v11058_v7   ;;  %v7893_v13 = vadd.f32 %v13237_v41, %v11627_v11  ;;  %v7884_v15 = vpop.f32.mrb[109].mxu1  ;;  %11161 = vst [vmem:[%s13062_s18 + $0x1a0] sm:$0xff] %v10733_v8   ;;  %v7373_v16 = vadd.f32 %v13237_v41, %v7372_v14  ;;  %v11500_v18 = vpop.f32.mrb[110].mxu0 }
 0x1df   : > { %11225 = vst [vmem:[%s13062_s18 + $0x3a0] sm:$0xff] %v11053_v9   ;;  %v7885_v17 = vadd.f32 %v13237_v41, %v7884_v15  ;;  %v11628_v19 = vpop.f32.mrb[110].mxu1  ;;  %v7384_v20 = vadd.f32 %v13237_v41, %v11500_v18  ;;  %v7375_v22 = vpop.f32.mrb[111].mxu0  ;;  %v8073_v6 = vmax.f32 %v7381_v12, 0.0 }
 0x1e0   : > { %v7896_v21 = vadd.f32 %v13237_v41, %v11628_v19  ;;  %v7887_v23 = vpop.f32.mrb[111].mxu1  ;;  %v7376_v24 = vadd.f32 %v13237_v41, %v7375_v22  ;;  %v8201_v27 = vmax.f32 %v7893_v13, 0.0  ;;  %v8071_v29 = vmax.f32 %v7373_v16, 0.0 }
 0x1e1   : > { %v7888_v25 = vadd.f32 %v13237_v41, %v7887_v23  ;;  %v8074_v28 = vmax.f32 %v7384_v20, 0.0  ;;  %v8199_v30 = vmax.f32 %v7885_v17, 0.0 }
 0x1e2   : > { %v8202_v26 = vmax.f32 %v7896_v21, 0.0  ;;  %v8072_v31 = vmax.f32 %v7376_v24, 0.0 }
 0x1e3   : > { %v8200_v32 = vmax.f32 %v7888_v25, 0.0  ;;  %v10748_v33 = vpack.c.bf16 %v8074_v28, %v8073_v6 }
 0x1e4   : > { %v11068_v34 = vpack.c.bf16 %v8202_v26, %v8201_v27  ;;  %v10743_v35 = vpack.c.bf16 %v8072_v31, %v8071_v29  ;;  %v11503_v37 = vpop.f32.mrb[112].mxu0 }
 0x1e5   : > { %v11063_v36 = vpack.c.bf16 %v8200_v32, %v8199_v30  ;;  %v11631_v38 = vpop.f32.mrb[112].mxu1  ;;  %11164 = vst [vmem:[%s13062_s18 + $0x1b8] sm:$0xff] %v10748_v33   ;;  %v7397_v39 = vadd.f32 %v13237_v41, %v11503_v37  ;;  %v7388_v42 = vpop.f32.mrb[113].mxu0 }
 0x1e6   : > { %11228 = vst [vmem:[%s13062_s18 + $0x3b8] sm:$0xff] %v11068_v34   ;;  %v7909_v40 = vadd.f32 %v13237_v41, %v11631_v38  ;;  %v7900_v43 = vpop.f32.mrb[113].mxu1  ;;  %11163 = vst [vmem:[%s13062_s18 + $0x1b0] sm:$0xff] %v10743_v35   ;;  %v7389_v44 = vadd.f32 %v13237_v41, %v7388_v42  ;;  %v11504_v46 = vpop.f32.mrb[114].mxu0 }
 0x1e7   : > { %11227 = vst [vmem:[%s13062_s18 + $0x3b0] sm:$0xff] %v11063_v36   ;;  %v7901_v45 = vadd.f32 %v13237_v41, %v7900_v43  ;;  %v11632_v47 = vpop.f32.mrb[114].mxu1  ;;  %v7400_v48 = vadd.f32 %v13237_v41, %v11504_v46  ;;  %v7391_v50 = vpop.f32.mrb[115].mxu0  ;;  %v8077_v54 = vmax.f32 %v7397_v39, 0.0 }
 0x1e8   : > { %v7912_v49 = vadd.f32 %v13237_v41, %v11632_v47  ;;  %v7903_v51 = vpop.f32.mrb[115].mxu1  ;;  %v7392_v52 = vadd.f32 %v13237_v41, %v7391_v50  ;;  %v8205_v55 = vmax.f32 %v7909_v40, 0.0  ;;  %v8075_v58 = vmax.f32 %v7389_v44, 0.0 }
 0x1e9   : > { %v7904_v53 = vadd.f32 %v13237_v41, %v7903_v51  ;;  %v8078_v56 = vmax.f32 %v7400_v48, 0.0  ;;  %v8203_v59 = vmax.f32 %v7901_v45, 0.0 }
 0x1ea   : > { %v8206_v57 = vmax.f32 %v7912_v49, 0.0  ;;  %v8076_v60 = vmax.f32 %v7392_v52, 0.0 }
 0x1eb   : > { %v8204_v61 = vmax.f32 %v7904_v53, 0.0  ;;  %v10758_v62 = vpack.c.bf16 %v8078_v56, %v8077_v54 }
 0x1ec   : > { %v11078_v63 = vpack.c.bf16 %v8206_v57, %v8205_v55  ;;  %v10753_v0 = vpack.c.bf16 %v8076_v60, %v8075_v58  ;;  %v11507_v3 = vpop.f32.mrb[116].mxu0 }
 0x1ed   : > { %v11073_v2 = vpack.c.bf16 %v8204_v61, %v8203_v59  ;;  %v11635_v4 = vpop.f32.mrb[116].mxu1  ;;  %11166 = vst [vmem:[%s13062_s18 + $0x1c8] sm:$0xff] %v10758_v62   ;;  %v7413_v5 = vadd.f32 %v13237_v41, %v11507_v3  ;;  %v7404_v8 = vpop.f32.mrb[117].mxu0 }
 0x1ee   : > { %11230 = vst [vmem:[%s13062_s18 + $0x3c8] sm:$0xff] %v11078_v63   ;;  %v7925_v7 = vadd.f32 %v13237_v41, %v11635_v4  ;;  %v7916_v9 = vpop.f32.mrb[117].mxu1  ;;  %11165 = vst [vmem:[%s13062_s18 + $0x1c0] sm:$0xff] %v10753_v0   ;;  %v7405_v10 = vadd.f32 %v13237_v41, %v7404_v8  ;;  %v11508_v12 = vpop.f32.mrb[118].mxu0 }
 0x1ef   : > { %11229 = vst [vmem:[%s13062_s18 + $0x3c0] sm:$0xff] %v11073_v2   ;;  %v7917_v11 = vadd.f32 %v13237_v41, %v7916_v9  ;;  %v11636_v13 = vpop.f32.mrb[118].mxu1  ;;  %v7416_v14 = vadd.f32 %v13237_v41, %v11508_v12  ;;  %v7407_v16 = vpop.f32.mrb[119].mxu0  ;;  %v8081_v20 = vmax.f32 %v7413_v5, 0.0 }
 0x1f0   : > { %v7928_v15 = vadd.f32 %v13237_v41, %v11636_v13  ;;  %v7919_v17 = vpop.f32.mrb[119].mxu1  ;;  %v7408_v18 = vadd.f32 %v13237_v41, %v7407_v16  ;;  %v8209_v21 = vmax.f32 %v7925_v7, 0.0  ;;  %v8079_v24 = vmax.f32 %v7405_v10, 0.0 }
 0x1f1   : > { %v7920_v19 = vadd.f32 %v13237_v41, %v7919_v17  ;;  %v8082_v22 = vmax.f32 %v7416_v14, 0.0  ;;  %v8207_v25 = vmax.f32 %v7917_v11, 0.0 }
 0x1f2   : > { %v8210_v23 = vmax.f32 %v7928_v15, 0.0  ;;  %v8080_v6 = vmax.f32 %v7408_v18, 0.0 }
 0x1f3   : > { %v8208_v27 = vmax.f32 %v7920_v19, 0.0  ;;  %v10768_v28 = vpack.c.bf16 %v8082_v22, %v8081_v20 }
 0x1f4   : > { %v11088_v26 = vpack.c.bf16 %v8210_v23, %v8209_v21  ;;  %v10763_v29 = vpack.c.bf16 %v8080_v6, %v8079_v24  ;;  %v11511_v31 = vpop.f32.mrb[120].mxu0 }
 0x1f5   : > { %v11083_v30 = vpack.c.bf16 %v8208_v27, %v8207_v25  ;;  %v11639_v32 = vpop.f32.mrb[120].mxu1  ;;  %11168 = vst [vmem:[%s13062_s18 + $0x1d8] sm:$0xff] %v10768_v28   ;;  %v7429_v33 = vadd.f32 %v13237_v41, %v11511_v31  ;;  %v7420_v35 = vpop.f32.mrb[121].mxu0 }
 0x1f6   : > { %11232 = vst [vmem:[%s13062_s18 + $0x3d8] sm:$0xff] %v11088_v26   ;;  %v7941_v34 = vadd.f32 %v13237_v41, %v11639_v32  ;;  %v7932_v36 = vpop.f32.mrb[121].mxu1  ;;  %11167 = vst [vmem:[%s13062_s18 + $0x1d0] sm:$0xff] %v10763_v29   ;;  %v7421_v37 = vadd.f32 %v13237_v41, %v7420_v35  ;;  %v11512_v39 = vpop.f32.mrb[122].mxu0 }
 0x1f7   : > { %11231 = vst [vmem:[%s13062_s18 + $0x3d0] sm:$0xff] %v11083_v30   ;;  %v7933_v38 = vadd.f32 %v13237_v41, %v7932_v36  ;;  %v11640_v40 = vpop.f32.mrb[122].mxu1  ;;  %v7432_v42 = vadd.f32 %v13237_v41, %v11512_v39  ;;  %v7423_v44 = vpop.f32.mrb[123].mxu0  ;;  %v8085_v48 = vmax.f32 %v7429_v33, 0.0 }
 0x1f8   : > { %v7944_v43 = vadd.f32 %v13237_v41, %v11640_v40  ;;  %v7935_v45 = vpop.f32.mrb[123].mxu1  ;;  %v7424_v46 = vadd.f32 %v13237_v41, %v7423_v44  ;;  %v8213_v49 = vmax.f32 %v7941_v34, 0.0  ;;  %v8083_v52 = vmax.f32 %v7421_v37, 0.0 }
 0x1f9   : > { %v7936_v47 = vadd.f32 %v13237_v41, %v7935_v45  ;;  %v8086_v50 = vmax.f32 %v7432_v42, 0.0  ;;  %v8211_v53 = vmax.f32 %v7933_v38, 0.0  ;;  %v11807_v41 = vld [vmem:[%s13444_s1] ss:$0 sm:$0xff] }
 0x1fa   : > { %v8214_v51 = vmax.f32 %v7944_v43, 0.0  ;;  %v8084_v54 = vmax.f32 %v7424_v46, 0.0 }
 0x1fb   : > { %v8212_v55 = vmax.f32 %v7936_v47, 0.0  ;;  %v10778_v56 = vpack.c.bf16 %v8086_v50, %v8085_v48 }
 0x1fc   : > { %v11098_v57 = vpack.c.bf16 %v8214_v51, %v8213_v49  ;;  %v10773_v58 = vpack.c.bf16 %v8084_v54, %v8083_v52  ;;  %v11515_v60 = vpop.f32.mrb[124].mxu0 }
 0x1fd   : > { %v11093_v59 = vpack.c.bf16 %v8212_v55, %v8211_v53  ;;  %v11643_v61 = vpop.f32.mrb[124].mxu1  ;;  %11170 = vst [vmem:[%s13062_s18 + $0x1e8] sm:$0xff] %v10778_v56   ;;  %v7445_v62 = vadd.f32 %v11807_v41, %v11515_v60  ;;  %v7436_v0 = vpop.f32.mrb[125].mxu0 }
 0x1fe   : > { %11234 = vst [vmem:[%s13062_s18 + $0x3e8] sm:$0xff] %v11098_v57   ;;  %v7957_v63 = vadd.f32 %v11807_v41, %v11643_v61  ;;  %v7948_v2 = vpop.f32.mrb[125].mxu1  ;;  %11169 = vst [vmem:[%s13062_s18 + $0x1e0] sm:$0xff] %v10773_v58   ;;  %v7437_v3 = vadd.f32 %v11807_v41, %v7436_v0  ;;  %v11516_v5 = vpop.f32.mrb[126].mxu0 }
 0x1ff   : > { %11233 = vst [vmem:[%s13062_s18 + $0x3e0] sm:$0xff] %v11093_v59   ;;  %v7949_v4 = vadd.f32 %v11807_v41, %v7948_v2  ;;  %v11644_v7 = vpop.f32.mrb[126].mxu1  ;;  %v7448_v8 = vadd.f32 %v11807_v41, %v11516_v5  ;;  %v7439_v10 = vpop.f32.mrb[127].mxu0  ;;  %v8089_v14 = vmax.f32 %v7445_v62, 0.0 }
 0x200   : > { %v7960_v9 = vadd.f32 %v11807_v41, %v11644_v7  ;;  %v7951_v11 = vpop.f32.mrb[127].mxu1  ;;  %v7440_v12 = vadd.f32 %v11807_v41, %v7439_v10  ;;  %v8217_v15 = vmax.f32 %v7957_v63, 0.0  ;;  %v8087_v18 = vmax.f32 %v7437_v3, 0.0 }
 0x201   : > { %v7952_v13 = vadd.f32 %v11807_v41, %v7951_v11  ;;  %v8090_v16 = vmax.f32 %v7448_v8, 0.0  ;;  %v8215_v19 = vmax.f32 %v7949_v4, 0.0 }
 0x202   : > { %v8218_v17 = vmax.f32 %v7960_v9, 0.0  ;;  %v8088_v20 = vmax.f32 %v7440_v12, 0.0 }
 0x203   : > { %v8216_v21 = vmax.f32 %v7952_v13, 0.0  ;;  %v10788_v22 = vpack.c.bf16 %v8090_v16, %v8089_v14 }
 0x204   : > { %v11108_v23 = vpack.c.bf16 %v8218_v17, %v8217_v15  ;;  %v10783_v24 = vpack.c.bf16 %v8088_v20, %v8087_v18 }
 0x205   : > { %v11103_v25 = vpack.c.bf16 %v8216_v21, %v8215_v19  ;;  %11172 = vst [vmem:[%s13062_s18 + $0x1f8] sm:$0xff] %v10788_v22  }
 0x206   : > { %11236 = vst [vmem:[%s13062_s18 + $0x3f8] sm:$0xff] %v11108_v23   ;;  %11171 = vst [vmem:[%s13062_s18 + $0x1f0] sm:$0xff] %v10783_v24  }
 0x207   : > { %11235 = vst [vmem:[%s13062_s18 + $0x3f0] sm:$0xff] %v11103_v25  }
 0x208 PF: > { %s19_s17 = sadd.s32 1, %s11814_s17  }
 0x209   : > { %p16_p4 = scmp.ge.s32.totalorder %s19_s17, 6  }
 0x20b   :  { %18 = sbr.rel (!%p16_p4) target bundleno = 3 (0x3), region = 572 }

// kernel: forward.19
= control target key start
LH: loop header
LB: loop body
LE: loop exit
PB: predicated region body
PF: predicated region fallthrough
CT: control target
= control target key end

     0   :  { %s6149_s17 = smov 0   ;;  %s6977_s0 = inlined_call_operand.vmem [shape: bf16[128,128], index: 0, kind: input, shape index: {}]   ;;  %s6978_s1 = inlined_call_operand.vmem [shape: f32[1,128], index: 1, kind: input, shape index: {}]   ;;  %s6979_s2 = inlined_call_operand.vmem [shape: bf16[2048,72], index: 2, kind: input, shape index: {}]   ;;  %s6980_s3 = inlined_call_operand.<no memory space> [shape: bf16[], index: 3, kind: input, shape index: {}]   ;;  %s6981_s4 = inlined_call_operand.vmem [shape: bf16[2048,128], index: 4, kind: output, shape index: {}]  }
   0x1   :  { %v9_v0 = vstv %s6980_s3 }
   0x2   :  { %v6147_v1 = vunpack.i.l.bf16 %v9_v0 }
   0x3 LB: > { %s4947_s18 = sadd.s32 4294967295, %s6116_s17   ;;  %p4951_p0 = scmp.ge.s32.totalorder %s6116_s17, 1  ;;  %s6116_s17 = sphi %s6149_s17, %s19_s17  }
   0x4   : > { %p144_p1 = scmp.lt.s32.totalorder %s6116_s17, 3 }
   0x6   : > { %p145_p2 = pnand %p4951_p0, %p144_p1 }
   0x8   : > { %148 = sbr.rel (%p145_p2) target bundleno = 391 (0x187), region = 32 }
   0xf   : > { %v6038_v2 = vld [vmem:[%s6977_s0] sm:$0xff]   ;;  %s4952_s3 = sshll.u32 %s4947_s18, 7  ;;  %v192_v3 = vlaneseq  ;;  %v6039_v4 = vld [vmem:[%s6977_s0 + $0x8] sm:$0xff]   ;;  %v6040_v5 = vld [vmem:[%s6977_s0 + $0x10] sm:$0xff]   ;;  %v6118_v26 = vmov 0.0  }
  0x10   : > { %p169_p3 = scmp.lt.s32.totalorder %s4952_s3, 255  ;;  %5869 = vmatprep.subr.bf16.mxu0 %v6038_v2  ;;  %6013 = vmatprep.subr.bf16.mxu1 %v6038_v2  ;;  %v6041_v7 = vld [vmem:[%s6977_s0 + $0x18] sm:$0xff]   ;;  %v6042_v25 = vld [vmem:[%s6977_s0 + $0x20] sm:$0xff]   ;;  %v6043_v47 = vld [vmem:[%s6977_s0 + $0x28] sm:$0xff]  }
  0x11   : > { %5870 = vmatpush3.bf16.msra.mxu0 %v6038_v2  ;;  %6021 = vmatpush3.bf16.msra.mxu1 %v6038_v2  ;;  %v6168_v6 = vand.u32 127, %v192_v3  ;;  %v6044_v61 = vld [vmem:[%s6977_s0 + $0x30] sm:$0xff]  }
  0x12   : > { %s6983_s3 = smov (!%p169_p3, %s4952_s3), 255  ;;  %5871 = vmatprep.subr.bf16.mxu0 %v6039_v4  ;;  %6014 = vmatprep.subr.bf16.mxu1 %v6039_v4 }
  0x13   : > { %s4953_s25 = sshll.u32 %s6983_s3, 2  ;;  %vm195_vm0 = vcmp.lt.s32.totalorder %v6168_v6, 72 }
  0x14   : > { %s6176_s28 = scalar_lea.vmem %s6979_s2, %s4953_s25  ;;  %s6788_s18 = scalar_lea.vmem %s6981_s4, %s4953_s25 }
  0x15   : > { %5872 = vmatpush3.bf16.msra.mxu0 %v6039_v4  ;;  %6022 = vmatpush3.bf16.msra.mxu1 %v6039_v4  ;;  %v189_v8 = vld [vmem:[%s6176_s28] sm:$0xff]   ;;  %v4957_v10 = vld [vmem:[%s6176_s28 + $0x8] sm:$0xff]   ;;  %v4959_v16 = vld [vmem:[%s6176_s28 + $0x10] sm:$0xff]  }
  0x16   : > { %5873 = vmatprep.subr.bf16.mxu0 %v6040_v5  ;;  %6015 = vmatprep.subr.bf16.mxu1 %v6040_v5  ;;  %v5019_v9 = vld [vmem:[%s6176_s28 + $0x100] sm:$0xff]   ;;  %v190_v11 = vunpack.c.l.bf16 %v189_v8  ;;  %v211_v12 = vunpack.c.h.bf16 %v189_v8  ;;  %v5021_v15 = vld [vmem:[%s6176_s28 + $0x108] sm:$0xff]   ;;  %v233_v17 = vunpack.c.l.bf16 %v4957_v10  ;;  %v255_v18 = vunpack.c.h.bf16 %v4957_v10  ;;  %v5023_v31 = vld [vmem:[%s6176_s28 + $0x110] sm:$0xff]  }
  0x17   : > { %v1597_v13 = vunpack.c.l.bf16 %v5019_v9  ;;  %v1619_v14 = vunpack.c.h.bf16 %v5019_v9  ;;  %v1641_v19 = vunpack.c.l.bf16 %v5021_v15  ;;  %v1663_v20 = vunpack.c.h.bf16 %v5021_v15  ;;  %v4961_v40 = vld [vmem:[%s6176_s28 + $0x18] sm:$0xff]   ;;  %v4963_v46 = vld [vmem:[%s6176_s28 + $0x20] sm:$0xff]   ;;  %v4965_v8 = vld [vmem:[%s6176_s28 + $0x28] sm:$0xff]  }
  0x18   : > { %v196_v21 = vsel %vm195_vm0, %v190_v11, %v6147_v1  ;;  %v217_v22 = vsel %vm195_vm0, %v211_v12, %v6147_v1  ;;  %v277_v24 = vunpack.c.l.bf16 %v4959_v16  ;;  %v299_v30 = vunpack.c.h.bf16 %v4959_v16  ;;  %v5025_v41 = vld [vmem:[%s6176_s28 + $0x118] sm:$0xff]   ;;  %v5027_v56 = vld [vmem:[%s6176_s28 + $0x120] sm:$0xff]   ;;  %v5029_v9 = vld [vmem:[%s6176_s28 + $0x128] sm:$0xff]  }
  0x19   : > { %5874 = vmatpush3.bf16.msra.mxu0 %v6040_v5  ;;  %6023 = vmatpush3.bf16.msra.mxu1 %v6040_v5  ;;  %v1603_v23 = vsel %vm195_vm0, %v1597_v13, %v6147_v1  ;;  %v197_v27 = vpack.c.bf16 %v6118_v26, %v196_v21  ;;  %v219_v28 = vpack.c.bf16 %v6118_v26, %v217_v22  ;;  %v1685_v45 = vunpack.c.l.bf16 %v5023_v31  ;;  %v4967_v10 = vld [vmem:[%s6176_s28 + $0x30] sm:$0xff]  }
  0x1a   : > { %5875 = vmatprep.subr.bf16.mxu0 %v6041_v7  ;;  %6016 = vmatprep.subr.bf16.mxu1 %v6041_v7  ;;  %v1605_v29 = vpack.c.bf16 %v6118_v26, %v1603_v23  ;;  %v1625_v32 = vsel %vm195_vm0, %v1619_v14, %v6147_v1  ;;  %v239_v33 = vsel %vm195_vm0, %v233_v17, %v6147_v1  ;;  %v1707_v51 = vunpack.c.h.bf16 %v5023_v31 }
  0x1b   : > { %v261_v34 = vsel %vm195_vm0, %v255_v18, %v6147_v1  ;;  %v1647_v35 = vsel %vm195_vm0, %v1641_v19, %v6147_v1  ;;  %199 = vst [vmem:[#allocation7] sm:$0xf] %v197_v27  ;;  %221 = vst [vmem:[#allocation7 + $0x4] sm:$0xf] %v219_v28  ;;  %v1627_v36 = vpack.c.bf16 %v6118_v26, %v1625_v32  ;;  %v321_v53 = vunpack.c.l.bf16 %v4961_v40  ;;  %v6045_v27 = vld [vmem:[%s6977_s0 + $0x38] sm:$0xff]  }
  0x1c   : > { %1607 = vst [vmem:[#allocation7 + $0x100] sm:$0xf] %v1605_v29  ;;  %v241_v37 = vpack.c.bf16 %v6118_v26, %v239_v33  ;;  %v263_v38 = vpack.c.bf16 %v6118_v26, %v261_v34  ;;  %v1649_v39 = vpack.c.bf16 %v6118_v26, %v1647_v35  ;;  %v1669_v42 = vsel %vm195_vm0, %v1663_v20, %v6147_v1  ;;  %v5031_v20 = vld [vmem:[%s6176_s28 + $0x130] sm:$0xff]  }
  0x1d   : > { %5876 = vmatpush3.bf16.msra.mxu0 %v6041_v7  ;;  %6024 = vmatpush3.bf16.msra.mxu1 %v6041_v7  ;;  %v283_v43 = vsel %vm195_vm0, %v277_v24, %v6147_v1  ;;  %v305_v44 = vsel %vm195_vm0, %v299_v30, %v6147_v1  ;;  %1629 = vst [vmem:[#allocation7 + $0x104] sm:$0xf] %v1627_v36  ;;  %v343_v54 = vunpack.c.h.bf16 %v4961_v40  ;;  %v1729_v55 = vunpack.c.l.bf16 %v5025_v41  ;;  %v4969_v36 = vld [vmem:[%s6176_s28 + $0x38] sm:$0xff]  }
  0x1e   : > { %5877 = vmatprep.subr.bf16.mxu0 %v6042_v25  ;;  %6017 = vmatprep.subr.bf16.mxu1 %v6042_v25  ;;  %243 = vst [vmem:[#allocation7 + $0x8] sm:$0xf] %v241_v37  ;;  %265 = vst [vmem:[#allocation7 + $0xc] sm:$0xf] %v263_v38  ;;  %v1671_v48 = vpack.c.bf16 %v6118_v26, %v1669_v42  ;;  %v285_v49 = vpack.c.bf16 %v6118_v26, %v283_v43  ;;  %v1751_v59 = vunpack.c.h.bf16 %v5025_v41 }
  0x1f   : > { %1651 = vst [vmem:[#allocation7 + $0x108] sm:$0xf] %v1649_v39  ;;  %v307_v50 = vpack.c.bf16 %v6118_v26, %v305_v44  ;;  %v1691_v52 = vsel %vm195_vm0, %v1685_v45, %v6147_v1  ;;  %v1713_v58 = vsel %vm195_vm0, %v1707_v51, %v6147_v1  ;;  %v365_v60 = vunpack.c.l.bf16 %v4963_v46  ;;  %v5033_v45 = vld [vmem:[%s6176_s28 + $0x138] sm:$0xff]   ;;  %v5035_v51 = vld [vmem:[%s6176_s28 + $0x140] sm:$0xff]  }
  0x20   : > { %1673 = vst [vmem:[#allocation7 + $0x10c] sm:$0xf] %v1671_v48  ;;  %287 = vst [vmem:[#allocation7 + $0x10] sm:$0xf] %v285_v49  ;;  %v1693_v57 = vpack.c.bf16 %v6118_v26, %v1691_v52  ;;  %v1715_v62 = vpack.c.bf16 %v6118_v26, %v1713_v58  ;;  %v327_v63 = vsel %vm195_vm0, %v321_v53, %v6147_v1  ;;  %v387_v2 = vunpack.c.h.bf16 %v4963_v46 }
  0x21   : > { %309 = vst [vmem:[#allocation7 + $0x14] sm:$0xf] %v307_v50  ;;  %5878 = vmatpush3.bf16.msra.mxu0 %v6042_v25  ;;  %6025 = vmatpush3.bf16.msra.mxu1 %v6042_v25  ;;  %v349_v0 = vsel %vm195_vm0, %v343_v54, %v6147_v1  ;;  %v329_v3 = vpack.c.bf16 %v6118_v26, %v327_v63  ;;  %v1773_v7 = vunpack.c.l.bf16 %v5027_v56  ;;  %v1795_v23 = vunpack.c.h.bf16 %v5027_v56  ;;  %v4971_v50 = vld [vmem:[%s6176_s28 + $0x40] sm:$0xff]  }
  0x22   : > { %5879 = vmatprep.subr.bf16.mxu0 %v6043_v47  ;;  %6018 = vmatprep.subr.bf16.mxu1 %v6043_v47  ;;  %1695 = vst [vmem:[#allocation7 + $0x110] sm:$0xf] %v1693_v57  ;;  %v351_v4 = vpack.c.bf16 %v6118_v26, %v349_v0  ;;  %v1735_v5 = vsel %vm195_vm0, %v1729_v55, %v6147_v1  ;;  %v6046_v11 = vld [vmem:[#allocation7] sm:$0xff]   ;;  %1717 = vst [vmem:[#allocation7 + $0x114] sm:$0xf] %v1715_v62  ;;  %v409_v24 = vunpack.c.l.bf16 %v4965_v8  ;;  %v4973_v57 = vld [vmem:[%s6176_s28 + $0x48] sm:$0xff]  }
  0x23   : > { %v1737_v12 = vpack.c.bf16 %v6118_v26, %v1735_v5  ;;  %v1757_v13 = vsel %vm195_vm0, %v1751_v59, %v6147_v1  ;;  %v371_v14 = vsel %vm195_vm0, %v365_v60, %v6147_v1  ;;  %v393_v15 = vsel %vm195_vm0, %v387_v2, %v6147_v1  ;;  %331 = vst [vmem:[#allocation7 + $0x18] sm:$0xf] %v329_v3 }
  0x24   : > { %353 = vst [vmem:[#allocation7 + $0x1c] sm:$0xf] %v351_v4  ;;  %v1759_v16 = vpack.c.bf16 %v6118_v26, %v1757_v13  ;;  %v373_v17 = vpack.c.bf16 %v6118_v26, %v371_v14  ;;  %v395_v18 = vpack.c.bf16 %v6118_v26, %v393_v15  ;;  %v1779_v19 = vsel %vm195_vm0, %v1773_v7, %v6147_v1  ;;  %v6047_v21 = vld [vmem:[#allocation7 + $0x100] sm:$0xff]   ;;  %v5037_v15 = vld [vmem:[%s6176_s28 + $0x148] sm:$0xff]  }
  0x25   : > { %5880 = vmatpush3.bf16.msra.mxu0 %v6043_v47  ;;  %6026 = vmatpush3.bf16.msra.mxu1 %v6043_v47  ;;  %1739 = vst [vmem:[#allocation7 + $0x118] sm:$0xf] %v1737_v12  ;;  %v1781_v22 = vpack.c.bf16 %v6118_v26, %v1779_v19  ;;  %v431_v25 = vunpack.c.h.bf16 %v4965_v8  ;;  %v1817_v28 = vunpack.c.l.bf16 %v5029_v9  ;;  %v1839_v29 = vunpack.c.h.bf16 %v5029_v9  ;;  %v6048_v52 = vld [vmem:[#allocation7 + $0x8] sm:$0xff]  }
  0x26   : > { %5881 = vmatprep.subr.bf16.mxu0 %v6044_v61  ;;  %6019 = vmatprep.subr.bf16.mxu1 %v6044_v61  ;;  %1761 = vst [vmem:[#allocation7 + $0x11c] sm:$0xf] %v1759_v16  ;;  %375 = vst [vmem:[#allocation7 + $0x20] sm:$0xf] %v373_v17  ;;  %v453_v30 = vunpack.c.l.bf16 %v4967_v10  ;;  %v475_v31 = vunpack.c.h.bf16 %v4967_v10  ;;  %v1801_v32 = vsel %vm195_vm0, %v1795_v23, %v6147_v1  ;;  %v1861_v35 = vunpack.c.l.bf16 %v5031_v20 }
  0x27   : > { %397 = vst [vmem:[#allocation7 + $0x24] sm:$0xf] %v395_v18  ;;  %5885 = vmatprep.mubr.bf16.mxu0 %v6046_v11  ;;  %5949 = vmatprep.mubr.bf16.mxu1 %v6047_v21  ;;  %1783 = vst [vmem:[#allocation7 + $0x120] sm:$0xf] %v1781_v22  ;;  %v415_v33 = vsel %vm195_vm0, %v409_v24, %v6147_v1  ;;  %v437_v34 = vsel %vm195_vm0, %v431_v25, %v6147_v1  ;;  %v1883_v44 = vunpack.c.h.bf16 %v5031_v20  ;;  %v6049_v58 = vld [vmem:[#allocation7 + $0x108] sm:$0xff]   ;;  %v4975_v20 = vld [vmem:[%s6176_s28 + $0x50] sm:$0xff]  }
  0x28   : > { %v1803_v37 = vpack.c.bf16 %v6118_v26, %v1801_v32  ;;  %v417_v38 = vpack.c.bf16 %v6118_v26, %v415_v33  ;;  %v439_v39 = vpack.c.bf16 %v6118_v26, %v437_v34  ;;  %v1823_v40 = vsel %vm195_vm0, %v1817_v28, %v6147_v1  ;;  %v6050_v59 = vld [vmem:[#allocation7 + $0x10] sm:$0xff]  }
  0x29   : > { %5882 = vmatpush3.bf16.msra.mxu0 %v6044_v61  ;;  %6027 = vmatpush3.bf16.msra.mxu1 %v6044_v61  ;;  %v1825_v41 = vpack.c.bf16 %v6118_v26, %v1823_v40  ;;  %v1845_v42 = vsel %vm195_vm0, %v1839_v29, %v6147_v1  ;;  %v459_v43 = vsel %vm195_vm0, %v453_v30, %v6147_v1  ;;  %v497_v49 = vunpack.c.l.bf16 %v4969_v36  ;;  %v6051_v0 = vld [vmem:[#allocation7 + $0x110] sm:$0xff]  }
  0x2a   : > { %5883 = vmatprep.subr.bf16.mxu0 %v6045_v27  ;;  %6020 = vmatprep.subr.bf16.mxu1 %v6045_v27  ;;  %1805 = vst [vmem:[#allocation7 + $0x124] sm:$0xf] %v1803_v37  ;;  %419 = vst [vmem:[#allocation7 + $0x28] sm:$0xf] %v417_v38  ;;  %v1847_v46 = vpack.c.bf16 %v6118_v26, %v1845_v42  ;;  %v461_v47 = vpack.c.bf16 %v6118_v26, %v459_v43  ;;  %v519_v56 = vunpack.c.h.bf16 %v4969_v36  ;;  %v5039_v25 = vld [vmem:[%s6176_s28 + $0x150] sm:$0xff]   ;;  %v5041_v37 = vld [vmem:[%s6176_s28 + $0x158] sm:$0xff]  }
  0x2b   : > { %441 = vst [vmem:[#allocation7 + $0x2c] sm:$0xf] %v439_v39  ;;  %v481_v48 = vsel %vm195_vm0, %v475_v31, %v6147_v1  ;;  %1827 = vst [vmem:[#allocation7 + $0x128] sm:$0xf] %v1825_v41  ;;  %v1867_v54 = vsel %vm195_vm0, %v1861_v35, %v6147_v1  ;;  %v1889_v55 = vsel %vm195_vm0, %v1883_v44, %v6147_v1  ;;  %v1905_v63 = vunpack.c.l.bf16 %v5033_v45  ;;  %v4977_v31 = vld [vmem:[%s6176_s28 + $0x58] sm:$0xff]  }
  0x2c   : > { %v483_v53 = vpack.c.bf16 %v6118_v26, %v481_v48  ;;  %1849 = vst [vmem:[#allocation7 + $0x12c] sm:$0xf] %v1847_v46  ;;  %463 = vst [vmem:[#allocation7 + $0x30] sm:$0xf] %v461_v47  ;;  %v1869_v60 = vpack.c.bf16 %v6118_v26, %v1867_v54  ;;  %v1891_v61 = vpack.c.bf16 %v6118_v26, %v1889_v55  ;;  %v1927_v4 = vunpack.c.h.bf16 %v5033_v45  ;;  %v6052_v32 = vld [vmem:[#allocation7 + $0x18] sm:$0xff]   ;;  %v5043_v54 = vld [vmem:[%s6176_s28 + $0x160] sm:$0xff]  }
  0x2d   : > { %v503_v62 = vsel %vm195_vm0, %v497_v49, %v6147_v1  ;;  %5884 = vmatpush3.bf16.msra.mxu0 %v6045_v27  ;;  %6028 = vmatpush3.bf16.msra.mxu1 %v6045_v27  ;;  %v525_v3 = vsel %vm195_vm0, %v519_v56, %v6147_v1  ;;  %v541_v5 = vunpack.c.l.bf16 %v4971_v50  ;;  %v1911_v8 = vsel %vm195_vm0, %v1905_v63, %v6147_v1  ;;  %v6053_v38 = vld [vmem:[#allocation7 + $0x118] sm:$0xff]  }
  0x2e   : > { %485 = vst [vmem:[#allocation7 + $0x34] sm:$0xf] %v483_v53  ;;  %v505_v2 = vpack.c.bf16 %v6118_v26, %v503_v62  ;;  %1871 = vst [vmem:[#allocation7 + $0x130] sm:$0xf] %v1869_v60  ;;  %v527_v7 = vpack.c.bf16 %v6118_v26, %v525_v3  ;;  %v563_v9 = vunpack.c.h.bf16 %v4971_v50  ;;  %v1949_v10 = vunpack.c.l.bf16 %v5035_v51  ;;  %v6054_v39 = vld [vmem:[#allocation7 + $0x20] sm:$0xff]  }
  0x2f   : > { %1893 = vst [vmem:[#allocation7 + $0x134] sm:$0xf] %v1891_v61  ;;  %v1913_v11 = vpack.c.bf16 %v6118_v26, %v1911_v8  ;;  %v1933_v12 = vsel %vm195_vm0, %v1927_v4, %v6147_v1  ;;  %v547_v13 = vsel %vm195_vm0, %v541_v5, %v6147_v1  ;;  %v1971_v14 = vunpack.c.h.bf16 %v5035_v51  ;;  %v4979_v53 = vld [vmem:[%s6176_s28 + $0x60] sm:$0xff]   ;;  %v4981_v4 = vld [vmem:[%s6176_s28 + $0x68] sm:$0xff]  }
  0x30   : > { %507 = vst [vmem:[#allocation7 + $0x38] sm:$0xf] %v505_v2  ;;  %5886 = vmatmul.mubr.bf16.vlgmr.msra.gmra.mrb[0].mxu0 %v6048_v52  ;;  %5950 = vmatmul.mubr.bf16.vlgmr.msra.gmra.mrb[0].mxu1 %v6049_v58  ;;  %529 = vst [vmem:[#allocation7 + $0x3c] sm:$0xf] %v527_v7  ;;  %v1935_v16 = vpack.c.bf16 %v6118_v26, %v1933_v12  ;;  %v549_v17 = vpack.c.bf16 %v6118_v26, %v547_v13  ;;  %v585_v19 = vunpack.c.l.bf16 %v4973_v57 }
  0x31   : > { %v569_v18 = vsel %vm195_vm0, %v563_v9, %v6147_v1  ;;  %5889 = vmatprep.mubr.bf16.mxu0 %v6050_v59  ;;  %5953 = vmatprep.mubr.bf16.mxu1 %v6051_v0  ;;  %1915 = vst [vmem:[#allocation7 + $0x138] sm:$0xf] %v1913_v11  ;;  %v1955_v22 = vsel %vm195_vm0, %v1949_v10, %v6147_v1  ;;  %v607_v24 = vunpack.c.h.bf16 %v4973_v57  ;;  %v1993_v30 = vunpack.c.l.bf16 %v5037_v15  ;;  %v6055_v44 = vld [vmem:[#allocation7 + $0x120] sm:$0xff]   ;;  %v5045_v10 = vld [vmem:[%s6176_s28 + $0x168] sm:$0xff]   ;;  %v4983_v11 = vld [vmem:[%s6176_s28 + $0x70] sm:$0xff]  }
  0x32   : > { %v571_v21 = vpack.c.bf16 %v6118_v26, %v569_v18  ;;  %v1977_v23 = vsel %vm195_vm0, %v1971_v14, %v6147_v1  ;;  %1937 = vst [vmem:[#allocation7 + $0x13c] sm:$0xf] %v1935_v16  ;;  %551 = vst [vmem:[#allocation7 + $0x40] sm:$0xf] %v549_v17  ;;  %v1957_v27 = vpack.c.bf16 %v6118_v26, %v1955_v22  ;;  %v2015_v35 = vunpack.c.h.bf16 %v5037_v15  ;;  %v5047_v16 = vld [vmem:[%s6176_s28 + $0x170] sm:$0xff]   ;;  %v6056_v17 = vld [vmem:[#allocation7 + $0x28] sm:$0xff]  }
  0x33   : > { %v1979_v28 = vpack.c.bf16 %v6118_v26, %v1977_v23  ;;  %v591_v29 = vsel %vm195_vm0, %v585_v19, %v6147_v1  ;;  %v613_v34 = vsel %vm195_vm0, %v607_v24, %v6147_v1  ;;  %v629_v36 = vunpack.c.l.bf16 %v4975_v20  ;;  %v6057_v18 = vld [vmem:[#allocation7 + $0x128] sm:$0xff]  }
  0x34   : > { %573 = vst [vmem:[#allocation7 + $0x44] sm:$0xf] %v571_v21  ;;  %v593_v33 = vpack.c.bf16 %v6118_v26, %v591_v29  ;;  %1959 = vst [vmem:[#allocation7 + $0x140] sm:$0xf] %v1957_v27  ;;  %v615_v40 = vpack.c.bf16 %v6118_v26, %v613_v34  ;;  %v1999_v41 = vsel %vm195_vm0, %v1993_v30, %v6147_v1  ;;  %v651_v42 = vunpack.c.h.bf16 %v4975_v20 }
  0x35   : > { %1981 = vst [vmem:[#allocation7 + $0x144] sm:$0xf] %v1979_v28  ;;  %v2037_v43 = vunpack.c.l.bf16 %v5039_v25  ;;  %v2001_v45 = vpack.c.bf16 %v6118_v26, %v1999_v41  ;;  %v2021_v46 = vsel %vm195_vm0, %v2015_v35, %v6147_v1  ;;  %v635_v47 = vsel %vm195_vm0, %v629_v36, %v6147_v1  ;;  %v6058_v23 = vld [vmem:[#allocation7 + $0x30] sm:$0xff]  }
  0x36   : > { %595 = vst [vmem:[#allocation7 + $0x48] sm:$0xf] %v593_v33  ;;  %v2059_v48 = vunpack.c.h.bf16 %v5039_v25  ;;  %617 = vst [vmem:[#allocation7 + $0x4c] sm:$0xf] %v615_v40  ;;  %v2023_v49 = vpack.c.bf16 %v6118_v26, %v2021_v46  ;;  %v637_v50 = vpack.c.bf16 %v6118_v26, %v635_v47  ;;  %v657_v51 = vsel %vm195_vm0, %v651_v42, %v6147_v1  ;;  %v6059_v24 = vld [vmem:[#allocation7 + $0x130] sm:$0xff]   ;;  %v4985_v42 = vld [vmem:[%s6176_s28 + $0x78] sm:$0xff]  }
  0x37   : > { %v2043_v52 = vsel %vm195_vm0, %v2037_v43, %v6147_v1  ;;  %2003 = vst [vmem:[#allocation7 + $0x148] sm:$0xf] %v2001_v45  ;;  %v659_v55 = vpack.c.bf16 %v6118_v26, %v657_v51  ;;  %v673_v58 = vunpack.c.l.bf16 %v4977_v31  ;;  %v695_v60 = vunpack.c.h.bf16 %v4977_v31  ;;  %v5049_v47 = vld [vmem:[%s6176_s28 + $0x178] sm:$0xff]  }
  0x38   : > { %v2045_v56 = vpack.c.bf16 %v6118_v26, %v2043_v52  ;;  %v2065_v57 = vsel %vm195_vm0, %v2059_v48, %v6147_v1  ;;  %5890 = vmatmul.mubr.bf16.gmra.mrb[4].mxu0 %v6052_v32  ;;  %5954 = vmatmul.mubr.bf16.gmra.mrb[4].mxu1 %v6053_v38  ;;  %2025 = vst [vmem:[#allocation7 + $0x14c] sm:$0xf] %v2023_v49  ;;  %639 = vst [vmem:[#allocation7 + $0x50] sm:$0xf] %v637_v50  ;;  %v2081_v61 = vunpack.c.l.bf16 %v5041_v37  ;;  %v4987_v52 = vld [vmem:[%s6176_s28 + $0x80] sm:$0xff]  }
  0x39   : > { %v2067_v59 = vpack.c.bf16 %v6118_v26, %v2065_v57  ;;  %v2103_v62 = vunpack.c.h.bf16 %v5041_v37  ;;  %5893 = vmatprep.mubr.bf16.mxu0 %v6054_v39  ;;  %5957 = vmatprep.mubr.bf16.mxu1 %v6055_v44  ;;  %661 = vst [vmem:[#allocation7 + $0x54] sm:$0xf] %v659_v55  ;;  %v679_v63 = vsel %vm195_vm0, %v673_v58, %v6147_v1  ;;  %v717_v0 = vunpack.c.l.bf16 %v4979_v53  ;;  %v6061_v55 = vld [vmem:[#allocation7 + $0x138] sm:$0xff]  }
  0x3a   : > { %2047 = vst [vmem:[#allocation7 + $0x150] sm:$0xf] %v2045_v56  ;;  %v739_v2 = vunpack.c.h.bf16 %v4979_v53  ;;  %v2125_v3 = vunpack.c.l.bf16 %v5043_v54  ;;  %v681_v5 = vpack.c.bf16 %v6118_v26, %v679_v63  ;;  %v701_v7 = vsel %vm195_vm0, %v695_v60, %v6147_v1  ;;  %v5051_v53 = vld [vmem:[%s6176_s28 + $0x180] sm:$0xff]  }
  0x3b   : > { %2069 = vst [vmem:[#allocation7 + $0x154] sm:$0xf] %v2067_v59  ;;  %v2087_v8 = vsel %vm195_vm0, %v2081_v61, %v6147_v1  ;;  %v2109_v9 = vsel %vm195_vm0, %v2103_v62, %v6147_v1  ;;  %v703_v12 = vpack.c.bf16 %v6118_v26, %v701_v7  ;;  %v723_v15 = vsel %vm195_vm0, %v717_v0, %v6147_v1  ;;  %v6062_v60 = vld [vmem:[#allocation7 + $0x40] sm:$0xff]  }
  0x3c   : > { %v2089_v13 = vpack.c.bf16 %v6118_v26, %v2087_v8  ;;  %v2111_v14 = vpack.c.bf16 %v6118_v26, %v2109_v9  ;;  %683 = vst [vmem:[#allocation7 + $0x58] sm:$0xf] %v681_v5  ;;  %v725_v19 = vpack.c.bf16 %v6118_v26, %v723_v15  ;;  %v745_v20 = vsel %vm195_vm0, %v739_v2, %v6147_v1  ;;  %v6063_v2 = vld [vmem:[#allocation7 + $0x140] sm:$0xff]  }
  0x3d   : > { %v2131_v21 = vsel %vm195_vm0, %v2125_v3, %v6147_v1  ;;  %v2147_v22 = vunpack.c.h.bf16 %v5043_v54  ;;  %705 = vst [vmem:[#allocation7 + $0x5c] sm:$0xf] %v703_v12  ;;  %v747_v25 = vpack.c.bf16 %v6118_v26, %v745_v20  ;;  %v761_v28 = vunpack.c.l.bf16 %v4981_v4  ;;  %v6060_v54 = vld [vmem:[#allocation7 + $0x38] sm:$0xff]   ;;  %v4989_v12 = vld [vmem:[%s6176_s28 + $0x88] sm:$0xff]  }
  0x3e   : > { %2091 = vst [vmem:[#allocation7 + $0x158] sm:$0xf] %v2089_v13  ;;  %2113 = vst [vmem:[#allocation7 + $0x15c] sm:$0xf] %v2111_v14  ;;  %v2133_v27 = vpack.c.bf16 %v6118_v26, %v2131_v21  ;;  %v783_v29 = vunpack.c.h.bf16 %v4981_v4  ;;  %v2169_v31 = vunpack.c.l.bf16 %v5045_v10  ;;  %v2191_v32 = vunpack.c.h.bf16 %v5045_v10 }
  0x3f   : > { %727 = vst [vmem:[#allocation7 + $0x60] sm:$0xf] %v725_v19  ;;  %v2153_v30 = vsel %vm195_vm0, %v2147_v22, %v6147_v1  ;;  %v805_v33 = vunpack.c.l.bf16 %v4983_v11  ;;  %749 = vst [vmem:[#allocation7 + $0x64] sm:$0xf] %v747_v25  ;;  %v767_v35 = vsel %vm195_vm0, %v761_v28, %v6147_v1  ;;  %v827_v37 = vunpack.c.h.bf16 %v4983_v11  ;;  %v5055_v28 = vld [vmem:[%s6176_s28 + $0x190] sm:$0xff]  }
  0x40   : > { %2135 = vst [vmem:[#allocation7 + $0x160] sm:$0xf] %v2133_v27  ;;  %v2155_v34 = vpack.c.bf16 %v6118_v26, %v2153_v30  ;;  %v789_v36 = vsel %vm195_vm0, %v783_v29, %v6147_v1  ;;  %5894 = vmatmul.mubr.bf16.gmra.mrb[8].mxu0 %v6056_v17  ;;  %5958 = vmatmul.mubr.bf16.gmra.mrb[8].mxu1 %v6057_v18  ;;  %v2213_v41 = vunpack.c.l.bf16 %v5047_v16  ;;  %v2235_v46 = vunpack.c.h.bf16 %v5047_v16  ;;  %v5053_v17 = vld [vmem:[%s6176_s28 + $0x188] sm:$0xff]   ;;  %v4991_v18 = vld [vmem:[%s6176_s28 + $0x90] sm:$0xff]  }
  0x41   : > { %v769_v38 = vpack.c.bf16 %v6118_v26, %v767_v35  ;;  %v791_v39 = vpack.c.bf16 %v6118_v26, %v789_v36  ;;  %v2175_v40 = vsel %vm195_vm0, %v2169_v31, %v6147_v1  ;;  %5897 = vmatprep.mubr.bf16.mxu0 %v6058_v23  ;;  %5961 = vmatprep.mubr.bf16.mxu1 %v6059_v24  ;;  %v849_v59 = vunpack.c.l.bf16 %v4985_v42  ;;  %v6064_v35 = vld [vmem:[#allocation7 + $0x48] sm:$0xff]  }
  0x42   : > { %2157 = vst [vmem:[#allocation7 + $0x164] sm:$0xf] %v2155_v34  ;;  %v2177_v43 = vpack.c.bf16 %v6118_v26, %v2175_v40  ;;  %v2197_v44 = vsel %vm195_vm0, %v2191_v32, %v6147_v1  ;;  %v811_v45 = vsel %vm195_vm0, %v805_v33, %v6147_v1  ;;  %v833_v50 = vsel %vm195_vm0, %v827_v37, %v6147_v1  ;;  %v4993_v33 = vld [vmem:[%s6176_s28 + $0x98] sm:$0xff]   ;;  %v4995_v40 = vld [vmem:[%s6176_s28 + $0xa0] sm:$0xff]  }
  0x43   : > { %771 = vst [vmem:[#allocation7 + $0x68] sm:$0xf] %v769_v38  ;;  %793 = vst [vmem:[#allocation7 + $0x6c] sm:$0xf] %v791_v39  ;;  %v2199_v48 = vpack.c.bf16 %v6118_v26, %v2197_v44  ;;  %v813_v49 = vpack.c.bf16 %v6118_v26, %v811_v45  ;;  %v2219_v51 = vsel %vm195_vm0, %v2213_v41, %v6147_v1  ;;  %v871_v62 = vunpack.c.h.bf16 %v4985_v42  ;;  %v5057_v34 = vld [vmem:[%s6176_s28 + $0x198] sm:$0xff]   ;;  %v6065_v41 = vld [vmem:[#allocation7 + $0x148] sm:$0xff]  }
  0x44   : > { %2179 = vst [vmem:[#allocation7 + $0x168] sm:$0xf] %v2177_v43  ;;  %v835_v56 = vpack.c.bf16 %v6118_v26, %v833_v50  ;;  %v2221_v57 = vpack.c.bf16 %v6118_v26, %v2219_v51  ;;  %v2241_v58 = vsel %vm195_vm0, %v2235_v46, %v6147_v1  ;;  %v2257_v63 = vunpack.c.l.bf16 %v5049_v47  ;;  %v6066_v46 = vld [vmem:[#allocation7 + $0x50] sm:$0xff]  }
  0x45   : > { %2201 = vst [vmem:[#allocation7 + $0x16c] sm:$0xf] %v2199_v48  ;;  %815 = vst [vmem:[#allocation7 + $0x70] sm:$0xf] %v813_v49  ;;  %v2243_v61 = vpack.c.bf16 %v6118_v26, %v2241_v58  ;;  %v2279_v0 = vunpack.c.h.bf16 %v5049_v47  ;;  %v855_v3 = vsel %vm195_vm0, %v849_v59, %v6147_v1  ;;  %v893_v4 = vunpack.c.l.bf16 %v4987_v52  ;;  %v6067_v47 = vld [vmem:[#allocation7 + $0x150] sm:$0xff]  }
  0x46   : > { %837 = vst [vmem:[#allocation7 + $0x74] sm:$0xf] %v835_v56  ;;  %2223 = vst [vmem:[#allocation7 + $0x170] sm:$0xf] %v2221_v57  ;;  %v915_v5 = vunpack.c.h.bf16 %v4987_v52  ;;  %v2301_v7 = vunpack.c.l.bf16 %v5051_v53  ;;  %v857_v8 = vpack.c.bf16 %v6118_v26, %v855_v3  ;;  %v877_v9 = vsel %vm195_vm0, %v871_v62, %v6147_v1  ;;  %v5059_v56 = vld [vmem:[%s6176_s28 + $0x1a0] sm:$0xff]  }
  0x47   : > { %2245 = vst [vmem:[#allocation7 + $0x174] sm:$0xf] %v2243_v61  ;;  %v2263_v10 = vsel %vm195_vm0, %v2257_v63, %v6147_v1  ;;  %v2285_v11 = vsel %vm195_vm0, %v2279_v0, %v6147_v1  ;;  %v879_v13 = vpack.c.bf16 %v6118_v26, %v877_v9  ;;  %v899_v16 = vsel %vm195_vm0, %v893_v4, %v6147_v1 }
  0x48   : > { %v2265_v14 = vpack.c.bf16 %v6118_v26, %v2263_v10  ;;  %v2287_v15 = vpack.c.bf16 %v6118_v26, %v2285_v11  ;;  %5898 = vmatmul.mubr.bf16.gmra.mrb[12].mxu0 %v6060_v54  ;;  %5962 = vmatmul.mubr.bf16.gmra.mrb[12].mxu1 %v6061_v55  ;;  %859 = vst [vmem:[#allocation7 + $0x78] sm:$0xf] %v857_v8  ;;  %v2323_v22 = vunpack.c.h.bf16 %v5051_v53  ;;  %v937_v25 = vunpack.c.l.bf16 %v4989_v12 }
  0x49   : > { %v901_v19 = vpack.c.bf16 %v6118_v26, %v899_v16  ;;  %v921_v20 = vsel %vm195_vm0, %v915_v5, %v6147_v1  ;;  %v2307_v21 = vsel %vm195_vm0, %v2301_v7, %v6147_v1  ;;  %5901 = vmatprep.mubr.bf16.mxu0 %v6062_v60  ;;  %5965 = vmatprep.mubr.bf16.mxu1 %v6063_v2  ;;  %v959_v27 = vunpack.c.h.bf16 %v4989_v12  ;;  %v4997_v7 = vld [vmem:[%s6176_s28 + $0xa8] sm:$0xff]  }
  0x4a   : > { %881 = vst [vmem:[#allocation7 + $0x7c] sm:$0xf] %v879_v13  ;;  %2267 = vst [vmem:[#allocation7 + $0x178] sm:$0xf] %v2265_v14  ;;  %v923_v23 = vpack.c.bf16 %v6118_v26, %v921_v20  ;;  %v2309_v24 = vpack.c.bf16 %v6118_v26, %v2307_v21  ;;  %v2329_v29 = vsel %vm195_vm0, %v2323_v22, %v6147_v1  ;;  %v2345_v30 = vunpack.c.l.bf16 %v5053_v17  ;;  %v5061_v12 = vld [vmem:[%s6176_s28 + $0x1a8] sm:$0xff]   ;;  %v6068_v13 = vld [vmem:[#allocation7 + $0x58] sm:$0xff]  }
  0x4b   : > { %2289 = vst [vmem:[#allocation7 + $0x17c] sm:$0xf] %v2287_v15  ;;  %903 = vst [vmem:[#allocation7 + $0x80] sm:$0xf] %v901_v19  ;;  %v2367_v31 = vunpack.c.h.bf16 %v5053_v17  ;;  %v981_v32 = vunpack.c.l.bf16 %v4991_v18  ;;  %v2331_v36 = vpack.c.bf16 %v6118_v26, %v2329_v29  ;;  %v943_v37 = vsel %vm195_vm0, %v937_v25, %v6147_v1  ;;  %v5063_v19 = vld [vmem:[%s6176_s28 + $0x1b0] sm:$0xff]   ;;  %v6069_v20 = vld [vmem:[#allocation7 + $0x158] sm:$0xff]  }
  0x4c   : > { %925 = vst [vmem:[#allocation7 + $0x84] sm:$0xf] %v923_v23  ;;  %2311 = vst [vmem:[#allocation7 + $0x180] sm:$0xf] %v2309_v24  ;;  %v965_v38 = vsel %vm195_vm0, %v959_v27, %v6147_v1  ;;  %v1003_v39 = vunpack.c.h.bf16 %v4991_v18  ;;  %v945_v42 = vpack.c.bf16 %v6118_v26, %v943_v37  ;;  %v2351_v44 = vsel %vm195_vm0, %v2345_v30, %v6147_v1  ;;  %v4999_v18 = vld [vmem:[%s6176_s28 + $0xb0] sm:$0xff]   ;;  %v6070_v21 = vld [vmem:[#allocation7 + $0x60] sm:$0xff]  }
  0x4d   : > { %v967_v43 = vpack.c.bf16 %v6118_v26, %v965_v38  ;;  %v2373_v45 = vsel %vm195_vm0, %v2367_v31, %v6147_v1  ;;  %2333 = vst [vmem:[#allocation7 + $0x184] sm:$0xf] %v2331_v36  ;;  %v2353_v48 = vpack.c.bf16 %v6118_v26, %v2351_v44  ;;  %v987_v50 = vsel %vm195_vm0, %v981_v32, %v6147_v1  ;;  %v6071_v27 = vld [vmem:[#allocation7 + $0x160] sm:$0xff]   ;;  %v5001_v44 = vld [vmem:[%s6176_s28 + $0xb8] sm:$0xff]  }
  0x4e   : > { %v2375_v49 = vpack.c.bf16 %v6118_v26, %v2373_v45  ;;  %v1009_v51 = vsel %vm195_vm0, %v1003_v39, %v6147_v1  ;;  %947 = vst [vmem:[#allocation7 + $0x88] sm:$0xf] %v945_v42  ;;  %v989_v52 = vpack.c.bf16 %v6118_v26, %v987_v50  ;;  %v2389_v54 = vunpack.c.l.bf16 %v5055_v28  ;;  %v5003_v50 = vld [vmem:[%s6176_s28 + $0xc0] sm:$0xff]  }
  0x4f   : > { %969 = vst [vmem:[#allocation7 + $0x8c] sm:$0xf] %v967_v43  ;;  %v1011_v53 = vpack.c.bf16 %v6118_v26, %v1009_v51  ;;  %v2411_v55 = vunpack.c.h.bf16 %v5055_v28  ;;  %2355 = vst [vmem:[#allocation7 + $0x188] sm:$0xf] %v2353_v48  ;;  %v1025_v57 = vunpack.c.l.bf16 %v4993_v33  ;;  %v1047_v58 = vunpack.c.h.bf16 %v4993_v33 }
  0x50   : > { %2377 = vst [vmem:[#allocation7 + $0x18c] sm:$0xf] %v2375_v49  ;;  %v2433_v59 = vunpack.c.l.bf16 %v5057_v34  ;;  %v2455_v60 = vunpack.c.h.bf16 %v5057_v34  ;;  %5902 = vmatmul.mubr.bf16.gmra.mrb[16].mxu0 %v6064_v35  ;;  %5966 = vmatmul.mubr.bf16.gmra.mrb[16].mxu1 %v6065_v41  ;;  %991 = vst [vmem:[#allocation7 + $0x90] sm:$0xf] %v989_v52  ;;  %v2395_v61 = vsel %vm195_vm0, %v2389_v54, %v6147_v1  ;;  %v1069_v63 = vunpack.c.l.bf16 %v4995_v40  ;;  %v5065_v49 = vld [vmem:[%s6176_s28 + $0x1b8] sm:$0xff]  }
  0x51   : > { %1013 = vst [vmem:[#allocation7 + $0x94] sm:$0xf] %v1011_v53  ;;  %v2417_v62 = vsel %vm195_vm0, %v2411_v55, %v6147_v1  ;;  %v1091_v0 = vunpack.c.h.bf16 %v4995_v40  ;;  %5905 = vmatprep.mubr.bf16.mxu0 %v6066_v46  ;;  %5969 = vmatprep.mubr.bf16.mxu1 %v6067_v47  ;;  %v2397_v2 = vpack.c.bf16 %v6118_v26, %v2395_v61  ;;  %v2477_v5 = vunpack.c.l.bf16 %v5059_v56  ;;  %v5067_v55 = vld [vmem:[%s6176_s28 + $0x1c0] sm:$0xff]  }
  0x52   : > { %v2419_v3 = vpack.c.bf16 %v6118_v26, %v2417_v62  ;;  %v1031_v4 = vsel %vm195_vm0, %v1025_v57, %v6147_v1  ;;  %v1053_v9 = vsel %vm195_vm0, %v1047_v58, %v6147_v1  ;;  %v2439_v10 = vsel %vm195_vm0, %v2433_v59, %v6147_v1  ;;  %v6073_v57 = vld [vmem:[#allocation7 + $0x168] sm:$0xff]   ;;  %v6074_v62 = vld [vmem:[#allocation7 + $0x70] sm:$0xff]  }
  0x53   : > { %v1033_v8 = vpack.c.bf16 %v6118_v26, %v1031_v4  ;;  %v2461_v11 = vsel %vm195_vm0, %v2455_v60, %v6147_v1  ;;  %2399 = vst [vmem:[#allocation7 + $0x190] sm:$0xf] %v2397_v2  ;;  %v1055_v14 = vpack.c.bf16 %v6118_v26, %v1053_v9  ;;  %v2441_v15 = vpack.c.bf16 %v6118_v26, %v2439_v10  ;;  %v6075_v4 = vld [vmem:[#allocation7 + $0x170] sm:$0xff]  }
  0x54   : > { %2421 = vst [vmem:[#allocation7 + $0x194] sm:$0xf] %v2419_v3  ;;  %v2463_v16 = vpack.c.bf16 %v6118_v26, %v2461_v11  ;;  %v1075_v17 = vsel %vm195_vm0, %v1069_v63, %v6147_v1  ;;  %v1097_v23 = vsel %vm195_vm0, %v1091_v0, %v6147_v1  ;;  %v2483_v24 = vsel %vm195_vm0, %v2477_v5, %v6147_v1 }
  0x55   : > { %1035 = vst [vmem:[#allocation7 + $0x98] sm:$0xf] %v1033_v8  ;;  %v1077_v22 = vpack.c.bf16 %v6118_v26, %v1075_v17  ;;  %v2499_v25 = vunpack.c.h.bf16 %v5059_v56  ;;  %1057 = vst [vmem:[#allocation7 + $0x9c] sm:$0xf] %v1055_v14  ;;  %v1099_v28 = vpack.c.bf16 %v6118_v26, %v1097_v23  ;;  %v2485_v29 = vpack.c.bf16 %v6118_v26, %v2483_v24  ;;  %v6072_v56 = vld [vmem:[#allocation7 + $0x68] sm:$0xff]  }
  0x56   : > { %2443 = vst [vmem:[#allocation7 + $0x198] sm:$0xf] %v2441_v15  ;;  %2465 = vst [vmem:[#allocation7 + $0x19c] sm:$0xf] %v2463_v16  ;;  %v1113_v30 = vunpack.c.l.bf16 %v4997_v7  ;;  %v1135_v31 = vunpack.c.h.bf16 %v4997_v7  ;;  %v2521_v33 = vunpack.c.l.bf16 %v5061_v12  ;;  %v2543_v34 = vunpack.c.h.bf16 %v5061_v12  ;;  %v5005_v14 = vld [vmem:[%s6176_s28 + $0xc8] sm:$0xff]  }
  0x57   : > { %1079 = vst [vmem:[#allocation7 + $0xa0] sm:$0xf] %v1077_v22  ;;  %v2505_v32 = vsel %vm195_vm0, %v2499_v25, %v6147_v1  ;;  %v1157_v35 = vunpack.c.l.bf16 %v4999_v18  ;;  %1101 = vst [vmem:[#allocation7 + $0xa4] sm:$0xf] %v1099_v28  ;;  %v1179_v39 = vunpack.c.h.bf16 %v4999_v18  ;;  %v2565_v43 = vunpack.c.l.bf16 %v5063_v19 }
  0x58   : > { %2487 = vst [vmem:[#allocation7 + $0x1a0] sm:$0xf] %v2485_v29  ;;  %v2507_v36 = vpack.c.bf16 %v6118_v26, %v2505_v32  ;;  %v1119_v37 = vsel %vm195_vm0, %v1113_v30, %v6147_v1  ;;  %v1141_v38 = vsel %vm195_vm0, %v1135_v31, %v6147_v1  ;;  %5906 = vmatmul.mubr.bf16.gmra.mrb[20].mxu0 %v6068_v13  ;;  %v2587_v48 = vunpack.c.h.bf16 %v5063_v19  ;;  %v5069_v19 = vld [vmem:[%s6176_s28 + $0x1c8] sm:$0xff]   ;;  %v5071_v30 = vld [vmem:[%s6176_s28 + $0x1d0] sm:$0xff]  }
  0x59   : > { %5970 = vmatmul.mubr.bf16.gmra.mrb[20].mxu1 %v6069_v20  ;;  %v1121_v40 = vpack.c.bf16 %v6118_v26, %v1119_v37  ;;  %v1143_v41 = vpack.c.bf16 %v6118_v26, %v1141_v38  ;;  %v2527_v42 = vsel %vm195_vm0, %v2521_v33, %v6147_v1  ;;  %5909 = vmatprep.mubr.bf16.mxu0 %v6070_v21  ;;  %v1201_v61 = vunpack.c.l.bf16 %v5001_v44  ;;  %v5007_v20 = vld [vmem:[%s6176_s28 + $0xd0] sm:$0xff]   ;;  %v6076_v37 = vld [vmem:[#allocation7 + $0x78] sm:$0xff]  }
  0x5a   : > { %5973 = vmatprep.mubr.bf16.mxu1 %v6071_v27  ;;  %2509 = vst [vmem:[#allocation7 + $0x1a4] sm:$0xf] %v2507_v36  ;;  %v2529_v45 = vpack.c.bf16 %v6118_v26, %v2527_v42  ;;  %v2549_v46 = vsel %vm195_vm0, %v2543_v34, %v6147_v1  ;;  %v1163_v47 = vsel %vm195_vm0, %v1157_v35, %v6147_v1  ;;  %v1223_v0 = vunpack.c.h.bf16 %v5001_v44  ;;  %v5009_v35 = vld [vmem:[%s6176_s28 + $0xd8] sm:$0xff]   ;;  %v5011_v42 = vld [vmem:[%s6176_s28 + $0xe0] sm:$0xff]  }
  0x5b   : > { %1123 = vst [vmem:[#allocation7 + $0xa8] sm:$0xf] %v1121_v40  ;;  %1145 = vst [vmem:[#allocation7 + $0xac] sm:$0xf] %v1143_v41  ;;  %v2551_v51 = vpack.c.bf16 %v6118_v26, %v2549_v46  ;;  %v1165_v52 = vpack.c.bf16 %v6118_v26, %v1163_v47  ;;  %v1185_v53 = vsel %vm195_vm0, %v1179_v39, %v6147_v1  ;;  %v2609_v2 = vunpack.c.l.bf16 %v5065_v49  ;;  %v5073_v36 = vld [vmem:[%s6176_s28 + $0x1d8] sm:$0xff]  }
  0x5c   : > { %v2571_v54 = vsel %vm195_vm0, %v2565_v43, %v6147_v1  ;;  %2531 = vst [vmem:[#allocation7 + $0x1a8] sm:$0xf] %v2529_v45  ;;  %v1187_v58 = vpack.c.bf16 %v6118_v26, %v1185_v53  ;;  %v2593_v60 = vsel %vm195_vm0, %v2587_v48, %v6147_v1  ;;  %v2631_v3 = vunpack.c.h.bf16 %v5065_v49  ;;  %v6077_v43 = vld [vmem:[#allocation7 + $0x178] sm:$0xff]   ;;  %v6078_v48 = vld [vmem:[#allocation7 + $0x80] sm:$0xff]  }
  0x5d   : > { %v2573_v59 = vpack.c.bf16 %v6118_v26, %v2571_v54  ;;  %2553 = vst [vmem:[#allocation7 + $0x1ac] sm:$0xf] %v2551_v51  ;;  %1167 = vst [vmem:[#allocation7 + $0xb0] sm:$0xf] %v1165_v52  ;;  %v2595_v63 = vpack.c.bf16 %v6118_v26, %v2593_v60  ;;  %v1207_v5 = vsel %vm195_vm0, %v1201_v61, %v6147_v1  ;;  %v1245_v7 = vunpack.c.l.bf16 %v5003_v50  ;;  %v6079_v49 = vld [vmem:[#allocation7 + $0x180] sm:$0xff]  }
  0x5e   : > { %1189 = vst [vmem:[#allocation7 + $0xb4] sm:$0xf] %v1187_v58  ;;  %v1267_v8 = vunpack.c.h.bf16 %v5003_v50  ;;  %v2653_v9 = vunpack.c.l.bf16 %v5067_v55  ;;  %v1209_v10 = vpack.c.bf16 %v6118_v26, %v1207_v5  ;;  %v1229_v11 = vsel %vm195_vm0, %v1223_v0, %v6147_v1  ;;  %v5075_v58 = vld [vmem:[%s6176_s28 + $0x1e0] sm:$0xff]  }
  0x5f   : > { %2575 = vst [vmem:[#allocation7 + $0x1b0] sm:$0xf] %v2573_v59  ;;  %2597 = vst [vmem:[#allocation7 + $0x1b4] sm:$0xf] %v2595_v63  ;;  %v2615_v12 = vsel %vm195_vm0, %v2609_v2, %v6147_v1  ;;  %v2637_v13 = vsel %vm195_vm0, %v2631_v3, %v6147_v1  ;;  %v1231_v15 = vpack.c.bf16 %v6118_v26, %v1229_v11  ;;  %v2675_v24 = vunpack.c.h.bf16 %v5067_v55 }
  0x60   : > { %v2617_v16 = vpack.c.bf16 %v6118_v26, %v2615_v12  ;;  %v2639_v17 = vpack.c.bf16 %v6118_v26, %v2637_v13  ;;  %v1251_v18 = vsel %vm195_vm0, %v1245_v7, %v6147_v1  ;;  %5910 = vmatmul.mubr.bf16.gmra.mrb[24].mxu0 %v6072_v56  ;;  %1211 = vst [vmem:[#allocation7 + $0xb8] sm:$0xf] %v1209_v10  ;;  %v1289_v28 = vunpack.c.l.bf16 %v5005_v14 }
  0x61   : > { %5974 = vmatmul.mubr.bf16.gmra.mrb[24].mxu1 %v6073_v57  ;;  %v1253_v21 = vpack.c.bf16 %v6118_v26, %v1251_v18  ;;  %v1273_v22 = vsel %vm195_vm0, %v1267_v8, %v6147_v1  ;;  %v2659_v23 = vsel %vm195_vm0, %v2653_v9, %v6147_v1  ;;  %5913 = vmatprep.mubr.bf16.mxu0 %v6074_v62  ;;  %v1311_v29 = vunpack.c.h.bf16 %v5005_v14  ;;  %v5013_v9 = vld [vmem:[%s6176_s28 + $0xe8] sm:$0xff]  }
  0x62   : > { %5977 = vmatprep.mubr.bf16.mxu1 %v6075_v4  ;;  %1233 = vst [vmem:[#allocation7 + $0xbc] sm:$0xf] %v1231_v15  ;;  %2619 = vst [vmem:[#allocation7 + $0x1b8] sm:$0xf] %v2617_v16  ;;  %v1275_v25 = vpack.c.bf16 %v6118_v26, %v1273_v22  ;;  %v2661_v27 = vpack.c.bf16 %v6118_v26, %v2659_v23  ;;  %v2681_v31 = vsel %vm195_vm0, %v2675_v24, %v6147_v1  ;;  %v5077_v14 = vld [vmem:[%s6176_s28 + $0x1e8] sm:$0xff]   ;;  %v6082_v23 = vld [vmem:[#allocation7 + $0x90] sm:$0xff]  }
  0x63   : > { %2641 = vst [vmem:[#allocation7 + $0x1bc] sm:$0xf] %v2639_v17  ;;  %1255 = vst [vmem:[#allocation7 + $0xc0] sm:$0xf] %v1253_v21  ;;  %v2697_v32 = vunpack.c.l.bf16 %v5069_v19  ;;  %v2719_v33 = vunpack.c.h.bf16 %v5069_v19  ;;  %v1333_v34 = vunpack.c.l.bf16 %v5007_v20  ;;  %v2683_v38 = vpack.c.bf16 %v6118_v26, %v2681_v31  ;;  %v6080_v15 = vld [vmem:[#allocation7 + $0x88] sm:$0xff]   ;;  %v5079_v21 = vld [vmem:[%s6176_s28 + $0x1f0] sm:$0xff]  }
  0x64   : > { %1277 = vst [vmem:[#allocation7 + $0xc4] sm:$0xf] %v1275_v25  ;;  %2663 = vst [vmem:[#allocation7 + $0x1c0] sm:$0xf] %v2661_v27  ;;  %v1295_v39 = vsel %vm195_vm0, %v1289_v28, %v6147_v1  ;;  %v1317_v40 = vsel %vm195_vm0, %v1311_v29, %v6147_v1  ;;  %v1355_v41 = vunpack.c.h.bf16 %v5007_v20  ;;  %v2741_v56 = vunpack.c.l.bf16 %v5071_v30  ;;  %v5015_v20 = vld [vmem:[%s6176_s28 + $0xf0] sm:$0xff]   ;;  %v6081_v22 = vld [vmem:[#allocation7 + $0x188] sm:$0xff]  }
  0x65   : > { %v1297_v44 = vpack.c.bf16 %v6118_v26, %v1295_v39  ;;  %v1319_v45 = vpack.c.bf16 %v6118_v26, %v1317_v40  ;;  %v2703_v46 = vsel %vm195_vm0, %v2697_v32, %v6147_v1  ;;  %v2725_v47 = vsel %vm195_vm0, %v2719_v33, %v6147_v1  ;;  %2685 = vst [vmem:[#allocation7 + $0x1c4] sm:$0xf] %v2683_v38  ;;  %v6083_v29 = vld [vmem:[#allocation7 + $0x190] sm:$0xff]  }
  0x66   : > { %v2705_v50 = vpack.c.bf16 %v6118_v26, %v2703_v46  ;;  %v2727_v51 = vpack.c.bf16 %v6118_v26, %v2725_v47  ;;  %v1339_v52 = vsel %vm195_vm0, %v1333_v34, %v6147_v1  ;;  %v1361_v53 = vsel %vm195_vm0, %v1355_v41, %v6147_v1  ;;  %v5017_v46 = vld [vmem:[%s6176_s28 + $0xf8] sm:$0xff]  }
  0x67   : > { %1299 = vst [vmem:[#allocation7 + $0xc8] sm:$0xf] %v1297_v44  ;;  %1321 = vst [vmem:[#allocation7 + $0xcc] sm:$0xf] %v1319_v45  ;;  %v1341_v54 = vpack.c.bf16 %v6118_v26, %v1339_v52  ;;  %v1363_v55 = vpack.c.bf16 %v6118_v26, %v1361_v53  ;;  %v2763_v57 = vunpack.c.h.bf16 %v5071_v30  ;;  %v1377_v59 = vunpack.c.l.bf16 %v5009_v35 }
  0x68   : > { %2707 = vst [vmem:[#allocation7 + $0x1c8] sm:$0xf] %v2705_v50  ;;  %2729 = vst [vmem:[#allocation7 + $0x1cc] sm:$0xf] %v2727_v51  ;;  %v1399_v60 = vunpack.c.h.bf16 %v5009_v35  ;;  %v2785_v61 = vunpack.c.l.bf16 %v5073_v36  ;;  %v2807_v62 = vunpack.c.h.bf16 %v5073_v36  ;;  %5914 = vmatmul.mubr.bf16.gmra.mrb[28].mxu0 %v6076_v37  ;;  %v2747_v63 = vsel %vm195_vm0, %v2741_v56, %v6147_v1  ;;  %v5081_v51 = vld [vmem:[%s6176_s28 + $0x1f8] sm:$0xff]  }
  0x69   : > { %5978 = vmatmul.mubr.bf16.gmra.mrb[28].mxu1 %v6077_v43  ;;  %1343 = vst [vmem:[#allocation7 + $0xd0] sm:$0xf] %v1341_v54  ;;  %1365 = vst [vmem:[#allocation7 + $0xd4] sm:$0xf] %v1363_v55  ;;  %v2769_v0 = vsel %vm195_vm0, %v2763_v57, %v6147_v1  ;;  %v1421_v2 = vunpack.c.l.bf16 %v5011_v42  ;;  %v1443_v3 = vunpack.c.h.bf16 %v5011_v42  ;;  %5917 = vmatprep.mubr.bf16.mxu0 %v6078_v48  ;;  %v2829_v8 = vunpack.c.l.bf16 %v5075_v58  ;;  %v6084_v56 = vld [vmem:[#allocation7 + $0x98] sm:$0xff]  }
  0x6a   : > { %5981 = vmatprep.mubr.bf16.mxu1 %v6079_v49  ;;  %v2749_v4 = vpack.c.bf16 %v6118_v26, %v2747_v63  ;;  %v2771_v5 = vpack.c.bf16 %v6118_v26, %v2769_v0  ;;  %v1383_v7 = vsel %vm195_vm0, %v1377_v59, %v6147_v1  ;;  %v1405_v11 = vsel %vm195_vm0, %v1399_v60, %v6147_v1  ;;  %v6085_v57 = vld [vmem:[#allocation7 + $0x198] sm:$0xff]  }
  0x6b   : > { %v1385_v10 = vpack.c.bf16 %v6118_v26, %v1383_v7  ;;  %v2791_v12 = vsel %vm195_vm0, %v2785_v61, %v6147_v1  ;;  %v2813_v13 = vsel %vm195_vm0, %v2807_v62, %v6147_v1  ;;  %v1407_v16 = vpack.c.bf16 %v6118_v26, %v1405_v11  ;;  %v6086_v62 = vld [vmem:[#allocation7 + $0xa0] sm:$0xff]   ;;  %v6092_v6 = vld [vmem:[#allocation7 + $0xb8] sm:$0xff]  }
  0x6c   : > { %2751 = vst [vmem:[#allocation7 + $0x1d0] sm:$0xf] %v2749_v4  ;;  %2773 = vst [vmem:[#allocation7 + $0x1d4] sm:$0xf] %v2771_v5  ;;  %v2793_v17 = vpack.c.bf16 %v6118_v26, %v2791_v12  ;;  %v2815_v18 = vpack.c.bf16 %v6118_v26, %v2813_v13  ;;  %v1427_v19 = vsel %vm195_vm0, %v1421_v2, %v6147_v1  ;;  %v2851_v28 = vunpack.c.h.bf16 %v5075_v58  ;;  %v6087_v4 = vld [vmem:[#allocation7 + $0x1a0] sm:$0xff]  }
  0x6d   : > { %1387 = vst [vmem:[#allocation7 + $0xd8] sm:$0xf] %v1385_v10  ;;  %v1429_v24 = vpack.c.bf16 %v6118_v26, %v1427_v19  ;;  %v1449_v25 = vsel %vm195_vm0, %v1443_v3, %v6147_v1  ;;  %v2835_v27 = vsel %vm195_vm0, %v2829_v8, %v6147_v1  ;;  %1409 = vst [vmem:[#allocation7 + $0xdc] sm:$0xf] %v1407_v16  ;;  %v1465_v32 = vunpack.c.l.bf16 %v5013_v9  ;;  %v6090_v16 = vld [vmem:[#allocation7 + $0xb0] sm:$0xff]   ;;  %v6094_v19 = vld [vmem:[#allocation7 + $0xc0] sm:$0xff]  }
  0x6e   : > { %2795 = vst [vmem:[#allocation7 + $0x1d8] sm:$0xf] %v2793_v17  ;;  %2817 = vst [vmem:[#allocation7 + $0x1dc] sm:$0xf] %v2815_v18  ;;  %v1451_v30 = vpack.c.bf16 %v6118_v26, %v1449_v25  ;;  %v2837_v31 = vpack.c.bf16 %v6118_v26, %v2835_v27  ;;  %v1487_v33 = vunpack.c.h.bf16 %v5013_v9  ;;  %v2857_v34 = vsel %vm195_vm0, %v2851_v28, %v6147_v1  ;;  %v6091_v17 = vld [vmem:[#allocation7 + $0x1b0] sm:$0xff]   ;;  %v6093_v18 = vld [vmem:[#allocation7 + $0x1b8] sm:$0xff]  }
  0x6f   : > { %1431 = vst [vmem:[#allocation7 + $0xe0] sm:$0xf] %v1429_v24  ;;  %v2873_v35 = vunpack.c.l.bf16 %v5077_v14  ;;  %v2895_v36 = vunpack.c.h.bf16 %v5077_v14  ;;  %v1509_v37 = vunpack.c.l.bf16 %v5015_v20  ;;  %v2859_v38 = vpack.c.bf16 %v6118_v26, %v2857_v34  ;;  %v6088_v14 = vld [vmem:[#allocation7 + $0xa8] sm:$0xff]  }
  0x70   : > { %1453 = vst [vmem:[#allocation7 + $0xe4] sm:$0xf] %v1451_v30  ;;  %2839 = vst [vmem:[#allocation7 + $0x1e0] sm:$0xf] %v2837_v31  ;;  %v1471_v39 = vsel %vm195_vm0, %v1465_v32, %v6147_v1  ;;  %v1493_v40 = vsel %vm195_vm0, %v1487_v33, %v6147_v1  ;;  %v1531_v41 = vunpack.c.h.bf16 %v5015_v20  ;;  %5918 = vmatmul.mubr.bf16.gmra.mrb[32].mxu0 %v6080_v15  ;;  %v2917_v45 = vunpack.c.l.bf16 %v5079_v21  ;;  %v6089_v15 = vld [vmem:[#allocation7 + $0x1a8] sm:$0xff]  }
  0x71   : > { %5982 = vmatmul.mubr.bf16.gmra.mrb[32].mxu1 %v6081_v22  ;;  %v1473_v42 = vpack.c.bf16 %v6118_v26, %v1471_v39  ;;  %v1495_v43 = vpack.c.bf16 %v6118_v26, %v1493_v40  ;;  %v2879_v44 = vsel %vm195_vm0, %v2873_v35, %v6147_v1  ;;  %5921 = vmatprep.mubr.bf16.mxu0 %v6082_v23  ;;  %v2939_v50 = vunpack.c.h.bf16 %v5079_v21  ;;  %v6096_v20 = vld [vmem:[#allocation7 + $0xc8] sm:$0xff]   ;;  %v6098_v22 = vld [vmem:[#allocation7 + $0xd0] sm:$0xff]   ;;  %v6773_v35 = vld [vmem:[%s6978_s1] ss:$0 sm:$0xff] }
  0x72   : > { %5985 = vmatprep.mubr.bf16.mxu1 %v6083_v29  ;;  %2861 = vst [vmem:[#allocation7 + $0x1e4] sm:$0xf] %v2859_v38  ;;  %v2881_v47 = vpack.c.bf16 %v6118_v26, %v2879_v44  ;;  %v2901_v48 = vsel %vm195_vm0, %v2895_v36, %v6147_v1  ;;  %v1515_v49 = vsel %vm195_vm0, %v1509_v37, %v6147_v1  ;;  %v1553_v61 = vunpack.c.l.bf16 %v5017_v46  ;;  %v6097_v21 = vld [vmem:[#allocation7 + $0x1c8] sm:$0xff]  }
  0x73   : > { %1475 = vst [vmem:[#allocation7 + $0xe8] sm:$0xf] %v1473_v42  ;;  %1497 = vst [vmem:[#allocation7 + $0xec] sm:$0xf] %v1495_v43  ;;  %v2903_v52 = vpack.c.bf16 %v6118_v26, %v2901_v48  ;;  %v1517_v53 = vpack.c.bf16 %v6118_v26, %v1515_v49  ;;  %v1537_v54 = vsel %vm195_vm0, %v1531_v41, %v6147_v1  ;;  %v1575_v0 = vunpack.c.h.bf16 %v5017_v46  ;;  %v6099_v23 = vld [vmem:[#allocation7 + $0x1d0] sm:$0xff]  }
  0x74   : > { %v2923_v55 = vsel %vm195_vm0, %v2917_v45, %v6147_v1  ;;  %2883 = vst [vmem:[#allocation7 + $0x1e8] sm:$0xf] %v2881_v47  ;;  %v1539_v58 = vpack.c.bf16 %v6118_v26, %v1537_v54  ;;  %v2945_v60 = vsel %vm195_vm0, %v2939_v50, %v6147_v1  ;;  %v2961_v2 = vunpack.c.l.bf16 %v5081_v51  ;;  %v6100_v24 = vld [vmem:[#allocation7 + $0xd8] sm:$0xff]  }
  0x75   : > { %v2925_v59 = vpack.c.bf16 %v6118_v26, %v2923_v55  ;;  %2905 = vst [vmem:[#allocation7 + $0x1ec] sm:$0xf] %v2903_v52  ;;  %1519 = vst [vmem:[#allocation7 + $0xf0] sm:$0xf] %v1517_v53  ;;  %v2947_v63 = vpack.c.bf16 %v6118_v26, %v2945_v60  ;;  %v2983_v3 = vunpack.c.h.bf16 %v5081_v51  ;;  %v1559_v5 = vsel %vm195_vm0, %v1553_v61, %v6147_v1  ;;  %v6101_v25 = vld [vmem:[#allocation7 + $0x1d8] sm:$0xff]  }
  0x76   : > { %1541 = vst [vmem:[#allocation7 + $0xf4] sm:$0xf] %v1539_v58  ;;  %v1561_v7 = vpack.c.bf16 %v6118_v26, %v1559_v5  ;;  %v1581_v8 = vsel %vm195_vm0, %v1575_v0, %v6147_v1  ;;  %v2967_v9 = vsel %vm195_vm0, %v2961_v2, %v6147_v1 }
  0x77   : > { %2927 = vst [vmem:[#allocation7 + $0x1f0] sm:$0xf] %v2925_v59  ;;  %2949 = vst [vmem:[#allocation7 + $0x1f4] sm:$0xf] %v2947_v63  ;;  %v2989_v10 = vsel %vm195_vm0, %v2983_v3, %v6147_v1  ;;  %v1583_v11 = vpack.c.bf16 %v6118_v26, %v1581_v8  ;;  %v2969_v12 = vpack.c.bf16 %v6118_v26, %v2967_v9  ;;  %v6102_v27 = vld [vmem:[#allocation7 + $0xe0] sm:$0xff]  }
  0x78   : > { %v2991_v13 = vpack.c.bf16 %v6118_v26, %v2989_v10  ;;  %5922 = vmatmul.mubr.bf16.gmra.mrb[36].mxu0 %v6084_v56  ;;  %1563 = vst [vmem:[#allocation7 + $0xf8] sm:$0xf] %v1561_v7  ;;  %v6095_v26 = vld [vmem:[#allocation7 + $0x1c0] sm:$0xff]  }
  0x79   : > { %5986 = vmatmul.mubr.bf16.gmra.mrb[36].mxu1 %v6085_v57  ;;  %5925 = vmatprep.mubr.bf16.mxu0 %v6086_v62  ;;  %1585 = vst [vmem:[#allocation7 + $0xfc] sm:$0xf] %v1583_v11  ;;  %2971 = vst [vmem:[#allocation7 + $0x1f8] sm:$0xf] %v2969_v12  ;;  %v6103_v28 = vld [vmem:[#allocation7 + $0x1e0] sm:$0xff]  }
  0x7a   : > { %5989 = vmatprep.mubr.bf16.mxu1 %v6087_v4  ;;  %2993 = vst [vmem:[#allocation7 + $0x1fc] sm:$0xf] %v2991_v13  ;;  %v6104_v29 = vld [vmem:[#allocation7 + $0xe8] sm:$0xff]  }
  0x7c   : > { %v6105_v30 = vld [vmem:[#allocation7 + $0x1e8] sm:$0xff]  }
  0x7d   : > { %v6106_v31 = vld [vmem:[#allocation7 + $0xf0] sm:$0xff]  }
  0x7e   : > { %v6107_v32 = vld [vmem:[#allocation7 + $0x1f0] sm:$0xff]  }
  0x80   : > { %5926 = vmatmul.mubr.bf16.gmra.mrb[40].mxu0 %v6088_v14  ;;  %v6108_v33 = vld [vmem:[#allocation7 + $0xf8] sm:$0xff]  }
  0x81   : > { %5990 = vmatmul.mubr.bf16.gmra.mrb[40].mxu1 %v6089_v15  ;;  %5929 = vmatprep.mubr.bf16.mxu0 %v6090_v16  ;;  %v6109_v34 = vld [vmem:[#allocation7 + $0x1f8] sm:$0xff]  }
  0x82   : > { %5993 = vmatprep.mubr.bf16.mxu1 %v6091_v17 }
  0x88   : > { %5930 = vmatmul.mubr.bf16.gmra.mrb[44].mxu0 %v6092_v6 }
  0x89   : > { %5994 = vmatmul.mubr.bf16.gmra.mrb[44].mxu1 %v6093_v18  ;;  %5933 = vmatprep.mubr.bf16.mxu0 %v6094_v19 }
  0x8a   : > { %5997 = vmatprep.mubr.bf16.mxu1 %v6095_v26 }
  0x90   : > { %5934 = vmatmul.mubr.bf16.gmra.mrb[48].mxu0 %v6096_v20 }
  0x91   : > { %5998 = vmatmul.mubr.bf16.gmra.mrb[48].mxu1 %v6097_v21  ;;  %5937 = vmatprep.mubr.bf16.mxu0 %v6098_v22 }
  0x92   : > { %6001 = vmatprep.mubr.bf16.mxu1 %v6099_v23 }
  0x98   : > { %5938 = vmatmul.mubr.bf16.gmra.mrb[52].mxu0 %v6100_v24 }
  0x99   : > { %6002 = vmatmul.mubr.bf16.gmra.mrb[52].mxu1 %v6101_v25  ;;  %5941 = vmatprep.mubr.bf16.mxu0 %v6102_v27 }
  0x9a   : > { %6005 = vmatprep.mubr.bf16.mxu1 %v6103_v28 }
  0xa0   : > { %5942 = vmatmul.mubr.bf16.gmra.mrb[56].mxu0 %v6104_v29 }
  0xa1   : > { %6006 = vmatmul.mubr.bf16.gmra.mrb[56].mxu1 %v6105_v30  ;;  %5945 = vmatprep.mubr.bf16.mxu0 %v6106_v31 }
  0xa2   : > { %6009 = vmatprep.mubr.bf16.mxu1 %v6107_v32 }
  0xa8   : > { %5946 = vmatmul.mubr.bf16.gmra.mrb[60].mxu0 %v6108_v33 }
  0xa9   : > { %6010 = vmatmul.mubr.bf16.gmra.mrb[60].mxu1 %v6109_v34 }
 0x103   : > { %v5887_v36 = vpop.f32.mrb[0].mxu0  ;;  %v5951_v37 = vpop.f32.mrb[0].mxu1 }
 0x104   : > { %v3621_v38 = vadd.f32 %v5887_v36, %v6773_v35  ;;  %v3877_v39 = vadd.f32 %v5951_v37, %v6773_v35  ;;  %v3612_v40 = vpop.f32.mrb[1].mxu0  ;;  %v3868_v41 = vpop.f32.mrb[1].mxu1 }
 0x105   : > { %v3613_v42 = vadd.f32 %v6773_v35, %v3612_v40  ;;  %v3869_v43 = vadd.f32 %v6773_v35, %v3868_v41  ;;  %v5888_v44 = vpop.f32.mrb[2].mxu0  ;;  %v5952_v45 = vpop.f32.mrb[2].mxu1 }
 0x106   : > { %v3624_v46 = vadd.f32 %v5888_v44, %v6773_v35  ;;  %v3880_v47 = vadd.f32 %v5952_v45, %v6773_v35  ;;  %v3615_v48 = vpop.f32.mrb[3].mxu0  ;;  %v3871_v49 = vpop.f32.mrb[3].mxu1  ;;  %v4125_v52 = vmax.f32 %v3621_v38, 0.0  ;;  %v4189_v53 = vmax.f32 %v3877_v39, 0.0 }
 0x107   : > { %v3616_v50 = vadd.f32 %v6773_v35, %v3615_v48  ;;  %v3872_v51 = vadd.f32 %v6773_v35, %v3871_v49  ;;  %v4123_v56 = vmax.f32 %v3613_v42, 0.0  ;;  %v4187_v57 = vmax.f32 %v3869_v43, 0.0 }
 0x108   : > { %v4126_v54 = vmax.f32 %v3624_v46, 0.0  ;;  %v4190_v55 = vmax.f32 %v3880_v47, 0.0 }
 0x109   : > { %v4124_v58 = vmax.f32 %v3616_v50, 0.0  ;;  %v4188_v59 = vmax.f32 %v3872_v51, 0.0 }
 0x10a   : > { %v5422_v60 = vpack.c.bf16 %v4126_v54, %v4125_v52  ;;  %v5582_v61 = vpack.c.bf16 %v4190_v55, %v4189_v53 }
 0x10b   : > { %v5417_v62 = vpack.c.bf16 %v4124_v58, %v4123_v56  ;;  %v5577_v63 = vpack.c.bf16 %v4188_v59, %v4187_v57  ;;  %v5891_v0 = vpop.f32.mrb[4].mxu0  ;;  %v5955_v2 = vpop.f32.mrb[4].mxu1 }
 0x10c   : > { %5734 = vst [vmem:[%s6788_s18 + $0x8] sm:$0xff] %v5422_v60   ;;  %5766 = vst [vmem:[%s6788_s18 + $0x108] sm:$0xff] %v5582_v61   ;;  %v3637_v3 = vadd.f32 %v5891_v0, %v6773_v35  ;;  %v3893_v4 = vadd.f32 %v5955_v2, %v6773_v35  ;;  %v3628_v5 = vpop.f32.mrb[5].mxu0  ;;  %v3884_v7 = vpop.f32.mrb[5].mxu1 }
 0x10d   : > { %5418 = vst [vmem:[%s6788_s18] sm:$0xff] %v5417_v62   ;;  %5765 = vst [vmem:[%s6788_s18 + $0x100] sm:$0xff] %v5577_v63   ;;  %v3629_v8 = vadd.f32 %v6773_v35, %v3628_v5  ;;  %v3885_v9 = vadd.f32 %v6773_v35, %v3884_v7  ;;  %v5892_v10 = vpop.f32.mrb[6].mxu0  ;;  %v5956_v11 = vpop.f32.mrb[6].mxu1 }
 0x10e   : > { %v3640_v12 = vadd.f32 %v5892_v10, %v6773_v35  ;;  %v3896_v13 = vadd.f32 %v5956_v11, %v6773_v35  ;;  %v3631_v14 = vpop.f32.mrb[7].mxu0  ;;  %v3887_v15 = vpop.f32.mrb[7].mxu1  ;;  %v4129_v6 = vmax.f32 %v3637_v3, 0.0  ;;  %v4193_v18 = vmax.f32 %v3893_v4, 0.0 }
 0x10f   : > { %v3632_v16 = vadd.f32 %v6773_v35, %v3631_v14  ;;  %v3888_v17 = vadd.f32 %v6773_v35, %v3887_v15  ;;  %v4127_v20 = vmax.f32 %v3629_v8, 0.0  ;;  %v4191_v21 = vmax.f32 %v3885_v9, 0.0 }
 0x110   : > { %v4130_v19 = vmax.f32 %v3640_v12, 0.0  ;;  %v4194_v26 = vmax.f32 %v3896_v13, 0.0 }
 0x111   : > { %v4128_v22 = vmax.f32 %v3632_v16, 0.0  ;;  %v4192_v23 = vmax.f32 %v3888_v17, 0.0 }
 0x112   : > { %v5432_v24 = vpack.c.bf16 %v4130_v19, %v4129_v6  ;;  %v5592_v25 = vpack.c.bf16 %v4194_v26, %v4193_v18 }
 0x113   : > { %v5427_v27 = vpack.c.bf16 %v4128_v22, %v4127_v20  ;;  %v5587_v28 = vpack.c.bf16 %v4192_v23, %v4191_v21  ;;  %v5895_v29 = vpop.f32.mrb[8].mxu0  ;;  %v5959_v30 = vpop.f32.mrb[8].mxu1 }
 0x114   : > { %5736 = vst [vmem:[%s6788_s18 + $0x18] sm:$0xff] %v5432_v24   ;;  %5768 = vst [vmem:[%s6788_s18 + $0x118] sm:$0xff] %v5592_v25   ;;  %v3653_v31 = vadd.f32 %v5895_v29, %v6773_v35  ;;  %v3909_v32 = vadd.f32 %v5959_v30, %v6773_v35  ;;  %v3644_v33 = vpop.f32.mrb[9].mxu0  ;;  %v3900_v34 = vpop.f32.mrb[9].mxu1 }
 0x115   : > { %5735 = vst [vmem:[%s6788_s18 + $0x10] sm:$0xff] %v5427_v27   ;;  %5767 = vst [vmem:[%s6788_s18 + $0x110] sm:$0xff] %v5587_v28   ;;  %v3645_v36 = vadd.f32 %v6773_v35, %v3644_v33  ;;  %v3901_v37 = vadd.f32 %v6773_v35, %v3900_v34  ;;  %v5896_v38 = vpop.f32.mrb[10].mxu0  ;;  %v5960_v39 = vpop.f32.mrb[10].mxu1 }
 0x116   : > { %v3656_v40 = vadd.f32 %v5896_v38, %v6773_v35  ;;  %v3912_v41 = vadd.f32 %v5960_v39, %v6773_v35  ;;  %v3647_v42 = vpop.f32.mrb[11].mxu0  ;;  %v3903_v43 = vpop.f32.mrb[11].mxu1  ;;  %v4133_v46 = vmax.f32 %v3653_v31, 0.0  ;;  %v4197_v47 = vmax.f32 %v3909_v32, 0.0 }
 0x117   : > { %v3648_v44 = vadd.f32 %v6773_v35, %v3647_v42  ;;  %v3904_v45 = vadd.f32 %v6773_v35, %v3903_v43  ;;  %v4131_v50 = vmax.f32 %v3645_v36, 0.0  ;;  %v4195_v51 = vmax.f32 %v3901_v37, 0.0 }
 0x118   : > { %v4134_v48 = vmax.f32 %v3656_v40, 0.0  ;;  %v4198_v49 = vmax.f32 %v3912_v41, 0.0 }
 0x119   : > { %v4132_v52 = vmax.f32 %v3648_v44, 0.0  ;;  %v4196_v53 = vmax.f32 %v3904_v45, 0.0 }
 0x11a   : > { %v5442_v54 = vpack.c.bf16 %v4134_v48, %v4133_v46  ;;  %v5602_v55 = vpack.c.bf16 %v4198_v49, %v4197_v47 }
 0x11b   : > { %v5437_v56 = vpack.c.bf16 %v4132_v52, %v4131_v50  ;;  %v5597_v57 = vpack.c.bf16 %v4196_v53, %v4195_v51  ;;  %v5899_v58 = vpop.f32.mrb[12].mxu0  ;;  %v5963_v59 = vpop.f32.mrb[12].mxu1 }
 0x11c   : > { %5738 = vst [vmem:[%s6788_s18 + $0x28] sm:$0xff] %v5442_v54   ;;  %5770 = vst [vmem:[%s6788_s18 + $0x128] sm:$0xff] %v5602_v55   ;;  %v3669_v60 = vadd.f32 %v5899_v58, %v6773_v35  ;;  %v3925_v61 = vadd.f32 %v5963_v59, %v6773_v35  ;;  %v3660_v62 = vpop.f32.mrb[13].mxu0  ;;  %v3916_v63 = vpop.f32.mrb[13].mxu1 }
 0x11d   : > { %5737 = vst [vmem:[%s6788_s18 + $0x20] sm:$0xff] %v5437_v56   ;;  %5769 = vst [vmem:[%s6788_s18 + $0x120] sm:$0xff] %v5597_v57   ;;  %v3661_v0 = vadd.f32 %v6773_v35, %v3660_v62  ;;  %v3917_v2 = vadd.f32 %v6773_v35, %v3916_v63  ;;  %v5900_v3 = vpop.f32.mrb[14].mxu0  ;;  %v5964_v4 = vpop.f32.mrb[14].mxu1 }
 0x11e   : > { %v3672_v5 = vadd.f32 %v5900_v3, %v6773_v35  ;;  %v3928_v7 = vadd.f32 %v5964_v4, %v6773_v35  ;;  %v3663_v8 = vpop.f32.mrb[15].mxu0  ;;  %v3919_v9 = vpop.f32.mrb[15].mxu1  ;;  %v4137_v12 = vmax.f32 %v3669_v60, 0.0  ;;  %v4201_v13 = vmax.f32 %v3925_v61, 0.0 }
 0x11f   : > { %v3664_v10 = vadd.f32 %v6773_v35, %v3663_v8  ;;  %v3920_v11 = vadd.f32 %v6773_v35, %v3919_v9  ;;  %v4135_v16 = vmax.f32 %v3661_v0, 0.0  ;;  %v4199_v17 = vmax.f32 %v3917_v2, 0.0 }
 0x120   : > { %v4138_v14 = vmax.f32 %v3672_v5, 0.0  ;;  %v4202_v15 = vmax.f32 %v3928_v7, 0.0 }
 0x121   : > { %v4136_v6 = vmax.f32 %v3664_v10, 0.0  ;;  %v4200_v18 = vmax.f32 %v3920_v11, 0.0 }
 0x122   : > { %v5452_v19 = vpack.c.bf16 %v4138_v14, %v4137_v12  ;;  %v5612_v26 = vpack.c.bf16 %v4202_v15, %v4201_v13 }
 0x123   : > { %v5447_v20 = vpack.c.bf16 %v4136_v6, %v4135_v16  ;;  %v5607_v21 = vpack.c.bf16 %v4200_v18, %v4199_v17  ;;  %v5903_v22 = vpop.f32.mrb[16].mxu0  ;;  %v5967_v23 = vpop.f32.mrb[16].mxu1 }
 0x124   : > { %5740 = vst [vmem:[%s6788_s18 + $0x38] sm:$0xff] %v5452_v19   ;;  %5772 = vst [vmem:[%s6788_s18 + $0x138] sm:$0xff] %v5612_v26   ;;  %v3685_v24 = vadd.f32 %v5903_v22, %v6773_v35  ;;  %v3941_v25 = vadd.f32 %v5967_v23, %v6773_v35  ;;  %v3676_v27 = vpop.f32.mrb[17].mxu0  ;;  %v3932_v28 = vpop.f32.mrb[17].mxu1 }
 0x125   : > { %5739 = vst [vmem:[%s6788_s18 + $0x30] sm:$0xff] %v5447_v20   ;;  %5771 = vst [vmem:[%s6788_s18 + $0x130] sm:$0xff] %v5607_v21   ;;  %v3677_v29 = vadd.f32 %v6773_v35, %v3676_v27  ;;  %v3933_v30 = vadd.f32 %v6773_v35, %v3932_v28  ;;  %v5904_v31 = vpop.f32.mrb[18].mxu0  ;;  %v5968_v32 = vpop.f32.mrb[18].mxu1 }
 0x126   : > { %v3688_v33 = vadd.f32 %v5904_v31, %v6773_v35  ;;  %v3944_v34 = vadd.f32 %v5968_v32, %v6773_v35  ;;  %v3679_v36 = vpop.f32.mrb[19].mxu0  ;;  %v3935_v37 = vpop.f32.mrb[19].mxu1  ;;  %v4141_v40 = vmax.f32 %v3685_v24, 0.0  ;;  %v4205_v41 = vmax.f32 %v3941_v25, 0.0 }
 0x127   : > { %v3680_v38 = vadd.f32 %v6773_v35, %v3679_v36  ;;  %v3936_v39 = vadd.f32 %v6773_v35, %v3935_v37  ;;  %v4139_v44 = vmax.f32 %v3677_v29, 0.0  ;;  %v4203_v45 = vmax.f32 %v3933_v30, 0.0 }
 0x128   : > { %v4142_v42 = vmax.f32 %v3688_v33, 0.0  ;;  %v4206_v43 = vmax.f32 %v3944_v34, 0.0 }
 0x129   : > { %v4140_v46 = vmax.f32 %v3680_v38, 0.0  ;;  %v4204_v47 = vmax.f32 %v3936_v39, 0.0 }
 0x12a   : > { %v5462_v48 = vpack.c.bf16 %v4142_v42, %v4141_v40  ;;  %v5622_v49 = vpack.c.bf16 %v4206_v43, %v4205_v41 }
 0x12b   : > { %v5457_v50 = vpack.c.bf16 %v4140_v46, %v4139_v44  ;;  %v5617_v51 = vpack.c.bf16 %v4204_v47, %v4203_v45  ;;  %v5907_v52 = vpop.f32.mrb[20].mxu0 }
 0x12c   : > { %v5971_v53 = vpop.f32.mrb[20].mxu1  ;;  %5742 = vst [vmem:[%s6788_s18 + $0x48] sm:$0xff] %v5462_v48   ;;  %5774 = vst [vmem:[%s6788_s18 + $0x148] sm:$0xff] %v5622_v49   ;;  %v3701_v54 = vadd.f32 %v5907_v52, %v6773_v35  ;;  %v3692_v56 = vpop.f32.mrb[21].mxu0 }
 0x12d   : > { %v3957_v55 = vadd.f32 %v5971_v53, %v6773_v35  ;;  %v3948_v57 = vpop.f32.mrb[21].mxu1  ;;  %5741 = vst [vmem:[%s6788_s18 + $0x40] sm:$0xff] %v5457_v50   ;;  %5773 = vst [vmem:[%s6788_s18 + $0x140] sm:$0xff] %v5617_v51   ;;  %v3693_v58 = vadd.f32 %v6773_v35, %v3692_v56  ;;  %v5908_v60 = vpop.f32.mrb[22].mxu0 }
 0x12e   : > { %v3949_v59 = vadd.f32 %v6773_v35, %v3948_v57  ;;  %v5972_v61 = vpop.f32.mrb[22].mxu1  ;;  %v3704_v62 = vadd.f32 %v5908_v60, %v6773_v35  ;;  %v3695_v0 = vpop.f32.mrb[23].mxu0  ;;  %v4145_v5 = vmax.f32 %v3701_v54, 0.0 }
 0x12f   : > { %v3960_v63 = vadd.f32 %v5972_v61, %v6773_v35  ;;  %v3951_v2 = vpop.f32.mrb[23].mxu1  ;;  %v3696_v3 = vadd.f32 %v6773_v35, %v3695_v0  ;;  %v4209_v7 = vmax.f32 %v3957_v55, 0.0  ;;  %v4143_v10 = vmax.f32 %v3693_v58, 0.0 }
 0x130   : > { %v3952_v4 = vadd.f32 %v6773_v35, %v3951_v2  ;;  %v4146_v8 = vmax.f32 %v3704_v62, 0.0  ;;  %v4207_v11 = vmax.f32 %v3949_v59, 0.0 }
 0x131   : > { %v4210_v9 = vmax.f32 %v3960_v63, 0.0  ;;  %v4144_v12 = vmax.f32 %v3696_v3, 0.0 }
 0x132   : > { %v4208_v13 = vmax.f32 %v3952_v4, 0.0  ;;  %v5472_v14 = vpack.c.bf16 %v4146_v8, %v4145_v5 }
 0x133   : > { %v5632_v15 = vpack.c.bf16 %v4210_v9, %v4209_v7  ;;  %v5467_v16 = vpack.c.bf16 %v4144_v12, %v4143_v10  ;;  %v5911_v6 = vpop.f32.mrb[24].mxu0 }
 0x134   : > { %v5627_v17 = vpack.c.bf16 %v4208_v13, %v4207_v11  ;;  %v5975_v18 = vpop.f32.mrb[24].mxu1  ;;  %5744 = vst [vmem:[%s6788_s18 + $0x58] sm:$0xff] %v5472_v14   ;;  %v3717_v19 = vadd.f32 %v5911_v6, %v6773_v35  ;;  %v3708_v20 = vpop.f32.mrb[25].mxu0 }
 0x135   : > { %5776 = vst [vmem:[%s6788_s18 + $0x158] sm:$0xff] %v5632_v15   ;;  %v3973_v26 = vadd.f32 %v5975_v18, %v6773_v35  ;;  %v3964_v21 = vpop.f32.mrb[25].mxu1  ;;  %5743 = vst [vmem:[%s6788_s18 + $0x50] sm:$0xff] %v5467_v16   ;;  %v3709_v22 = vadd.f32 %v6773_v35, %v3708_v20  ;;  %v5912_v24 = vpop.f32.mrb[26].mxu0 }
 0x136   : > { %5775 = vst [vmem:[%s6788_s18 + $0x150] sm:$0xff] %v5627_v17   ;;  %v3965_v23 = vadd.f32 %v6773_v35, %v3964_v21  ;;  %v5976_v25 = vpop.f32.mrb[26].mxu1  ;;  %v3720_v27 = vadd.f32 %v5912_v24, %v6773_v35  ;;  %v3711_v29 = vpop.f32.mrb[27].mxu0  ;;  %v4149_v33 = vmax.f32 %v3717_v19, 0.0 }
 0x137   : > { %v3976_v28 = vadd.f32 %v5976_v25, %v6773_v35  ;;  %v3967_v30 = vpop.f32.mrb[27].mxu1  ;;  %v3712_v31 = vadd.f32 %v6773_v35, %v3711_v29  ;;  %v4213_v34 = vmax.f32 %v3973_v26, 0.0  ;;  %v4147_v38 = vmax.f32 %v3709_v22, 0.0 }
 0x138   : > { %v3968_v32 = vadd.f32 %v6773_v35, %v3967_v30  ;;  %v4150_v36 = vmax.f32 %v3720_v27, 0.0  ;;  %v4211_v39 = vmax.f32 %v3965_v23, 0.0 }
 0x139   : > { %v4214_v37 = vmax.f32 %v3976_v28, 0.0  ;;  %v4148_v40 = vmax.f32 %v3712_v31, 0.0 }
 0x13a   : > { %v4212_v41 = vmax.f32 %v3968_v32, 0.0  ;;  %v5482_v42 = vpack.c.bf16 %v4150_v36, %v4149_v33 }
 0x13b   : > { %v5642_v43 = vpack.c.bf16 %v4214_v37, %v4213_v34  ;;  %v5477_v44 = vpack.c.bf16 %v4148_v40, %v4147_v38  ;;  %v5915_v46 = vpop.f32.mrb[28].mxu0 }
 0x13c   : > { %v5637_v45 = vpack.c.bf16 %v4212_v41, %v4211_v39  ;;  %v5979_v47 = vpop.f32.mrb[28].mxu1  ;;  %5746 = vst [vmem:[%s6788_s18 + $0x68] sm:$0xff] %v5482_v42   ;;  %v3733_v48 = vadd.f32 %v5915_v46, %v6773_v35  ;;  %v3724_v50 = vpop.f32.mrb[29].mxu0 }
 0x13d   : > { %5778 = vst [vmem:[%s6788_s18 + $0x168] sm:$0xff] %v5642_v43   ;;  %v3989_v49 = vadd.f32 %v5979_v47, %v6773_v35  ;;  %v3980_v51 = vpop.f32.mrb[29].mxu1  ;;  %5745 = vst [vmem:[%s6788_s18 + $0x60] sm:$0xff] %v5477_v44   ;;  %v3725_v52 = vadd.f32 %v6773_v35, %v3724_v50  ;;  %v5916_v54 = vpop.f32.mrb[30].mxu0 }
 0x13e   : > { %5777 = vst [vmem:[%s6788_s18 + $0x160] sm:$0xff] %v5637_v45   ;;  %v3981_v53 = vadd.f32 %v6773_v35, %v3980_v51  ;;  %v5980_v55 = vpop.f32.mrb[30].mxu1  ;;  %v3736_v56 = vadd.f32 %v5916_v54, %v6773_v35  ;;  %v3727_v58 = vpop.f32.mrb[31].mxu0  ;;  %v4153_v62 = vmax.f32 %v3733_v48, 0.0 }
 0x13f   : > { %v3992_v57 = vadd.f32 %v5980_v55, %v6773_v35  ;;  %v3983_v59 = vpop.f32.mrb[31].mxu1  ;;  %v3728_v60 = vadd.f32 %v6773_v35, %v3727_v58  ;;  %v4217_v63 = vmax.f32 %v3989_v49, 0.0  ;;  %v4151_v3 = vmax.f32 %v3725_v52, 0.0 }
 0x140   : > { %v3984_v61 = vadd.f32 %v6773_v35, %v3983_v59  ;;  %v4154_v0 = vmax.f32 %v3736_v56, 0.0  ;;  %v4215_v4 = vmax.f32 %v3981_v53, 0.0 }
 0x141   : > { %v4218_v2 = vmax.f32 %v3992_v57, 0.0  ;;  %v4152_v5 = vmax.f32 %v3728_v60, 0.0 }
 0x142   : > { %v4216_v7 = vmax.f32 %v3984_v61, 0.0  ;;  %v5492_v8 = vpack.c.bf16 %v4154_v0, %v4153_v62 }
 0x143   : > { %v5652_v9 = vpack.c.bf16 %v4218_v2, %v4217_v63  ;;  %v5487_v10 = vpack.c.bf16 %v4152_v5, %v4151_v3  ;;  %v5919_v12 = vpop.f32.mrb[32].mxu0 }
 0x144   : > { %v5647_v11 = vpack.c.bf16 %v4216_v7, %v4215_v4  ;;  %v5983_v13 = vpop.f32.mrb[32].mxu1  ;;  %5748 = vst [vmem:[%s6788_s18 + $0x78] sm:$0xff] %v5492_v8   ;;  %v3749_v14 = vadd.f32 %v5919_v12, %v6773_v35  ;;  %v3740_v16 = vpop.f32.mrb[33].mxu0 }
 0x145   : > { %5780 = vst [vmem:[%s6788_s18 + $0x178] sm:$0xff] %v5652_v9   ;;  %v4005_v15 = vadd.f32 %v5983_v13, %v6773_v35  ;;  %v3996_v17 = vpop.f32.mrb[33].mxu1  ;;  %5747 = vst [vmem:[%s6788_s18 + $0x70] sm:$0xff] %v5487_v10   ;;  %v3741_v6 = vadd.f32 %v6773_v35, %v3740_v16  ;;  %v5920_v19 = vpop.f32.mrb[34].mxu0 }
 0x146   : > { %5779 = vst [vmem:[%s6788_s18 + $0x170] sm:$0xff] %v5647_v11   ;;  %v3997_v18 = vadd.f32 %v6773_v35, %v3996_v17  ;;  %v5984_v26 = vpop.f32.mrb[34].mxu1  ;;  %v3752_v20 = vadd.f32 %v5920_v19, %v6773_v35  ;;  %v3743_v22 = vpop.f32.mrb[35].mxu0  ;;  %v4157_v27 = vmax.f32 %v3749_v14, 0.0 }
 0x147   : > { %v4008_v21 = vadd.f32 %v5984_v26, %v6773_v35  ;;  %v3999_v23 = vpop.f32.mrb[35].mxu1  ;;  %v3744_v24 = vadd.f32 %v6773_v35, %v3743_v22  ;;  %v4221_v28 = vmax.f32 %v4005_v15, 0.0  ;;  %v4155_v31 = vmax.f32 %v3741_v6, 0.0 }
 0x148   : > { %v4000_v25 = vadd.f32 %v6773_v35, %v3999_v23  ;;  %v4158_v29 = vmax.f32 %v3752_v20, 0.0  ;;  %v4219_v32 = vmax.f32 %v3997_v18, 0.0 }
 0x149   : > { %v4222_v30 = vmax.f32 %v4008_v21, 0.0  ;;  %v4156_v33 = vmax.f32 %v3744_v24, 0.0 }
 0x14a   : > { %v4220_v34 = vmax.f32 %v4000_v25, 0.0  ;;  %v5502_v36 = vpack.c.bf16 %v4158_v29, %v4157_v27 }
 0x14b   : > { %v5662_v37 = vpack.c.bf16 %v4222_v30, %v4221_v28  ;;  %v5497_v38 = vpack.c.bf16 %v4156_v33, %v4155_v31  ;;  %v5923_v40 = vpop.f32.mrb[36].mxu0 }
 0x14c   : > { %v5657_v39 = vpack.c.bf16 %v4220_v34, %v4219_v32  ;;  %v5987_v41 = vpop.f32.mrb[36].mxu1  ;;  %5750 = vst [vmem:[%s6788_s18 + $0x88] sm:$0xff] %v5502_v36   ;;  %v3765_v42 = vadd.f32 %v5923_v40, %v6773_v35  ;;  %v3756_v44 = vpop.f32.mrb[37].mxu0 }
 0x14d   : > { %5782 = vst [vmem:[%s6788_s18 + $0x188] sm:$0xff] %v5662_v37   ;;  %v4021_v43 = vadd.f32 %v5987_v41, %v6773_v35  ;;  %v4012_v45 = vpop.f32.mrb[37].mxu1  ;;  %5749 = vst [vmem:[%s6788_s18 + $0x80] sm:$0xff] %v5497_v38   ;;  %v3757_v46 = vadd.f32 %v6773_v35, %v3756_v44  ;;  %v5924_v48 = vpop.f32.mrb[38].mxu0 }
 0x14e   : > { %5781 = vst [vmem:[%s6788_s18 + $0x180] sm:$0xff] %v5657_v39   ;;  %v4013_v47 = vadd.f32 %v6773_v35, %v4012_v45  ;;  %v5988_v49 = vpop.f32.mrb[38].mxu1  ;;  %v3768_v50 = vadd.f32 %v5924_v48, %v6773_v35  ;;  %v3759_v52 = vpop.f32.mrb[39].mxu0  ;;  %v4161_v56 = vmax.f32 %v3765_v42, 0.0 }
 0x14f   : > { %v4024_v51 = vadd.f32 %v5988_v49, %v6773_v35  ;;  %v4015_v53 = vpop.f32.mrb[39].mxu1  ;;  %v3760_v54 = vadd.f32 %v6773_v35, %v3759_v52  ;;  %v4225_v57 = vmax.f32 %v4021_v43, 0.0  ;;  %v4159_v60 = vmax.f32 %v3757_v46, 0.0 }
 0x150   : > { %v4016_v55 = vadd.f32 %v6773_v35, %v4015_v53  ;;  %v4162_v58 = vmax.f32 %v3768_v50, 0.0  ;;  %v4223_v61 = vmax.f32 %v4013_v47, 0.0 }
 0x151   : > { %v4226_v59 = vmax.f32 %v4024_v51, 0.0  ;;  %v4160_v62 = vmax.f32 %v3760_v54, 0.0 }
 0x152   : > { %v4224_v63 = vmax.f32 %v4016_v55, 0.0  ;;  %v5512_v0 = vpack.c.bf16 %v4162_v58, %v4161_v56 }
 0x153   : > { %v5672_v2 = vpack.c.bf16 %v4226_v59, %v4225_v57  ;;  %v5507_v3 = vpack.c.bf16 %v4160_v62, %v4159_v60  ;;  %v5927_v5 = vpop.f32.mrb[40].mxu0 }
 0x154   : > { %v5667_v4 = vpack.c.bf16 %v4224_v63, %v4223_v61  ;;  %v5991_v7 = vpop.f32.mrb[40].mxu1  ;;  %5752 = vst [vmem:[%s6788_s18 + $0x98] sm:$0xff] %v5512_v0   ;;  %v3781_v8 = vadd.f32 %v5927_v5, %v6773_v35  ;;  %v3772_v10 = vpop.f32.mrb[41].mxu0 }
 0x155   : > { %5784 = vst [vmem:[%s6788_s18 + $0x198] sm:$0xff] %v5672_v2   ;;  %v4037_v9 = vadd.f32 %v5991_v7, %v6773_v35  ;;  %v4028_v11 = vpop.f32.mrb[41].mxu1  ;;  %5751 = vst [vmem:[%s6788_s18 + $0x90] sm:$0xff] %v5507_v3   ;;  %v3773_v12 = vadd.f32 %v6773_v35, %v3772_v10  ;;  %v5928_v14 = vpop.f32.mrb[42].mxu0 }
 0x156   : > { %5783 = vst [vmem:[%s6788_s18 + $0x190] sm:$0xff] %v5667_v4   ;;  %v4029_v13 = vadd.f32 %v6773_v35, %v4028_v11  ;;  %v5992_v15 = vpop.f32.mrb[42].mxu1  ;;  %v3784_v16 = vadd.f32 %v5928_v14, %v6773_v35  ;;  %v3775_v6 = vpop.f32.mrb[43].mxu0  ;;  %v4165_v20 = vmax.f32 %v3781_v8, 0.0 }
 0x157   : > { %v4040_v17 = vadd.f32 %v5992_v15, %v6773_v35  ;;  %v4031_v18 = vpop.f32.mrb[43].mxu1  ;;  %v3776_v19 = vadd.f32 %v6773_v35, %v3775_v6  ;;  %v4229_v21 = vmax.f32 %v4037_v9, 0.0  ;;  %v4163_v24 = vmax.f32 %v3773_v12, 0.0 }
 0x158   : > { %v4032_v26 = vadd.f32 %v6773_v35, %v4031_v18  ;;  %v4166_v22 = vmax.f32 %v3784_v16, 0.0  ;;  %v4227_v25 = vmax.f32 %v4029_v13, 0.0 }
 0x159   : > { %v4230_v23 = vmax.f32 %v4040_v17, 0.0  ;;  %v4164_v27 = vmax.f32 %v3776_v19, 0.0 }
 0x15a   : > { %v4228_v28 = vmax.f32 %v4032_v26, 0.0  ;;  %v5522_v29 = vpack.c.bf16 %v4166_v22, %v4165_v20 }
 0x15b   : > { %v5682_v30 = vpack.c.bf16 %v4230_v23, %v4229_v21  ;;  %v5517_v31 = vpack.c.bf16 %v4164_v27, %v4163_v24  ;;  %v5931_v33 = vpop.f32.mrb[44].mxu0 }
 0x15c   : > { %v5677_v32 = vpack.c.bf16 %v4228_v28, %v4227_v25  ;;  %v5995_v34 = vpop.f32.mrb[44].mxu1  ;;  %5754 = vst [vmem:[%s6788_s18 + $0xa8] sm:$0xff] %v5522_v29   ;;  %v3797_v36 = vadd.f32 %v5931_v33, %v6773_v35  ;;  %v3788_v38 = vpop.f32.mrb[45].mxu0 }
 0x15d   : > { %5786 = vst [vmem:[%s6788_s18 + $0x1a8] sm:$0xff] %v5682_v30   ;;  %v4053_v37 = vadd.f32 %v5995_v34, %v6773_v35  ;;  %v4044_v39 = vpop.f32.mrb[45].mxu1  ;;  %5753 = vst [vmem:[%s6788_s18 + $0xa0] sm:$0xff] %v5517_v31   ;;  %v3789_v40 = vadd.f32 %v6773_v35, %v3788_v38  ;;  %v5932_v42 = vpop.f32.mrb[46].mxu0 }
 0x15e   : > { %5785 = vst [vmem:[%s6788_s18 + $0x1a0] sm:$0xff] %v5677_v32   ;;  %v4045_v41 = vadd.f32 %v6773_v35, %v4044_v39  ;;  %v5996_v43 = vpop.f32.mrb[46].mxu1  ;;  %v3800_v44 = vadd.f32 %v5932_v42, %v6773_v35  ;;  %v3791_v46 = vpop.f32.mrb[47].mxu0  ;;  %v4169_v50 = vmax.f32 %v3797_v36, 0.0 }
 0x15f   : > { %v4056_v45 = vadd.f32 %v5996_v43, %v6773_v35  ;;  %v4047_v47 = vpop.f32.mrb[47].mxu1  ;;  %v3792_v48 = vadd.f32 %v6773_v35, %v3791_v46  ;;  %v4233_v51 = vmax.f32 %v4053_v37, 0.0  ;;  %v4167_v54 = vmax.f32 %v3789_v40, 0.0 }
 0x160   : > { %v4048_v49 = vadd.f32 %v6773_v35, %v4047_v47  ;;  %v4170_v52 = vmax.f32 %v3800_v44, 0.0  ;;  %v4231_v55 = vmax.f32 %v4045_v41, 0.0 }
 0x161   : > { %v4234_v53 = vmax.f32 %v4056_v45, 0.0  ;;  %v4168_v56 = vmax.f32 %v3792_v48, 0.0 }
 0x162   : > { %v4232_v57 = vmax.f32 %v4048_v49, 0.0  ;;  %v5532_v58 = vpack.c.bf16 %v4170_v52, %v4169_v50 }
 0x163   : > { %v5692_v59 = vpack.c.bf16 %v4234_v53, %v4233_v51  ;;  %v5527_v60 = vpack.c.bf16 %v4168_v56, %v4167_v54  ;;  %v5935_v62 = vpop.f32.mrb[48].mxu0 }
 0x164   : > { %v5687_v61 = vpack.c.bf16 %v4232_v57, %v4231_v55  ;;  %v5999_v63 = vpop.f32.mrb[48].mxu1  ;;  %5756 = vst [vmem:[%s6788_s18 + $0xb8] sm:$0xff] %v5532_v58   ;;  %v3813_v0 = vadd.f32 %v5935_v62, %v6773_v35  ;;  %v3804_v3 = vpop.f32.mrb[49].mxu0 }
 0x165   : > { %5788 = vst [vmem:[%s6788_s18 + $0x1b8] sm:$0xff] %v5692_v59   ;;  %v4069_v2 = vadd.f32 %v5999_v63, %v6773_v35  ;;  %v4060_v4 = vpop.f32.mrb[49].mxu1  ;;  %5755 = vst [vmem:[%s6788_s18 + $0xb0] sm:$0xff] %v5527_v60   ;;  %v3805_v5 = vadd.f32 %v6773_v35, %v3804_v3  ;;  %v5936_v8 = vpop.f32.mrb[50].mxu0 }
 0x166   : > { %5787 = vst [vmem:[%s6788_s18 + $0x1b0] sm:$0xff] %v5687_v61   ;;  %v4061_v7 = vadd.f32 %v6773_v35, %v4060_v4  ;;  %v6000_v9 = vpop.f32.mrb[50].mxu1  ;;  %v3816_v10 = vadd.f32 %v5936_v8, %v6773_v35  ;;  %v3807_v12 = vpop.f32.mrb[51].mxu0  ;;  %v4173_v16 = vmax.f32 %v3813_v0, 0.0 }
 0x167   : > { %v4072_v11 = vadd.f32 %v6000_v9, %v6773_v35  ;;  %v4063_v13 = vpop.f32.mrb[51].mxu1  ;;  %v3808_v14 = vadd.f32 %v6773_v35, %v3807_v12  ;;  %v4237_v17 = vmax.f32 %v4069_v2, 0.0  ;;  %v4171_v19 = vmax.f32 %v3805_v5, 0.0 }
 0x168   : > { %v4064_v15 = vadd.f32 %v6773_v35, %v4063_v13  ;;  %v4174_v6 = vmax.f32 %v3816_v10, 0.0  ;;  %v4235_v26 = vmax.f32 %v4061_v7, 0.0 }
 0x169   : > { %v4238_v18 = vmax.f32 %v4072_v11, 0.0  ;;  %v4172_v20 = vmax.f32 %v3808_v14, 0.0 }
 0x16a   : > { %v4236_v21 = vmax.f32 %v4064_v15, 0.0  ;;  %v5542_v22 = vpack.c.bf16 %v4174_v6, %v4173_v16 }
 0x16b   : > { %v5702_v23 = vpack.c.bf16 %v4238_v18, %v4237_v17  ;;  %v5537_v24 = vpack.c.bf16 %v4172_v20, %v4171_v19  ;;  %v5939_v27 = vpop.f32.mrb[52].mxu0 }
 0x16c   : > { %v5697_v25 = vpack.c.bf16 %v4236_v21, %v4235_v26  ;;  %v6003_v28 = vpop.f32.mrb[52].mxu1  ;;  %5758 = vst [vmem:[%s6788_s18 + $0xc8] sm:$0xff] %v5542_v22   ;;  %v3829_v29 = vadd.f32 %v5939_v27, %v6773_v35  ;;  %v3820_v31 = vpop.f32.mrb[53].mxu0 }
 0x16d   : > { %5790 = vst [vmem:[%s6788_s18 + $0x1c8] sm:$0xff] %v5702_v23   ;;  %v4085_v30 = vadd.f32 %v6003_v28, %v6773_v35  ;;  %v4076_v32 = vpop.f32.mrb[53].mxu1  ;;  %5757 = vst [vmem:[%s6788_s18 + $0xc0] sm:$0xff] %v5537_v24   ;;  %v3821_v33 = vadd.f32 %v6773_v35, %v3820_v31  ;;  %v5940_v36 = vpop.f32.mrb[54].mxu0 }
 0x16e   : > { %5789 = vst [vmem:[%s6788_s18 + $0x1c0] sm:$0xff] %v5697_v25   ;;  %v4077_v34 = vadd.f32 %v6773_v35, %v4076_v32  ;;  %v6004_v37 = vpop.f32.mrb[54].mxu1  ;;  %v3832_v38 = vadd.f32 %v5940_v36, %v6773_v35  ;;  %v3823_v40 = vpop.f32.mrb[55].mxu0  ;;  %v4177_v44 = vmax.f32 %v3829_v29, 0.0 }
 0x16f   : > { %v4088_v39 = vadd.f32 %v6004_v37, %v6773_v35  ;;  %v4079_v41 = vpop.f32.mrb[55].mxu1  ;;  %v3824_v42 = vadd.f32 %v6773_v35, %v3823_v40  ;;  %v4241_v45 = vmax.f32 %v4085_v30, 0.0  ;;  %v4175_v48 = vmax.f32 %v3821_v33, 0.0 }
 0x170   : > { %v4080_v43 = vadd.f32 %v6773_v35, %v4079_v41  ;;  %v4178_v46 = vmax.f32 %v3832_v38, 0.0  ;;  %v4239_v49 = vmax.f32 %v4077_v34, 0.0 }
 0x171   : > { %v4242_v47 = vmax.f32 %v4088_v39, 0.0  ;;  %v4176_v50 = vmax.f32 %v3824_v42, 0.0 }
 0x172   : > { %v4240_v51 = vmax.f32 %v4080_v43, 0.0  ;;  %v5552_v52 = vpack.c.bf16 %v4178_v46, %v4177_v44 }
 0x173   : > { %v5712_v53 = vpack.c.bf16 %v4242_v47, %v4241_v45  ;;  %v5547_v54 = vpack.c.bf16 %v4176_v50, %v4175_v48  ;;  %v5943_v56 = vpop.f32.mrb[56].mxu0 }
 0x174   : > { %v5707_v55 = vpack.c.bf16 %v4240_v51, %v4239_v49  ;;  %v6007_v57 = vpop.f32.mrb[56].mxu1  ;;  %5760 = vst [vmem:[%s6788_s18 + $0xd8] sm:$0xff] %v5552_v52   ;;  %v3845_v58 = vadd.f32 %v5943_v56, %v6773_v35  ;;  %v3836_v60 = vpop.f32.mrb[57].mxu0 }
 0x175   : > { %5792 = vst [vmem:[%s6788_s18 + $0x1d8] sm:$0xff] %v5712_v53   ;;  %v4101_v59 = vadd.f32 %v6007_v57, %v6773_v35  ;;  %v4092_v61 = vpop.f32.mrb[57].mxu1  ;;  %5759 = vst [vmem:[%s6788_s18 + $0xd0] sm:$0xff] %v5547_v54   ;;  %v3837_v62 = vadd.f32 %v6773_v35, %v3836_v60  ;;  %v5944_v0 = vpop.f32.mrb[58].mxu0 }
 0x176   : > { %5791 = vst [vmem:[%s6788_s18 + $0x1d0] sm:$0xff] %v5707_v55   ;;  %v4093_v63 = vadd.f32 %v6773_v35, %v4092_v61  ;;  %v6008_v2 = vpop.f32.mrb[58].mxu1  ;;  %v3848_v3 = vadd.f32 %v5944_v0, %v6773_v35  ;;  %v3839_v5 = vpop.f32.mrb[59].mxu0  ;;  %v4181_v10 = vmax.f32 %v3845_v58, 0.0 }
 0x177   : > { %v4104_v4 = vadd.f32 %v6008_v2, %v6773_v35  ;;  %v4095_v7 = vpop.f32.mrb[59].mxu1  ;;  %v3840_v8 = vadd.f32 %v6773_v35, %v3839_v5  ;;  %v4245_v11 = vmax.f32 %v4101_v59, 0.0  ;;  %v4179_v14 = vmax.f32 %v3837_v62, 0.0 }
 0x178   : > { %v4096_v9 = vadd.f32 %v6773_v35, %v4095_v7  ;;  %v4182_v12 = vmax.f32 %v3848_v3, 0.0  ;;  %v4243_v15 = vmax.f32 %v4093_v63, 0.0 }
 0x179   : > { %v4246_v13 = vmax.f32 %v4104_v4, 0.0  ;;  %v4180_v16 = vmax.f32 %v3840_v8, 0.0 }
 0x17a   : > { %v4244_v17 = vmax.f32 %v4096_v9, 0.0  ;;  %v5562_v6 = vpack.c.bf16 %v4182_v12, %v4181_v10 }
 0x17b   : > { %v5722_v18 = vpack.c.bf16 %v4246_v13, %v4245_v11  ;;  %v5557_v19 = vpack.c.bf16 %v4180_v16, %v4179_v14  ;;  %v5947_v20 = vpop.f32.mrb[60].mxu0 }
 0x17c   : > { %v5717_v26 = vpack.c.bf16 %v4244_v17, %v4243_v15  ;;  %v6011_v21 = vpop.f32.mrb[60].mxu1  ;;  %5762 = vst [vmem:[%s6788_s18 + $0xe8] sm:$0xff] %v5562_v6   ;;  %v3861_v22 = vadd.f32 %v5947_v20, %v6773_v35  ;;  %v3852_v24 = vpop.f32.mrb[61].mxu0 }
 0x17d   : > { %5794 = vst [vmem:[%s6788_s18 + $0x1e8] sm:$0xff] %v5722_v18   ;;  %v4117_v23 = vadd.f32 %v6011_v21, %v6773_v35  ;;  %v4108_v25 = vpop.f32.mrb[61].mxu1  ;;  %5761 = vst [vmem:[%s6788_s18 + $0xe0] sm:$0xff] %v5557_v19   ;;  %v3853_v27 = vadd.f32 %v6773_v35, %v3852_v24  ;;  %v5948_v29 = vpop.f32.mrb[62].mxu0 }
 0x17e   : > { %5793 = vst [vmem:[%s6788_s18 + $0x1e0] sm:$0xff] %v5717_v26   ;;  %v4109_v28 = vadd.f32 %v6773_v35, %v4108_v25  ;;  %v6012_v30 = vpop.f32.mrb[62].mxu1  ;;  %v3864_v31 = vadd.f32 %v5948_v29, %v6773_v35  ;;  %v3855_v33 = vpop.f32.mrb[63].mxu0  ;;  %v4185_v38 = vmax.f32 %v3861_v22, 0.0 }
 0x17f   : > { %v4120_v32 = vadd.f32 %v6012_v30, %v6773_v35  ;;  %v4111_v34 = vpop.f32.mrb[63].mxu1  ;;  %v3856_v36 = vadd.f32 %v6773_v35, %v3855_v33  ;;  %v4249_v39 = vmax.f32 %v4117_v23, 0.0  ;;  %v4183_v42 = vmax.f32 %v3853_v27, 0.0 }
 0x180   : > { %v4112_v37 = vadd.f32 %v6773_v35, %v4111_v34  ;;  %v4186_v40 = vmax.f32 %v3864_v31, 0.0  ;;  %v4247_v43 = vmax.f32 %v4109_v28, 0.0 }
 0x181   : > { %v4250_v41 = vmax.f32 %v4120_v32, 0.0  ;;  %v4184_v44 = vmax.f32 %v3856_v36, 0.0 }
 0x182   : > { %v4248_v45 = vmax.f32 %v4112_v37, 0.0  ;;  %v5572_v46 = vpack.c.bf16 %v4186_v40, %v4185_v38 }
 0x183   : > { %v5732_v47 = vpack.c.bf16 %v4250_v41, %v4249_v39  ;;  %v5567_v48 = vpack.c.bf16 %v4184_v44, %v4183_v42 }
 0x184   : > { %v5727_v49 = vpack.c.bf16 %v4248_v45, %v4247_v43  ;;  %5764 = vst [vmem:[%s6788_s18 + $0xf8] sm:$0xff] %v5572_v46  }
 0x185   : > { %5796 = vst [vmem:[%s6788_s18 + $0x1f8] sm:$0xff] %v5732_v47   ;;  %5763 = vst [vmem:[%s6788_s18 + $0xf0] sm:$0xff] %v5567_v48  }
 0x186   : > { %5795 = vst [vmem:[%s6788_s18 + $0x1f0] sm:$0xff] %v5727_v49  }
 0x187 PF: > { %s19_s17 = sadd.s32 1, %s6116_s17  }
 0x188   : > { %p16_p4 = scmp.ge.s32.totalorder %s19_s17, 4  }
 0x18a   :  { %18 = sbr.rel (!%p16_p4) target bundleno = 3 (0x3), region = 316 }

// kernel: forward.20
= control target key start
LH: loop header
LB: loop body
LE: loop exit
PB: predicated region body
PF: predicated region fallthrough
CT: control target
= control target key end

     0   :  { %s2562_s17 = smov 0   ;;  %s2911_s0 = inlined_call_operand.vmem [shape: bf16[256,128], index: 0, kind: input, shape index: {}]   ;;  %s2912_s1 = inlined_call_operand.vmem [shape: f32[1,128], index: 1, kind: input, shape index: {}]   ;;  %s2913_s2 = inlined_call_operand.vmem [shape: bf16[512,144], index: 2, kind: input, shape index: {}]   ;;  %s2914_s3 = inlined_call_operand.<no memory space> [shape: bf16[], index: 3, kind: input, shape index: {}]   ;;  %s2915_s4 = inlined_call_operand.vmem [shape: bf16[512,128], index: 4, kind: output, shape index: {}]  }
   0x1   :  { %v9_v0 = vstv %s2914_s3 }
   0x2   :  { %v2560_v1 = vunpack.i.l.bf16 %v9_v0 }
   0x3 LB: > { %s2038_s18 = sadd.s32 4294967295, %s2529_s17   ;;  %p2042_p0 = scmp.ge.s32.totalorder %s2529_s17, 1  ;;  %s2529_s17 = sphi %s2562_s17, %s19_s17  }
   0x4   : > { %p145_p1 = scmp.lt.s32.totalorder %s2529_s17, 3 }
   0x6   : > { %p146_p2 = pnand %p2042_p0, %p145_p1 }
   0x8   : > { %149 = sbr.rel (%p146_p2) target bundleno = 330 (0x14a), region = 32 }
   0xf   : > { %v2459_v2 = vld [vmem:[%s2911_s0 + $0x40] sm:$0xff]   ;;  %s2043_s3 = sshll.u32 %s2038_s18, 5  ;;  %v2461_v4 = vld [vmem:[%s2911_s0 + $0x48] sm:$0xff]   ;;  %v207_v5 = vlaneseq  ;;  %v2463_v7 = vld [vmem:[%s2911_s0 + $0x50] sm:$0xff]   ;;  %v2531_v38 = vmov 0.0  }
  0x10   : > { %v2460_v3 = vld [vmem:[%s2911_s0] sm:$0xff]   ;;  %2322 = vmatprep.subr.bf16.mxu0 %v2459_v2  ;;  %2434 = vmatprep.subr.bf16.mxu1 %v2459_v2  ;;  %p171_p3 = scmp.lt.s32.totalorder %s2043_s3, 63  ;;  %v2462_v6 = vld [vmem:[%s2911_s0 + $0x8] sm:$0xff]   ;;  %v2464_v9 = vld [vmem:[%s2911_s0 + $0x10] sm:$0xff]  }
  0x11   : > { %2323 = vmatpush3.bf16.msra.mxu0 %v2460_v3  ;;  %2442 = vmatpush3.bf16.msra.mxu1 %v2460_v3  ;;  %v208_v8 = vand.u32 127, %v207_v5  ;;  %v2465_v10 = vld [vmem:[%s2911_s0 + $0x58] sm:$0xff]   ;;  %v2467_v13 = vld [vmem:[%s2911_s0 + $0x60] sm:$0xff]   ;;  %v2469_v15 = vld [vmem:[%s2911_s0 + $0x68] sm:$0xff]  }
  0x12   : > { %2324 = vmatprep.subr.bf16.mxu0 %v2461_v4  ;;  %2435 = vmatprep.subr.bf16.mxu1 %v2461_v4  ;;  %s2917_s3 = smov (!%p171_p3, %s2043_s3), 63  ;;  %v2466_v12 = vld [vmem:[%s2911_s0 + $0x18] sm:$0xff]   ;;  %v2468_v14 = vld [vmem:[%s2911_s0 + $0x20] sm:$0xff]   ;;  %v2470_v19 = vld [vmem:[%s2911_s0 + $0x28] sm:$0xff]  }
  0x13   : > { %s2194_s7 = sshll.u32 %s2917_s3, 3  ;;  %v2594_v11 = vadd.s32 128, %v208_v8  ;;  %v2626_v25 = vld [vmem:[%s2911_s0 + $0x70] sm:$0xff]   ;;  %v2473_v5 = vld [vmem:[%s2911_s0 + $0x78] sm:$0xff]   ;;  %s2047_s6 = sshll.u32 %s2917_s3, 2 }
  0x14   : > { %s2605_s14 = scalar_lea.vmem %s2913_s2, %s2194_s7  ;;  %v2654_v46 = vld [vmem:[%s2911_s0 + $0x30] sm:$0xff]   ;;  %s2862_s9 = scalar_lea.vmem %s2915_s4, %s2047_s6 }
  0x15   : > { %2325 = vmatpush3.bf16.msra.mxu0 %v2462_v6  ;;  %2443 = vmatpush3.bf16.msra.mxu1 %v2462_v6  ;;  %vm210_vm0 = vcmp.lt.s32.totalorder %v2594_v11, 144  ;;  %v183_v16 = vld [vmem:[%s2605_s14] sm:$0xf]  ;;  %v2048_v17 = vld [vmem:[%s2605_s14 + $0x4] ss:$8 sps:$4 sm:$0xff]  }
  0x16   : > { %2326 = vmatprep.subr.bf16.mxu0 %v2463_v7  ;;  %2436 = vmatprep.subr.bf16.mxu1 %v2463_v7  ;;  %v2049_v18 = vld [vmem:[%s2605_s14 + $0x8] sm:$0xf]  ;;  %193 = vst [vmem:[#allocation7] sm:$0xf] %v183_v16  ;;  %v205_v20 = vunpack.c.l.bf16 %v2048_v17  ;;  %v240_v21 = vunpack.c.h.bf16 %v2048_v17  ;;  %v2079_v22 = vld [vmem:[%s2605_s14 + $0x80] sm:$0xf] }
  0x17   : > { %228 = vst [vmem:[#allocation7 + $0x8] sm:$0xf] %v2049_v18  ;;  %v2080_v23 = vld [vmem:[%s2605_s14 + $0x84] ss:$8 sps:$4 sm:$0xff]   ;;  %v2081_v24 = vld [vmem:[%s2605_s14 + $0x88] sm:$0xf] }
  0x18   : > { %753 = vst [vmem:[#allocation7 + $0x80] sm:$0xf] %v2079_v22  ;;  %v765_v26 = vunpack.c.l.bf16 %v2080_v23  ;;  %788 = vst [vmem:[#allocation7 + $0x88] sm:$0xf] %v2081_v24  ;;  %v800_v27 = vunpack.c.h.bf16 %v2080_v23  ;;  %v2051_v28 = vld [vmem:[%s2605_s14 + $0x10] sm:$0xf]  ;;  %v211_v31 = vsel %vm210_vm0, %v205_v20, %v2560_v1  ;;  %v246_v32 = vsel %vm210_vm0, %v240_v21, %v2560_v1 }
  0x19   : > { %2327 = vmatpush3.bf16.msra.mxu0 %v2464_v9  ;;  %2444 = vmatpush3.bf16.msra.mxu1 %v2464_v9  ;;  %v2052_v29 = vld [vmem:[%s2605_s14 + $0x14] ss:$8 sps:$4 sm:$0xff]   ;;  %v2053_v30 = vld [vmem:[%s2605_s14 + $0x18] sm:$0xf]  ;;  %263 = vst [vmem:[#allocation7 + $0x10] sm:$0xf] %v2051_v28  ;;  %v213_v39 = vpack.c.bf16 %v2531_v38, %v211_v31  ;;  %v248_v40 = vpack.c.bf16 %v2531_v38, %v246_v32 }
  0x1a   : > { %2328 = vmatprep.subr.bf16.mxu0 %v2465_v10  ;;  %2437 = vmatprep.subr.bf16.mxu1 %v2465_v10  ;;  %v275_v33 = vunpack.c.l.bf16 %v2052_v29  ;;  %298 = vst [vmem:[#allocation7 + $0x18] sm:$0xf] %v2053_v30  ;;  %v310_v34 = vunpack.c.h.bf16 %v2052_v29  ;;  %v2083_v35 = vld [vmem:[%s2605_s14 + $0x90] sm:$0xf]  ;;  %v2639_v36 = vld [vmem:[%s2605_s14 + $0x94] ss:$8 sps:$4 sm:$0xff]   ;;  %v771_v41 = vsel %vm210_vm0, %v765_v26, %v2560_v1  ;;  %v806_v48 = vsel %vm210_vm0, %v800_v27, %v2560_v1 }
  0x1b   : > { %v2085_v37 = vld [vmem:[%s2605_s14 + $0x98] sm:$0xf]  ;;  %823 = vst [vmem:[#allocation7 + $0x90] sm:$0xf] %v2083_v35  ;;  %v835_v42 = vunpack.c.l.bf16 %v2639_v36  ;;  %v2055_v43 = vld [vmem:[%s2605_s14 + $0x20] sm:$0xf]  ;;  %v773_v47 = vpack.c.bf16 %v2531_v38, %v771_v41  ;;  %v808_v54 = vpack.c.bf16 %v2531_v38, %v806_v48  ;;  %v870_v62 = vunpack.c.h.bf16 %v2639_v36 }
  0x1c   : > { %858 = vst [vmem:[#allocation7 + $0x98] sm:$0xf] %v2085_v37  ;;  %v2056_v44 = vld [vmem:[%s2605_s14 + $0x24] ss:$8 sps:$4 sm:$0xff]   ;;  %v2057_v45 = vld [vmem:[%s2605_s14 + $0x28] sm:$0xf]  ;;  %v281_v49 = vsel %vm210_vm0, %v275_v33, %v2560_v1  ;;  %v316_v50 = vsel %vm210_vm0, %v310_v34, %v2560_v1 }
  0x1d   : > { %2329 = vmatpush3.bf16.msra.mxu0 %v2466_v12  ;;  %2445 = vmatpush3.bf16.msra.mxu1 %v2466_v12  ;;  %333 = vst [vmem:[#allocation7 + $0x20] sm:$0xf] %v2055_v43  ;;  %368 = vst [vmem:[#allocation7 + $0x28] sm:$0xf] %v2057_v45  ;;  %v2087_v51 = vld [vmem:[%s2605_s14 + $0xa0] sm:$0xf]  ;;  %v283_v55 = vpack.c.bf16 %v2531_v38, %v281_v49  ;;  %v318_v56 = vpack.c.bf16 %v2531_v38, %v316_v50  ;;  %v345_v63 = vunpack.c.l.bf16 %v2056_v44 }
  0x1e   : > { %2330 = vmatprep.subr.bf16.mxu0 %v2467_v13  ;;  %2438 = vmatprep.subr.bf16.mxu1 %v2467_v13  ;;  %v2668_v52 = vld [vmem:[%s2605_s14 + $0xa4] ss:$8 sps:$4 sm:$0xff]   ;;  %v2089_v53 = vld [vmem:[%s2605_s14 + $0xa8] sm:$0xf]  ;;  %215 = vst [vmem:[#allocation7 + $0x4] sm:$0xf] %v213_v39  ;;  %v841_v57 = vsel %vm210_vm0, %v835_v42, %v2560_v1  ;;  %v380_v0 = vunpack.c.h.bf16 %v2056_v44 }
  0x1f   : > { %250 = vst [vmem:[#allocation7 + $0xc] sm:$0xf] %v248_v40  ;;  %893 = vst [vmem:[#allocation7 + $0xa0] sm:$0xf] %v2087_v51  ;;  %v2059_v58 = vld [vmem:[%s2605_s14 + $0x30] sm:$0xf]  ;;  %v843_v61 = vpack.c.bf16 %v2531_v38, %v841_v57  ;;  %v905_v6 = vunpack.c.l.bf16 %v2668_v52  ;;  %v940_v7 = vunpack.c.h.bf16 %v2668_v52 }
  0x20   : > { %928 = vst [vmem:[#allocation7 + $0xa8] sm:$0xf] %v2089_v53  ;;  %v2679_v59 = vld [vmem:[%s2605_s14 + $0x34] ss:$8 sps:$4 sm:$0xff]   ;;  %v2061_v60 = vld [vmem:[%s2605_s14 + $0x38] sm:$0xf]  ;;  %v386_v16 = vsel %vm210_vm0, %v380_v0, %v2560_v1 }
  0x21   : > { %2331 = vmatpush3.bf16.msra.mxu0 %v2468_v14  ;;  %2446 = vmatpush3.bf16.msra.mxu1 %v2468_v14  ;;  %775 = vst [vmem:[#allocation7 + $0x84] sm:$0xf] %v773_v47  ;;  %403 = vst [vmem:[#allocation7 + $0x30] sm:$0xf] %v2059_v58  ;;  %v2091_v2 = vld [vmem:[%s2605_s14 + $0xb0] sm:$0xf]  ;;  %v415_v8 = vunpack.c.l.bf16 %v2679_v59  ;;  %v450_v9 = vunpack.c.h.bf16 %v2679_v59  ;;  %v876_v14 = vsel %vm210_vm0, %v870_v62, %v2560_v1 }
  0x22   : > { %2332 = vmatprep.subr.bf16.mxu0 %v2469_v15  ;;  %2439 = vmatprep.subr.bf16.mxu1 %v2469_v15  ;;  %438 = vst [vmem:[#allocation7 + $0x38] sm:$0xf] %v2061_v60  ;;  %v2686_v3 = vld [vmem:[%s2605_s14 + $0xb4] ss:$8 sps:$4 sm:$0xff]   ;;  %v2093_v4 = vld [vmem:[%s2605_s14 + $0xb8] sm:$0xf]  ;;  %v351_v15 = vsel %vm210_vm0, %v345_v63, %v2560_v1  ;;  %v878_v21 = vpack.c.bf16 %v2531_v38, %v876_v14 }
  0x23   : > { %810 = vst [vmem:[#allocation7 + $0x8c] sm:$0xf] %v808_v54  ;;  %285 = vst [vmem:[#allocation7 + $0x14] sm:$0xf] %v283_v55  ;;  %v2063_v10 = vld [vmem:[%s2605_s14 + $0x40] sm:$0xf]  ;;  %v975_v17 = vunpack.c.l.bf16 %v2686_v3  ;;  %v353_v22 = vpack.c.bf16 %v2531_v38, %v351_v15  ;;  %v388_v23 = vpack.c.bf16 %v2531_v38, %v386_v16  ;;  %v911_v24 = vsel %vm210_vm0, %v905_v6, %v2560_v1 }
  0x24   : > { %320 = vst [vmem:[#allocation7 + $0x1c] sm:$0xf] %v318_v56  ;;  %963 = vst [vmem:[#allocation7 + $0xb0] sm:$0xf] %v2091_v2  ;;  %v2065_v12 = vld [vmem:[%s2605_s14 + $0x48] sm:$0xf]  ;;  %v913_v28 = vpack.c.bf16 %v2531_v38, %v911_v24  ;;  %v946_v29 = vsel %vm210_vm0, %v940_v7, %v2560_v1  ;;  %v421_v30 = vsel %vm210_vm0, %v415_v8, %v2560_v1  ;;  %v1010_v31 = vunpack.c.h.bf16 %v2686_v3 }
  0x25   : > { %2333 = vmatpush3.bf16.msra.mxu0 %v2470_v19  ;;  %2447 = vmatpush3.bf16.msra.mxu1 %v2470_v19  ;;  %998 = vst [vmem:[#allocation7 + $0xb8] sm:$0xf] %v2093_v4  ;;  %v2474_v13 = vld [vmem:[%s2911_s0 + $0x38] sm:$0xff]   ;;  %845 = vst [vmem:[#allocation7 + $0x94] sm:$0xf] %v843_v61  ;;  %v948_v35 = vpack.c.bf16 %v2531_v38, %v946_v29  ;;  %v423_v36 = vpack.c.bf16 %v2531_v38, %v421_v30 }
  0x26   : > { %2334 = vmatprep.subr.bf16.mxu0 %v2626_v25  ;;  %2440 = vmatprep.subr.bf16.mxu1 %v2626_v25  ;;  %473 = vst [vmem:[#allocation7 + $0x40] sm:$0xf] %v2063_v10  ;;  %v2714_v18 = vld [vmem:[%s2605_s14 + $0x44] ss:$8 sps:$4 sm:$0xff]   ;;  %508 = vst [vmem:[#allocation7 + $0x48] sm:$0xf] %v2065_v12  ;;  %v456_v37 = vsel %vm210_vm0, %v450_v9, %v2560_v1  ;;  %v981_v45 = vsel %vm210_vm0, %v975_v17, %v2560_v1 }
  0x27   : > { %v2095_v19 = vld [vmem:[%s2605_s14 + $0xc0] sm:$0xf]  ;;  %v2097_v20 = vld [vmem:[%s2605_s14 + $0xc8] sm:$0xf]  ;;  %v2725_v25 = vld [vmem:[%s2605_s14 + $0xc4] ss:$8 sps:$4 sm:$0xff]   ;;  %v485_v39 = vunpack.c.l.bf16 %v2714_v18  ;;  %v458_v44 = vpack.c.bf16 %v2531_v38, %v456_v37  ;;  %v520_v47 = vunpack.c.h.bf16 %v2714_v18  ;;  %v983_v50 = vpack.c.bf16 %v2531_v38, %v981_v45 }
  0x28   : > { %1033 = vst [vmem:[#allocation7 + $0xc0] sm:$0xf] %v2095_v19  ;;  %1068 = vst [vmem:[#allocation7 + $0xc8] sm:$0xf] %v2097_v20  ;;  %v2067_v26 = vld [vmem:[%s2605_s14 + $0x50] sm:$0xf]  ;;  %v1045_v53 = vunpack.c.l.bf16 %v2725_v25  ;;  %v1080_v59 = vunpack.c.h.bf16 %v2725_v25 }
  0x29   : > { %v2069_v27 = vld [vmem:[%s2605_s14 + $0x58] sm:$0xf]  ;;  %2335 = vmatpush3.bf16.msra.mxu0 %v2654_v46  ;;  %2448 = vmatpush3.bf16.msra.mxu1 %v2654_v46  ;;  %543 = vst [vmem:[#allocation7 + $0x50] sm:$0xf] %v2067_v26  ;;  %v2740_v32 = vld [vmem:[%s2605_s14 + $0x54] ss:$8 sps:$4 sm:$0xff]   ;;  %v1016_v46 = vsel %vm210_vm0, %v1010_v31, %v2560_v1  ;;  %v491_v52 = vsel %vm210_vm0, %v485_v39, %v2560_v1 }
  0x2a   : > { %578 = vst [vmem:[#allocation7 + $0x58] sm:$0xf] %v2069_v27  ;;  %v2099_v33 = vld [vmem:[%s2605_s14 + $0xd0] sm:$0xf]  ;;  %v2101_v34 = vld [vmem:[%s2605_s14 + $0xd8] sm:$0xf]  ;;  %2336 = vmatprep.subr.bf16.mxu0 %v2473_v5  ;;  %2441 = vmatprep.subr.bf16.mxu1 %v2473_v5  ;;  %v1018_v51 = vpack.c.bf16 %v2531_v38, %v1016_v46  ;;  %v493_v57 = vpack.c.bf16 %v2531_v38, %v491_v52  ;;  %v555_v60 = vunpack.c.l.bf16 %v2740_v32  ;;  %v590_v0 = vunpack.c.h.bf16 %v2740_v32 }
  0x2b   : > { %880 = vst [vmem:[#allocation7 + $0x9c] sm:$0xf] %v878_v21  ;;  %355 = vst [vmem:[#allocation7 + $0x24] sm:$0xf] %v353_v22  ;;  %v2751_v40 = vld [vmem:[%s2605_s14 + $0xd4] ss:$8 sps:$4 sm:$0xff]   ;;  %v526_v58 = vsel %vm210_vm0, %v520_v47, %v2560_v1  ;;  %v1051_v63 = vsel %vm210_vm0, %v1045_v53, %v2560_v1  ;;  %v1086_v4 = vsel %vm210_vm0, %v1080_v59, %v2560_v1 }
  0x2c   : > { %390 = vst [vmem:[#allocation7 + $0x2c] sm:$0xf] %v388_v23  ;;  %1103 = vst [vmem:[#allocation7 + $0xd0] sm:$0xf] %v2099_v33  ;;  %v2071_v41 = vld [vmem:[%s2605_s14 + $0x60] sm:$0xf]  ;;  %v528_v62 = vpack.c.bf16 %v2531_v38, %v526_v58  ;;  %v1115_v2 = vunpack.c.l.bf16 %v2751_v40  ;;  %v1053_v3 = vpack.c.bf16 %v2531_v38, %v1051_v63  ;;  %v561_v5 = vsel %vm210_vm0, %v555_v60, %v2560_v1 }
  0x2d   : > { %1138 = vst [vmem:[#allocation7 + $0xd8] sm:$0xf] %v2101_v34  ;;  %v2073_v42 = vld [vmem:[%s2605_s14 + $0x68] sm:$0xf]  ;;  %915 = vst [vmem:[#allocation7 + $0xa4] sm:$0xf] %v913_v28  ;;  %2337 = vmatpush3.bf16.msra.mxu0 %v2474_v13  ;;  %2449 = vmatpush3.bf16.msra.mxu1 %v2474_v13  ;;  %v1150_v6 = vunpack.c.h.bf16 %v2751_v40  ;;  %v1088_v8 = vpack.c.bf16 %v2531_v38, %v1086_v4  ;;  %v563_v9 = vpack.c.bf16 %v2531_v38, %v561_v5 }
  0x2e   : > { %v2475_v43 = vld [vmem:[#allocation7] ss:$8 sps:$4 sm:$0xff]   ;;  %613 = vst [vmem:[#allocation7 + $0x60] sm:$0xf] %v2071_v41  ;;  %v2764_v48 = vld [vmem:[%s2605_s14 + $0x64] ss:$8 sps:$4 sm:$0xff]   ;;  %v596_v10 = vsel %vm210_vm0, %v590_v0, %v2560_v1  ;;  %v1121_v18 = vsel %vm210_vm0, %v1115_v2, %v2560_v1 }
  0x2f   : > { %648 = vst [vmem:[#allocation7 + $0x68] sm:$0xf] %v2073_v42  ;;  %v2477_v49 = vld [vmem:[#allocation7 + $0x4] ss:$8 sps:$4 sm:$0xff]   ;;  %950 = vst [vmem:[#allocation7 + $0xac] sm:$0xf] %v948_v35  ;;  %v625_v12 = vunpack.c.l.bf16 %v2764_v48  ;;  %v598_v17 = vpack.c.bf16 %v2531_v38, %v596_v10  ;;  %v1156_v19 = vsel %vm210_vm0, %v1150_v6, %v2560_v1  ;;  %v660_v20 = vunpack.c.h.bf16 %v2764_v48 }
  0x30   : > { %425 = vst [vmem:[#allocation7 + $0x34] sm:$0xf] %v423_v36  ;;  %v2103_v54 = vld [vmem:[%s2605_s14 + $0xe0] sm:$0xf]  ;;  %v2480_v56 = vld [vmem:[#allocation7 + $0x84] ss:$8 sps:$4 sm:$0xff]   ;;  %1661 = vmatprep.mubr.bf16.mxu0 %v2477_v49  ;;  %v1123_v21 = vpack.c.bf16 %v2531_v38, %v1121_v18  ;;  %v1158_v22 = vpack.c.bf16 %v2531_v38, %v1156_v19 }
  0x31   : > { %v2478_v55 = vld [vmem:[#allocation7 + $0x80] ss:$8 sps:$4 sm:$0xff]   ;;  %460 = vst [vmem:[#allocation7 + $0x3c] sm:$0xf] %v458_v44  ;;  %1173 = vst [vmem:[#allocation7 + $0xe0] sm:$0xf] %v2103_v54  ;;  %1725 = vmatprep.mubr.bf16.mxu1 %v2480_v56  ;;  %1662 = vmatmul.mubr.bf16.vlgmr.msra.gmra.mrb[0].mxu0 %v2475_v43  ;;  %v631_v23 = vsel %vm210_vm0, %v625_v12, %v2560_v1  ;;  %v666_v27 = vsel %vm210_vm0, %v660_v20, %v2560_v1 }
  0x32   : > { %v2481_v61 = vld [vmem:[#allocation7 + $0x14] ss:$8 sps:$4 sm:$0xff]   ;;  %985 = vst [vmem:[#allocation7 + $0xb4] sm:$0xf] %v983_v50  ;;  %1020 = vst [vmem:[#allocation7 + $0xbc] sm:$0xf] %v1018_v51  ;;  %1726 = vmatmul.mubr.bf16.vlgmr.msra.gmra.mrb[0].mxu1 %v2478_v55  ;;  %v633_v26 = vpack.c.bf16 %v2531_v38, %v631_v23  ;;  %v668_v32 = vpack.c.bf16 %v2531_v38, %v666_v27 }
  0x33   : > { %495 = vst [vmem:[#allocation7 + $0x44] sm:$0xf] %v493_v57  ;;  %v2104_v7 = vld [vmem:[%s2605_s14 + $0xe4] ss:$8 sps:$4 sm:$0xff]   ;;  %530 = vst [vmem:[#allocation7 + $0x4c] sm:$0xf] %v528_v62  ;;  %1669 = vmatprep.mubr.bf16.mxu0 %v2481_v61 }
  0x34   : > { %v2105_v13 = vld [vmem:[%s2605_s14 + $0xe8] sm:$0xf]  ;;  %v2075_v14 = vld [vmem:[%s2605_s14 + $0x70] sm:$0xf]  ;;  %v2076_v15 = vld [vmem:[%s2605_s14 + $0x74] ss:$8 sps:$4 sm:$0xff]   ;;  %v1185_v24 = vunpack.c.l.bf16 %v2104_v7  ;;  %v1220_v28 = vunpack.c.h.bf16 %v2104_v7 }
  0x35   : > { %v2483_v16 = vld [vmem:[#allocation7 + $0x94] ss:$8 sps:$4 sm:$0xff]   ;;  %1055 = vst [vmem:[#allocation7 + $0xc4] sm:$0xf] %v1053_v3  ;;  %1208 = vst [vmem:[#allocation7 + $0xe8] sm:$0xf] %v2105_v13  ;;  %v695_v29 = vunpack.c.l.bf16 %v2076_v15  ;;  %v730_v34 = vunpack.c.h.bf16 %v2076_v15 }
  0x36   : > { %683 = vst [vmem:[#allocation7 + $0x70] sm:$0xf] %v2075_v14  ;;  %1090 = vst [vmem:[#allocation7 + $0xcc] sm:$0xf] %v1088_v8  ;;  %1733 = vmatprep.mubr.bf16.mxu1 %v2483_v16  ;;  %v2485_v25 = vld [vmem:[#allocation7 + $0x10] ss:$8 sps:$4 sm:$0xff]   ;;  %v1191_v33 = vsel %vm210_vm0, %v1185_v24, %v2560_v1  ;;  %v1226_v37 = vsel %vm210_vm0, %v1220_v28, %v2560_v1 }
  0x37   : > { %565 = vst [vmem:[#allocation7 + $0x54] sm:$0xf] %v563_v9  ;;  %600 = vst [vmem:[#allocation7 + $0x5c] sm:$0xf] %v598_v17  ;;  %v2486_v30 = vld [vmem:[#allocation7 + $0x90] ss:$8 sps:$4 sm:$0xff]   ;;  %v1193_v36 = vpack.c.bf16 %v2531_v38, %v1191_v33  ;;  %v701_v39 = vsel %vm210_vm0, %v695_v29, %v2560_v1  ;;  %v1228_v40 = vpack.c.bf16 %v2531_v38, %v1226_v37 }
  0x38   : > { %v2487_v31 = vld [vmem:[#allocation7 + $0x24] ss:$8 sps:$4 sm:$0xff]   ;;  %1125 = vst [vmem:[#allocation7 + $0xd4] sm:$0xf] %v1123_v21  ;;  %1160 = vst [vmem:[#allocation7 + $0xdc] sm:$0xf] %v1158_v22  ;;  %v703_v41 = vpack.c.bf16 %v2531_v38, %v701_v39  ;;  %v736_v42 = vsel %vm210_vm0, %v730_v34, %v2560_v1 }
  0x39   : > { %v2489_v35 = vld [vmem:[#allocation7 + $0xa4] ss:$8 sps:$4 sm:$0xff]   ;;  %635 = vst [vmem:[#allocation7 + $0x64] sm:$0xf] %v633_v26  ;;  %670 = vst [vmem:[#allocation7 + $0x6c] sm:$0xf] %v668_v32  ;;  %v738_v43 = vpack.c.bf16 %v2531_v38, %v736_v42  ;;  %1670 = vmatmul.mubr.bf16.gmra.mrb[4].mxu0 %v2485_v25 }
  0x3a   : > { %1195 = vst [vmem:[#allocation7 + $0xe4] sm:$0xf] %v1193_v36  ;;  %1734 = vmatmul.mubr.bf16.gmra.mrb[4].mxu1 %v2486_v30  ;;  %1230 = vst [vmem:[#allocation7 + $0xec] sm:$0xf] %v1228_v40  ;;  %1677 = vmatprep.mubr.bf16.mxu0 %v2487_v31  ;;  %v2491_v44 = vld [vmem:[#allocation7 + $0x20] ss:$8 sps:$4 sm:$0xff]  }
  0x3b   : > { %705 = vst [vmem:[#allocation7 + $0x74] sm:$0xf] %v703_v41  ;;  %1741 = vmatprep.mubr.bf16.mxu1 %v2489_v35  ;;  %740 = vst [vmem:[#allocation7 + $0x7c] sm:$0xf] %v738_v43  ;;  %v2492_v45 = vld [vmem:[#allocation7 + $0xa0] ss:$8 sps:$4 sm:$0xff]  }
  0x3c   : > { %v2493_v46 = vld [vmem:[#allocation7 + $0x34] ss:$8 sps:$4 sm:$0xff]   ;;  %v2077_v48 = vld [vmem:[%s2605_s14 + $0x78] sm:$0xf]  ;;  %v2107_v49 = vld [vmem:[%s2605_s14 + $0xf0] sm:$0xf] }
  0x3d   : > { %v2495_v47 = vld [vmem:[#allocation7 + $0xb4] ss:$8 sps:$4 sm:$0xff]   ;;  %718 = vst [vmem:[#allocation7 + $0x78] sm:$0xf] %v2077_v48  ;;  %1243 = vst [vmem:[#allocation7 + $0xf0] sm:$0xf] %v2107_v49 }
  0x3e   : > { %v2108_v50 = vld [vmem:[%s2605_s14 + $0xf4] ss:$8 sps:$4 sm:$0xff]   ;;  %v2109_v51 = vld [vmem:[%s2605_s14 + $0xf8] sm:$0xf]  ;;  %v2499_v60 = vld [vmem:[#allocation7 + $0x44] ss:$8 sps:$4 sm:$0xff]  }
  0x3f   : > { %v1255_v52 = vunpack.c.l.bf16 %v2108_v50  ;;  %1278 = vst [vmem:[#allocation7 + $0xf8] sm:$0xf] %v2109_v51  ;;  %v1290_v53 = vunpack.c.h.bf16 %v2108_v50  ;;  %v2497_v56 = vld [vmem:[#allocation7 + $0x30] ss:$8 sps:$4 sm:$0xff]   ;;  %v2501_v61 = vld [vmem:[#allocation7 + $0xc4] ss:$8 sps:$4 sm:$0xff]  }
  0x40   : > { %v2498_v57 = vld [vmem:[#allocation7 + $0xb0] ss:$8 sps:$4 sm:$0xff]   ;;  %v2503_v62 = vld [vmem:[#allocation7 + $0x40] ss:$8 sps:$4 sm:$0xff]   ;;  %v2505_v0 = vld [vmem:[#allocation7 + $0x54] ss:$8 sps:$4 sm:$0xff]  }
  0x41   : > { %1678 = vmatmul.mubr.bf16.gmra.mrb[8].mxu0 %v2491_v44  ;;  %v1261_v54 = vsel %vm210_vm0, %v1255_v52, %v2560_v1  ;;  %v1296_v55 = vsel %vm210_vm0, %v1290_v53, %v2560_v1  ;;  %v2504_v63 = vld [vmem:[#allocation7 + $0xc0] ss:$8 sps:$4 sm:$0xff]   ;;  %v2507_v2 = vld [vmem:[#allocation7 + $0xd4] ss:$8 sps:$4 sm:$0xff]   ;;  %v2509_v11 = vld [vmem:[#allocation7 + $0x50] ss:$8 sps:$4 sm:$0xff]  }
  0x42   : > { %1742 = vmatmul.mubr.bf16.gmra.mrb[8].mxu1 %v2492_v45  ;;  %1685 = vmatprep.mubr.bf16.mxu0 %v2493_v46  ;;  %v1263_v58 = vpack.c.bf16 %v2531_v38, %v1261_v54  ;;  %v1298_v59 = vpack.c.bf16 %v2531_v38, %v1296_v55  ;;  %v2510_v3 = vld [vmem:[#allocation7 + $0xd0] ss:$8 sps:$4 sm:$0xff]   ;;  %v2511_v4 = vld [vmem:[#allocation7 + $0x64] ss:$8 sps:$4 sm:$0xff]   ;;  %v2515_v5 = vld [vmem:[#allocation7 + $0x60] ss:$8 sps:$4 sm:$0xff]  }
  0x43   : > { %1749 = vmatprep.mubr.bf16.mxu1 %v2495_v47  ;;  %v2513_v38 = vld [vmem:[#allocation7 + $0xe4] ss:$8 sps:$4 sm:$0xff]   ;;  %v2516_v6 = vld [vmem:[#allocation7 + $0xe0] ss:$8 sps:$4 sm:$0xff]   ;;  %v2517_v7 = vld [vmem:[#allocation7 + $0x74] ss:$8 sps:$4 sm:$0xff]  }
  0x44   : > { %1265 = vst [vmem:[#allocation7 + $0xf4] sm:$0xf] %v1263_v58  ;;  %1300 = vst [vmem:[#allocation7 + $0xfc] sm:$0xf] %v1298_v59  ;;  %v2521_v9 = vld [vmem:[#allocation7 + $0x70] ss:$8 sps:$4 sm:$0xff]  }
  0x45   : > { %v2852_v14 = vld [vmem:[%s2912_s1] ss:$0 sm:$0xff] }
  0x46   : > { %v2522_v10 = vld [vmem:[#allocation7 + $0xf0] ss:$8 sps:$4 sm:$0xff]  }
  0x49   : > { %1686 = vmatmul.mubr.bf16.gmra.mrb[12].mxu0 %v2497_v56 }
  0x4a   : > { %1750 = vmatmul.mubr.bf16.gmra.mrb[12].mxu1 %v2498_v57  ;;  %1693 = vmatprep.mubr.bf16.mxu0 %v2499_v60 }
  0x4b   : > { %1757 = vmatprep.mubr.bf16.mxu1 %v2501_v61  ;;  %v2519_v8 = vld [vmem:[#allocation7 + $0xf4] ss:$8 sps:$4 sm:$0xff]  }
  0x51   : > { %1694 = vmatmul.mubr.bf16.gmra.mrb[16].mxu0 %v2503_v62 }
  0x52   : > { %1758 = vmatmul.mubr.bf16.gmra.mrb[16].mxu1 %v2504_v63  ;;  %1701 = vmatprep.mubr.bf16.mxu0 %v2505_v0 }
  0x53   : > { %1765 = vmatprep.mubr.bf16.mxu1 %v2507_v2 }
  0x59   : > { %1702 = vmatmul.mubr.bf16.gmra.mrb[20].mxu0 %v2509_v11 }
  0x5a   : > { %1766 = vmatmul.mubr.bf16.gmra.mrb[20].mxu1 %v2510_v3  ;;  %1709 = vmatprep.mubr.bf16.mxu0 %v2511_v4 }
  0x5b   : > { %1773 = vmatprep.mubr.bf16.mxu1 %v2513_v38 }
  0x61   : > { %1710 = vmatmul.mubr.bf16.gmra.mrb[24].mxu0 %v2515_v5 }
  0x62   : > { %1774 = vmatmul.mubr.bf16.gmra.mrb[24].mxu1 %v2516_v6  ;;  %1717 = vmatprep.mubr.bf16.mxu0 %v2517_v7 }
  0x63   : > { %1781 = vmatprep.mubr.bf16.mxu1 %v2519_v8 }
  0x69   : > { %1718 = vmatmul.mubr.bf16.gmra.mrb[28].mxu0 %v2521_v9 }
  0x6a   : > { %1782 = vmatmul.mubr.bf16.gmra.mrb[28].mxu1 %v2522_v10 }
 0x104   : > { %v2338_v12 = vpop.f32.mrb[0].mxu0 }
 0x105   : > { %v2386_v13 = vpop.f32.mrb[0].mxu1  ;;  %v2339_v15 = vpop.f32.mrb[1].mxu0 }
 0x106   : > { %v2387_v16 = vpop.f32.mrb[1].mxu1  ;;  %v2340_v17 = vadd.f32 %v2339_v15, %v2338_v12  ;;  %v2341_v19 = vpop.f32.mrb[2].mxu0 }
 0x107   : > { %v2388_v18 = vadd.f32 %v2387_v16, %v2386_v13  ;;  %v2389_v20 = vpop.f32.mrb[2].mxu1  ;;  %v2342_v21 = vpop.f32.mrb[3].mxu0 }
 0x108   : > { %v2390_v22 = vpop.f32.mrb[3].mxu1  ;;  %v1664_v23 = vadd.f32 %v2340_v17, %v2852_v14  ;;  %v2343_v25 = vadd.f32 %v2342_v21, %v2341_v19 }
 0x109   : > { %v1728_v24 = vadd.f32 %v2388_v18, %v2852_v14  ;;  %v2391_v26 = vadd.f32 %v2390_v22, %v2389_v20 }
 0x10a   : > { %v1667_v27 = vadd.f32 %v2343_v25, %v2852_v14  ;;  %v1790_v29 = vmax.f32 %v1664_v23, 0.0 }
 0x10b   : > { %v1731_v28 = vadd.f32 %v2391_v26, %v2852_v14  ;;  %v1806_v30 = vmax.f32 %v1728_v24, 0.0 }
 0x10c   : > { %v1791_v31 = vmax.f32 %v1667_v27, 0.0  ;;  %v2344_v33 = vpop.f32.mrb[4].mxu0 }
 0x10d   : > { %v1807_v32 = vmax.f32 %v1731_v28, 0.0  ;;  %v2392_v34 = vpop.f32.mrb[4].mxu1  ;;  %v2345_v35 = vpop.f32.mrb[5].mxu0 }
 0x10e   : > { %v2393_v36 = vpop.f32.mrb[5].mxu1  ;;  %v2230_v37 = vpack.c.bf16 %v1791_v31, %v1790_v29  ;;  %v2346_v40 = vadd.f32 %v2345_v35, %v2344_v33  ;;  %v2347_v42 = vpop.f32.mrb[6].mxu0 }
 0x10f   : > { %v2270_v39 = vpack.c.bf16 %v1807_v32, %v1806_v30  ;;  %v2394_v41 = vadd.f32 %v2393_v36, %v2392_v34  ;;  %v2395_v43 = vpop.f32.mrb[6].mxu1  ;;  %v2348_v44 = vpop.f32.mrb[7].mxu0 }
 0x110   : > { %v2396_v45 = vpop.f32.mrb[7].mxu1  ;;  %2231 = vst [vmem:[%s2862_s9] sm:$0xff] %v2230_v37   ;;  %v1672_v46 = vadd.f32 %v2346_v40, %v2852_v14  ;;  %v2349_v48 = vadd.f32 %v2348_v44, %v2347_v42 }
 0x111   : > { %2314 = vst [vmem:[%s2862_s9 + $0x40] sm:$0xff] %v2270_v39   ;;  %v1736_v47 = vadd.f32 %v2394_v41, %v2852_v14  ;;  %v2397_v49 = vadd.f32 %v2396_v45, %v2395_v43 }
 0x112   : > { %v1675_v50 = vadd.f32 %v2349_v48, %v2852_v14  ;;  %v1792_v52 = vmax.f32 %v1672_v46, 0.0 }
 0x113   : > { %v1739_v51 = vadd.f32 %v2397_v49, %v2852_v14  ;;  %v1808_v53 = vmax.f32 %v1736_v47, 0.0 }
 0x114   : > { %v1793_v54 = vmax.f32 %v1675_v50, 0.0  ;;  %v2350_v56 = vpop.f32.mrb[8].mxu0 }
 0x115   : > { %v1809_v55 = vmax.f32 %v1739_v51, 0.0  ;;  %v2398_v57 = vpop.f32.mrb[8].mxu1  ;;  %v2351_v58 = vpop.f32.mrb[9].mxu0 }
 0x116   : > { %v2399_v59 = vpop.f32.mrb[9].mxu1  ;;  %v2235_v60 = vpack.c.bf16 %v1793_v54, %v1792_v52  ;;  %v2352_v62 = vadd.f32 %v2351_v58, %v2350_v56  ;;  %v2353_v0 = vpop.f32.mrb[10].mxu0 }
 0x117   : > { %v2275_v61 = vpack.c.bf16 %v1809_v55, %v1808_v53  ;;  %v2400_v63 = vadd.f32 %v2399_v59, %v2398_v57  ;;  %v2401_v2 = vpop.f32.mrb[10].mxu1  ;;  %v2354_v11 = vpop.f32.mrb[11].mxu0 }
 0x118   : > { %v2402_v3 = vpop.f32.mrb[11].mxu1  ;;  %2307 = vst [vmem:[%s2862_s9 + $0x8] sm:$0xff] %v2235_v60   ;;  %v1680_v4 = vadd.f32 %v2352_v62, %v2852_v14  ;;  %v2355_v5 = vadd.f32 %v2354_v11, %v2353_v0 }
 0x119   : > { %2315 = vst [vmem:[%s2862_s9 + $0x48] sm:$0xff] %v2275_v61   ;;  %v1744_v38 = vadd.f32 %v2400_v63, %v2852_v14  ;;  %v2403_v6 = vadd.f32 %v2402_v3, %v2401_v2 }
 0x11a   : > { %v1683_v7 = vadd.f32 %v2355_v5, %v2852_v14  ;;  %v1794_v9 = vmax.f32 %v1680_v4, 0.0 }
 0x11b   : > { %v1747_v8 = vadd.f32 %v2403_v6, %v2852_v14  ;;  %v1810_v10 = vmax.f32 %v1744_v38, 0.0 }
 0x11c   : > { %v1795_v12 = vmax.f32 %v1683_v7, 0.0  ;;  %v2356_v15 = vpop.f32.mrb[12].mxu0 }
 0x11d   : > { %v1811_v13 = vmax.f32 %v1747_v8, 0.0  ;;  %v2404_v16 = vpop.f32.mrb[12].mxu1  ;;  %v2357_v17 = vpop.f32.mrb[13].mxu0 }
 0x11e   : > { %v2405_v18 = vpop.f32.mrb[13].mxu1  ;;  %v2240_v19 = vpack.c.bf16 %v1795_v12, %v1794_v9  ;;  %v2358_v21 = vadd.f32 %v2357_v17, %v2356_v15  ;;  %v2359_v23 = vpop.f32.mrb[14].mxu0 }
 0x11f   : > { %v2280_v20 = vpack.c.bf16 %v1811_v13, %v1810_v10  ;;  %v2406_v22 = vadd.f32 %v2405_v18, %v2404_v16  ;;  %v2407_v24 = vpop.f32.mrb[14].mxu1  ;;  %v2360_v25 = vpop.f32.mrb[15].mxu0 }
 0x120   : > { %v2408_v26 = vpop.f32.mrb[15].mxu1  ;;  %2308 = vst [vmem:[%s2862_s9 + $0x10] sm:$0xff] %v2240_v19   ;;  %v1688_v27 = vadd.f32 %v2358_v21, %v2852_v14  ;;  %v2361_v29 = vadd.f32 %v2360_v25, %v2359_v23 }
 0x121   : > { %2316 = vst [vmem:[%s2862_s9 + $0x50] sm:$0xff] %v2280_v20   ;;  %v1752_v28 = vadd.f32 %v2406_v22, %v2852_v14  ;;  %v2409_v30 = vadd.f32 %v2408_v26, %v2407_v24 }
 0x122   : > { %v1691_v31 = vadd.f32 %v2361_v29, %v2852_v14  ;;  %v1796_v33 = vmax.f32 %v1688_v27, 0.0 }
 0x123   : > { %v1755_v32 = vadd.f32 %v2409_v30, %v2852_v14  ;;  %v1812_v34 = vmax.f32 %v1752_v28, 0.0 }
 0x124   : > { %v1797_v35 = vmax.f32 %v1691_v31, 0.0  ;;  %v2362_v37 = vpop.f32.mrb[16].mxu0 }
 0x125   : > { %v1813_v36 = vmax.f32 %v1755_v32, 0.0  ;;  %v2410_v39 = vpop.f32.mrb[16].mxu1  ;;  %v2363_v40 = vpop.f32.mrb[17].mxu0 }
 0x126   : > { %v2411_v41 = vpop.f32.mrb[17].mxu1  ;;  %v2245_v42 = vpack.c.bf16 %v1797_v35, %v1796_v33  ;;  %v2364_v44 = vadd.f32 %v2363_v40, %v2362_v37  ;;  %v2365_v46 = vpop.f32.mrb[18].mxu0 }
 0x127   : > { %v2285_v43 = vpack.c.bf16 %v1813_v36, %v1812_v34  ;;  %v2412_v45 = vadd.f32 %v2411_v41, %v2410_v39  ;;  %v2413_v47 = vpop.f32.mrb[18].mxu1  ;;  %v2366_v48 = vpop.f32.mrb[19].mxu0 }
 0x128   : > { %v2414_v49 = vpop.f32.mrb[19].mxu1  ;;  %2309 = vst [vmem:[%s2862_s9 + $0x18] sm:$0xff] %v2245_v42   ;;  %v1696_v50 = vadd.f32 %v2364_v44, %v2852_v14  ;;  %v2367_v52 = vadd.f32 %v2366_v48, %v2365_v46 }
 0x129   : > { %2317 = vst [vmem:[%s2862_s9 + $0x58] sm:$0xff] %v2285_v43   ;;  %v1760_v51 = vadd.f32 %v2412_v45, %v2852_v14  ;;  %v2415_v53 = vadd.f32 %v2414_v49, %v2413_v47 }
 0x12a   : > { %v1699_v54 = vadd.f32 %v2367_v52, %v2852_v14  ;;  %v1798_v56 = vmax.f32 %v1696_v50, 0.0 }
 0x12b   : > { %v1763_v55 = vadd.f32 %v2415_v53, %v2852_v14  ;;  %v1814_v57 = vmax.f32 %v1760_v51, 0.0 }
 0x12c   : > { %v1799_v58 = vmax.f32 %v1699_v54, 0.0  ;;  %v2368_v60 = vpop.f32.mrb[20].mxu0 }
 0x12d   : > { %v1815_v59 = vmax.f32 %v1763_v55, 0.0  ;;  %v2416_v61 = vpop.f32.mrb[20].mxu1  ;;  %v2369_v62 = vpop.f32.mrb[21].mxu0 }
 0x12e   : > { %v2417_v63 = vpop.f32.mrb[21].mxu1  ;;  %v2250_v0 = vpack.c.bf16 %v1799_v58, %v1798_v56  ;;  %v2370_v11 = vadd.f32 %v2369_v62, %v2368_v60  ;;  %v2371_v4 = vpop.f32.mrb[22].mxu0 }
 0x12f   : > { %v2290_v2 = vpack.c.bf16 %v1815_v59, %v1814_v57  ;;  %v2418_v3 = vadd.f32 %v2417_v63, %v2416_v61  ;;  %v2419_v38 = vpop.f32.mrb[22].mxu1  ;;  %v2372_v5 = vpop.f32.mrb[23].mxu0 }
 0x130   : > { %v2420_v6 = vpop.f32.mrb[23].mxu1  ;;  %2310 = vst [vmem:[%s2862_s9 + $0x20] sm:$0xff] %v2250_v0   ;;  %v1704_v7 = vadd.f32 %v2370_v11, %v2852_v14  ;;  %v2373_v9 = vadd.f32 %v2372_v5, %v2371_v4 }
 0x131   : > { %2318 = vst [vmem:[%s2862_s9 + $0x60] sm:$0xff] %v2290_v2   ;;  %v1768_v8 = vadd.f32 %v2418_v3, %v2852_v14  ;;  %v2421_v10 = vadd.f32 %v2420_v6, %v2419_v38 }
 0x132   : > { %v1707_v12 = vadd.f32 %v2373_v9, %v2852_v14  ;;  %v1800_v15 = vmax.f32 %v1704_v7, 0.0 }
 0x133   : > { %v1771_v13 = vadd.f32 %v2421_v10, %v2852_v14  ;;  %v1816_v16 = vmax.f32 %v1768_v8, 0.0 }
 0x134   : > { %v1801_v17 = vmax.f32 %v1707_v12, 0.0  ;;  %v2374_v19 = vpop.f32.mrb[24].mxu0 }
 0x135   : > { %v1817_v18 = vmax.f32 %v1771_v13, 0.0  ;;  %v2422_v20 = vpop.f32.mrb[24].mxu1  ;;  %v2375_v21 = vpop.f32.mrb[25].mxu0 }
 0x136   : > { %v2423_v22 = vpop.f32.mrb[25].mxu1  ;;  %v2255_v23 = vpack.c.bf16 %v1801_v17, %v1800_v15  ;;  %v2376_v25 = vadd.f32 %v2375_v21, %v2374_v19  ;;  %v2377_v27 = vpop.f32.mrb[26].mxu0 }
 0x137   : > { %v2295_v24 = vpack.c.bf16 %v1817_v18, %v1816_v16  ;;  %v2424_v26 = vadd.f32 %v2423_v22, %v2422_v20  ;;  %v2425_v28 = vpop.f32.mrb[26].mxu1  ;;  %v2378_v29 = vpop.f32.mrb[27].mxu0 }
 0x138   : > { %v2426_v30 = vpop.f32.mrb[27].mxu1  ;;  %2311 = vst [vmem:[%s2862_s9 + $0x28] sm:$0xff] %v2255_v23   ;;  %v1712_v31 = vadd.f32 %v2376_v25, %v2852_v14  ;;  %v2379_v33 = vadd.f32 %v2378_v29, %v2377_v27 }
 0x139   : > { %2319 = vst [vmem:[%s2862_s9 + $0x68] sm:$0xff] %v2295_v24   ;;  %v1776_v32 = vadd.f32 %v2424_v26, %v2852_v14  ;;  %v2427_v34 = vadd.f32 %v2426_v30, %v2425_v28 }
 0x13a   : > { %v1715_v35 = vadd.f32 %v2379_v33, %v2852_v14  ;;  %v1802_v37 = vmax.f32 %v1712_v31, 0.0 }
 0x13b   : > { %v1779_v36 = vadd.f32 %v2427_v34, %v2852_v14  ;;  %v1818_v39 = vmax.f32 %v1776_v32, 0.0 }
 0x13c   : > { %v1803_v40 = vmax.f32 %v1715_v35, 0.0  ;;  %v2380_v42 = vpop.f32.mrb[28].mxu0 }
 0x13d   : > { %v1819_v41 = vmax.f32 %v1779_v36, 0.0  ;;  %v2428_v43 = vpop.f32.mrb[28].mxu1  ;;  %v2381_v44 = vpop.f32.mrb[29].mxu0 }
 0x13e   : > { %v2429_v45 = vpop.f32.mrb[29].mxu1  ;;  %v2260_v46 = vpack.c.bf16 %v1803_v40, %v1802_v37  ;;  %v2382_v48 = vadd.f32 %v2381_v44, %v2380_v42  ;;  %v2383_v50 = vpop.f32.mrb[30].mxu0 }
 0x13f   : > { %v2300_v47 = vpack.c.bf16 %v1819_v41, %v1818_v39  ;;  %v2430_v49 = vadd.f32 %v2429_v45, %v2428_v43  ;;  %v2431_v51 = vpop.f32.mrb[30].mxu1  ;;  %v2384_v52 = vpop.f32.mrb[31].mxu0 }
 0x140   : > { %v2432_v53 = vpop.f32.mrb[31].mxu1  ;;  %2312 = vst [vmem:[%s2862_s9 + $0x30] sm:$0xff] %v2260_v46   ;;  %v1720_v54 = vadd.f32 %v2382_v48, %v2852_v14  ;;  %v2385_v56 = vadd.f32 %v2384_v52, %v2383_v50 }
 0x141   : > { %2320 = vst [vmem:[%s2862_s9 + $0x70] sm:$0xff] %v2300_v47   ;;  %v1784_v55 = vadd.f32 %v2430_v49, %v2852_v14  ;;  %v2433_v57 = vadd.f32 %v2432_v53, %v2431_v51 }
 0x142   : > { %v1723_v58 = vadd.f32 %v2385_v56, %v2852_v14  ;;  %v1804_v60 = vmax.f32 %v1720_v54, 0.0 }
 0x143   : > { %v1787_v59 = vadd.f32 %v2433_v57, %v2852_v14  ;;  %v1820_v61 = vmax.f32 %v1784_v55, 0.0 }
 0x144   : > { %v1805_v62 = vmax.f32 %v1723_v58, 0.0 }
 0x145   : > { %v1821_v63 = vmax.f32 %v1787_v59, 0.0 }
 0x146   : > { %v2265_v0 = vpack.c.bf16 %v1805_v62, %v1804_v60 }
 0x147   : > { %v2305_v2 = vpack.c.bf16 %v1821_v63, %v1820_v61 }
 0x148   : > { %2313 = vst [vmem:[%s2862_s9 + $0x38] sm:$0xff] %v2265_v0  }
 0x149   : > { %2321 = vst [vmem:[%s2862_s9 + $0x78] sm:$0xff] %v2305_v2  }
 0x14a PF: > { %s19_s17 = sadd.s32 1, %s2529_s17  }
 0x14b   : > { %p16_p4 = scmp.ge.s32.totalorder %s19_s17, 4  }
 0x14d   :  { %18 = sbr.rel (!%p16_p4) target bundleno = 3 (0x3), region = 188 }

// kernel: forward.21
= control target key start
LH: loop header
LB: loop body
LE: loop exit
PB: predicated region body
PF: predicated region fallthrough
CT: control target
= control target key end

     0   :  { %s1386_s17 = smov 0   ;;  %s1539_s0 = inlined_call_operand.vmem [shape: bf16[384,128], index: 0, kind: input, shape index: {}]   ;;  %s1540_s1 = inlined_call_operand.vmem [shape: f32[1,128], index: 1, kind: input, shape index: {}]   ;;  %s1541_s2 = inlined_call_operand.vmem [shape: bf16[128,288], index: 2, kind: input, shape index: {}]   ;;  %s1542_s3 = inlined_call_operand.<no memory space> [shape: bf16[], index: 3, kind: input, shape index: {}]   ;;  %s1543_s4 = inlined_call_operand.vmem [shape: bf16[128,128], index: 4, kind: output, shape index: {}]  }
   0x1   :  { %v9_v0 = vstv %s1542_s3 }
   0x2   :  { %v1384_v1 = vunpack.i.l.bf16 %v9_v0 }
   0x3 LB: > { %s1079_s18 = sadd.s32 4294967295, %s1353_s17   ;;  %p1083_p0 = scmp.ge.s32.totalorder %s1353_s17, 1  ;;  %s1353_s17 = sphi %s1386_s17, %s19_s17  }
   0x4   : > { %p145_p1 = scmp.lt.s32.totalorder %s1353_s17, 3 }
   0x6   : > { %p146_p2 = pnand %p1083_p0, %p145_p1 }
   0x8   : > { %149 = sbr.rel (%p146_p2) target bundleno = 298 (0x12a), region = 32 }
   0xf   : > { %v1313_v2 = vld [vmem:[%s1539_s0 + $0x40] sm:$0xff]   ;;  %v1315_v4 = vld [vmem:[%s1539_s0 + $0x48] sm:$0xff]   ;;  %v1318_v7 = vld [vmem:[%s1539_s0 + $0x50] sm:$0xff]   ;;  %s1084_s30 = sshll.u32 %s1079_s18, 3  ;;  %v220_v14 = vlaneseq  ;;  %v1355_v50 = vmov 0.0  }
  0x10   : > { %v1314_v3 = vld [vmem:[%s1539_s0] sm:$0xff]   ;;  %1227 = vmatprep.subr.bf16.mxu0 %v1313_v2  ;;  %v1317_v6 = vld [vmem:[%s1539_s0 + $0x8] sm:$0xff]   ;;  %v1320_v9 = vld [vmem:[%s1539_s0 + $0x10] sm:$0xff]   ;;  %p171_p3 = scmp.lt.s32.totalorder %s1084_s30, 15 }
  0x11   : > { %1228 = vmatpush3.bf16.msra.mxu0 %v1314_v3  ;;  %v1316_v5 = vld [vmem:[%s1539_s0 + $0x80] sm:$0xff]   ;;  %v1319_v8 = vld [vmem:[%s1539_s0 + $0x88] sm:$0xff]   ;;  %v1321_v10 = vld [vmem:[%s1539_s0 + $0x58] sm:$0xff]   ;;  %v221_v18 = vand.u32 127, %v220_v14 }
  0x12   : > { %1229 = vmatprep.subr.bf16.mxu0 %v1315_v4  ;;  %1279 = vmatprep.subr.bf16.mxu1 %v1316_v5  ;;  %v1322_v11 = vld [vmem:[%s1539_s0 + $0x90] sm:$0xff]   ;;  %v1323_v12 = vld [vmem:[%s1539_s0 + $0x18] sm:$0xff]   ;;  %v1324_v13 = vld [vmem:[%s1539_s0 + $0x60] sm:$0xff]   ;;  %s1545_s30 = smov (!%p171_p3, %s1084_s30), 15 }
  0x13   : > { %1280 = vmatpush3.bf16.msra.mxu1 %v1316_v5  ;;  %v1325_v15 = vld [vmem:[%s1539_s0 + $0x98] sm:$0xff]   ;;  %v1326_v16 = vld [vmem:[%s1539_s0 + $0x20] sm:$0xff]   ;;  %v1327_v19 = vld [vmem:[%s1539_s0 + $0x68] sm:$0xff]   ;;  %s1303_s25 = smul.u32 12, %s1545_s30  ;;  %v1451_v22 = vadd.s32 256, %v221_v18  ;;  %s1087_s22 = sshll.u32 %s1545_s30, 2 }
  0x14   : > { %1281 = vmatprep.subr.bf16.mxu1 %v1319_v8  ;;  %v1328_v17 = vld [vmem:[%s1539_s0 + $0xa0] sm:$0xff]   ;;  %v1329_v20 = vld [vmem:[%s1539_s0 + $0x28] sm:$0xff]   ;;  %v1330_v23 = vld [vmem:[%s1539_s0 + $0x70] sm:$0xff]  }
  0x15   : > { %1230 = vmatpush3.bf16.msra.mxu0 %v1317_v6  ;;  %v1331_v21 = vld [vmem:[%s1539_s0 + $0xa8] sm:$0xff]   ;;  %s1459_s9 = scalar_lea.vmem %s1541_s2, %s1303_s25  ;;  %v1332_v24 = vld [vmem:[%s1539_s0 + $0x30] sm:$0xff]   ;;  %vm223_vm0 = vcmp.lt.s32.totalorder %v1451_v22, 288  ;;  %v1333_v29 = vld [vmem:[%s1539_s0 + $0x78] sm:$0xff]   ;;  %s1530_s25 = scalar_lea.vmem %s1543_s4, %s1087_s22 }
  0x16   : > { %1231 = vmatprep.subr.bf16.mxu0 %v1318_v7  ;;  %v1334_v25 = vld [vmem:[%s1539_s0 + $0xb0] sm:$0xff]   ;;  %v183_v26 = vld [vmem:[%s1459_s9] sm:$0xff]   ;;  %v1089_v27 = vld [vmem:[%s1459_s9 + $0x8] sm:$0xff]  }
  0x17   : > { %1282 = vmatpush3.bf16.msra.mxu1 %v1319_v8  ;;  %v1091_v28 = vld [vmem:[%s1459_s9 + $0x10] sm:$0xf]  ;;  %193 = vst [vmem:[#allocation7] sm:$0xff] %v183_v26   ;;  %v218_v30 = vunpack.c.l.bf16 %v1089_v27  ;;  %v1168_v31 = vunpack.c.h.bf16 %v1089_v27  ;;  %v1335_v32 = vld [vmem:[%s1539_s0 + $0x38] sm:$0xff]   ;;  %v1092_v34 = vld [vmem:[%s1459_s9 + $0x14] ss:$24 sps:$4 sm:$0xff]  }
  0x18   : > { %1283 = vmatprep.subr.bf16.mxu1 %v1322_v11  ;;  %254 = vst [vmem:[#allocation7 + $0x10] sm:$0xf] %v1091_v28  ;;  %v1339_v33 = vld [vmem:[%s1539_s0 + $0xb8] sm:$0xff]   ;;  %v1095_v35 = vld [vmem:[%s1459_s9 + $0x20] sm:$0xff]   ;;  %v266_v37 = vunpack.c.l.bf16 %v1092_v34  ;;  %v1097_v41 = vld [vmem:[%s1459_s9 + $0x28] sm:$0xf]  ;;  %v362_v43 = vunpack.c.h.bf16 %v1092_v34 }
  0x19   : > { %1232 = vmatpush3.bf16.msra.mxu0 %v1320_v9  ;;  %v224_v36 = vsel %vm223_vm0, %v218_v30, %v1384_v1  ;;  %v314_v38 = vunpack.c.l.bf16 %v1095_v35  ;;  %v1178_v39 = vunpack.c.h.bf16 %v1095_v35  ;;  %v1486_v40 = vld [vmem:[%s1459_s9 + $0x18] sm:$0xff]   ;;  %350 = vst [vmem:[#allocation7 + $0x28] sm:$0xf] %v1097_v41  ;;  %v1490_v44 = vld [vmem:[%s1459_s9 + $0x30] sm:$0xff]   ;;  %v1103_v48 = vld [vmem:[%s1459_s9 + $0x40] sm:$0xf] }
  0x1a   : > { %1233 = vmatprep.subr.bf16.mxu0 %v1321_v10  ;;  %v1169_v42 = vpack.c.bf16 %v1168_v31, %v224_v36  ;;  %v272_v45 = vsel %vm223_vm0, %v266_v37, %v1384_v1  ;;  %v1101_v47 = vld [vmem:[%s1459_s9 + $0x38] sm:$0xff]   ;;  %v368_v53 = vsel %vm223_vm0, %v362_v43, %v1384_v1  ;;  %446 = vst [vmem:[#allocation7 + $0x40] sm:$0xf] %v1103_v48  ;;  %v1107_v55 = vld [vmem:[%s1459_s9 + $0x50] sm:$0xff]   ;;  %v1346_v60 = vld [vmem:[%s1459_s9 + $0x48] sm:$0xff]  }
  0x1b   : > { %1284 = vmatpush3.bf16.msra.mxu1 %v1322_v11  ;;  %v320_v46 = vsel %vm223_vm0, %v314_v38, %v1384_v1  ;;  %v1104_v49 = vld [vmem:[%s1459_s9 + $0x44] ss:$24 sps:$4 sm:$0xff]   ;;  %v274_v51 = vpack.c.bf16 %v1355_v50, %v272_v45  ;;  %v410_v54 = vunpack.c.l.bf16 %v1101_v47  ;;  %v370_v56 = vpack.c.bf16 %v1355_v50, %v368_v53  ;;  %v1109_v61 = vld [vmem:[%s1459_s9 + $0x58] sm:$0xf]  ;;  %v1111_v26 = vld [vmem:[%s1540_s1] ss:$0 sm:$0xff] }
  0x1c   : > { %1285 = vmatprep.subr.bf16.mxu1 %v1325_v15  ;;  %1170 = vst [vmem:[#allocation7 + $0x8] sm:$0xff] %v1169_v42   ;;  %v1179_v52 = vpack.c.bf16 %v1178_v39, %v320_v46  ;;  %v1188_v57 = vunpack.c.h.bf16 %v1101_v47  ;;  %v458_v58 = vunpack.c.l.bf16 %v1104_v49  ;;  %v506_v59 = vunpack.c.l.bf16 %v1107_v55  ;;  %542 = vst [vmem:[#allocation7 + $0x58] sm:$0xf] %v1109_v61 }
  0x1d   : > { %1234 = vmatpush3.bf16.msra.mxu0 %v1323_v12  ;;  %276 = vst [vmem:[#allocation7 + $0x14] sm:$0xf] %v274_v51  ;;  %v416_v62 = vsel %vm223_vm0, %v410_v54, %v1384_v1  ;;  %v1198_v63 = vunpack.c.h.bf16 %v1107_v55  ;;  %v554_v0 = vunpack.c.h.bf16 %v1104_v49  ;;  %372 = vst [vmem:[#allocation7 + $0x2c] sm:$0xf] %v370_v56 }
  0x1e   : > { %1235 = vmatprep.subr.bf16.mxu0 %v1324_v13  ;;  %1180 = vst [vmem:[#allocation7 + $0x20] sm:$0xff] %v1179_v52   ;;  %v1189_v2 = vpack.c.bf16 %v1188_v57, %v416_v62  ;;  %v464_v3 = vsel %vm223_vm0, %v458_v58, %v1384_v1  ;;  %v512_v4 = vsel %vm223_vm0, %v506_v59, %v1384_v1 }
  0x1f   : > { %1286 = vmatpush3.bf16.msra.mxu1 %v1325_v15  ;;  %v466_v5 = vpack.c.bf16 %v1355_v50, %v464_v3  ;;  %v1199_v6 = vpack.c.bf16 %v1198_v63, %v512_v4  ;;  %v560_v7 = vsel %vm223_vm0, %v554_v0, %v1384_v1  ;;  %v1338_v10 = vld [vmem:[#allocation7 + $0x4] ss:$12 sps:$4 sm:$0xff]  }
  0x20   : > { %1287 = vmatprep.subr.bf16.mxu1 %v1328_v17  ;;  %1190 = vst [vmem:[#allocation7 + $0x38] sm:$0xff] %v1189_v2   ;;  %v562_v8 = vpack.c.bf16 %v1355_v50, %v560_v7  ;;  %877 = vmatprep.mubr.bf16.mxu0 %v1338_v10 }
  0x21   : > { %1236 = vmatpush3.bf16.msra.mxu0 %v1326_v16  ;;  %468 = vst [vmem:[#allocation7 + $0x44] sm:$0xf] %v466_v5  ;;  %1200 = vst [vmem:[#allocation7 + $0x50] sm:$0xff] %v1199_v6  }
  0x22   : > { %1237 = vmatprep.subr.bf16.mxu0 %v1327_v19  ;;  %564 = vst [vmem:[#allocation7 + $0x5c] sm:$0xf] %v562_v8 }
  0x23   : > { %1288 = vmatpush3.bf16.msra.mxu1 %v1328_v17  ;;  %v1336_v9 = vld [vmem:[#allocation7] ss:$12 sps:$4 sm:$0xff]  }
  0x24   : > { %1289 = vmatprep.subr.bf16.mxu1 %v1331_v21  ;;  %v1340_v11 = vld [vmem:[#allocation7 + $0x8] ss:$12 sps:$4 sm:$0xff]  }
  0x25   : > { %1238 = vmatpush3.bf16.msra.mxu0 %v1329_v20  ;;  %v1341_v12 = vld [vmem:[#allocation7 + $0x20] ss:$12 sps:$4 sm:$0xff]   ;;  %v572_v13 = vld [vmem:[#allocation7 + $0x24] sm:$0xff]  ;;  %1295 = vmatprep.mubr.bf16.mxu1 %v1340_v11 }
  0x26   : > { %1239 = vmatprep.subr.bf16.mxu0 %v1330_v23  ;;  %v1116_v14 = vcombine.high %v1486_v40, %v572_v13  ;;  %v1115_v17 = vcombine.low %v1486_v40, %v572_v13 }
  0x27   : > { %1290 = vmatpush3.bf16.msra.mxu1 %v1331_v21  ;;  %v576_v15 = vld [vmem:[#allocation7 + $0x3c] sm:$0xff] }
  0x28   : > { %1291 = vmatprep.subr.bf16.mxu1 %v1334_v25  ;;  %v1344_v16 = vld [vmem:[#allocation7 + $0x38] ss:$12 sps:$4 sm:$0xff]   ;;  %v1119_v18 = vcombine.high %v1490_v44, %v576_v15  ;;  %v1118_v21 = vcombine.low %v1490_v44, %v576_v15 }
  0x29   : > { %1240 = vmatpush3.bf16.msra.mxu0 %v1332_v24  ;;  %v1345_v19 = vld [vmem:[#allocation7 + $0x50] ss:$12 sps:$4 sm:$0xff]   ;;  %v580_v20 = vld [vmem:[#allocation7 + $0x54] sm:$0xff] }
  0x2a   : > { %1241 = vmatprep.subr.bf16.mxu0 %v1333_v29  ;;  %v1122_v22 = vcombine.high %v1346_v60, %v580_v20  ;;  %v1121_v23 = vcombine.low %v1346_v60, %v580_v20 }
  0x2b   : > { %1292 = vmatpush3.bf16.msra.mxu1 %v1334_v25 }
  0x2c   : > { %1293 = vmatprep.subr.bf16.mxu1 %v1339_v33 }
  0x2d   : > { %1242 = vmatpush3.bf16.msra.mxu0 %v1335_v32 }
  0x2f   : > { %1294 = vmatpush3.bf16.msra.mxu1 %v1339_v33 }
  0x30   : > { %878 = vmatmul.mubr.bf16.vlgmr.msra.gmra.mrb[0].mxu0 %v1336_v9 }
  0x31   : > { %885 = vmatprep.mubr.bf16.mxu0 %v1116_v14 }
  0x32   : > { %1296 = vmatmul.mubr.bf16.vlgmr.msra.gmra.mrb[0].mxu1 %v1341_v12 }
  0x33   : > { %1299 = vmatprep.mubr.bf16.mxu1 %v1344_v16 }
  0x38   : > { %886 = vmatmul.mubr.bf16.gmra.mrb[4].mxu0 %v1115_v17 }
  0x39   : > { %893 = vmatprep.mubr.bf16.mxu0 %v1119_v18 }
  0x3a   : > { %1300 = vmatmul.mubr.bf16.gmra.mrb[4].mxu1 %v1345_v19 }
  0x40   : > { %894 = vmatmul.mubr.bf16.gmra.mrb[8].mxu0 %v1118_v21 }
  0x41   : > { %901 = vmatprep.mubr.bf16.mxu0 %v1122_v22 }
  0x48   : > { %902 = vmatmul.mubr.bf16.gmra.mrb[12].mxu0 %v1121_v23 }
 0x103   : > { %v1243_v24 = vpop.f32.mrb[0].mxu0 }
 0x104   : > { %v1244_v25 = vpop.f32.mrb[1].mxu0 }
 0x105   : > { %v1245_v27 = vadd.f32 %v1244_v25, %v1243_v24  ;;  %v1246_v28 = vpop.f32.mrb[2].mxu0  ;;  %v1297_v29 = vpop.f32.mrb[0].mxu1 }
 0x106   : > { %v1247_v30 = vpop.f32.mrb[3].mxu0  ;;  %v944_v31 = vpop.f32.mrb[1].mxu1 }
 0x107   : > { %v1248_v32 = vadd.f32 %v1247_v30, %v1246_v28  ;;  %v880_v33 = vadd.f32 %v1245_v27, %v1111_v26  ;;  %v1298_v34 = vpop.f32.mrb[2].mxu1 }
 0x108   : > { %v947_v35 = vpop.f32.mrb[3].mxu1 }
 0x109   : > { %v945_v36 = vadd.f32 %v944_v31, %v880_v33  ;;  %v883_v37 = vadd.f32 %v1248_v32, %v1111_v26 }
 0x10b   : > { %v948_v38 = vadd.f32 %v947_v35, %v883_v37  ;;  %v1249_v39 = vpop.f32.mrb[4].mxu0  ;;  %v975_v41 = vmax.f32 %v945_v36, 0.0 }
 0x10c   : > { %v1250_v40 = vpop.f32.mrb[5].mxu0 }
 0x10d   : > { %v976_v42 = vmax.f32 %v948_v38, 0.0  ;;  %v1251_v43 = vadd.f32 %v1250_v40, %v1249_v39  ;;  %v1252_v44 = vpop.f32.mrb[6].mxu0  ;;  %v1301_v45 = vpop.f32.mrb[4].mxu1 }
 0x10e   : > { %v1253_v46 = vpop.f32.mrb[7].mxu0  ;;  %v960_v47 = vpop.f32.mrb[5].mxu1 }
 0x10f   : > { %v1204_v48 = vpack.c.bf16 %v976_v42, %v975_v41  ;;  %v888_v49 = vadd.f32 %v1251_v43, %v1111_v26  ;;  %v1254_v50 = vadd.f32 %v1253_v46, %v1252_v44  ;;  %v1302_v51 = vpop.f32.mrb[6].mxu1 }
 0x110   : > { %v963_v52 = vpop.f32.mrb[7].mxu1 }
 0x111   : > { %1205 = vst [vmem:[%s1530_s25] sm:$0xff] %v1204_v48   ;;  %v953_v53 = vadd.f32 %v1297_v29, %v888_v49  ;;  %v891_v54 = vadd.f32 %v1254_v50, %v1111_v26 }
 0x113   : > { %v956_v55 = vadd.f32 %v1298_v34, %v891_v54  ;;  %v1255_v56 = vpop.f32.mrb[8].mxu0  ;;  %v977_v58 = vmax.f32 %v953_v53, 0.0 }
 0x114   : > { %v1256_v57 = vpop.f32.mrb[9].mxu0 }
 0x115   : > { %v978_v59 = vmax.f32 %v956_v55, 0.0  ;;  %v1257_v60 = vadd.f32 %v1256_v57, %v1255_v56  ;;  %v1258_v61 = vpop.f32.mrb[10].mxu0 }
 0x116   : > { %v1259_v62 = vpop.f32.mrb[11].mxu0 }
 0x117   : > { %v1209_v63 = vpack.c.bf16 %v978_v59, %v977_v58  ;;  %v1260_v0 = vadd.f32 %v1259_v62, %v1258_v61  ;;  %v896_v2 = vadd.f32 %v1257_v60, %v1111_v26 }
 0x119   : > { %1224 = vst [vmem:[%s1530_s25 + $0x8] sm:$0xff] %v1209_v63   ;;  %v961_v3 = vadd.f32 %v960_v47, %v896_v2  ;;  %v899_v4 = vadd.f32 %v1260_v0, %v1111_v26 }
 0x11b   : > { %v964_v5 = vadd.f32 %v963_v52, %v899_v4  ;;  %v1261_v6 = vpop.f32.mrb[12].mxu0  ;;  %v979_v8 = vmax.f32 %v961_v3, 0.0 }
 0x11c   : > { %v1262_v7 = vpop.f32.mrb[13].mxu0 }
 0x11d   : > { %v980_v9 = vmax.f32 %v964_v5, 0.0  ;;  %v1263_v10 = vadd.f32 %v1262_v7, %v1261_v6  ;;  %v1264_v11 = vpop.f32.mrb[14].mxu0 }
 0x11e   : > { %v1265_v12 = vpop.f32.mrb[15].mxu0 }
 0x11f   : > { %v1214_v13 = vpack.c.bf16 %v980_v9, %v979_v8  ;;  %v904_v14 = vadd.f32 %v1263_v10, %v1111_v26  ;;  %v1266_v15 = vadd.f32 %v1265_v12, %v1264_v11 }
 0x121   : > { %1225 = vst [vmem:[%s1530_s25 + $0x10] sm:$0xff] %v1214_v13   ;;  %v969_v16 = vadd.f32 %v1301_v45, %v904_v14  ;;  %v907_v17 = vadd.f32 %v1266_v15, %v1111_v26 }
 0x123   : > { %v972_v18 = vadd.f32 %v1302_v51, %v907_v17  ;;  %v981_v19 = vmax.f32 %v969_v16, 0.0 }
 0x125   : > { %v982_v20 = vmax.f32 %v972_v18, 0.0 }
 0x127   : > { %v1219_v21 = vpack.c.bf16 %v982_v20, %v981_v19 }
 0x129   : > { %1226 = vst [vmem:[%s1530_s25 + $0x18] sm:$0xff] %v1219_v21  }
 0x12a PF: > { %s19_s17 = sadd.s32 1, %s1353_s17  }
 0x12b   : > { %p16_p4 = scmp.ge.s32.totalorder %s19_s17, 4  }
 0x12d   :  { %18 = sbr.rel (!%p16_p4) target bundleno = 3 (0x3), region = 108 }

// kernel: forward.22
= control target key start
LH: loop header
LB: loop body
LE: loop exit
PB: predicated region body
PF: predicated region fallthrough
CT: control target
= control target key end

     0   :  { %s1348_s0 = inlined_call_operand.vmem [shape: bf16[640,128], index: 0, kind: input, shape index: {}]   ;;  %s1349_s1 = inlined_call_operand.vmem [shape: f32[1,128], index: 1, kind: input, shape index: {}]   ;;  %s1350_s2 = inlined_call_operand.vmem [shape: bf16[32,576], index: 2, kind: input, shape index: {}]   ;;  %s1351_s3 = inlined_call_operand.<no memory space> [shape: bf16[], index: 3, kind: input, shape index: {}]   ;;  %s1352_s4 = inlined_call_operand.vmem [shape: bf16[32,128], index: 4, kind: output, shape index: {}]  }
   0x1   :  { %v9_v0 = vstv %s1351_s3 }
   0x2   :  { %v1176_v1 = vunpack.i.l.bf16 %v9_v0 }
   0x3   :  { %v1097_v2 = vld [vmem:[%s1348_s0 + $0x40] sm:$0xff]   ;;  %v1101_v6 = vld [vmem:[%s1348_s0 + $0x48] sm:$0xff]   ;;  %v1105_v10 = vld [vmem:[%s1348_s0 + $0x50] sm:$0xff]   ;;  %v83_v22 = vlaneseq }
   0x4   :  { %v1098_v3 = vld [vmem:[%s1348_s0] sm:$0xff]   ;;  %1010 = vmatprep.subr.bf16.mxu0 %v1097_v2  ;;  %v1102_v7 = vld [vmem:[%s1348_s0 + $0x8] sm:$0xff]   ;;  %v1106_v11 = vld [vmem:[%s1348_s0 + $0x10] sm:$0xff]  }
   0x5   :  { %v1099_v4 = vld [vmem:[%s1348_s0 + $0xc0] sm:$0xff]   ;;  %1011 = vmatpush3.bf16.msra.mxu0 %v1098_v3  ;;  %v1103_v8 = vld [vmem:[%s1348_s0 + $0xc8] sm:$0xff]   ;;  %v1107_v12 = vld [vmem:[%s1348_s0 + $0xd0] sm:$0xff]   ;;  %v84_v27 = vand.u32 127, %v83_v22 }
   0x6   :  { %v1100_v5 = vld [vmem:[%s1348_s0 + $0x80] sm:$0xff]   ;;  %1038 = vmatprep.subr.bf16.mxu1 %v1099_v4  ;;  %1012 = vmatprep.subr.bf16.mxu0 %v1101_v6  ;;  %v1104_v9 = vld [vmem:[%s1348_s0 + $0x88] sm:$0xff]   ;;  %v1108_v13 = vld [vmem:[%s1348_s0 + $0x90] sm:$0xff]  }
   0x7   :  { %1039 = vmatpush3.bf16.msra.mxu1 %v1100_v5  ;;  %v1109_v14 = vld [vmem:[%s1348_s0 + $0x58] sm:$0xff]   ;;  %v1113_v18 = vld [vmem:[%s1348_s0 + $0x60] sm:$0xff]   ;;  %v1117_v23 = vld [vmem:[%s1348_s0 + $0x68] sm:$0xff]   ;;  %v85_v32 = vadd.s32 512, %v84_v27  ;;  %v1147_v5 = vmov 0.0  }
   0x8   :  { %1040 = vmatprep.subr.bf16.mxu1 %v1103_v8  ;;  %v1110_v15 = vld [vmem:[%s1348_s0 + $0x18] sm:$0xff]   ;;  %v1114_v19 = vld [vmem:[%s1348_s0 + $0x20] sm:$0xff]   ;;  %v1118_v24 = vld [vmem:[%s1348_s0 + $0x28] sm:$0xff]  }
   0x9   :  { %1013 = vmatpush3.bf16.msra.mxu0 %v1102_v7  ;;  %v1111_v16 = vld [vmem:[%s1348_s0 + $0xd8] sm:$0xff]   ;;  %v1115_v20 = vld [vmem:[%s1348_s0 + $0xe0] sm:$0xff]   ;;  %v1119_v25 = vld [vmem:[%s1348_s0 + $0xe8] sm:$0xff]   ;;  %vm86_vm0 = vcmp.lt.s32.totalorder %v85_v32, 576 }
   0xa   :  { %1014 = vmatprep.subr.bf16.mxu0 %v1105_v10  ;;  %v1112_v17 = vld [vmem:[%s1348_s0 + $0x98] sm:$0xff]   ;;  %v1116_v21 = vld [vmem:[%s1348_s0 + $0xa0] sm:$0xff]   ;;  %v1120_v26 = vld [vmem:[%s1348_s0 + $0xa8] sm:$0xff]  }
   0xb   :  { %1041 = vmatpush3.bf16.msra.mxu1 %v1104_v9  ;;  %v1121_v28 = vld [vmem:[%s1348_s0 + $0x70] sm:$0xff]   ;;  %v1125_v33 = vld [vmem:[%s1348_s0 + $0x78] sm:$0xff]   ;;  %v20_v36 = vld [vmem:[%s1350_s2] sm:$0xff]  }
   0xc   :  { %1042 = vmatprep.subr.bf16.mxu1 %v1107_v12  ;;  %v1122_v29 = vld [vmem:[%s1348_s0 + $0x30] sm:$0xff]   ;;  %v1126_v34 = vld [vmem:[%s1348_s0 + $0x38] sm:$0xff]   ;;  %30 = vst [vmem:[#allocation7] sm:$0xff] %v20_v36   ;;  %v1133_v43 = vld [vmem:[%s1348_s0 + $0x100] sm:$0xff]  }
   0xd   :  { %1015 = vmatpush3.bf16.msra.mxu0 %v1106_v11  ;;  %v1123_v30 = vld [vmem:[%s1348_s0 + $0xf0] sm:$0xff]   ;;  %v1127_v35 = vld [vmem:[%s1348_s0 + $0xf8] sm:$0xff]   ;;  %v1134_v45 = vld [vmem:[%s1350_s2 + $0x8] sm:$0xff]  }
   0xe   :  { %1016 = vmatprep.subr.bf16.mxu0 %v1109_v14  ;;  %v1124_v31 = vld [vmem:[%s1348_s0 + $0xb0] sm:$0xff]   ;;  %v1128_v40 = vld [vmem:[%s1350_s2 + $0x18] sm:$0xff]   ;;  %v888_v46 = vld [vmem:[%s1350_s2 + $0x20] sm:$0xf] }
   0xf   :  { %1043 = vmatpush3.bf16.msra.mxu1 %v1108_v13  ;;  %v884_v37 = vld [vmem:[%s1350_s2 + $0x10] sm:$0xff]   ;;  %v1132_v41 = vld [vmem:[%s1348_s0 + $0xb8] sm:$0xff]   ;;  %973 = vst [vmem:[#allocation7 + $0x18] sm:$0xff] %v1128_v40   ;;  %143 = vst [vmem:[#allocation7 + $0x20] sm:$0xf] %v888_v46 }
  0x10   :  { %1044 = vmatprep.subr.bf16.mxu1 %v1111_v16  ;;  %v81_v38 = vunpack.c.l.bf16 %v884_v37  ;;  %v966_v39 = vunpack.c.h.bf16 %v884_v37  ;;  %v1139_v47 = vld [vmem:[%s1350_s2 + $0x28] sm:$0xff]   ;;  %v894_v48 = vld [vmem:[%s1350_s2 + $0x38] sm:$0xff]   ;;  %v1140_v51 = vld [vmem:[%s1350_s2 + $0x40] sm:$0xff]  }
  0x11   :  { %1017 = vmatpush3.bf16.msra.mxu0 %v1110_v15  ;;  %v229_v49 = vunpack.c.l.bf16 %v894_v48  ;;  %v986_v50 = vunpack.c.h.bf16 %v894_v48  ;;  %v1135_v53 = vld [vmem:[%s1348_s0 + $0x108] sm:$0xff]   ;;  %993 = vst [vmem:[#allocation7 + $0x40] sm:$0xff] %v1140_v51   ;;  %v1142_v60 = vld [vmem:[%s1350_s2 + $0x30] sm:$0xff]   ;;  %v1137_v8 = vld [vmem:[%s1348_s0 + $0x118] sm:$0xff]  }
  0x12   :  { %1018 = vmatprep.subr.bf16.mxu0 %v1113_v18  ;;  %v87_v42 = vsel %vm86_vm0, %v81_v38, %v1176_v1  ;;  %v898_v61 = vld [vmem:[%s1350_s2 + $0x48] sm:$0xf]  ;;  %v889_v62 = vld [vmem:[%s1350_s2 + $0x24] ss:$40 sps:$4 sm:$0xff]   ;;  %v1136_v63 = vld [vmem:[%s1348_s0 + $0x110] sm:$0xff]  }
  0x13   :  { %1045 = vmatpush3.bf16.msra.mxu1 %v1112_v17  ;;  %v967_v44 = vpack.c.bf16 %v966_v39, %v87_v42  ;;  %v235_v58 = vsel %vm86_vm0, %v229_v49, %v1176_v1  ;;  %291 = vst [vmem:[#allocation7 + $0x48] sm:$0xf] %v898_v61  ;;  %v155_v0 = vunpack.c.l.bf16 %v889_v62  ;;  %v303_v2 = vunpack.c.h.bf16 %v889_v62  ;;  %v1141_v15 = vld [vmem:[%s1348_s0 + $0x128] sm:$0xff]   ;;  %v1143_v17 = vld [vmem:[%s1348_s0 + $0x130] sm:$0xff]   ;;  %v1144_v18 = vld [vmem:[%s1348_s0 + $0x138] sm:$0xff]  }
  0x14   :  { %1046 = vmatprep.subr.bf16.mxu1 %v1115_v20  ;;  %v987_v59 = vpack.c.bf16 %v986_v50, %v235_v58  ;;  %v900_v22 = vld [vmem:[%s1349_s1] ss:$0 sm:$0xff] }
  0x15   :  { %1019 = vmatpush3.bf16.msra.mxu0 %v1114_v19  ;;  %968 = vst [vmem:[#allocation7 + $0x10] sm:$0xff] %v967_v44   ;;  %v161_v3 = vsel %vm86_vm0, %v155_v0, %v1176_v1  ;;  %v309_v4 = vsel %vm86_vm0, %v303_v2, %v1176_v1  ;;  %v1138_v1 = vld [vmem:[%s1348_s0 + $0x120] sm:$0xff]  }
  0x16   :  { %1020 = vmatprep.subr.bf16.mxu0 %v1117_v23  ;;  %v319_v52 = vld [vmem:[#allocation7 + $0x1c] sm:$0xff]  ;;  %v1131_v55 = vld [vmem:[#allocation7 + $0x4] ss:$20 sps:$4 sm:$0xff]   ;;  %988 = vst [vmem:[#allocation7 + $0x38] sm:$0xff] %v987_v59   ;;  %v163_v6 = vpack.c.bf16 %v1147_v5, %v161_v3  ;;  %v311_v7 = vpack.c.bf16 %v1147_v5, %v309_v4 }
  0x17   :  { %1047 = vmatpush3.bf16.msra.mxu1 %v1116_v21  ;;  %v903_v56 = vcombine.low %v1134_v45, %v319_v52  ;;  %v904_v57 = vcombine.high %v1134_v45, %v319_v52  ;;  %738 = vmatprep.mubr.bf16.mxu0 %v1131_v55 }
  0x18   :  { %1048 = vmatprep.subr.bf16.mxu1 %v1119_v25  ;;  %165 = vst [vmem:[#allocation7 + $0x24] sm:$0xf] %v163_v6  ;;  %313 = vst [vmem:[#allocation7 + $0x4c] sm:$0xf] %v311_v7 }
  0x19   :  { %1021 = vmatpush3.bf16.msra.mxu0 %v1118_v24  ;;  %787 = vmatprep.mubr.bf16.mxu1 %v904_v57 }
  0x1a   :  { %1022 = vmatprep.subr.bf16.mxu0 %v1121_v28  ;;  %v325_v10 = vld [vmem:[#allocation7 + $0x44] sm:$0xff] }
  0x1b   :  { %1049 = vmatpush3.bf16.msra.mxu1 %v1120_v26  ;;  %v909_v13 = vcombine.high %v1142_v60, %v325_v10  ;;  %v908_v14 = vcombine.low %v1142_v60, %v325_v10 }
  0x1c   :  { %1050 = vmatprep.subr.bf16.mxu1 %v1123_v30  ;;  %v1129_v54 = vld [vmem:[#allocation7] ss:$20 sps:$4 sm:$0xff]  }
  0x1d   :  { %1023 = vmatpush3.bf16.msra.mxu0 %v1122_v29  ;;  %v324_v9 = vld [vmem:[#allocation7 + $0x3c] sm:$0xff] }
  0x1e   :  { %1024 = vmatprep.subr.bf16.mxu0 %v1125_v33  ;;  %v907_v11 = vcombine.high %v1139_v47, %v324_v9  ;;  %v906_v12 = vcombine.low %v1139_v47, %v324_v9 }
  0x1f   :  { %1051 = vmatpush3.bf16.msra.mxu1 %v1124_v31  ;;  %v1145_v16 = vld [vmem:[#allocation7 + $0x10] ss:$20 sps:$4 sm:$0xff]   ;;  %v1146_v19 = vld [vmem:[#allocation7 + $0x38] ss:$20 sps:$4 sm:$0xff]  }
  0x20   :  { %1052 = vmatprep.subr.bf16.mxu1 %v1127_v35 }
  0x21   :  { %1025 = vmatpush3.bf16.msra.mxu0 %v1126_v34 }
  0x22   :  { %1076 = vmatprep.subr.bf16.mxu0 %v1133_v43 }
  0x23   :  { %1053 = vmatpush3.bf16.msra.mxu1 %v1132_v41 }
  0x24   :  { %739 = vmatmul.mubr.bf16.vlgmr.msra.gmra.mrb[0].mxu0 %v1129_v54 }
  0x25   :  { %1077 = vmatpush3.bf16.msra.mxu0 %v1133_v43  ;;  %746 = vmatprep.mubr.bf16.mxu0 %v907_v11 }
  0x26   :  { %788 = vmatmul.mubr.bf16.vlgmr.msra.gmra.mrb[0].mxu1 %v903_v56  ;;  %1078 = vmatprep.subr.bf16.mxu0 %v1135_v53 }
  0x27   :  { %795 = vmatprep.mubr.bf16.mxu1 %v909_v13 }
  0x29   :  { %1079 = vmatpush3.bf16.msra.mxu0 %v1135_v53 }
  0x2a   :  { %1080 = vmatprep.subr.bf16.mxu0 %v1136_v63 }
  0x2c   :  { %747 = vmatmul.mubr.bf16.gmra.mrb[4].mxu0 %v906_v12 }
  0x2d   :  { %1081 = vmatpush3.bf16.msra.mxu0 %v1136_v63  ;;  %1092 = vmatprep.mubr.bf16.mxu0 %v1145_v16 }
  0x2e   :  { %1082 = vmatprep.subr.bf16.mxu0 %v1137_v8  ;;  %796 = vmatmul.mubr.bf16.gmra.mrb[4].mxu1 %v908_v14 }
  0x31   :  { %1083 = vmatpush3.bf16.msra.mxu0 %v1137_v8 }
  0x32   :  { %1084 = vmatprep.subr.bf16.mxu0 %v1138_v1 }
  0x35   :  { %1085 = vmatpush3.bf16.msra.mxu0 %v1138_v1 }
  0x36   :  { %1086 = vmatprep.subr.bf16.mxu0 %v1141_v15 }
  0x39   :  { %1087 = vmatpush3.bf16.msra.mxu0 %v1141_v15 }
  0x3a   :  { %1088 = vmatprep.subr.bf16.mxu0 %v1143_v17 }
  0x3d   :  { %1089 = vmatpush3.bf16.msra.mxu0 %v1143_v17 }
  0x3e   :  { %1090 = vmatprep.subr.bf16.mxu0 %v1144_v18 }
  0x41   :  { %1091 = vmatpush3.bf16.msra.mxu0 %v1144_v18 }
  0x44   :  { %1093 = vmatmul.mubr.bf16.vlgmr.msra.gmra.mrb[8].mxu0 %v1146_v19 }
  0xf7   :  { %v1026_v20 = vpop.f32.mrb[0].mxu0 }
  0xf8   :  { %v1027_v23 = vpop.f32.mrb[1].mxu0 }
  0xf9   :  { %v1054_v21 = vpop.f32.mrb[0].mxu1  ;;  %v1028_v25 = vadd.f32 %v1027_v23, %v1026_v20  ;;  %v1029_v26 = vpop.f32.mrb[2].mxu0 }
  0xfa   :  { %v1055_v24 = vpop.f32.mrb[1].mxu1  ;;  %v1030_v29 = vpop.f32.mrb[3].mxu0 }
  0xfb   :  { %v1056_v27 = vadd.f32 %v1055_v24, %v1054_v21  ;;  %v1057_v28 = vpop.f32.mrb[2].mxu1  ;;  %v741_v31 = vadd.f32 %v1028_v25, %v900_v22  ;;  %v1031_v32 = vadd.f32 %v1030_v29, %v1029_v26 }
  0xfc   :  { %v1058_v30 = vpop.f32.mrb[3].mxu1 }
  0xfd   :  { %v1059_v33 = vadd.f32 %v1058_v30, %v1057_v28  ;;  %v744_v34 = vadd.f32 %v1031_v32, %v900_v22  ;;  %v790_v35 = vadd.f32 %v1056_v27, %v741_v31 }
  0xff   :  { %v793_v36 = vadd.f32 %v1059_v33, %v744_v34  ;;  %v1032_v37 = vpop.f32.mrb[4].mxu0 }
 0x100   :  { %v1033_v38 = vpop.f32.mrb[5].mxu0 }
 0x101   :  { %v1060_v39 = vpop.f32.mrb[4].mxu1  ;;  %v1034_v40 = vadd.f32 %v1033_v38, %v1032_v37  ;;  %v1035_v41 = vpop.f32.mrb[6].mxu0 }
 0x102   :  { %v1061_v42 = vpop.f32.mrb[5].mxu1  ;;  %v1036_v43 = vpop.f32.mrb[7].mxu0 }
 0x103   :  { %v1062_v44 = vadd.f32 %v1061_v42, %v1060_v39  ;;  %v1063_v45 = vpop.f32.mrb[6].mxu1  ;;  %v749_v46 = vadd.f32 %v1034_v40, %v900_v22  ;;  %v1037_v47 = vadd.f32 %v1036_v43, %v1035_v41 }
 0x104   :  { %v1064_v48 = vpop.f32.mrb[7].mxu1 }
 0x105   :  { %v1065_v49 = vadd.f32 %v1064_v48, %v1063_v45  ;;  %v752_v50 = vadd.f32 %v1037_v47, %v900_v22  ;;  %v798_v51 = vadd.f32 %v1062_v44, %v749_v46 }
 0x107   :  { %v801_v52 = vadd.f32 %v1065_v49, %v752_v50 }
 0x117   :  { %v1094_v53 = vpop.f32.mrb[8].mxu0 }
 0x118   :  { %v847_v54 = vadd.f32 %v1094_v53, %v798_v51  ;;  %v838_v55 = vpop.f32.mrb[9].mxu0 }
 0x119   :  { %v839_v56 = vadd.f32 %v838_v55, %v790_v35  ;;  %v1095_v57 = vpop.f32.mrb[10].mxu0 }
 0x11a   :  { %v850_v58 = vadd.f32 %v1095_v57, %v801_v52  ;;  %v841_v59 = vpop.f32.mrb[11].mxu0  ;;  %v855_v61 = vmax.f32 %v847_v54, 0.0 }
 0x11b   :  { %v842_v60 = vadd.f32 %v841_v59, %v793_v36  ;;  %v853_v63 = vmax.f32 %v839_v56, 0.0 }
 0x11c   :  { %v856_v62 = vmax.f32 %v850_v58, 0.0 }
 0x11d   :  { %v854_v0 = vmax.f32 %v842_v60, 0.0 }
 0x11e   :  { %v1002_v2 = vpack.c.bf16 %v856_v62, %v855_v61 }
 0x11f   :  { %v997_v3 = vpack.c.bf16 %v854_v0, %v853_v63 }
 0x120   :  { %1009 = vst [vmem:[%s1352_s4 + $0x8] sm:$0xff] %v1002_v2  }
 0x121   :  { %998 = vst [vmem:[%s1352_s4] sm:$0xff] %v997_v3  }

// kernel: forward.16
= control target key start
LH: loop header
LB: loop body
LE: loop exit
PB: predicated region body
PF: predicated region fallthrough
CT: control target
= control target key end

     0   :  { %s934_s0 = inlined_call_operand.vmem [shape: s32[6], index: 0, kind: input, shape index: {}]   ;;  %s935_s1 = inlined_call_operand.vmem [shape: bf16[768,128], index: 1, kind: input, shape index: {}]   ;;  %s936_s2 = inlined_call_operand.vmem [shape: bf16[3,128,128], index: 2, kind: input, shape index: {}]   ;;  %s937_s3 = inlined_call_operand.vmem [shape: f32[3,1,128], index: 3, kind: input, shape index: {}]   ;;  %s938_s4 = inlined_call_operand.vmem [shape: bf16[768,128], index: 4, kind: output, shape index: {}]  }
   0x1   :  { %s9_s17 = sshll.u32 %s934_s0, 4  ;;  %s10_s17 = int_to_ptr.vmem [resolvable:$true] %s9_s17 }
   0x2   :  { %s818_s18 = scalar_lea.vmem %s10_s17, 16  ;;  %p823_p1 = scmp.lt.s32.totalorder %s10_s17, %s10_s17 }
   0x3   :  { %p819_p0 = scmp.ne.s32.totalorder %s10_s17, %s818_s18  ;;  %p824_p2 = scmp.lt.s32.totalorder %s818_s18, %s818_s18 }
   0x5   :  { %p825_p3 = por %p824_p2, %p823_p1 }
   0x7   :  { %p826_p4 = pnand %p825_p3, %p819_p0 }
   0x9   :  { %829 = shalt.err (!%p826_p4)  }
   0xa   :  { %s840_s19 = smov [#allocation3]  }
   0xb   :  { %12 = dma.vmem_to_smem %s10_s17, 16, %s840_s19, [#allocation2] }
   0xc   :  { %834 = dma.done.wait [#allocation2], 16 }
   0xd   :  { %835 = vsyncadd [#allocation2], 4294967280 }
   0xe   :  { %14 = sfence }
   0xf   :  { %s869_s20 = smov 0  }
  0x10 LB: > { %s875_s0 = sadd.s32 4294967295, %s838_s20   ;;  %p623_p5 = scmp.ge.s32.totalorder %s838_s20, 1  ;;  %s838_s20 = sphi %s869_s20, %s20_s20  }
  0x11   : > { %p171_p6 = scmp.lt.s32.totalorder %s838_s20, 7 }
  0x13   : > { %p172_p7 = pnand %p623_p5, %p171_p6 }
  0x14   : > { %s211_s21 = sld [smem:[#allocation3 + %s875_s0]] (!%p172_p7)  ;;  %s624_s22 = sshll.u32 (!%p172_p7), %s875_s0, 4 }
  0x15   : > { %175 = sbr.rel (%p172_p7) target bundleno = 294 (0x126), region = 32  ;;  %p206_p8 = scmp.lt.s32.totalorder (!%p172_p7), %s624_s22, 95 }
  0x16   : > { %s218_s5 = sld [smem:[#allocation3 + %s875_s0]] (!%p172_p7) }
  0x1a   : > { %p212_p9 = scmp.lt.s32.totalorder (!%p172_p7), %s211_s21, 2 }
  0x1c   : > { %s940_s22 = smov (!%p206_p8, %s624_s22), 95  ;;  %s942_s21 = smov (!%p212_p9, %s211_s21), 2 }
  0x1d   : > { %s625_s23 = sshll.u32 %s940_s22, 2  ;;  %s665_s27 = sshll.u32 %s942_s21, 6 }
  0x1e   : > { %s889_s26 = scalar_lea.vmem %s935_s1, %s625_s23  ;;  %s896_s30 = scalar_lea.vmem %s936_s2, %s665_s27 }
  0x1f   : > { %v810_v0 = vld [vmem:[%s889_s26] sm:$0xff]   ;;  %v803_v3 = vld [vmem:[%s896_s30 + $0x8] sm:$0xff]   ;;  %v804_v4 = vld [vmem:[%s896_s30 + $0x10] sm:$0xff]   ;;  %p219_p10 = scmp.lt.s32.totalorder %s218_s5, 2  ;;  %s921_s11 = scalar_lea.vmem %s938_s4, %s625_s23 }
  0x20   : > { %v811_v1 = vld [vmem:[%s889_s26 + $0x20] sm:$0xff]   ;;  %761 = vmatprep.mubr.bf16.mxu0 %v810_v0  ;;  %v805_v5 = vld [vmem:[%s896_s30 + $0x18] sm:$0xff]   ;;  %v807_v7 = vld [vmem:[%s896_s30 + $0x28] sm:$0xff]  }
  0x21   : > { %769 = vmatprep.mubr.bf16.mxu1 %v811_v1  ;;  %v802_v2 = vld [vmem:[%s896_s30] sm:$0xff]   ;;  %v808_v8 = vld [vmem:[%s896_s30 + $0x30] sm:$0xff]   ;;  %v809_v9 = vld [vmem:[%s896_s30 + $0x38] sm:$0xff]   ;;  %s944_s5 = smov (!%p219_p10, %s218_s5), 2 }
  0x22   : > { %745 = vmatprep.subr.bf16.mxu0 %v802_v2  ;;  %777 = vmatprep.subr.bf16.mxu1 %v802_v2  ;;  %v806_v6 = vld [vmem:[%s896_s30 + $0x20] sm:$0xff]   ;;  %v812_v10 = vld [vmem:[%s889_s26 + $0x8] sm:$0xff]   ;;  %v814_v12 = vld [vmem:[%s889_s26 + $0x10] sm:$0xff]   ;;  %s221_s8 = scalar_lea.vmem %s937_s3, %s944_s5 }
  0x23   : > { %746 = vmatpush3.bf16.msra.mxu0 %v802_v2  ;;  %785 = vmatpush3.bf16.msra.mxu1 %v802_v2  ;;  %v813_v11 = vld [vmem:[%s889_s26 + $0x28] sm:$0xff]   ;;  %v815_v13 = vld [vmem:[%s889_s26 + $0x30] sm:$0xff]   ;;  %v816_v14 = vld [vmem:[%s889_s26 + $0x18] sm:$0xff]  }
  0x24   : > { %747 = vmatprep.subr.bf16.mxu0 %v803_v3  ;;  %778 = vmatprep.subr.bf16.mxu1 %v803_v3  ;;  %v817_v15 = vld [vmem:[%s889_s26 + $0x38] sm:$0xff]   ;;  %v630_v17 = vld [vmem:[%s221_s8] ss:$0 sm:$0xff] }
  0x27   : > { %748 = vmatpush3.bf16.msra.mxu0 %v803_v3  ;;  %786 = vmatpush3.bf16.msra.mxu1 %v803_v3 }
  0x28   : > { %749 = vmatprep.subr.bf16.mxu0 %v804_v4  ;;  %779 = vmatprep.subr.bf16.mxu1 %v804_v4 }
  0x2b   : > { %750 = vmatpush3.bf16.msra.mxu0 %v804_v4  ;;  %787 = vmatpush3.bf16.msra.mxu1 %v804_v4 }
  0x2c   : > { %751 = vmatprep.subr.bf16.mxu0 %v805_v5  ;;  %780 = vmatprep.subr.bf16.mxu1 %v805_v5 }
  0x2f   : > { %752 = vmatpush3.bf16.msra.mxu0 %v805_v5  ;;  %788 = vmatpush3.bf16.msra.mxu1 %v805_v5 }
  0x30   : > { %753 = vmatprep.subr.bf16.mxu0 %v806_v6  ;;  %781 = vmatprep.subr.bf16.mxu1 %v806_v6 }
  0x33   : > { %754 = vmatpush3.bf16.msra.mxu0 %v806_v6  ;;  %789 = vmatpush3.bf16.msra.mxu1 %v806_v6 }
  0x34   : > { %755 = vmatprep.subr.bf16.mxu0 %v807_v7  ;;  %782 = vmatprep.subr.bf16.mxu1 %v807_v7 }
  0x37   : > { %756 = vmatpush3.bf16.msra.mxu0 %v807_v7  ;;  %790 = vmatpush3.bf16.msra.mxu1 %v807_v7 }
  0x38   : > { %757 = vmatprep.subr.bf16.mxu0 %v808_v8  ;;  %783 = vmatprep.subr.bf16.mxu1 %v808_v8 }
  0x3b   : > { %758 = vmatpush3.bf16.msra.mxu0 %v808_v8  ;;  %791 = vmatpush3.bf16.msra.mxu1 %v808_v8 }
  0x3c   : > { %759 = vmatprep.subr.bf16.mxu0 %v809_v9  ;;  %784 = vmatprep.subr.bf16.mxu1 %v809_v9 }
  0x3f   : > { %760 = vmatpush3.bf16.msra.mxu0 %v809_v9  ;;  %792 = vmatpush3.bf16.msra.mxu1 %v809_v9 }
  0x42   : > { %762 = vmatmul.mubr.bf16.vlgmr.msra.gmra.mrb[0].mxu0 %v812_v10  ;;  %770 = vmatmul.mubr.bf16.vlgmr.msra.gmra.mrb[0].mxu1 %v813_v11 }
  0x43   : > { %765 = vmatprep.mubr.bf16.mxu0 %v814_v12  ;;  %773 = vmatprep.mubr.bf16.mxu1 %v815_v13 }
  0x4a   : > { %766 = vmatmul.mubr.bf16.gmra.mrb[4].mxu0 %v816_v14  ;;  %774 = vmatmul.mubr.bf16.gmra.mrb[4].mxu1 %v817_v15 }
 0x115   : > { %v763_v16 = vpop.f32.mrb[0].mxu0  ;;  %v771_v18 = vpop.f32.mrb[0].mxu1 }
 0x116   : > { %v399_v19 = vpop.f32.mrb[1].mxu0  ;;  %v431_v20 = vpop.f32.mrb[1].mxu1  ;;  %v408_v23 = vadd.f32 %v763_v16, %v630_v17  ;;  %v440_v24 = vadd.f32 %v771_v18, %v630_v17 }
 0x117   : > { %v764_v21 = vpop.f32.mrb[2].mxu0  ;;  %v772_v22 = vpop.f32.mrb[2].mxu1  ;;  %v400_v29 = vadd.f32 %v630_v17, %v399_v19  ;;  %v432_v30 = vadd.f32 %v630_v17, %v431_v20 }
 0x118   : > { %v411_v25 = vadd.f32 %v764_v21, %v630_v17  ;;  %v443_v26 = vadd.f32 %v772_v22, %v630_v17  ;;  %v402_v27 = vpop.f32.mrb[3].mxu0  ;;  %v434_v28 = vpop.f32.mrb[3].mxu1 }
 0x119   : > { %v403_v31 = vadd.f32 %v630_v17, %v402_v27  ;;  %v435_v32 = vadd.f32 %v630_v17, %v434_v28 }
 0x11a   : > { %v690_v33 = vpack.c.bf16 %v411_v25, %v408_v23  ;;  %v710_v34 = vpack.c.bf16 %v443_v26, %v440_v24 }
 0x11b   : > { %v685_v35 = vpack.c.bf16 %v403_v31, %v400_v29  ;;  %v705_v36 = vpack.c.bf16 %v435_v32, %v432_v30 }
 0x11c   : > { %722 = vst [vmem:[%s921_s11 + $0x8] sm:$0xff] %v690_v33   ;;  %726 = vst [vmem:[%s921_s11 + $0x28] sm:$0xff] %v710_v34  }
 0x11d   : > { %686 = vst [vmem:[%s921_s11] sm:$0xff] %v685_v35   ;;  %725 = vst [vmem:[%s921_s11 + $0x20] sm:$0xff] %v705_v36   ;;  %v767_v37 = vpop.f32.mrb[4].mxu0  ;;  %v775_v38 = vpop.f32.mrb[4].mxu1 }
 0x11e   : > { %v415_v39 = vpop.f32.mrb[5].mxu0  ;;  %v447_v40 = vpop.f32.mrb[5].mxu1  ;;  %v424_v43 = vadd.f32 %v767_v37, %v630_v17  ;;  %v456_v44 = vadd.f32 %v775_v38, %v630_v17 }
 0x11f   : > { %v768_v41 = vpop.f32.mrb[6].mxu0  ;;  %v776_v42 = vpop.f32.mrb[6].mxu1  ;;  %v416_v49 = vadd.f32 %v630_v17, %v415_v39  ;;  %v448_v50 = vadd.f32 %v630_v17, %v447_v40 }
 0x120   : > { %v427_v45 = vadd.f32 %v768_v41, %v630_v17  ;;  %v459_v46 = vadd.f32 %v776_v42, %v630_v17  ;;  %v418_v47 = vpop.f32.mrb[7].mxu0  ;;  %v450_v48 = vpop.f32.mrb[7].mxu1 }
 0x121   : > { %v419_v51 = vadd.f32 %v630_v17, %v418_v47  ;;  %v451_v52 = vadd.f32 %v630_v17, %v450_v48 }
 0x122   : > { %v700_v53 = vpack.c.bf16 %v427_v45, %v424_v43  ;;  %v720_v54 = vpack.c.bf16 %v459_v46, %v456_v44 }
 0x123   : > { %v695_v55 = vpack.c.bf16 %v419_v51, %v416_v49  ;;  %v715_v56 = vpack.c.bf16 %v451_v52, %v448_v50 }
 0x124   : > { %724 = vst [vmem:[%s921_s11 + $0x18] sm:$0xff] %v700_v53   ;;  %728 = vst [vmem:[%s921_s11 + $0x38] sm:$0xff] %v720_v54  }
 0x125   : > { %723 = vst [vmem:[%s921_s11 + $0x10] sm:$0xff] %v695_v55   ;;  %727 = vst [vmem:[%s921_s11 + $0x30] sm:$0xff] %v715_v56  }
 0x126 PF: > { %s20_s20 = sadd.s32 1, %s838_s20  }
 0x127   : > { %p17_p11 = scmp.ge.s32.totalorder %s20_s20, 8  }
 0x129   :  { %19 = sbr.rel (!%p17_p11) target bundleno = 16 (0x10), region = 68 }

// kernel: forward.24
= control target key start
LH: loop header
LB: loop body
LE: loop exit
PB: predicated region body
PF: predicated region fallthrough
CT: control target
= control target key end

     0   :  { %s912_s0 = inlined_call_operand.vmem [shape: bf16[640,128], index: 0, kind: input, shape index: {}]   ;;  %s913_s1 = inlined_call_operand.vmem [shape: f32[1,128], index: 1, kind: input, shape index: {}]   ;;  %s914_s2 = inlined_call_operand.vmem [shape: bf16[8,576], index: 2, kind: input, shape index: {}]   ;;  %s915_s3 = inlined_call_operand.<no memory space> [shape: bf16[], index: 3, kind: input, shape index: {}]   ;;  %s916_s4 = inlined_call_operand.vmem [shape: bf16[8,128], index: 4, kind: output, shape index: {}]  }
   0x1   :  { %v9_v0 = vstv %s915_s3 }
   0x2   :  { %v774_v1 = vunpack.i.l.bf16 %v9_v0 }
   0x3   :  { %v698_v2 = vld [vmem:[%s912_s0 + $0x40] sm:$0xff]   ;;  %v702_v6 = vld [vmem:[%s912_s0 + $0x48] sm:$0xff]   ;;  %v706_v10 = vld [vmem:[%s912_s0 + $0x50] sm:$0xff]   ;;  %v83_v32 = vlaneseq  ;;  %v744_v36 = vmov 0.0   ;;  %vm745_vm1 = vmmov 0  }
   0x4   :  { %v699_v3 = vld [vmem:[%s912_s0] sm:$0xff]   ;;  %623 = vmatprep.subr.bf16.mxu0 %v698_v2  ;;  %v703_v7 = vld [vmem:[%s912_s0 + $0x8] sm:$0xff]   ;;  %v707_v11 = vld [vmem:[%s912_s0 + $0x10] sm:$0xff]  }
   0x5   :  { %v700_v4 = vld [vmem:[%s912_s0 + $0xc0] sm:$0xff]   ;;  %624 = vmatpush3.bf16.msra.mxu0 %v699_v3  ;;  %v704_v8 = vld [vmem:[%s912_s0 + $0xc8] sm:$0xff]   ;;  %v708_v12 = vld [vmem:[%s912_s0 + $0xd0] sm:$0xff]   ;;  %v84_v38 = vand.u32 127, %v83_v32 }
   0x6   :  { %v701_v5 = vld [vmem:[%s912_s0 + $0x80] sm:$0xff]   ;;  %645 = vmatprep.subr.bf16.mxu1 %v700_v4  ;;  %625 = vmatprep.subr.bf16.mxu0 %v702_v6  ;;  %v705_v9 = vld [vmem:[%s912_s0 + $0x88] sm:$0xff]   ;;  %v709_v13 = vld [vmem:[%s912_s0 + $0x90] sm:$0xff]  }
   0x7   :  { %646 = vmatpush3.bf16.msra.mxu1 %v701_v5  ;;  %v710_v14 = vld [vmem:[%s912_s0 + $0x58] sm:$0xff]   ;;  %v714_v18 = vld [vmem:[%s912_s0 + $0x60] sm:$0xff]   ;;  %v718_v22 = vld [vmem:[%s912_s0 + $0x68] sm:$0xff]   ;;  %v85_v41 = vadd.s32 512, %v84_v38 }
   0x8   :  { %647 = vmatprep.subr.bf16.mxu1 %v704_v8  ;;  %v711_v15 = vld [vmem:[%s912_s0 + $0x18] sm:$0xff]   ;;  %v715_v19 = vld [vmem:[%s912_s0 + $0x20] sm:$0xff]   ;;  %v719_v23 = vld [vmem:[%s912_s0 + $0x28] sm:$0xff]  }
   0x9   :  { %626 = vmatpush3.bf16.msra.mxu0 %v703_v7  ;;  %v712_v16 = vld [vmem:[%s912_s0 + $0xd8] sm:$0xff]   ;;  %v716_v20 = vld [vmem:[%s912_s0 + $0xe0] sm:$0xff]   ;;  %v720_v24 = vld [vmem:[%s912_s0 + $0xe8] sm:$0xff]   ;;  %vm86_vm0 = vcmp.lt.s32.totalorder %v85_v41, 576 }
   0xa   :  { %627 = vmatprep.subr.bf16.mxu0 %v706_v10  ;;  %v713_v17 = vld [vmem:[%s912_s0 + $0x98] sm:$0xff]   ;;  %v717_v21 = vld [vmem:[%s912_s0 + $0xa0] sm:$0xff]   ;;  %v721_v25 = vld [vmem:[%s912_s0 + $0xa8] sm:$0xff]  }
   0xb   :  { %648 = vmatpush3.bf16.msra.mxu1 %v705_v9  ;;  %v722_v26 = vld [vmem:[%s912_s0 + $0x70] sm:$0xff]   ;;  %v726_v30 = vld [vmem:[%s912_s0 + $0x78] sm:$0xff]   ;;  %v20_v34 = vld [vmem:[%s914_s2] sm:$0xff]  }
   0xc   :  { %649 = vmatprep.subr.bf16.mxu1 %v708_v12  ;;  %v723_v27 = vld [vmem:[%s912_s0 + $0x30] sm:$0xff]   ;;  %v727_v31 = vld [vmem:[%s912_s0 + $0x38] sm:$0xff]   ;;  %30 = vst [vmem:[#allocation7] sm:$0xff] %v20_v34   ;;  %v732_v37 = vld [vmem:[%s914_s2 + $0x8] sm:$0xff]  }
   0xd   :  { %628 = vmatpush3.bf16.msra.mxu0 %v707_v11  ;;  %v724_v28 = vld [vmem:[%s912_s0 + $0xf0] sm:$0xff]   ;;  %v728_v33 = vld [vmem:[%s912_s0 + $0xf8] sm:$0xff]   ;;  %v574_v39 = vcombine.low %v732_v37, %v732_v37  ;;  %v575_v40 = vcombine.high %v732_v37, %v732_v37  ;;  %v735_v45 = vld [vmem:[%s912_s0 + $0x100] sm:$0xff]  }
   0xe   :  { %629 = vmatprep.subr.bf16.mxu0 %v710_v14  ;;  %v725_v29 = vld [vmem:[%s912_s0 + $0xb0] sm:$0xff]   ;;  %v731_v35 = vld [vmem:[%s912_s0 + $0xb8] sm:$0xff]   ;;  %v736_v48 = vld [vmem:[%s912_s0 + $0x108] sm:$0xff]  }
   0xf   :  { %650 = vmatpush3.bf16.msra.mxu1 %v709_v13  ;;  %513 = vmatprep.mubr.bf16.mxu1 %v575_v40  ;;  %v570_v46 = vld [vmem:[%s914_s2 + $0x10] sm:$0xf]  ;;  %v738_v52 = vld [vmem:[%s912_s0 + $0x118] sm:$0xff]   ;;  %v739_v53 = vld [vmem:[%s912_s0 + $0x120] sm:$0xff]  }
  0x10   :  { %651 = vmatprep.subr.bf16.mxu1 %v712_v16  ;;  %v81_v47 = vunpack.c.l.bf16 %v570_v46  ;;  %v737_v51 = vld [vmem:[%s912_s0 + $0x110] sm:$0xff]   ;;  %v740_v54 = vld [vmem:[%s912_s0 + $0x128] sm:$0xff]   ;;  %v742_v56 = vld [vmem:[%s912_s0 + $0x138] sm:$0xff]  }
  0x11   :  { %630 = vmatpush3.bf16.msra.mxu0 %v711_v15  ;;  %v741_v55 = vld [vmem:[%s912_s0 + $0x130] sm:$0xff]   ;;  %v571_v0 = vld [vmem:[%s913_s1] ss:$0 sm:$0xff] }
  0x12   :  { %631 = vmatprep.subr.bf16.mxu0 %v714_v18  ;;  %v87_v49 = vsel %vm86_vm0, %v81_v47, %v774_v1 }
  0x13   :  { %652 = vmatpush3.bf16.msra.mxu1 %v713_v17  ;;  %v93_v42 = vld [vmem:[#allocation7] sm:$0xff]  ;;  %v89_v50 = vpack.c.bf16 %v744_v36, %v87_v49 }
  0x14   :  { %653 = vmatprep.subr.bf16.mxu1 %v716_v20  ;;  %v572_v43 = vcombine.low %v93_v42, %v93_v42  ;;  %v573_v44 = vcombine.high %v93_v42, %v93_v42 }
  0x15   :  { %632 = vmatpush3.bf16.msra.mxu0 %v715_v19  ;;  %91 = vst [vmem:[#allocation7 + $0x10] sm:$0xf] %v89_v50 }
  0x16   :  { %633 = vmatprep.subr.bf16.mxu0 %v718_v22  ;;  %473 = vmatprep.mubr.bf16.mxu0 %v573_v44 }
  0x17   :  { %654 = vmatpush3.bf16.msra.mxu1 %v717_v21 }
  0x18   :  { %655 = vmatprep.subr.bf16.mxu1 %v720_v24 }
  0x19   :  { %634 = vmatpush3.bf16.msra.mxu0 %v719_v23 }
  0x1a   :  { %635 = vmatprep.subr.bf16.mxu0 %v722_v26 }
  0x1b   :  { %656 = vmatpush3.bf16.msra.mxu1 %v721_v25 }
  0x1c   :  { %657 = vmatprep.subr.bf16.mxu1 %v724_v28  ;;  %v743_v57 = vld [vmem:[#allocation7 + $0x10] ss:$0 sps:$4 sm:$0xff]  }
  0x1d   :  { %636 = vmatpush3.bf16.msra.mxu0 %v723_v27 }
  0x1e   :  { %637 = vmatprep.subr.bf16.mxu0 %v726_v30 }
  0x1f   :  { %658 = vmatpush3.bf16.msra.mxu1 %v725_v29 }
  0x20   :  { %659 = vmatprep.subr.bf16.mxu1 %v728_v33 }
  0x21   :  { %638 = vmatpush3.bf16.msra.mxu0 %v727_v31 }
  0x22   :  { %676 = vmatprep.subr.bf16.mxu0 %v744_v36 }
  0x23   :  { %660 = vmatpush3.bf16.msra.mxu1 %v731_v35 }
  0x24   :  { %474 = vmatmul.mubr.bf16.vlgmr.msra.gmra.mrb[0].mxu0 %v572_v43 }
  0x25   :  { %677 = vmatpush3.bf16.msra.mxu0 %v735_v45  ;;  %692 = vmatprep.mubr.msk.bf16.mxu0 %vm745_vm1, %v744_v36 }
  0x26   :  { %514 = vmatmul.mubr.bf16.vlgmr.msra.gmra.mrb[0].mxu1 %v574_v39  ;;  %678 = vmatprep.subr.bf16.mxu0 %v744_v36 }
  0x29   :  { %679 = vmatpush3.bf16.msra.mxu0 %v736_v48 }
  0x2a   :  { %680 = vmatprep.subr.bf16.mxu0 %v744_v36 }
  0x2d   :  { %681 = vmatpush3.bf16.msra.mxu0 %v737_v51 }
  0x2e   :  { %682 = vmatprep.subr.bf16.mxu0 %v744_v36 }
  0x31   :  { %683 = vmatpush3.bf16.msra.mxu0 %v738_v52 }
  0x32   :  { %684 = vmatprep.subr.bf16.mxu0 %v744_v36 }
  0x35   :  { %685 = vmatpush3.bf16.msra.mxu0 %v739_v53 }
  0x36   :  { %686 = vmatprep.subr.bf16.mxu0 %v744_v36 }
  0x39   :  { %687 = vmatpush3.bf16.msra.mxu0 %v740_v54 }
  0x3a   :  { %688 = vmatprep.subr.bf16.mxu0 %v744_v36 }
  0x3d   :  { %689 = vmatpush3.bf16.msra.mxu0 %v741_v55 }
  0x3e   :  { %690 = vmatprep.subr.bf16.mxu0 %v744_v36 }
  0x41   :  { %691 = vmatpush3.bf16.msra.mxu0 %v742_v56 }
  0x44   :  { %693 = vmatmul.mubr.bf16.vlgmr.msra.gmra.mrb[4].mxu0 %v743_v57 }
  0xf7   :  { %v639_v63 = vpop.f32.mrb[0].mxu0 }
  0xf8   :  { %v640_v1 = vpop.f32.mrb[1].mxu0 }
  0xf9   :  { %v661_v58 = vpop.f32.mrb[0].mxu1  ;;  %v641_v2 = vadd.f32 %v640_v1, %v639_v63  ;;  %v642_v3 = vpop.f32.mrb[2].mxu0 }
  0xfa   :  { %v662_v59 = vpop.f32.mrb[1].mxu1  ;;  %v643_v4 = vpop.f32.mrb[3].mxu0 }
  0xfb   :  { %v663_v60 = vadd.f32 %v662_v59, %v661_v58  ;;  %v664_v61 = vpop.f32.mrb[2].mxu1  ;;  %v476_v5 = vadd.f32 %v641_v2, %v571_v0 }
  0xfc   :  { %v665_v62 = vpop.f32.mrb[3].mxu1 }
  0xfd   :  { %v516_v6 = vadd.f32 %v663_v60, %v476_v5 }
 0x117   :  { %v555_v7 = vpop.f32.mrb[4].mxu0 }
 0x118   :  { %v556_v8 = vadd.f32 %v555_v7, %v516_v6  ;;  %v694_v9 = vpop.f32.mrb[5].mxu0 }
 0x119   :  { %v558_v10 = vpop.f32.mrb[6].mxu0 }
 0x11a   :  { %v561_v11 = vpack.c.bf16 %v556_v8, %v556_v8  ;;  %v695_v12 = vpop.f32.mrb[7].mxu0 }
 0x11c   :  { %562 = vst [vmem:[%s916_s4] sm:$0xf] %v561_v11 }

// kernel: forward.23
= control target key start
LH: loop header
LB: loop body
LE: loop exit
PB: predicated region body
PF: predicated region fallthrough
CT: control target
= control target key end

     0   :  { %s952_s0 = inlined_call_operand.vmem [shape: bf16[640,128], index: 0, kind: input, shape index: {}]   ;;  %s953_s1 = inlined_call_operand.vmem [shape: f32[1,128], index: 1, kind: input, shape index: {}]   ;;  %s954_s2 = inlined_call_operand.vmem [shape: bf16[2,576], index: 2, kind: input, shape index: {}]   ;;  %s955_s3 = inlined_call_operand.<no memory space> [shape: bf16[], index: 3, kind: input, shape index: {}]   ;;  %s956_s4 = inlined_call_operand.vmem [shape: bf16[8,128], index: 4, kind: output, shape index: {}]  }
   0x1   :  { %v9_v0 = vstv %s955_s3 }
   0x2   :  { %v798_v1 = vunpack.i.l.bf16 %v9_v0 }
   0x3   :  { %v723_v2 = vld [vmem:[%s952_s0 + $0x40] sm:$0xff]   ;;  %v727_v6 = vld [vmem:[%s952_s0 + $0x48] sm:$0xff]   ;;  %v731_v10 = vld [vmem:[%s952_s0 + $0x50] sm:$0xff]   ;;  %v26_v25 = vlaneseq  ;;  %v768_v40 = vmov 0.0   ;;  %vm769_vm2 = vmmov 0  }
   0x4   :  { %v724_v3 = vld [vmem:[%s952_s0] sm:$0xff]   ;;  %648 = vmatprep.subr.bf16.mxu0 %v723_v2  ;;  %v728_v7 = vld [vmem:[%s952_s0 + $0x8] sm:$0xff]   ;;  %v732_v11 = vld [vmem:[%s952_s0 + $0x10] sm:$0xff]  }
   0x5   :  { %v725_v4 = vld [vmem:[%s952_s0 + $0xc0] sm:$0xff]   ;;  %649 = vmatpush3.bf16.msra.mxu0 %v724_v3  ;;  %v729_v8 = vld [vmem:[%s952_s0 + $0xc8] sm:$0xff]   ;;  %v733_v12 = vld [vmem:[%s952_s0 + $0xd0] sm:$0xff]   ;;  %v27_v30 = vshrl.u32 %v26_v25, 7  ;;  %v115_v47 = vand.u32 127, %v26_v25 }
   0x6   :  { %v726_v5 = vld [vmem:[%s952_s0 + $0x80] sm:$0xff]   ;;  %670 = vmatprep.subr.bf16.mxu1 %v725_v4  ;;  %650 = vmatprep.subr.bf16.mxu0 %v727_v6  ;;  %v730_v9 = vld [vmem:[%s952_s0 + $0x88] sm:$0xff]   ;;  %v734_v13 = vld [vmem:[%s952_s0 + $0x90] sm:$0xff]  }
   0x7   :  { %671 = vmatpush3.bf16.msra.mxu1 %v726_v5  ;;  %v735_v14 = vld [vmem:[%s952_s0 + $0x58] sm:$0xff]   ;;  %v739_v18 = vld [vmem:[%s952_s0 + $0x60] sm:$0xff]   ;;  %v743_v22 = vld [vmem:[%s952_s0 + $0x68] sm:$0xff]   ;;  %vm29_vm0 = vcmp.lt.s32.totalorder %v27_v30, 2  ;;  %v116_v54 = vadd.s32 512, %v115_v47 }
   0x8   :  { %672 = vmatprep.subr.bf16.mxu1 %v729_v8  ;;  %v736_v15 = vld [vmem:[%s952_s0 + $0x18] sm:$0xff]   ;;  %v740_v19 = vld [vmem:[%s952_s0 + $0x20] sm:$0xff]   ;;  %v744_v23 = vld [vmem:[%s952_s0 + $0x28] sm:$0xff]  }
   0x9   :  { %651 = vmatpush3.bf16.msra.mxu0 %v728_v7  ;;  %v737_v16 = vld [vmem:[%s952_s0 + $0xd8] sm:$0xff]   ;;  %v741_v20 = vld [vmem:[%s952_s0 + $0xe0] sm:$0xff]   ;;  %v745_v24 = vld [vmem:[%s952_s0 + $0xe8] sm:$0xff]   ;;  %vm117_vm1 = vcmp.lt.s32.totalorder %v116_v54, 576 }
   0xa   :  { %652 = vmatprep.subr.bf16.mxu0 %v731_v10  ;;  %v738_v17 = vld [vmem:[%s952_s0 + $0x98] sm:$0xff]   ;;  %v742_v21 = vld [vmem:[%s952_s0 + $0xa0] sm:$0xff]   ;;  %v746_v26 = vld [vmem:[%s952_s0 + $0xa8] sm:$0xff]  }
   0xb   :  { %673 = vmatpush3.bf16.msra.mxu1 %v730_v9  ;;  %v747_v27 = vld [vmem:[%s952_s0 + $0x70] sm:$0xff]   ;;  %v751_v32 = vld [vmem:[%s952_s0 + $0x78] sm:$0xff]   ;;  %v23_v35 = vld [vmem:[%s954_s2] sm:$0x1] }
   0xc   :  { %674 = vmatprep.subr.bf16.mxu1 %v733_v12  ;;  %v748_v28 = vld [vmem:[%s952_s0 + $0x30] sm:$0xff]   ;;  %v752_v33 = vld [vmem:[%s952_s0 + $0x38] sm:$0xff]   ;;  %v598_v36 = vld [vmem:[%s954_s2 + $0x1] sm:$0x1]  ;;  %v24_v37 = vunpack.c.l.bf16 %v23_v35 }
   0xd   :  { %653 = vmatpush3.bf16.msra.mxu0 %v732_v11  ;;  %v749_v29 = vld [vmem:[%s952_s0 + $0xf0] sm:$0xff]   ;;  %v753_v34 = vld [vmem:[%s952_s0 + $0xf8] sm:$0xff]   ;;  %v44_v38 = vunpack.c.l.bf16 %v598_v36  ;;  %v599_v41 = vld [vmem:[%s954_s2 + $0x2] sm:$0x1] }
   0xe   :  { %654 = vmatprep.subr.bf16.mxu0 %v735_v14  ;;  %v750_v31 = vld [vmem:[%s952_s0 + $0xb0] sm:$0xff]   ;;  %v756_v39 = vld [vmem:[%s952_s0 + $0xb8] sm:$0xff]   ;;  %v65_v42 = vunpack.c.l.bf16 %v599_v41  ;;  %v600_v43 = vld [vmem:[%s954_s2 + $0x3] sm:$0x1]  ;;  %v30_v44 = vsel %vm29_vm0, %v24_v37, %v798_v1 }
   0xf   :  { %675 = vmatpush3.bf16.msra.mxu1 %v734_v13  ;;  %v50_v45 = vsel %vm29_vm0, %v44_v38, %v798_v1  ;;  %v86_v46 = vunpack.c.l.bf16 %v600_v43  ;;  %v36_v48 = vpack.c.bf16 %v768_v40, %v30_v44  ;;  %v601_v55 = vld [vmem:[%s954_s2 + $0x4] sm:$0x1]  ;;  %v760_v4 = vld [vmem:[%s952_s0 + $0x108] sm:$0xff]   ;;  %v762_v5 = vld [vmem:[%s952_s0 + $0x118] sm:$0xff]  }
  0x10   :  { %676 = vmatprep.subr.bf16.mxu1 %v737_v16  ;;  %v57_v49 = vpack.c.bf16 %v768_v40, %v50_v45  ;;  %v71_v50 = vsel %vm29_vm0, %v65_v42, %v798_v1  ;;  %v107_v56 = vunpack.c.l.bf16 %v601_v55  ;;  %v759_v61 = vld [vmem:[%s952_s0 + $0x100] sm:$0xff]   ;;  %v764_v7 = vld [vmem:[%s952_s0 + $0x128] sm:$0xff]   ;;  %v765_v8 = vld [vmem:[%s952_s0 + $0x130] sm:$0xff]  }
  0x11   :  { %655 = vmatpush3.bf16.msra.mxu0 %v736_v15  ;;  %v78_v51 = vpack.c.bf16 %v768_v40, %v71_v50  ;;  %v92_v52 = vsel %vm29_vm0, %v86_v46, %v798_v1  ;;  %38 = vst [vmem:[#allocation7] sm:$0xf] %v36_v48  ;;  %v763_v6 = vld [vmem:[%s952_s0 + $0x120] sm:$0xff]   ;;  %v766_v9 = vld [vmem:[%s952_s0 + $0x138] sm:$0xff]  }
  0x12   :  { %656 = vmatprep.subr.bf16.mxu0 %v739_v18  ;;  %59 = vst [vmem:[#allocation7 + $0x4] sm:$0xf] %v57_v49  ;;  %v99_v53 = vpack.c.bf16 %v768_v40, %v92_v52  ;;  %v113_v58 = vsel %vm29_vm0, %v107_v56, %v798_v1  ;;  %v602_v12 = vld [vmem:[%s953_s1] ss:$0 sm:$0xff] }
  0x13   :  { %677 = vmatpush3.bf16.msra.mxu1 %v738_v17  ;;  %80 = vst [vmem:[#allocation7 + $0x8] sm:$0xf] %v78_v51  ;;  %v118_v62 = vsel %vm117_vm1, %v113_v58, %v798_v1  ;;  %v761_v1 = vld [vmem:[%s952_s0 + $0x110] sm:$0xff]  }
  0x14   :  { %678 = vmatprep.subr.bf16.mxu1 %v741_v20  ;;  %101 = vst [vmem:[#allocation7 + $0xc] sm:$0xf] %v99_v53  ;;  %v120_v0 = vpack.c.bf16 %v768_v40, %v118_v62 }
  0x15   :  { %657 = vmatpush3.bf16.msra.mxu0 %v740_v19 }
  0x16   :  { %658 = vmatprep.subr.bf16.mxu0 %v743_v22  ;;  %122 = vst [vmem:[#allocation7 + $0x10] sm:$0xf] %v120_v0 }
  0x17   :  { %679 = vmatpush3.bf16.msra.mxu1 %v742_v21 }
  0x18   :  { %680 = vmatprep.subr.bf16.mxu1 %v745_v24 }
  0x19   :  { %659 = vmatpush3.bf16.msra.mxu0 %v744_v23  ;;  %v124_v57 = vld [vmem:[#allocation7] sm:$0xff] }
  0x1a   :  { %660 = vmatprep.subr.bf16.mxu0 %v747_v27  ;;  %v603_v59 = vcombine.low %v124_v57, %v124_v57  ;;  %v604_v60 = vcombine.high %v124_v57, %v124_v57 }
  0x1b   :  { %681 = vmatpush3.bf16.msra.mxu1 %v746_v26  ;;  %v125_v63 = vld [vmem:[#allocation7 + $0x8] sm:$0xff] }
  0x1c   :  { %682 = vmatprep.subr.bf16.mxu1 %v749_v29  ;;  %504 = vmatprep.mubr.bf16.mxu0 %v604_v60  ;;  %v605_v2 = vcombine.low %v125_v63, %v125_v63  ;;  %v606_v3 = vcombine.high %v125_v63, %v125_v63 }
  0x1d   :  { %661 = vmatpush3.bf16.msra.mxu0 %v748_v28  ;;  %v767_v10 = vld [vmem:[#allocation7 + $0x10] ss:$0 sps:$4 sm:$0xff]  }
  0x1e   :  { %662 = vmatprep.subr.bf16.mxu0 %v751_v32  ;;  %544 = vmatprep.mubr.bf16.mxu1 %v606_v3 }
  0x1f   :  { %683 = vmatpush3.bf16.msra.mxu1 %v750_v31 }
  0x20   :  { %684 = vmatprep.subr.bf16.mxu1 %v753_v34 }
  0x21   :  { %663 = vmatpush3.bf16.msra.mxu0 %v752_v33 }
  0x22   :  { %701 = vmatprep.subr.bf16.mxu0 %v768_v40 }
  0x23   :  { %685 = vmatpush3.bf16.msra.mxu1 %v756_v39 }
  0x24   :  { %505 = vmatmul.mubr.bf16.vlgmr.msra.gmra.mrb[0].mxu0 %v603_v59 }
  0x25   :  { %702 = vmatpush3.bf16.msra.mxu0 %v759_v61  ;;  %717 = vmatprep.mubr.msk.bf16.mxu0 %vm769_vm2, %v768_v40 }
  0x26   :  { %545 = vmatmul.mubr.bf16.vlgmr.msra.gmra.mrb[0].mxu1 %v605_v2  ;;  %703 = vmatprep.subr.bf16.mxu0 %v768_v40 }
  0x29   :  { %704 = vmatpush3.bf16.msra.mxu0 %v760_v4 }
  0x2a   :  { %705 = vmatprep.subr.bf16.mxu0 %v768_v40 }
  0x2d   :  { %706 = vmatpush3.bf16.msra.mxu0 %v761_v1 }
  0x2e   :  { %707 = vmatprep.subr.bf16.mxu0 %v768_v40 }
  0x31   :  { %708 = vmatpush3.bf16.msra.mxu0 %v762_v5 }
  0x32   :  { %709 = vmatprep.subr.bf16.mxu0 %v768_v40 }
  0x35   :  { %710 = vmatpush3.bf16.msra.mxu0 %v763_v6 }
  0x36   :  { %711 = vmatprep.subr.bf16.mxu0 %v768_v40 }
  0x39   :  { %712 = vmatpush3.bf16.msra.mxu0 %v764_v7 }
  0x3a   :  { %713 = vmatprep.subr.bf16.mxu0 %v768_v40 }
  0x3d   :  { %714 = vmatpush3.bf16.msra.mxu0 %v765_v8 }
  0x3e   :  { %715 = vmatprep.subr.bf16.mxu0 %v768_v40 }
  0x41   :  { %716 = vmatpush3.bf16.msra.mxu0 %v766_v9 }
  0x44   :  { %718 = vmatmul.mubr.bf16.vlgmr.msra.gmra.mrb[4].mxu0 %v767_v10 }
  0xf7   :  { %v664_v11 = vpop.f32.mrb[0].mxu0 }
  0xf8   :  { %v665_v13 = vpop.f32.mrb[1].mxu0 }
  0xf9   :  { %v666_v14 = vadd.f32 %v665_v13, %v664_v11  ;;  %v667_v15 = vpop.f32.mrb[2].mxu0  ;;  %v686_v16 = vpop.f32.mrb[0].mxu1 }
  0xfa   :  { %v668_v17 = vpop.f32.mrb[3].mxu0  ;;  %v687_v18 = vpop.f32.mrb[1].mxu1 }
  0xfb   :  { %v507_v19 = vadd.f32 %v666_v14, %v602_v12  ;;  %v688_v20 = vadd.f32 %v687_v18, %v686_v16  ;;  %v689_v21 = vpop.f32.mrb[2].mxu1 }
  0xfc   :  { %v690_v22 = vpop.f32.mrb[3].mxu1 }
  0xfd   :  { %v547_v23 = vadd.f32 %v688_v20, %v507_v19 }
 0x117   :  { %v586_v24 = vpop.f32.mrb[4].mxu0 }
 0x118   :  { %v587_v25 = vadd.f32 %v586_v24, %v547_v23  ;;  %v719_v26 = vpop.f32.mrb[5].mxu0 }
 0x119   :  { %v589_v27 = vpop.f32.mrb[6].mxu0 }
 0x11a   :  { %v592_v28 = vpack.c.bf16 %v587_v25, %v587_v25  ;;  %v720_v29 = vpop.f32.mrb[7].mxu0 }
 0x11c   :  { %593 = vst [vmem:[%s956_s4] sm:$0xf] %v592_v28 }

// kernel: forward.17
= control target key start
LH: loop header
LB: loop body
LE: loop exit
PB: predicated region body
PF: predicated region fallthrough
CT: control target
= control target key end

     0   :  { %s1822_s0 = inlined_call_operand.vmem [shape: s32[8], index: 0, kind: input, shape index: {}]   ;;  %s1823_s1 = inlined_call_operand.vmem [shape: bf16[1024,640], index: 1, kind: input, shape index: {}]   ;;  %s1824_s2 = inlined_call_operand.vmem [shape: bf16[5,640,128], index: 2, kind: input, shape index: {}]   ;;  %s1825_s3 = inlined_call_operand.vmem [shape: f32[5,1,128], index: 3, kind: input, shape index: {}]   ;;  %s1826_s4 = inlined_call_operand.vmem [shape: f32[1024,128], index: 4, kind: output, shape index: {}]  }
   0x1   :  { %s9_s17 = sshll.u32 %s1822_s0, 4  ;;  %s10_s17 = int_to_ptr.vmem [resolvable:$true] %s9_s17 }
   0x2   :  { %s1592_s18 = scalar_lea.vmem %s10_s17, 16  ;;  %p1597_p1 = scmp.lt.s32.totalorder %s10_s17, %s10_s17 }
   0x3   :  { %p1593_p0 = scmp.ne.s32.totalorder %s10_s17, %s1592_s18  ;;  %p1598_p2 = scmp.lt.s32.totalorder %s1592_s18, %s1592_s18 }
   0x5   :  { %p1599_p3 = por %p1598_p2, %p1597_p1 }
   0x7   :  { %p1600_p4 = pnand %p1599_p3, %p1593_p0 }
   0x9   :  { %1603 = shalt.err (!%p1600_p4)  }
   0xa   :  { %s1614_s19 = smov [#allocation3]  }
   0xb   :  { %12 = dma.vmem_to_smem %s10_s17, 16, %s1614_s19, [#allocation2] }
   0xc   :  { %1608 = dma.done.wait [#allocation2], 16 }
   0xd   :  { %1609 = vsyncadd [#allocation2], 4294967280 }
   0xe   :  { %14 = sfence }
   0xf   :  { %s1643_s20 = smov 0  }
  0x10 LB: > { %s1649_s0 = sadd.s32 4294967295, %s1612_s20   ;;  %p1204_p5 = scmp.ge.s32.totalorder %s1612_s20, 1  ;;  %s1612_s20 = sphi %s1643_s20, %s20_s20  }
  0x11   : > { %p172_p6 = scmp.lt.s32.totalorder %s1612_s20, 9 }
  0x13   : > { %p173_p7 = pnand %p1204_p5, %p172_p6 }
  0x14   : > { %s214_s21 = sld [smem:[#allocation3 + %s1649_s0]] (!%p173_p7)  ;;  %s1205_s22 = sshll.u32 (!%p173_p7), %s1649_s0, 4 }
  0x15   : > { %176 = sbr.rel (%p173_p7) target bundleno = 358 (0x166), region = 32  ;;  %p208_p8 = scmp.lt.s32.totalorder (!%p173_p7), %s1205_s22, 127 }
  0x16   : > { %s221_s5 = sld [smem:[#allocation3 + %s1649_s0]] (!%p173_p7) }
  0x1a   : > { %p215_p9 = scmp.lt.s32.totalorder (!%p173_p7), %s214_s21, 4 }
  0x1c   : > { %s1828_s22 = smov (!%p208_p8, %s1205_s22), 127  ;;  %s1830_s21 = smov (!%p215_p9, %s214_s21), 4 }
  0x1d   : > { %s1485_s23 = smul.u32 20, %s1828_s22  ;;  %p222_p10 = scmp.lt.s32.totalorder %s221_s5, 4 }
  0x1e   : > { %s1486_s27 = smul.u32 320, %s1830_s21  ;;  %s1209_s9 = sshll.u32 %s1828_s22, 3 }
  0x1f   : > { %s1661_s26 = scalar_lea.vmem %s1823_s1, %s1485_s23  ;;  %s1832_s5 = smov (!%p222_p10, %s221_s5), 4 }
  0x20   : > { %v1530_v0 = vld [vmem:[%s1661_s26 + $0x4] ss:$20 sps:$4 sm:$0xff]   ;;  %v1533_v1 = vld [vmem:[%s1661_s26 + $0xc] ss:$20 sps:$4 sm:$0xff]   ;;  %s1668_s30 = scalar_lea.vmem %s1824_s2, %s1486_s27  ;;  %v1531_v34 = vld [vmem:[%s1661_s26 + $0x8] ss:$20 sps:$4 sm:$0xff]   ;;  %s224_s8 = scalar_lea.vmem %s1825_s3, %s1832_s5 }
  0x21   : > { %848 = vmatprep.mubr.bf16.mxu0 %v1530_v0  ;;  %945 = vmatprep.mubr.bf16.mxu1 %v1533_v1  ;;  %v1496_v2 = vld [vmem:[%s1668_s30 + $0x40] sm:$0xff]   ;;  %v1500_v6 = vld [vmem:[%s1668_s30 + $0x48] sm:$0xff]   ;;  %v1504_v10 = vld [vmem:[%s1668_s30 + $0x50] sm:$0xff]   ;;  %s1792_s12 = scalar_lea.vmem %s1826_s4, %s1209_s9 }
  0x22   : > { %v1497_v3 = vld [vmem:[%s1668_s30 + $0xc0] sm:$0xff]   ;;  %1293 = vmatprep.subr.bf16.mxu0 %v1496_v2  ;;  %v1501_v7 = vld [vmem:[%s1668_s30 + $0xc8] sm:$0xff]   ;;  %v1505_v11 = vld [vmem:[%s1668_s30 + $0xd0] sm:$0xff]  }
  0x23   : > { %v1498_v4 = vld [vmem:[%s1668_s30] sm:$0xff]   ;;  %1357 = vmatprep.subr.bf16.mxu1 %v1497_v3  ;;  %v1502_v8 = vld [vmem:[%s1668_s30 + $0x8] sm:$0xff]   ;;  %v1506_v12 = vld [vmem:[%s1668_s30 + $0x10] sm:$0xff]  }
  0x24   : > { %v1499_v5 = vld [vmem:[%s1668_s30 + $0x80] sm:$0xff]   ;;  %1294 = vmatpush3.bf16.msra.mxu0 %v1498_v4  ;;  %v1503_v9 = vld [vmem:[%s1668_s30 + $0x88] sm:$0xff]   ;;  %v1507_v13 = vld [vmem:[%s1668_s30 + $0x90] sm:$0xff]  }
  0x25   : > { %1358 = vmatpush3.bf16.msra.mxu1 %v1499_v5  ;;  %1295 = vmatprep.subr.bf16.mxu0 %v1500_v6  ;;  %v1508_v14 = vld [vmem:[%s1668_s30 + $0x58] sm:$0xff]   ;;  %v1512_v18 = vld [vmem:[%s1668_s30 + $0x60] sm:$0xff]   ;;  %v1516_v22 = vld [vmem:[%s1668_s30 + $0x68] sm:$0xff]  }
  0x26   : > { %1359 = vmatprep.subr.bf16.mxu1 %v1501_v7  ;;  %v1509_v15 = vld [vmem:[%s1668_s30 + $0xd8] sm:$0xff]   ;;  %v1513_v19 = vld [vmem:[%s1668_s30 + $0xe0] sm:$0xff]   ;;  %v1517_v23 = vld [vmem:[%s1668_s30 + $0xe8] sm:$0xff]  }
  0x27   : > { %v1510_v16 = vld [vmem:[%s1668_s30 + $0x18] sm:$0xff]   ;;  %v1514_v20 = vld [vmem:[%s1668_s30 + $0x20] sm:$0xff]   ;;  %v1518_v24 = vld [vmem:[%s1668_s30 + $0x28] sm:$0xff]  }
  0x28   : > { %1296 = vmatpush3.bf16.msra.mxu0 %v1502_v8  ;;  %v1511_v17 = vld [vmem:[%s1668_s30 + $0x98] sm:$0xff]   ;;  %v1515_v21 = vld [vmem:[%s1668_s30 + $0xa0] sm:$0xff]   ;;  %v1519_v25 = vld [vmem:[%s1668_s30 + $0xa8] sm:$0xff]  }
  0x29   : > { %1360 = vmatpush3.bf16.msra.mxu1 %v1503_v9  ;;  %1297 = vmatprep.subr.bf16.mxu0 %v1504_v10  ;;  %v1520_v26 = vld [vmem:[%s1668_s30 + $0x70] sm:$0xff]   ;;  %v1524_v30 = vld [vmem:[%s1668_s30 + $0x78] sm:$0xff]   ;;  %v1535_v36 = vld [vmem:[%s1661_s26 + $0x2c] ss:$20 sps:$4 sm:$0xff]  }
  0x2a   : > { %1361 = vmatprep.subr.bf16.mxu1 %v1505_v11  ;;  %v1521_v27 = vld [vmem:[%s1668_s30 + $0xf0] sm:$0xff]   ;;  %v1525_v31 = vld [vmem:[%s1668_s30 + $0xf8] sm:$0xff]   ;;  %v1534_v37 = vld [vmem:[%s1668_s30 + $0x100] sm:$0xff]  }
  0x2b   : > { %v1522_v28 = vld [vmem:[%s1668_s30 + $0x30] sm:$0xff]   ;;  %v1526_v33 = vld [vmem:[%s1668_s30 + $0x38] sm:$0xff]   ;;  %v1541_v39 = vld [vmem:[%s1668_s30 + $0x108] sm:$0xff]  }
  0x2c   : > { %1298 = vmatpush3.bf16.msra.mxu0 %v1506_v12  ;;  %v1523_v29 = vld [vmem:[%s1668_s30 + $0xb0] sm:$0xff]   ;;  %v1527_v35 = vld [vmem:[%s1668_s30 + $0xb8] sm:$0xff]   ;;  %v1562_v46 = vld [vmem:[%s1668_s30 + $0x120] sm:$0xff]  }
  0x2d   : > { %1362 = vmatpush3.bf16.msra.mxu1 %v1507_v13  ;;  %1299 = vmatprep.subr.bf16.mxu0 %v1508_v14  ;;  %v1528_v32 = vld [vmem:[%s1661_s26] ss:$20 sps:$4 sm:$0xff]   ;;  %v1539_v41 = vld [vmem:[%s1661_s26 + $0x28] ss:$20 sps:$4 sm:$0xff]   ;;  %v1540_v42 = vld [vmem:[%s1661_s26 + $0x30] ss:$20 sps:$4 sm:$0xff]  }
  0x2e   : > { %1363 = vmatprep.subr.bf16.mxu1 %v1509_v15  ;;  %v1537_v38 = vld [vmem:[%s1661_s26 + $0x34] ss:$20 sps:$4 sm:$0xff]   ;;  %v1544_v44 = vld [vmem:[%s1661_s26 + $0x5c] ss:$20 sps:$4 sm:$0xff]   ;;  %v1547_v48 = vld [vmem:[%s1661_s26 + $0x58] ss:$20 sps:$4 sm:$0xff]  }
  0x2f   : > { %v1548_v40 = vld [vmem:[%s1668_s30 + $0x110] sm:$0xff]   ;;  %v1555_v45 = vld [vmem:[%s1668_s30 + $0x118] sm:$0xff]   ;;  %v1569_v51 = vld [vmem:[%s1668_s30 + $0x128] sm:$0xff]  }
  0x30   : > { %1300 = vmatpush3.bf16.msra.mxu0 %v1510_v16  ;;  %v1542_v43 = vld [vmem:[%s1661_s26 + $0x54] ss:$20 sps:$4 sm:$0xff]   ;;  %v1546_v47 = vld [vmem:[%s1661_s26 + $0x50] ss:$20 sps:$4 sm:$0xff]   ;;  %v1553_v52 = vld [vmem:[%s1661_s26 + $0x78] ss:$20 sps:$4 sm:$0xff]  }
  0x31   : > { %1364 = vmatpush3.bf16.msra.mxu1 %v1511_v17  ;;  %1301 = vmatprep.subr.bf16.mxu0 %v1512_v18  ;;  %v1549_v49 = vld [vmem:[%s1661_s26 + $0x7c] ss:$20 sps:$4 sm:$0xff]   ;;  %v1551_v50 = vld [vmem:[%s1661_s26 + $0x84] ss:$20 sps:$4 sm:$0xff]   ;;  %v1554_v54 = vld [vmem:[%s1661_s26 + $0x80] ss:$20 sps:$4 sm:$0xff]  }
  0x32   : > { %1365 = vmatprep.subr.bf16.mxu1 %v1513_v19  ;;  %v1576_v53 = vld [vmem:[%s1668_s30 + $0x130] sm:$0xff]   ;;  %v1556_v55 = vld [vmem:[%s1661_s26 + $0xa4] ss:$20 sps:$4 sm:$0xff]   ;;  %v1558_v56 = vld [vmem:[%s1661_s26 + $0xac] ss:$20 sps:$4 sm:$0xff]  }
  0x33   : > { %v1583_v57 = vld [vmem:[%s1668_s30 + $0x138] sm:$0xff]   ;;  %v1560_v58 = vld [vmem:[%s1661_s26 + $0xa0] ss:$20 sps:$4 sm:$0xff]   ;;  %v1568_v63 = vld [vmem:[%s1661_s26 + $0xd0] ss:$20 sps:$4 sm:$0xff]  }
  0x34   : > { %1302 = vmatpush3.bf16.msra.mxu0 %v1514_v20  ;;  %v1561_v59 = vld [vmem:[%s1661_s26 + $0xa8] ss:$20 sps:$4 sm:$0xff]   ;;  %v1563_v60 = vld [vmem:[%s1661_s26 + $0xcc] ss:$20 sps:$4 sm:$0xff]   ;;  %v1574_v2 = vld [vmem:[%s1661_s26 + $0xf0] ss:$20 sps:$4 sm:$0xff]  }
  0x35   : > { %1366 = vmatpush3.bf16.msra.mxu1 %v1515_v21  ;;  %1303 = vmatprep.subr.bf16.mxu0 %v1516_v22  ;;  %v1565_v61 = vld [vmem:[%s1661_s26 + $0xd4] ss:$20 sps:$4 sm:$0xff]   ;;  %v1572_v1 = vld [vmem:[%s1661_s26 + $0xfc] ss:$20 sps:$4 sm:$0xff]   ;;  %v1575_v3 = vld [vmem:[%s1661_s26 + $0xf8] ss:$20 sps:$4 sm:$0xff]  }
  0x36   : > { %1367 = vmatprep.subr.bf16.mxu1 %v1517_v23  ;;  %v1567_v62 = vld [vmem:[%s1661_s26 + $0xc8] ss:$20 sps:$4 sm:$0xff]   ;;  %v1579_v5 = vld [vmem:[%s1661_s26 + $0x124] ss:$20 sps:$4 sm:$0xff]   ;;  %v1582_v7 = vld [vmem:[%s1661_s26 + $0x120] ss:$20 sps:$4 sm:$0xff]  }
  0x37   : > { %v1570_v0 = vld [vmem:[%s1661_s26 + $0xf4] ss:$20 sps:$4 sm:$0xff]   ;;  %v1577_v4 = vld [vmem:[%s1661_s26 + $0x11c] ss:$20 sps:$4 sm:$0xff]   ;;  %v1581_v6 = vld [vmem:[%s1661_s26 + $0x118] ss:$20 sps:$4 sm:$0xff]  }
  0x38   : > { %1304 = vmatpush3.bf16.msra.mxu0 %v1518_v24  ;;  %v1584_v8 = vld [vmem:[%s1661_s26 + $0x10] ss:$20 sps:$4 sm:$0xff]   ;;  %v1586_v10 = vld [vmem:[%s1661_s26 + $0x38] ss:$20 sps:$4 sm:$0xff]   ;;  %v1588_v12 = vld [vmem:[%s1661_s26 + $0x60] ss:$20 sps:$4 sm:$0xff]  }
  0x39   : > { %1368 = vmatpush3.bf16.msra.mxu1 %v1519_v25  ;;  %1305 = vmatprep.subr.bf16.mxu0 %v1520_v26  ;;  %v1585_v9 = vld [vmem:[%s1661_s26 + $0xb0] ss:$20 sps:$4 sm:$0xff]   ;;  %v1587_v11 = vld [vmem:[%s1661_s26 + $0xd8] ss:$20 sps:$4 sm:$0xff]   ;;  %v1589_v13 = vld [vmem:[%s1661_s26 + $0x100] ss:$20 sps:$4 sm:$0xff]  }
  0x3a   : > { %1369 = vmatprep.subr.bf16.mxu1 %v1521_v27  ;;  %v1590_v14 = vld [vmem:[%s1661_s26 + $0x88] ss:$20 sps:$4 sm:$0xff]   ;;  %v1752_v18 = vld [vmem:[%s224_s8] ss:$0 sm:$0xff] }
  0x3b   : > { %v1591_v15 = vld [vmem:[%s1661_s26 + $0x128] ss:$20 sps:$4 sm:$0xff]  }
  0x3c   : > { %1306 = vmatpush3.bf16.msra.mxu0 %v1522_v28 }
  0x3d   : > { %1370 = vmatpush3.bf16.msra.mxu1 %v1523_v29  ;;  %1307 = vmatprep.subr.bf16.mxu0 %v1524_v30 }
  0x3e   : > { %1371 = vmatprep.subr.bf16.mxu1 %v1525_v31 }
  0x40   : > { %1308 = vmatpush3.bf16.msra.mxu0 %v1526_v33 }
  0x41   : > { %1372 = vmatpush3.bf16.msra.mxu1 %v1527_v35  ;;  %1437 = vmatprep.subr.bf16.mxu0 %v1534_v37 }
  0x42   : > { %1469 = vmatprep.subr.bf16.mxu1 %v1534_v37 }
  0x43   : > { %849 = vmatmul.mubr.bf16.vlgmr.msra.gmra.mrb[0].mxu0 %v1528_v32 }
  0x44   : > { %946 = vmatmul.mubr.bf16.vlgmr.msra.gmra.mrb[0].mxu1 %v1531_v34  ;;  %1438 = vmatpush3.bf16.msra.mxu0 %v1534_v37 }
  0x45   : > { %1477 = vmatpush3.bf16.msra.mxu1 %v1534_v37  ;;  %856 = vmatprep.mubr.bf16.mxu0 %v1535_v36 }
  0x46   : > { %953 = vmatprep.mubr.bf16.mxu1 %v1537_v38  ;;  %1439 = vmatprep.subr.bf16.mxu0 %v1541_v39 }
  0x47   : > { %1470 = vmatprep.subr.bf16.mxu1 %v1541_v39 }
  0x48   : > { %1440 = vmatpush3.bf16.msra.mxu0 %v1541_v39 }
  0x49   : > { %1478 = vmatpush3.bf16.msra.mxu1 %v1541_v39  ;;  %1441 = vmatprep.subr.bf16.mxu0 %v1548_v40 }
  0x4a   : > { %1471 = vmatprep.subr.bf16.mxu1 %v1548_v40 }
  0x4b   : > { %857 = vmatmul.mubr.bf16.gmra.mrb[4].mxu0 %v1539_v41 }
  0x4c   : > { %954 = vmatmul.mubr.bf16.gmra.mrb[4].mxu1 %v1540_v42  ;;  %864 = vmatprep.mubr.bf16.mxu0 %v1542_v43 }
  0x4d   : > { %961 = vmatprep.mubr.bf16.mxu1 %v1544_v44  ;;  %1442 = vmatpush3.bf16.msra.mxu0 %v1548_v40 }
  0x4e   : > { %1479 = vmatpush3.bf16.msra.mxu1 %v1548_v40  ;;  %1443 = vmatprep.subr.bf16.mxu0 %v1555_v45 }
  0x4f   : > { %1472 = vmatprep.subr.bf16.mxu1 %v1555_v45 }
  0x51   : > { %1444 = vmatpush3.bf16.msra.mxu0 %v1555_v45 }
  0x52   : > { %1480 = vmatpush3.bf16.msra.mxu1 %v1555_v45  ;;  %1445 = vmatprep.subr.bf16.mxu0 %v1562_v46 }
  0x53   : > { %865 = vmatmul.mubr.bf16.gmra.mrb[8].mxu0 %v1546_v47  ;;  %1473 = vmatprep.subr.bf16.mxu1 %v1562_v46 }
  0x54   : > { %962 = vmatmul.mubr.bf16.gmra.mrb[8].mxu1 %v1547_v48  ;;  %872 = vmatprep.mubr.bf16.mxu0 %v1549_v49 }
  0x55   : > { %969 = vmatprep.mubr.bf16.mxu1 %v1551_v50  ;;  %1446 = vmatpush3.bf16.msra.mxu0 %v1562_v46 }
  0x56   : > { %1481 = vmatpush3.bf16.msra.mxu1 %v1562_v46  ;;  %1447 = vmatprep.subr.bf16.mxu0 %v1569_v51 }
  0x57   : > { %1474 = vmatprep.subr.bf16.mxu1 %v1569_v51 }
  0x59   : > { %1448 = vmatpush3.bf16.msra.mxu0 %v1569_v51 }
  0x5a   : > { %1482 = vmatpush3.bf16.msra.mxu1 %v1569_v51  ;;  %1449 = vmatprep.subr.bf16.mxu0 %v1576_v53 }
  0x5b   : > { %873 = vmatmul.mubr.bf16.gmra.mrb[12].mxu0 %v1553_v52  ;;  %1475 = vmatprep.subr.bf16.mxu1 %v1576_v53 }
  0x5c   : > { %970 = vmatmul.mubr.bf16.gmra.mrb[12].mxu1 %v1554_v54  ;;  %880 = vmatprep.mubr.bf16.mxu0 %v1556_v55 }
  0x5d   : > { %977 = vmatprep.mubr.bf16.mxu1 %v1558_v56  ;;  %1450 = vmatpush3.bf16.msra.mxu0 %v1576_v53 }
  0x5e   : > { %1483 = vmatpush3.bf16.msra.mxu1 %v1576_v53  ;;  %1451 = vmatprep.subr.bf16.mxu0 %v1583_v57 }
  0x5f   : > { %1476 = vmatprep.subr.bf16.mxu1 %v1583_v57 }
  0x61   : > { %1452 = vmatpush3.bf16.msra.mxu0 %v1583_v57 }
  0x62   : > { %1484 = vmatpush3.bf16.msra.mxu1 %v1583_v57 }
  0x63   : > { %881 = vmatmul.mubr.bf16.gmra.mrb[16].mxu0 %v1560_v58 }
  0x64   : > { %978 = vmatmul.mubr.bf16.gmra.mrb[16].mxu1 %v1561_v59  ;;  %888 = vmatprep.mubr.bf16.mxu0 %v1563_v60 }
  0x65   : > { %985 = vmatprep.mubr.bf16.mxu1 %v1565_v61 }
  0x6b   : > { %889 = vmatmul.mubr.bf16.gmra.mrb[20].mxu0 %v1567_v62 }
  0x6c   : > { %986 = vmatmul.mubr.bf16.gmra.mrb[20].mxu1 %v1568_v63  ;;  %896 = vmatprep.mubr.bf16.mxu0 %v1570_v0 }
  0x6d   : > { %993 = vmatprep.mubr.bf16.mxu1 %v1572_v1 }
  0x73   : > { %897 = vmatmul.mubr.bf16.gmra.mrb[24].mxu0 %v1574_v2 }
  0x74   : > { %994 = vmatmul.mubr.bf16.gmra.mrb[24].mxu1 %v1575_v3  ;;  %904 = vmatprep.mubr.bf16.mxu0 %v1577_v4 }
  0x75   : > { %1001 = vmatprep.mubr.bf16.mxu1 %v1579_v5 }
  0x7b   : > { %905 = vmatmul.mubr.bf16.gmra.mrb[28].mxu0 %v1581_v6 }
  0x7c   : > { %1002 = vmatmul.mubr.bf16.gmra.mrb[28].mxu1 %v1582_v7  ;;  %1453 = vmatprep.mubr.bf16.mxu0 %v1584_v8 }
  0x7d   : > { %1461 = vmatprep.mubr.bf16.mxu1 %v1585_v9 }
  0x83   : > { %1454 = vmatmul.mubr.bf16.vlgmr.msra.gmra.mrb[32].mxu0 %v1586_v10 }
  0x84   : > { %1462 = vmatmul.mubr.bf16.vlgmr.msra.gmra.mrb[32].mxu1 %v1587_v11  ;;  %1457 = vmatprep.mubr.bf16.mxu0 %v1588_v12 }
  0x85   : > { %1465 = vmatprep.mubr.bf16.mxu1 %v1589_v13 }
  0x8b   : > { %1458 = vmatmul.mubr.bf16.gmra.mrb[36].mxu0 %v1590_v14 }
  0x8c   : > { %1466 = vmatmul.mubr.bf16.gmra.mrb[36].mxu1 %v1591_v15 }
 0x116   : > { %v1309_v16 = vpop.f32.mrb[0].mxu0 }
 0x117   : > { %v1373_v17 = vpop.f32.mrb[0].mxu1  ;;  %v1310_v19 = vpop.f32.mrb[1].mxu0 }
 0x118   : > { %v1311_v20 = vadd.f32 %v1310_v19, %v1309_v16  ;;  %v1374_v21 = vpop.f32.mrb[1].mxu1  ;;  %v1312_v22 = vpop.f32.mrb[2].mxu0 }
 0x119   : > { %v1375_v23 = vadd.f32 %v1374_v21, %v1373_v17  ;;  %v1376_v24 = vpop.f32.mrb[2].mxu1  ;;  %v1313_v25 = vpop.f32.mrb[3].mxu0 }
 0x11a   : > { %v851_v26 = vadd.f32 %v1311_v20, %v1752_v18  ;;  %v1314_v27 = vadd.f32 %v1313_v25, %v1312_v22  ;;  %v1377_v28 = vpop.f32.mrb[3].mxu1 }
 0x11b   : > { %v1378_v29 = vadd.f32 %v1377_v28, %v1376_v24 }
 0x11c   : > { %v854_v30 = vadd.f32 %v1314_v27, %v1752_v18  ;;  %v1756_v31 = vadd.f32 %v1375_v23, %v851_v26 }
 0x11e   : > { %v1315_v32 = vpop.f32.mrb[4].mxu0  ;;  %v1758_v33 = vadd.f32 %v1378_v29, %v854_v30 }
 0x11f   : > { %v1379_v34 = vpop.f32.mrb[4].mxu1  ;;  %v1316_v35 = vpop.f32.mrb[5].mxu0 }
 0x120   : > { %v1317_v36 = vadd.f32 %v1316_v35, %v1315_v32  ;;  %v1380_v37 = vpop.f32.mrb[5].mxu1  ;;  %v1318_v38 = vpop.f32.mrb[6].mxu0 }
 0x121   : > { %v1381_v39 = vadd.f32 %v1380_v37, %v1379_v34  ;;  %v1382_v40 = vpop.f32.mrb[6].mxu1  ;;  %v1319_v41 = vpop.f32.mrb[7].mxu0 }
 0x122   : > { %v859_v42 = vadd.f32 %v1317_v36, %v1752_v18  ;;  %v1320_v43 = vadd.f32 %v1319_v41, %v1318_v38  ;;  %v1383_v44 = vpop.f32.mrb[7].mxu1 }
 0x123   : > { %v1384_v45 = vadd.f32 %v1383_v44, %v1382_v40 }
 0x124   : > { %v862_v46 = vadd.f32 %v1320_v43, %v1752_v18  ;;  %v1762_v47 = vadd.f32 %v1381_v39, %v859_v42 }
 0x126   : > { %v1321_v48 = vpop.f32.mrb[8].mxu0  ;;  %v1764_v49 = vadd.f32 %v1384_v45, %v862_v46 }
 0x127   : > { %v1385_v50 = vpop.f32.mrb[8].mxu1  ;;  %v1322_v51 = vpop.f32.mrb[9].mxu0 }
 0x128   : > { %v1323_v52 = vadd.f32 %v1322_v51, %v1321_v48  ;;  %v1386_v53 = vpop.f32.mrb[9].mxu1  ;;  %v1324_v54 = vpop.f32.mrb[10].mxu0 }
 0x129   : > { %v1387_v55 = vadd.f32 %v1386_v53, %v1385_v50  ;;  %v1388_v56 = vpop.f32.mrb[10].mxu1  ;;  %v1325_v57 = vpop.f32.mrb[11].mxu0 }
 0x12a   : > { %v867_v58 = vadd.f32 %v1323_v52, %v1752_v18  ;;  %v1326_v59 = vadd.f32 %v1325_v57, %v1324_v54  ;;  %v1389_v60 = vpop.f32.mrb[11].mxu1 }
 0x12b   : > { %v1390_v61 = vadd.f32 %v1389_v60, %v1388_v56 }
 0x12c   : > { %v870_v62 = vadd.f32 %v1326_v59, %v1752_v18  ;;  %v1768_v63 = vadd.f32 %v1387_v55, %v867_v58 }
 0x12e   : > { %v1327_v0 = vpop.f32.mrb[12].mxu0  ;;  %v1770_v1 = vadd.f32 %v1390_v61, %v870_v62 }
 0x12f   : > { %v1391_v2 = vpop.f32.mrb[12].mxu1  ;;  %v1328_v3 = vpop.f32.mrb[13].mxu0 }
 0x130   : > { %v1329_v4 = vadd.f32 %v1328_v3, %v1327_v0  ;;  %v1392_v5 = vpop.f32.mrb[13].mxu1  ;;  %v1330_v6 = vpop.f32.mrb[14].mxu0 }
 0x131   : > { %v1393_v7 = vadd.f32 %v1392_v5, %v1391_v2  ;;  %v1394_v8 = vpop.f32.mrb[14].mxu1  ;;  %v1331_v9 = vpop.f32.mrb[15].mxu0 }
 0x132   : > { %v875_v10 = vadd.f32 %v1329_v4, %v1752_v18  ;;  %v1332_v11 = vadd.f32 %v1331_v9, %v1330_v6  ;;  %v1395_v12 = vpop.f32.mrb[15].mxu1 }
 0x133   : > { %v1396_v13 = vadd.f32 %v1395_v12, %v1394_v8 }
 0x134   : > { %v878_v14 = vadd.f32 %v1332_v11, %v1752_v18  ;;  %v1774_v15 = vadd.f32 %v1393_v7, %v875_v10 }
 0x136   : > { %v1333_v16 = vpop.f32.mrb[16].mxu0  ;;  %v1776_v17 = vadd.f32 %v1396_v13, %v878_v14 }
 0x137   : > { %v1397_v19 = vpop.f32.mrb[16].mxu1  ;;  %v1334_v20 = vpop.f32.mrb[17].mxu0 }
 0x138   : > { %v1335_v21 = vadd.f32 %v1334_v20, %v1333_v16  ;;  %v1398_v22 = vpop.f32.mrb[17].mxu1  ;;  %v1336_v23 = vpop.f32.mrb[18].mxu0 }
 0x139   : > { %v1399_v24 = vadd.f32 %v1398_v22, %v1397_v19  ;;  %v1400_v25 = vpop.f32.mrb[18].mxu1  ;;  %v1337_v26 = vpop.f32.mrb[19].mxu0 }
 0x13a   : > { %v883_v27 = vadd.f32 %v1335_v21, %v1752_v18  ;;  %v1338_v28 = vadd.f32 %v1337_v26, %v1336_v23  ;;  %v1401_v29 = vpop.f32.mrb[19].mxu1 }
 0x13b   : > { %v1402_v30 = vadd.f32 %v1401_v29, %v1400_v25 }
 0x13c   : > { %v886_v32 = vadd.f32 %v1338_v28, %v1752_v18  ;;  %v980_v34 = vadd.f32 %v1399_v24, %v883_v27 }
 0x13e   : > { %v1339_v35 = vpop.f32.mrb[20].mxu0  ;;  %v1780_v36 = vadd.f32 %v1402_v30, %v886_v32 }
 0x13f   : > { %v1403_v37 = vpop.f32.mrb[20].mxu1  ;;  %v1340_v38 = vpop.f32.mrb[21].mxu0 }
 0x140   : > { %v1341_v39 = vadd.f32 %v1340_v38, %v1339_v35  ;;  %v1404_v40 = vpop.f32.mrb[21].mxu1  ;;  %v1342_v41 = vpop.f32.mrb[22].mxu0 }
 0x141   : > { %v1405_v42 = vadd.f32 %v1404_v40, %v1403_v37  ;;  %v1406_v43 = vpop.f32.mrb[22].mxu1  ;;  %v1343_v44 = vpop.f32.mrb[23].mxu0 }
 0x142   : > { %v891_v45 = vadd.f32 %v1341_v39, %v1752_v18  ;;  %v1344_v46 = vadd.f32 %v1343_v44, %v1342_v41  ;;  %v1407_v48 = vpop.f32.mrb[23].mxu1 }
 0x143   : > { %v1408_v50 = vadd.f32 %v1407_v48, %v1406_v43 }
 0x144   : > { %v894_v51 = vadd.f32 %v1344_v46, %v1752_v18  ;;  %v988_v52 = vadd.f32 %v1405_v42, %v891_v45 }
 0x146   : > { %v1345_v53 = vpop.f32.mrb[24].mxu0  ;;  %v991_v54 = vadd.f32 %v1408_v50, %v894_v51 }
 0x147   : > { %v1409_v55 = vpop.f32.mrb[24].mxu1  ;;  %v1346_v56 = vpop.f32.mrb[25].mxu0 }
 0x148   : > { %v1347_v57 = vadd.f32 %v1346_v56, %v1345_v53  ;;  %v1410_v58 = vpop.f32.mrb[25].mxu1  ;;  %v1348_v59 = vpop.f32.mrb[26].mxu0 }
 0x149   : > { %v1411_v60 = vadd.f32 %v1410_v58, %v1409_v55  ;;  %v1412_v61 = vpop.f32.mrb[26].mxu1  ;;  %v1349_v62 = vpop.f32.mrb[27].mxu0 }
 0x14a   : > { %v899_v0 = vadd.f32 %v1347_v57, %v1752_v18  ;;  %v1350_v2 = vadd.f32 %v1349_v62, %v1348_v59  ;;  %v1413_v3 = vpop.f32.mrb[27].mxu1 }
 0x14b   : > { %v1414_v4 = vadd.f32 %v1413_v3, %v1412_v61 }
 0x14c   : > { %v902_v5 = vadd.f32 %v1350_v2, %v1752_v18  ;;  %v996_v6 = vadd.f32 %v1411_v60, %v899_v0 }
 0x14e   : > { %v1351_v7 = vpop.f32.mrb[28].mxu0  ;;  %v999_v8 = vadd.f32 %v1414_v4, %v902_v5 }
 0x14f   : > { %v1415_v9 = vpop.f32.mrb[28].mxu1  ;;  %v1352_v10 = vpop.f32.mrb[29].mxu0 }
 0x150   : > { %v1353_v11 = vadd.f32 %v1352_v10, %v1351_v7  ;;  %v1416_v12 = vpop.f32.mrb[29].mxu1  ;;  %v1354_v13 = vpop.f32.mrb[30].mxu0 }
 0x151   : > { %v1417_v14 = vadd.f32 %v1416_v12, %v1415_v9  ;;  %v1418_v16 = vpop.f32.mrb[30].mxu1  ;;  %v1355_v19 = vpop.f32.mrb[31].mxu0 }
 0x152   : > { %v907_v20 = vadd.f32 %v1353_v11, %v1752_v18  ;;  %v1356_v21 = vadd.f32 %v1355_v19, %v1354_v13  ;;  %v1419_v22 = vpop.f32.mrb[31].mxu1 }
 0x153   : > { %v1420_v23 = vadd.f32 %v1419_v22, %v1418_v16 }
 0x154   : > { %v910_v24 = vadd.f32 %v1356_v21, %v1752_v18  ;;  %v1004_v25 = vadd.f32 %v1417_v14, %v907_v20 }
 0x156   : > { %v1455_v26 = vpop.f32.mrb[32].mxu0  ;;  %v1007_v27 = vadd.f32 %v1420_v23, %v910_v24 }
 0x157   : > { %v1053_v28 = vadd.f32 %v1455_v26, %v1762_v47  ;;  %v1463_v29 = vpop.f32.mrb[32].mxu1  ;;  %v1044_v30 = vpop.f32.mrb[33].mxu0 }
 0x158   : > { %v1085_v32 = vadd.f32 %v1463_v29, %v988_v52  ;;  %v1045_v18 = vadd.f32 %v1044_v30, %v1756_v31  ;;  %v1076_v35 = vpop.f32.mrb[33].mxu1  ;;  %v1456_v37 = vpop.f32.mrb[34].mxu0 }
 0x159   : > { %1109 = vst [vmem:[%s1792_s12 + $0x10] sm:$0xff] %v1053_v28  ;;  %v1077_v38 = vadd.f32 %v1076_v35, %v980_v34  ;;  %v1056_v39 = vadd.f32 %v1456_v37, %v1764_v49  ;;  %v1464_v40 = vpop.f32.mrb[34].mxu1  ;;  %v1047_v41 = vpop.f32.mrb[35].mxu0 }
 0x15a   : > { %1117 = vst [vmem:[%s1792_s12 + $0x50] sm:$0xff] %v1085_v32  ;;  %1107 = vst [vmem:[%s1792_s12] sm:$0xff] %v1045_v18  ;;  %v1088_v47 = vadd.f32 %v1464_v40, %v991_v54  ;;  %v1048_v42 = vadd.f32 %v1047_v41, %v1758_v33  ;;  %v1079_v43 = vpop.f32.mrb[35].mxu1 }
 0x15b   : > { %1115 = vst [vmem:[%s1792_s12 + $0x40] sm:$0xff] %v1077_v38  ;;  %1110 = vst [vmem:[%s1792_s12 + $0x18] sm:$0xff] %v1056_v39  ;;  %v1080_v31 = vadd.f32 %v1079_v43, %v1780_v36 }
 0x15c   : > { %1118 = vst [vmem:[%s1792_s12 + $0x58] sm:$0xff] %v1088_v47  ;;  %1108 = vst [vmem:[%s1792_s12 + $0x8] sm:$0xff] %v1048_v42 }
 0x15d   : > { %1116 = vst [vmem:[%s1792_s12 + $0x48] sm:$0xff] %v1080_v31 }
 0x15e   : > { %v1459_v34 = vpop.f32.mrb[36].mxu0 }
 0x15f   : > { %v1069_v49 = vadd.f32 %v1459_v34, %v1774_v15  ;;  %v1467_v44 = vpop.f32.mrb[36].mxu1  ;;  %v1060_v45 = vpop.f32.mrb[37].mxu0 }
 0x160   : > { %v1101_v46 = vadd.f32 %v1467_v44, %v1004_v25  ;;  %v1061_v33 = vadd.f32 %v1060_v45, %v1768_v63  ;;  %v1092_v48 = vpop.f32.mrb[37].mxu1  ;;  %v1460_v50 = vpop.f32.mrb[38].mxu0 }
 0x161   : > { %1113 = vst [vmem:[%s1792_s12 + $0x30] sm:$0xff] %v1069_v49  ;;  %v1093_v36 = vadd.f32 %v1092_v48, %v996_v6  ;;  %v1072_v51 = vadd.f32 %v1460_v50, %v1776_v17  ;;  %v1468_v52 = vpop.f32.mrb[38].mxu1  ;;  %v1063_v53 = vpop.f32.mrb[39].mxu0 }
 0x162   : > { %1121 = vst [vmem:[%s1792_s12 + $0x70] sm:$0xff] %v1101_v46  ;;  %1111 = vst [vmem:[%s1792_s12 + $0x20] sm:$0xff] %v1061_v33  ;;  %v1104_v15 = vadd.f32 %v1468_v52, %v1007_v27  ;;  %v1064_v54 = vadd.f32 %v1063_v53, %v1770_v1  ;;  %v1095_v55 = vpop.f32.mrb[39].mxu1 }
 0x163   : > { %1119 = vst [vmem:[%s1792_s12 + $0x60] sm:$0xff] %v1093_v36  ;;  %1114 = vst [vmem:[%s1792_s12 + $0x38] sm:$0xff] %v1072_v51  ;;  %v1096_v63 = vadd.f32 %v1095_v55, %v999_v8 }
 0x164   : > { %1122 = vst [vmem:[%s1792_s12 + $0x78] sm:$0xff] %v1104_v15  ;;  %1112 = vst [vmem:[%s1792_s12 + $0x28] sm:$0xff] %v1064_v54 }
 0x165   : > { %1120 = vst [vmem:[%s1792_s12 + $0x68] sm:$0xff] %v1096_v63 }
 0x166 PF: > { %s20_s20 = sadd.s32 1, %s1612_s20  }
 0x167   : > { %p17_p11 = scmp.ge.s32.totalorder %s20_s20, 10  }
 0x169   :  { %19 = sbr.rel (!%p17_p11) target bundleno = 16 (0x10), region = 68 }

</bundles_post_ra>
